<compile_context>
chip_gen: v6e
topology: v6e:2x2x1
jax: 0.10.0
libtpu: 0.0.40
codegen_flags: <defaults>
</compile_context>

<pallas_src>
import functools

import jax
import jax.numpy as jnp
from jax import lax
from jax.experimental import pallas as pl
from jax.experimental.pallas import tpu as pltpu


# ----------------------------------------------------------------------------
# Fused kernel
# ----------------------------------------------------------------------------
def _conv_block_kernel(*refs, TH, H, W, res_conv, has_xt):
    i = 0
    x_ref = refs[i]; i += 1                      # (1, H+2, W+2, cin) zero-padded
    xt_ref = None
    if has_xt:
        xt_ref = refs[i]; i += 1                 # (1, H+2, W+2, med) zero-padded
    mask_ref = refs[i]; i += 1                   # (H+2, W+2, med) ring mask (0/1)
    eyec_ref = refs[i]; i += 1                   # (cout, cout) identity (f32)
    eyem_ref = refs[i]; i += 1                   # (med, med) identity (f32)
    w1_ref, b1_ref, w2_ref, b2_ref, w3_ref, b3_ref = refs[i:i + 6]; i += 6
    if res_conv:
        wr_ref, br_ref = refs[i:i + 2]; i += 2
    out_ref, x2_ref = refs[i:i + 2]              # (1,cout,TH*W), (1,med,TH*W)

    r = pl.program_id(1)
    cin = x_ref.shape[-1]
    med = w1_ref.shape[-1]
    cdt = w1_ref.dtype                           # compute dtype (bf16)
    P = TH * W
    ph = (TH + 2) * (W + 2)

    # ---- load the (TH+2, W+2, cin) zero-padded halo tile ---------------------
    xh = x_ref[0, pl.ds(r * TH, TH + 2), :, :]

    # ---- conv1 (1x1, BN1 folded) + bias + ReLU (recomputed on halo rows) -----
    y1 = jnp.dot(xh.reshape(ph, cin).astype(cdt), w1_ref[...],
                 preferred_element_type=jnp.float32)
    y1 = jnp.maximum(y1 + b1_ref[...], 0.0).reshape(TH + 2, W + 2, med)

    # zero the conv2 padding ring (positions that are zero-padding of x1)
    y1 = y1 * mask_ref[pl.ds(r * TH, TH + 2), :, :]

    if has_xt:
        # torch: conv2(x1 + x_t); x_t is zero-padded spatially so the ring stays 0
        y1 = y1 + xt_ref[0, pl.ds(r * TH, TH + 2), :, :].astype(jnp.float32)

    # ---- conv2 (3x3, pad=1, stride=1, BN2 folded) + bias + ReLU --------------
    acc = jnp.zeros((P, med), jnp.float32)
    for kh in range(3):
        for kw in range(3):
            patch = y1[kh:kh + TH, kw:kw + W, :].reshape(P, med)
            acc = acc + jnp.dot(patch.astype(cdt), w2_ref[kh, kw],
                                preferred_element_type=jnp.float32)
    x2 = jnp.maximum(acc + b2_ref[...], 0.0)                 # (P, med) f32

    # ---- conv3 (1x1, BN3 folded) + bias --------------------------------------
    y3 = jnp.dot(x2.astype(cdt), w3_ref[...],
                 preferred_element_type=jnp.float32) + b3_ref[...]

    # ---- residual branch ------------------------------------------------------
    xres = xh[1:TH + 1, 1:W + 1, :].reshape(P, cin)          # original x rows
    if res_conv:
        res = jnp.dot(xres.astype(cdt), wr_ref[...],
                      preferred_element_type=jnp.float32) + br_ref[...]
    else:
        res = xres.astype(jnp.float32)                       # cin == cout (checked)
    out = jnp.maximum(y3 + res, 0.0)                         # (P, cout) f32

    # ---- lane-dense channel-major stores --------------------------------------
    # (C, P) = eye(C) @ (P, C)^T via an NT dot (exact); output block lane dim = P.
    nt = (((1,), (1,)), ((), ()))
    out_ref[0] = lax.dot_general(eyec_ref[...], out, nt,
                                 preferred_element_type=jnp.float32
                                 ).astype(out_ref.dtype)
    x2_ref[0] = lax.dot_general(eyem_ref[...], x2, nt,
                                preferred_element_type=jnp.float32
                                ).astype(x2_ref.dtype)


# ----------------------------------------------------------------------------
# Wrapper
# ----------------------------------------------------------------------------
def _pick_row_tile(H, W, max_tile_pixels):
    best = 1
    for t in range(1, H + 1):
        if H % t == 0 and t * W <= max_tile_pixels:
            best = t
    return best


def conv_block_forward(x_nchw, params, *, res_conv, x_t=None, return_x_2=True,
                       eps=1e-6, compute_dtype=jnp.bfloat16,
                       max_tile_pixels=1024):
    """ConvBlock.forward (stride=1, groups=1, drop_block/drop_path=None,
    BatchNorm in inference mode, eps=1e-6 as in the module)."""
    N, cin, H, W = x_nchw.shape
    med = params["w1"].shape[1]
    cout = params["w3"].shape[1]
    if not res_conv and cin != cout:
        raise ValueError(
            f"res_conv=False requires inplanes == outplanes (got {cin} vs {cout}).")

    TH = _pick_row_tile(H, W, max_tile_pixels)
    R = H // TH

    def fold(w, bn):  # fold BN scale into w's last (out-channel) axis; bias in f32
        gamma, beta, mean, var = bn
        s = gamma / jnp.sqrt(var + eps)
        b = beta - mean * s
        return (w * s).astype(compute_dtype), b.reshape(1, -1).astype(jnp.float32)

    w1f, b1 = fold(params["w1"], params["bn1"])          # (cin, med)
    w2f, b2 = fold(params["w2"], params["bn2"])          # (3, 3, med, med)
    w3f, b3 = fold(params["w3"], params["bn3"])          # (med, cout)

    x_nhwc = jnp.transpose(x_nchw, (0, 2, 3, 1))
    xpad = jnp.pad(x_nhwc, ((0, 0), (1, 1), (1, 1), (0, 0)))

    # ring mask for conv2's zero padding of x1 (1 inside, 0 on the padded ring)
    m2 = jnp.zeros((H + 2, W + 2), jnp.float32).at[1:H + 1, 1:W + 1].set(1.0)
    mask = jnp.broadcast_to(m2[:, :, None], (H + 2, W + 2, med))
    eye_c = jnp.eye(cout, dtype=jnp.float32)
    eye_m = jnp.eye(med, dtype=jnp.float32)

    ops = [xpad]
    in_specs = [pl.BlockSpec((1, H + 2, W + 2, cin), lambda n, r: (n, 0, 0, 0))]
    has_xt = x_t is not None
    if has_xt:
        xt_pad = jnp.pad(jnp.transpose(x_t, (0, 2, 3, 1)),
                         ((0, 0), (1, 1), (1, 1), (0, 0)))
        ops.append(xt_pad)
        in_specs.append(
            pl.BlockSpec((1, H + 2, W + 2, med), lambda n, r: (n, 0, 0, 0)))

    def _full_spec(a):
        nd = a.ndim
        return pl.BlockSpec(a.shape, lambda n, r: (0,) * nd)

    small = [mask, eye_c, eye_m, w1f, b1, w2f, b2, w3f, b3]
    if res_conv:
        wrf, br = fold(params["wr"], params["bn_r"])     # (cin, cout)
        small += [wrf, br]
    for a in small:
        ops.append(a)
        in_specs.append(_full_spec(a))

    kern = functools.partial(_conv_block_kernel, TH=TH, H=H, W=W,
                             res_conv=res_conv, has_xt=has_xt)
    out, x2 = pl.pallas_call(
        kern,
        grid=(N, R),
        in_specs=in_specs,
        out_specs=(
            pl.BlockSpec((1, cout, TH * W), lambda n, r: (n, 0, r)),
            pl.BlockSpec((1, med, TH * W), lambda n, r: (n, 0, r)),
        ),
        out_shape=(
            jax.ShapeDtypeStruct((N, cout, H * W), x_nchw.dtype),
            jax.ShapeDtypeStruct((N, med, H * W), x_nchw.dtype),
        ),
        compiler_params=pltpu.CompilerParams(
            dimension_semantics=("parallel", "parallel"),
            vmem_limit_bytes=32 * 1024 * 1024),
    )(*ops)

    out = out.reshape(N, cout, H, W)   # free: (N, C, H*W) is already NCHW order
    x2 = x2.reshape(N, med, H, W)
    return (out, x2) if return_x_2 else out


# ----------------------------------------------------------------------------
# Pure-JAX reference (f32) for the numerical check
# ----------------------------------------------------------------------------
def _ref_forward(x_nchw, params, *, res_conv, x_t=None, eps=1e-6):
    x = jnp.transpose(x_nchw, (0, 2, 3, 1))
    dn = ("NHWC", "HWIO", "NHWC")

    def bn(y, p):
        g, b, m, v = p
        s = g / jnp.sqrt(v + eps)
        return y * s + (b - m * s)

    residual = x
    cin, med = params["w1"].shape
    y = lax.conv_general_dilated(x, params["w1"].reshape(1, 1, cin, med),
                                 (1, 1), "VALID", dimension_numbers=dn)
    y = jnp.maximum(bn(y, params["bn1"]), 0.0)
    if x_t is not None:
        y = y + jnp.transpose(x_t, (0, 2, 3, 1))
    y = lax.conv_general_dilated(y, params["w2"], (1, 1), "SAME",
                                 dimension_numbers=dn)
    x2 = jnp.maximum(bn(y, params["bn2"]), 0.0)
    med2, cout = params["w3"].shape
    y = lax.conv_general_dilated(x2, params["w3"].reshape(1, 1, med2, cout),
                                 (1, 1), "VALID", dimension_numbers=dn)
    y = bn(y, params["bn3"])
    if res_conv:
        r = lax.conv_general_dilated(residual,
                                     params["wr"].reshape(1, 1, cin, cout),
                                     (1, 1), "VALID", dimension_numbers=dn)
        residual = bn(r, params["bn_r"])
    y = jnp.maximum(y + residual, 0.0)
    return jnp.transpose(y, (0, 3, 1, 2)), jnp.transpose(x2, (0, 3, 1, 2))


# ----------------------------------------------------------------------------
# main
# ----------------------------------------------------------------------------
def make_params(key, cin, cout, res_conv):
    med = cout // 4
    ks = jax.random.split(key, 8)

    def bn_params(c, k):
        k1, k2 = jax.random.split(k)
        gamma = 1.0 + 0.1 * jax.random.normal(k1, (c,), jnp.float32)
        beta = 0.05 * jnp.arange(c, dtype=jnp.float32)
        mean = 0.01 * jnp.arange(c, dtype=jnp.float32)
        var = 1.0 + 0.1 * jnp.abs(jax.random.normal(k2, (c,), jnp.float32))
        return (gamma, beta, mean, var)

    # torch weights are (out,in,kh,kw); stored here as (in,out) / (kh,kw,in,out)
    p = {
        "w1": 0.2 * jax.random.normal(ks[0], (cin, med), jnp.float32),
        "w2": 0.2 * jax.random.normal(ks[1], (3, 3, med, med), jnp.float32),
        "w3": 0.2 * jax.random.normal(ks[2], (med, cout), jnp.float32),
        "bn1": bn_params(med, ks[4]),
        "bn2": bn_params(med, ks[5]),
        "bn3": bn_params(cout, ks[6]),
    }
    if res_conv:
        p["wr"] = 0.2 * jax.random.normal(ks[3], (cin, cout), jnp.float32)
        p["bn_r"] = bn_params(cout, ks[7])
    return p


if __name__ == "__main__":
    key = jax.random.PRNGKey(0)
    k_p, k_p2, k_x, k_xt, k_x2 = jax.random.split(key, 5)

    # ConvBlock(inplanes=8, outplanes=16, stride=1, res_conv=True), 2x8x16x16
    N, cin, H, W = 2, 8, 16, 16
    cout = 16
    med = cout // 4
    params = make_params(k_p, cin, cout, res_conv=True)
    x = jax.random.normal(k_x, (N, cin, H, W), jnp.float32)
    x_t = 0.5 * jax.random.normal(k_xt, (N, med, H, W), jnp.float32)

    def check(got, want, tag):
        ok = bool(jnp.allclose(got, want, atol=5e-2, rtol=5e-2))
        diff = float(jnp.max(jnp.abs(got - want)))
        assert ok, f"{tag}: max|diff|={diff}"

    # 1) res_conv=True, no x_t (default row tiling)
    fwd = jax.jit(functools.partial(conv_block_forward, res_conv=True))
    out, x2 = fwd(x, params)
    jax.block_until_ready((out, x2))
    ref_out, ref_x2 = _ref_forward(x, params, res_conv=True)
    assert out.shape == (N, cout, H, W) and x2.shape == (N, med, H, W)
    check(out, ref_out, "out")
    check(x2, ref_x2, "x2")

    # 2) same, but force multiple row tiles (exercises the halo path, R=2)
    fwd_rt = jax.jit(functools.partial(conv_block_forward, res_conv=True,
                                       max_tile_pixels=128))
    out_rt, x2_rt = fwd_rt(x, params)
    jax.block_until_ready((out_rt, x2_rt))
    check(out_rt, ref_out, "out(row-tiled)")
    check(x2_rt, ref_x2, "x2(row-tiled)")

    # 3) fused x_t add: conv2(x1 + x_t)
    out_xt, x2_xt = fwd(x, params, x_t=x_t)
    jax.block_until_ready((out_xt, x2_xt))
    ref_out_xt, ref_x2_xt = _ref_forward(x, params, res_conv=True, x_t=x_t)
    check(out_xt, ref_out_xt, "out(x_t)")
    check(x2_xt, ref_x2_xt, "x2(x_t)")

    # 4) res_conv=False identity-residual path (requires inplanes == outplanes)
    params_nr = make_params(k_p2, cout, cout, res_conv=False)
    x_nr = jax.random.normal(k_x2, (N, cout, H, W), jnp.float32)
    out_nr, x2_nr = jax.jit(functools.partial(conv_block_forward,
                                              res_conv=False))(x_nr, params_nr)
    jax.block_until_ready((out_nr, x2_nr))
    ref_out_nr, ref_x2_nr = _ref_forward(x_nr, params_nr, res_conv=False)
    check(out_nr, ref_out_nr, "out(no res_conv)")
    check(x2_nr, ref_x2_nr, "x2(no res_conv)")

    print("KERNEL_OK")
</pallas_src>

<mosaic_0001>
module attributes {stable_mosaic.version = 11 : i64} {
  func.func @_conv_block_kernel(%arg0: i32, %arg1: i32, %arg2: memref<1x18x18x8xf32, #tpu.memory_space<vmem>>, %arg3: memref<18x18x4xf32, #tpu.memory_space<vmem>>, %arg4: memref<16x16xf32, #tpu.memory_space<vmem>>, %arg5: memref<4x4xf32, #tpu.memory_space<vmem>>, %arg6: memref<8x4xbf16, #tpu.memory_space<vmem>>, %arg7: memref<1x4xf32, #tpu.memory_space<vmem>>, %arg8: memref<3x3x4x4xbf16, #tpu.memory_space<vmem>>, %arg9: memref<1x4xf32, #tpu.memory_space<vmem>>, %arg10: memref<4x16xbf16, #tpu.memory_space<vmem>>, %arg11: memref<1x16xf32, #tpu.memory_space<vmem>>, %arg12: memref<8x16xbf16, #tpu.memory_space<vmem>>, %arg13: memref<1x16xf32, #tpu.memory_space<vmem>>, %arg14: memref<1x16x256xf32, #tpu.memory_space<vmem>>, %arg15: memref<1x4x256xf32, #tpu.memory_space<vmem>>) attributes {dimension_semantics = [#tpu.dimension_semantics<parallel>, #tpu.dimension_semantics<parallel>], iteration_bounds = array<i64: 2, 1>, scalar_prefetch = 0 : i64, scratch_operands = 0 : i64, tpu.core_type = #tpu.core_type<tc>, window_params = [{transform_indices = @transform_0, window_bounds = array<i64: 1, 18, 18, 8>}, {pipeline_mode = #tpu.pipeline_mode<synchronous>, transform_indices = @transform_1, window_bounds = array<i64: 18, 18, 4>}, {pipeline_mode = #tpu.pipeline_mode<synchronous>, transform_indices = @transform_2, window_bounds = array<i64: 16, 16>}, {pipeline_mode = #tpu.pipeline_mode<synchronous>, transform_indices = @transform_3, window_bounds = array<i64: 4, 4>}, {pipeline_mode = #tpu.pipeline_mode<synchronous>, transform_indices = @transform_4, window_bounds = array<i64: 8, 4>}, {pipeline_mode = #tpu.pipeline_mode<synchronous>, transform_indices = @transform_5, window_bounds = array<i64: 1, 4>}, {pipeline_mode = #tpu.pipeline_mode<synchronous>, transform_indices = @transform_6, window_bounds = array<i64: 3, 3, 4, 4>}, {pipeline_mode = #tpu.pipeline_mode<synchronous>, transform_indices = @transform_7, window_bounds = array<i64: 1, 4>}, {pipeline_mode = #tpu.pipeline_mode<synchronous>, transform_indices = @transform_8, window_bounds = array<i64: 4, 16>}, {pipeline_mode = #tpu.pipeline_mode<synchronous>, transform_indices = @transform_9, window_bounds = array<i64: 1, 16>}, {pipeline_mode = #tpu.pipeline_mode<synchronous>, transform_indices = @transform_10, window_bounds = array<i64: 8, 16>}, {pipeline_mode = #tpu.pipeline_mode<synchronous>, transform_indices = @transform_11, window_bounds = array<i64: 1, 16>}, {transform_indices = @transform_12, window_bounds = array<i64: 1, 16, 256>}, {transform_indices = @transform_13, window_bounds = array<i64: 1, 4, 256>}]} {
    %c16_i32 = arith.constant 16 : i32
    %0 = arith.muli %arg1, %c16_i32 : i32
    %c0 = arith.constant 0 : index
    %1 = arith.index_cast %0 : i32 to index
    %c0_0 = arith.constant 0 : index
    %c0_1 = arith.constant 0 : index
    %2 = vector.load %arg2[%c0, %1, %c0_0, %c0_1] : memref<1x18x18x8xf32, #tpu.memory_space<vmem>>, vector<1x18x18x8xf32>
    %3 = vector.shape_cast %2 : vector<1x18x18x8xf32> to vector<18x18x8xf32>
    %4 = vector.shape_cast %3 : vector<18x18x8xf32> to vector<324x8xf32>
    %5 = arith.truncf %4 : vector<324x8xf32> to vector<324x8xbf16>
    %c0_2 = arith.constant 0 : index
    %c0_3 = arith.constant 0 : index
    %6 = vector.load %arg6[%c0_2, %c0_3] : memref<8x4xbf16, #tpu.memory_space<vmem>>, vector<8x4xbf16>
    %cst = arith.constant dense<0.000000e+00> : vector<324x4xf32>
    %7 = tpu.matmul %5, %6, %cst {dimension_numbers = #tpu.dot_dimension_numbers<[1], [0], [0], [1], [0, 0, 1, 1], [], []>} : vector<324x8xbf16>, vector<8x4xbf16>, vector<324x4xf32> -> vector<324x4xf32>
    %c0_4 = arith.constant 0 : index
    %c0_5 = arith.constant 0 : index
    %8 = vector.load %arg7[%c0_4, %c0_5] : memref<1x4xf32, #tpu.memory_space<vmem>>, vector<1x4xf32>
    %9 = vector.broadcast %8 : vector<1x4xf32> to vector<324x4xf32>
    %10 = arith.addf %7, %9 : vector<324x4xf32>
    %cst_6 = arith.constant 0.000000e+00 : f32
    %11 = vector.broadcast %cst_6 : f32 to vector<324x4xf32>
    %12 = arith.maximumf %10, %11 : vector<324x4xf32>
    %13 = vector.shape_cast %12 : vector<324x4xf32> to vector<18x18x4xf32>
    %c16_i32_7 = arith.constant 16 : i32
    %14 = arith.muli %arg1, %c16_i32_7 : i32
    %15 = arith.index_cast %14 : i32 to index
    %c0_8 = arith.constant 0 : index
    %c0_9 = arith.constant 0 : index
    %16 = vector.load %arg3[%15, %c0_8, %c0_9] : memref<18x18x4xf32, #tpu.memory_space<vmem>>, vector<18x18x4xf32>
    %17 = arith.mulf %13, %16 : vector<18x18x4xf32>
    %cst_10 = arith.constant 0.000000e+00 : f32
    %18 = vector.broadcast %cst_10 : f32 to vector<256x4xf32>
    %19 = vector.extract_strided_slice %17 {offsets = [0, 0, 0], sizes = [16, 16, 4], strides = [1, 1, 1]} : vector<18x18x4xf32> to vector<16x16x4xf32>
    %20 = vector.shape_cast %19 : vector<16x16x4xf32> to vector<256x4xf32>
    %21 = arith.truncf %20 : vector<256x4xf32> to vector<256x4xbf16>
    %c0_11 = arith.constant 0 : index
    %c0_12 = arith.constant 0 : index
    %c0_13 = arith.constant 0 : index
    %c0_14 = arith.constant 0 : index
    %22 = vector.load %arg8[%c0_11, %c0_12, %c0_13, %c0_14] : memref<3x3x4x4xbf16, #tpu.memory_space<vmem>>, vector<1x1x4x4xbf16>
    %23 = vector.shape_cast %22 : vector<1x1x4x4xbf16> to vector<4x4xbf16>
    %cst_15 = arith.constant dense<0.000000e+00> : vector<256x4xf32>
    %24 = tpu.matmul %21, %23, %cst_15 {dimension_numbers = #tpu.dot_dimension_numbers<[1], [0], [0], [1], [0, 0, 1, 1], [], []>} : vector<256x4xbf16>, vector<4x4xbf16>, vector<256x4xf32> -> vector<256x4xf32>
    %25 = arith.addf %18, %24 : vector<256x4xf32>
    %26 = vector.extract_strided_slice %17 {offsets = [0, 1, 0], sizes = [16, 16, 4], strides = [1, 1, 1]} : vector<18x18x4xf32> to vector<16x16x4xf32>
    %27 = vector.shape_cast %26 : vector<16x16x4xf32> to vector<256x4xf32>
    %28 = arith.truncf %27 : vector<256x4xf32> to vector<256x4xbf16>
    %c0_16 = arith.constant 0 : index
    %c1 = arith.constant 1 : index
    %c0_17 = arith.constant 0 : index
    %c0_18 = arith.constant 0 : index
    %29 = vector.load %arg8[%c0_16, %c1, %c0_17, %c0_18] : memref<3x3x4x4xbf16, #tpu.memory_space<vmem>>, vector<1x1x4x4xbf16>
    %30 = vector.shape_cast %29 : vector<1x1x4x4xbf16> to vector<4x4xbf16>
    %cst_19 = arith.constant dense<0.000000e+00> : vector<256x4xf32>
    %31 = tpu.matmul %28, %30, %cst_19 {dimension_numbers = #tpu.dot_dimension_numbers<[1], [0], [0], [1], [0, 0, 1, 1], [], []>} : vector<256x4xbf16>, vector<4x4xbf16>, vector<256x4xf32> -> vector<256x4xf32>
    %32 = arith.addf %25, %31 : vector<256x4xf32>
    %33 = vector.extract_strided_slice %17 {offsets = [0, 2, 0], sizes = [16, 16, 4], strides = [1, 1, 1]} : vector<18x18x4xf32> to vector<16x16x4xf32>
    %34 = vector.shape_cast %33 : vector<16x16x4xf32> to vector<256x4xf32>
    %35 = arith.truncf %34 : vector<256x4xf32> to vector<256x4xbf16>
    %c0_20 = arith.constant 0 : index
    %c2 = arith.constant 2 : index
    %c0_21 = arith.constant 0 : index
    %c0_22 = arith.constant 0 : index
    %36 = vector.load %arg8[%c0_20, %c2, %c0_21, %c0_22] : memref<3x3x4x4xbf16, #tpu.memory_space<vmem>>, vector<1x1x4x4xbf16>
    %37 = vector.shape_cast %36 : vector<1x1x4x4xbf16> to vector<4x4xbf16>
    %cst_23 = arith.constant dense<0.000000e+00> : vector<256x4xf32>
    %38 = tpu.matmul %35, %37, %cst_23 {dimension_numbers = #tpu.dot_dimension_numbers<[1], [0], [0], [1], [0, 0, 1, 1], [], []>} : vector<256x4xbf16>, vector<4x4xbf16>, vector<256x4xf32> -> vector<256x4xf32>
    %39 = arith.addf %32, %38 : vector<256x4xf32>
    %40 = vector.extract_strided_slice %17 {offsets = [1, 0, 0], sizes = [16, 16, 4], strides = [1, 1, 1]} : vector<18x18x4xf32> to vector<16x16x4xf32>
    %41 = vector.shape_cast %40 : vector<16x16x4xf32> to vector<256x4xf32>
    %42 = arith.truncf %41 : vector<256x4xf32> to vector<256x4xbf16>
    %c1_24 = arith.constant 1 : index
    %c0_25 = arith.constant 0 : index
    %c0_26 = arith.constant 0 : index
    %c0_27 = arith.constant 0 : index
    %43 = vector.load %arg8[%c1_24, %c0_25, %c0_26, %c0_27] : memref<3x3x4x4xbf16, #tpu.memory_space<vmem>>, vector<1x1x4x4xbf16>
    %44 = vector.shape_cast %43 : vector<1x1x4x4xbf16> to vector<4x4xbf16>
    %cst_28 = arith.constant dense<0.000000e+00> : vector<256x4xf32>
    %45 = tpu.matmul %42, %44, %cst_28 {dimension_numbers = #tpu.dot_dimension_numbers<[1], [0], [0], [1], [0, 0, 1, 1], [], []>} : vector<256x4xbf16>, vector<4x4xbf16>, vector<256x4xf32> -> vector<256x4xf32>
    %46 = arith.addf %39, %45 : vector<256x4xf32>
    %47 = vector.extract_strided_slice %17 {offsets = [1, 1, 0], sizes = [16, 16, 4], strides = [1, 1, 1]} : vector<18x18x4xf32> to vector<16x16x4xf32>
    %48 = vector.shape_cast %47 : vector<16x16x4xf32> to vector<256x4xf32>
    %49 = arith.truncf %48 : vector<256x4xf32> to vector<256x4xbf16>
    %c1_29 = arith.constant 1 : index
    %c1_30 = arith.constant 1 : index
    %c0_31 = arith.constant 0 : index
    %c0_32 = arith.constant 0 : index
    %50 = vector.load %arg8[%c1_29, %c1_30, %c0_31, %c0_32] : memref<3x3x4x4xbf16, #tpu.memory_space<vmem>>, vector<1x1x4x4xbf16>
    %51 = vector.shape_cast %50 : vector<1x1x4x4xbf16> to vector<4x4xbf16>
    %cst_33 = arith.constant dense<0.000000e+00> : vector<256x4xf32>
    %52 = tpu.matmul %49, %51, %cst_33 {dimension_numbers = #tpu.dot_dimension_numbers<[1], [0], [0], [1], [0, 0, 1, 1], [], []>} : vector<256x4xbf16>, vector<4x4xbf16>, vector<256x4xf32> -> vector<256x4xf32>
    %53 = arith.addf %46, %52 : vector<256x4xf32>
    %54 = vector.extract_strided_slice %17 {offsets = [1, 2, 0], sizes = [16, 16, 4], strides = [1, 1, 1]} : vector<18x18x4xf32> to vector<16x16x4xf32>
    %55 = vector.shape_cast %54 : vector<16x16x4xf32> to vector<256x4xf32>
    %56 = arith.truncf %55 : vector<256x4xf32> to vector<256x4xbf16>
    %c1_34 = arith.constant 1 : index
    %c2_35 = arith.constant 2 : index
    %c0_36 = arith.constant 0 : index
    %c0_37 = arith.constant 0 : index
    %57 = vector.load %arg8[%c1_34, %c2_35, %c0_36, %c0_37] : memref<3x3x4x4xbf16, #tpu.memory_space<vmem>>, vector<1x1x4x4xbf16>
    %58 = vector.shape_cast %57 : vector<1x1x4x4xbf16> to vector<4x4xbf16>
    %cst_38 = arith.constant dense<0.000000e+00> : vector<256x4xf32>
    %59 = tpu.matmul %56, %58, %cst_38 {dimension_numbers = #tpu.dot_dimension_numbers<[1], [0], [0], [1], [0, 0, 1, 1], [], []>} : vector<256x4xbf16>, vector<4x4xbf16>, vector<256x4xf32> -> vector<256x4xf32>
    %60 = arith.addf %53, %59 : vector<256x4xf32>
    %61 = vector.extract_strided_slice %17 {offsets = [2, 0, 0], sizes = [16, 16, 4], strides = [1, 1, 1]} : vector<18x18x4xf32> to vector<16x16x4xf32>
    %62 = vector.shape_cast %61 : vector<16x16x4xf32> to vector<256x4xf32>
    %63 = arith.truncf %62 : vector<256x4xf32> to vector<256x4xbf16>
    %c2_39 = arith.constant 2 : index
    %c0_40 = arith.constant 0 : index
    %c0_41 = arith.constant 0 : index
    %c0_42 = arith.constant 0 : index
    %64 = vector.load %arg8[%c2_39, %c0_40, %c0_41, %c0_42] : memref<3x3x4x4xbf16, #tpu.memory_space<vmem>>, vector<1x1x4x4xbf16>
    %65 = vector.shape_cast %64 : vector<1x1x4x4xbf16> to vector<4x4xbf16>
    %cst_43 = arith.constant dense<0.000000e+00> : vector<256x4xf32>
    %66 = tpu.matmul %63, %65, %cst_43 {dimension_numbers = #tpu.dot_dimension_numbers<[1], [0], [0], [1], [0, 0, 1, 1], [], []>} : vector<256x4xbf16>, vector<4x4xbf16>, vector<256x4xf32> -> vector<256x4xf32>
    %67 = arith.addf %60, %66 : vector<256x4xf32>
    %68 = vector.extract_strided_slice %17 {offsets = [2, 1, 0], sizes = [16, 16, 4], strides = [1, 1, 1]} : vector<18x18x4xf32> to vector<16x16x4xf32>
    %69 = vector.shape_cast %68 : vector<16x16x4xf32> to vector<256x4xf32>
    %70 = arith.truncf %69 : vector<256x4xf32> to vector<256x4xbf16>
    %c2_44 = arith.constant 2 : index
    %c1_45 = arith.constant 1 : index
    %c0_46 = arith.constant 0 : index
    %c0_47 = arith.constant 0 : index
    %71 = vector.load %arg8[%c2_44, %c1_45, %c0_46, %c0_47] : memref<3x3x4x4xbf16, #tpu.memory_space<vmem>>, vector<1x1x4x4xbf16>
    %72 = vector.shape_cast %71 : vector<1x1x4x4xbf16> to vector<4x4xbf16>
    %cst_48 = arith.constant dense<0.000000e+00> : vector<256x4xf32>
    %73 = tpu.matmul %70, %72, %cst_48 {dimension_numbers = #tpu.dot_dimension_numbers<[1], [0], [0], [1], [0, 0, 1, 1], [], []>} : vector<256x4xbf16>, vector<4x4xbf16>, vector<256x4xf32> -> vector<256x4xf32>
    %74 = arith.addf %67, %73 : vector<256x4xf32>
    %75 = vector.extract_strided_slice %17 {offsets = [2, 2, 0], sizes = [16, 16, 4], strides = [1, 1, 1]} : vector<18x18x4xf32> to vector<16x16x4xf32>
    %76 = vector.shape_cast %75 : vector<16x16x4xf32> to vector<256x4xf32>
    %77 = arith.truncf %76 : vector<256x4xf32> to vector<256x4xbf16>
    %c2_49 = arith.constant 2 : index
    %c2_50 = arith.constant 2 : index
    %c0_51 = arith.constant 0 : index
    %c0_52 = arith.constant 0 : index
    %78 = vector.load %arg8[%c2_49, %c2_50, %c0_51, %c0_52] : memref<3x3x4x4xbf16, #tpu.memory_space<vmem>>, vector<1x1x4x4xbf16>
    %79 = vector.shape_cast %78 : vector<1x1x4x4xbf16> to vector<4x4xbf16>
    %cst_53 = arith.constant dense<0.000000e+00> : vector<256x4xf32>
    %80 = tpu.matmul %77, %79, %cst_53 {dimension_numbers = #tpu.dot_dimension_numbers<[1], [0], [0], [1], [0, 0, 1, 1], [], []>} : vector<256x4xbf16>, vector<4x4xbf16>, vector<256x4xf32> -> vector<256x4xf32>
    %81 = arith.addf %74, %80 : vector<256x4xf32>
    %c0_54 = arith.constant 0 : index
    %c0_55 = arith.constant 0 : index
    %82 = vector.load %arg9[%c0_54, %c0_55] : memref<1x4xf32, #tpu.memory_space<vmem>>, vector<1x4xf32>
    %83 = vector.broadcast %82 : vector<1x4xf32> to vector<256x4xf32>
    %84 = arith.addf %81, %83 : vector<256x4xf32>
    %cst_56 = arith.constant 0.000000e+00 : f32
    %85 = vector.broadcast %cst_56 : f32 to vector<256x4xf32>
    %86 = arith.maximumf %84, %85 : vector<256x4xf32>
    %87 = arith.truncf %86 : vector<256x4xf32> to vector<256x4xbf16>
    %c0_57 = arith.constant 0 : index
    %c0_58 = arith.constant 0 : index
    %88 = vector.load %arg10[%c0_57, %c0_58] : memref<4x16xbf16, #tpu.memory_space<vmem>>, vector<4x16xbf16>
    %cst_59 = arith.constant dense<0.000000e+00> : vector<256x16xf32>
    %89 = tpu.matmul %87, %88, %cst_59 {dimension_numbers = #tpu.dot_dimension_numbers<[1], [0], [0], [1], [0, 0, 1, 1], [], []>} : vector<256x4xbf16>, vector<4x16xbf16>, vector<256x16xf32> -> vector<256x16xf32>
    %c0_60 = arith.constant 0 : index
    %c0_61 = arith.constant 0 : index
    %90 = vector.load %arg11[%c0_60, %c0_61] : memref<1x16xf32, #tpu.memory_space<vmem>>, vector<1x16xf32>
    %91 = vector.broadcast %90 : vector<1x16xf32> to vector<256x16xf32>
    %92 = arith.addf %89, %91 : vector<256x16xf32>
    %93 = vector.extract_strided_slice %3 {offsets = [1, 1, 0], sizes = [16, 16, 8], strides = [1, 1, 1]} : vector<18x18x8xf32> to vector<16x16x8xf32>
    %94 = vector.shape_cast %93 : vector<16x16x8xf32> to vector<256x8xf32>
    %95 = arith.truncf %94 : vector<256x8xf32> to vector<256x8xbf16>
    %c0_62 = arith.constant 0 : index
    %c0_63 = arith.constant 0 : index
    %96 = vector.load %arg12[%c0_62, %c0_63] : memref<8x16xbf16, #tpu.memory_space<vmem>>, vector<8x16xbf16>
    %cst_64 = arith.constant dense<0.000000e+00> : vector<256x16xf32>
    %97 = tpu.matmul %95, %96, %cst_64 {dimension_numbers = #tpu.dot_dimension_numbers<[1], [0], [0], [1], [0, 0, 1, 1], [], []>} : vector<256x8xbf16>, vector<8x16xbf16>, vector<256x16xf32> -> vector<256x16xf32>
    %c0_65 = arith.constant 0 : index
    %c0_66 = arith.constant 0 : index
    %98 = vector.load %arg13[%c0_65, %c0_66] : memref<1x16xf32, #tpu.memory_space<vmem>>, vector<1x16xf32>
    %99 = vector.broadcast %98 : vector<1x16xf32> to vector<256x16xf32>
    %100 = arith.addf %97, %99 : vector<256x16xf32>
    %101 = arith.addf %92, %100 : vector<256x16xf32>
    %cst_67 = arith.constant 0.000000e+00 : f32
    %102 = vector.broadcast %cst_67 : f32 to vector<256x16xf32>
    %103 = arith.maximumf %101, %102 : vector<256x16xf32>
    %c0_68 = arith.constant 0 : index
    %c0_69 = arith.constant 0 : index
    %104 = vector.load %arg4[%c0_68, %c0_69] : memref<16x16xf32, #tpu.memory_space<vmem>>, vector<16x16xf32>
    %cst_70 = arith.constant dense<0.000000e+00> : vector<16x256xf32>
    %105 = tpu.matmul %104, %103, %cst_70 {dimension_numbers = #tpu.dot_dimension_numbers<[1], [1], [0], [0], [0, 0, 1, 0], [], []>} : vector<16x16xf32>, vector<256x16xf32>, vector<16x256xf32> -> vector<16x256xf32>
    %c0_71 = arith.constant 0 : index
    %c0_72 = arith.constant 0 : index
    %c0_73 = arith.constant 0 : index
    %106 = vector.load %arg14[%c0_71, %c0_72, %c0_73] : memref<1x16x256xf32, #tpu.memory_space<vmem>>, vector<1x16x256xf32>
    %107 = vector.shape_cast %106 : vector<1x16x256xf32> to vector<16x256xf32>
    %108 = vector.shape_cast %105 : vector<16x256xf32> to vector<1x16x256xf32>
    tpu.vector_store %arg14[%c0_71, %c0_72, %c0_73], %108 {strides = array<i32>} : memref<1x16x256xf32, #tpu.memory_space<vmem>>, vector<1x16x256xf32>,
    %c0_74 = arith.constant 0 : index
    %c0_75 = arith.constant 0 : index
    %109 = vector.load %arg5[%c0_74, %c0_75] : memref<4x4xf32, #tpu.memory_space<vmem>>, vector<4x4xf32>
    %cst_76 = arith.constant dense<0.000000e+00> : vector<4x256xf32>
    %110 = tpu.matmul %109, %86, %cst_76 {dimension_numbers = #tpu.dot_dimension_numbers<[1], [1], [0], [0], [0, 0, 1, 0], [], []>} : vector<4x4xf32>, vector<256x4xf32>, vector<4x256xf32> -> vector<4x256xf32>
    %c0_77 = arith.constant 0 : index
    %c0_78 = arith.constant 0 : index
    %c0_79 = arith.constant 0 : index
    %111 = vector.load %arg15[%c0_77, %c0_78, %c0_79] : memref<1x4x256xf32, #tpu.memory_space<vmem>>, vector<1x4x256xf32>
    %112 = vector.shape_cast %111 : vector<1x4x256xf32> to vector<4x256xf32>
    %113 = vector.shape_cast %110 : vector<4x256xf32> to vector<1x4x256xf32>
    tpu.vector_store %arg15[%c0_77, %c0_78, %c0_79], %113 {strides = array<i32>} : memref<1x4x256xf32, #tpu.memory_space<vmem>>, vector<1x4x256xf32>,
    return
  }
  func.func @transform_0(%arg0: i32, %arg1: i32) -> (i32, i32, i32, i32) {
    %c0_i32 = arith.constant 0 : i32
    %c0_i32_0 = arith.constant 0 : i32
    %c0_i32_1 = arith.constant 0 : i32
    %c0_i32_2 = arith.constant 0 : i32
    return %arg0, %c0_i32, %c0_i32_0, %c0_i32_1 : i32, i32, i32, i32
  }
  func.func @transform_1(%arg0: i32, %arg1: i32) -> (i32, i32, i32) {
    %c0_i32 = arith.constant 0 : i32
    %c0_i32_0 = arith.constant 0 : i32
    %c0_i32_1 = arith.constant 0 : i32
    %c0_i32_2 = arith.constant 0 : i32
    return %c0_i32, %c0_i32_0, %c0_i32_1 : i32, i32, i32
  }
  func.func @transform_2(%arg0: i32, %arg1: i32) -> (i32, i32) {
    %c0_i32 = arith.constant 0 : i32
    %c0_i32_0 = arith.constant 0 : i32
    %c0_i32_1 = arith.constant 0 : i32
    return %c0_i32, %c0_i32_0 : i32, i32
  }
  func.func @transform_3(%arg0: i32, %arg1: i32) -> (i32, i32) {
    %c0_i32 = arith.constant 0 : i32
    %c0_i32_0 = arith.constant 0 : i32
    %c0_i32_1 = arith.constant 0 : i32
    return %c0_i32, %c0_i32_0 : i32, i32
  }
  func.func @transform_4(%arg0: i32, %arg1: i32) -> (i32, i32) {
    %c0_i32 = arith.constant 0 : i32
    %c0_i32_0 = arith.constant 0 : i32
    %c0_i32_1 = arith.constant 0 : i32
    return %c0_i32, %c0_i32_0 : i32, i32
  }
  func.func @transform_5(%arg0: i32, %arg1: i32) -> (i32, i32) {
    %c0_i32 = arith.constant 0 : i32
    %c0_i32_0 = arith.constant 0 : i32
    %c0_i32_1 = arith.constant 0 : i32
    return %c0_i32, %c0_i32_0 : i32, i32
  }
  func.func @transform_6(%arg0: i32, %arg1: i32) -> (i32, i32, i32, i32) {
    %c0_i32 = arith.constant 0 : i32
    %c0_i32_0 = arith.constant 0 : i32
    %c0_i32_1 = arith.constant 0 : i32
    %c0_i32_2 = arith.constant 0 : i32
    %c0_i32_3 = arith.constant 0 : i32
    return %c0_i32, %c0_i32_0, %c0_i32_1, %c0_i32_2 : i32, i32, i32, i32
  }
  func.func @transform_7(%arg0: i32, %arg1: i32) -> (i32, i32) {
    %c0_i32 = arith.constant 0 : i32
    %c0_i32_0 = arith.constant 0 : i32
    %c0_i32_1 = arith.constant 0 : i32
    return %c0_i32, %c0_i32_0 : i32, i32
  }
  func.func @transform_8(%arg0: i32, %arg1: i32) -> (i32, i32) {
    %c0_i32 = arith.constant 0 : i32
    %c0_i32_0 = arith.constant 0 : i32
    %c0_i32_1 = arith.constant 0 : i32
    return %c0_i32, %c0_i32_0 : i32, i32
  }
  func.func @transform_9(%arg0: i32, %arg1: i32) -> (i32, i32) {
    %c0_i32 = arith.constant 0 : i32
    %c0_i32_0 = arith.constant 0 : i32
    %c0_i32_1 = arith.constant 0 : i32
    return %c0_i32, %c0_i32_0 : i32, i32
  }
  func.func @transform_10(%arg0: i32, %arg1: i32) -> (i32, i32) {
    %c0_i32 = arith.constant 0 : i32
    %c0_i32_0 = arith.constant 0 : i32
    %c0_i32_1 = arith.constant 0 : i32
    return %c0_i32, %c0_i32_0 : i32, i32
  }
  func.func @transform_11(%arg0: i32, %arg1: i32) -> (i32, i32) {
    %c0_i32 = arith.constant 0 : i32
    %c0_i32_0 = arith.constant 0 : i32
    %c0_i32_1 = arith.constant 0 : i32
    return %c0_i32, %c0_i32_0 : i32, i32
  }
  func.func @transform_12(%arg0: i32, %arg1: i32) -> (i32, i32, i32) {
    %c0_i32 = arith.constant 0 : i32
    %c0_i32_0 = arith.constant 0 : i32
    return %arg0, %c0_i32, %arg1 : i32, i32, i32
  }
  func.func @transform_13(%arg0: i32, %arg1: i32) -> (i32, i32, i32) {
    %c0_i32 = arith.constant 0 : i32
    %c0_i32_0 = arith.constant 0 : i32
    return %arg0, %c0_i32, %arg1 : i32, i32, i32
  }
}

</mosaic_0001>

<bundles_post_ra>
// kernel: conv_block_forward.1
= control target key start
LH: loop header
LB: loop body
LE: loop exit
PB: predicated region body
PF: predicated region fallthrough
CT: control target
= control target key end

     0   :  { %s11526_s25 = smov 0   ;;  %s11528_s26 = smov 0   ;;  %s16781_s0 = inlined_call_operand.vmem [shape: f32[2,18,18,8], index: 0, kind: input, shape index: {}]   ;;  %s16782_s1 = inlined_call_operand.vmem [shape: f32[18,18,4], index: 1, kind: input, shape index: {}]   ;;  %s16783_s2 = inlined_call_operand.vmem [shape: f32[16,16], index: 2, kind: input, shape index: {}]   ;;  %s16784_s3 = inlined_call_operand.vmem [shape: f32[4,4], index: 3, kind: input, shape index: {}]   ;;  %s16785_s4 = inlined_call_operand.vmem [shape: bf16[8,4], index: 4, kind: input, shape index: {}]   ;;  %s16786_s5 = inlined_call_operand.vmem [shape: f32[1,4], index: 5, kind: input, shape index: {}]   ;;  %s16787_s6 = inlined_call_operand.vmem [shape: bf16[3,3,4,4], index: 6, kind: input, shape index: {}]   ;;  %s16788_s7 = inlined_call_operand.vmem [shape: f32[1,4], index: 7, kind: input, shape index: {}]   ;;  %s16789_s8 = inlined_call_operand.vmem [shape: bf16[4,16], index: 8, kind: input, shape index: {}]   ;;  %s16790_s9 = inlined_call_operand.vmem [shape: f32[1,16], index: 9, kind: input, shape index: {}]   ;;  %s16791_s10 = inlined_call_operand.vmem [shape: bf16[8,16], index: 10, kind: input, shape index: {}]   ;;  %s16792_s11 = inlined_call_operand.vmem [shape: f32[1,16], index: 11, kind: input, shape index: {}]   ;;  %s16793_s12 = inlined_call_operand.vmem [shape: f32[2,16,256], index: 12, kind: output, shape index: {0}]   ;;  %s16794_s13 = inlined_call_operand.vmem [shape: f32[2,4,256], index: 13, kind: output, shape index: {1}]  }
   0x1   :  { %s11530_s27 = smov 0  }
   0x2 LB: > { %s36_s28 = sadd.s32 1, %s11447_s26  ;;  %p10186_p0 = scmp.ge.s32.totalorder %s11451_s27, 1  ;;  %s11451_s27 = sphi %s11530_s27, %s24_s27   ;;  %s11447_s26 = sphi %s11528_s26, %s17836_s26   ;;  %s11443_s25 = sphi %s11526_s25, %s17835_s25  }
   0x3   : > { %p38_p1 = scmp.ge.s32.totalorder %s36_s28, 2  ;;  %p406_p2 = scmp.lt.s32.totalorder %s11451_s27, 3 }
   0x5   : > { %s17838_s28 = smov (%p38_p1, %s36_s28), 0  ;;  %p407_p3 = pnand %p10186_p0, %p406_p2 }
   0x7   : > { %410 = sbr.rel (%p407_p3) target bundleno = 1608 (0x648), region = 68 }
   0xc   : > { %v2088_v0 = vld [vmem:[%s16785_s4] sm:$0xf]  ;;  %vm2160_vm0 = vcmask 1043456   ;;  %p463_p4 = scmp.lt.s32.totalorder %s11443_s25, 1  ;;  %v604_v1 = vlaneseq  ;;  %v11453_v2 = vmov 0.0   ;;  %vm11454_vm1 = vmmov 0  }
   0xd   : > { %10789 = vmatprep.subr.bf16.mxu0 %v11453_v2  ;;  %v2162_v3 = vsel %vm2160_vm0, %v2088_v0, 0  ;;  %10791 = vmatprep.mubr.msk.bf16.mxu0 %vm11454_vm1, %v11453_v2  ;;  %v11455_v4 = vmov 1983009808   ;;  %vm2096_vm2 = vcmask 64512   ;;  %vm9272_vm3 = vcmask 1046528  }
   0xe   : > { %10790 = vmatpush3.bf16.msra.mxu0 %v2162_v3  ;;  %s17840_s25 = smov (!%p463_p4, %s11443_s25), 1  ;;  %v602_v5 = vunpack.c.l.s4 %v11455_v4  ;;  %v605_v6 = vshrl.u32 %v604_v1, 7  ;;  %vm6254_vm4 = vcmask 1041408   ;;  %vm5204_vm5 = vcmask 1040384  }
   0xf   : > { %s11263_s14 = smul.u32 432, %s17840_s25  ;;  %vm5205_vm6 = vcmask 1042434   ;;  %vm5207_vm7 = vcmask 1044484   ;;  %vm5209_vm8 = vcmask 1046534   ;;  %vm6205_vm12 = vcmask 31744   ;;  %s10508_s18 = sshll.u32 %s17840_s25, 5 }
  0x10   : > { %v603_v7 = vunpack.c.0.s8 %v602_v5  ;;  %vm5206_vm9 = vmor %vm5204_vm5, %vm5205_vm6  ;;  %vm9687_vm13 = vcmask 130048   ;;  %s476_s21 = scalar_lea.vmem %s16793_s12, %s10508_s18 }
  0x11   : > { %s11557_s17 = scalar_lea.vmem %s16781_s0, %s11263_s14  ;;  %vm12076_vm10 = vmor %vm5206_vm9, %vm5207_vm7  ;;  %s10509_s14 = sshll.u32 %s17840_s25, 3 }
  0x12   : > { %v11559_v8 = vsub.s32 %v603_v7, %v605_v6  ;;  %v492_v9 = vld [vmem:[%s11557_s17] sm:$0xff]  ;;  %v493_v10 = vld [vmem:[%s11557_s17 + $0x8] sm:$0xff]  ;;  %v495_v15 = vld [vmem:[%s11557_s17 + $0x18] sm:$0xff]  ;;  %s486_s16 = scalar_lea.vmem %s16794_s13, %s10509_s14 }
  0x13   : > { %v600_v11 = vcombine.high %v492_v9, %v492_v9  ;;  %v617_v13 = vcombine.high %v493_v10, %v493_v10  ;;  %v496_v16 = vld [vmem:[%s11557_s17 + $0x20] sm:$0xff]  ;;  %v641_v17 = vcombine.high %v495_v15, %v495_v15  ;;  %v10192_v25 = vld.sshfl [vmem:[%s11557_s17 + $0x10] sm:$0x3 pattern:$0x76325410]  ;;  %v499_v47 = vld [vmem:[%s11557_s17 + $0x38] sm:$0xff] }
  0x14   : > { %v607_v12 = vrot.slane %v492_v9, %v11559_v8  ;;  %v624_v14 = vrot.slane %v493_v10, %v11559_v8  ;;  %v648_v18 = vrot.slane %v495_v15, %v11559_v8  ;;  %v658_v19 = vcombine.high %v496_v16, %v496_v16  ;;  %v11413_v38 = vld.sshfl [vmem:[%s11557_s17 + $0x28] sm:$0x3 pattern:$0x76325410]  ;;  %v498_v43 = vld [vmem:[%s11557_s17 + $0x30] sm:$0xff]  ;;  %vm12112_vm11 = vmor %vm12076_vm10, %vm5209_vm8 }
  0x15   : > { %v665_v20 = vrot.slane %v496_v16, %v11559_v8  ;;  %v614_v21 = vrot.slane %v600_v11, %v11559_v8  ;;  %v631_v23 = vrot.slane %v617_v13, %v11559_v8  ;;  %v655_v26 = vrot.slane %v641_v17, %v11559_v8  ;;  %v501_v61 = vld [vmem:[%s11557_s17 + $0x48] sm:$0xff]  ;;  %v500_v6 = vld [vmem:[%s11557_s17 + $0x40] sm:$0x3]  ;;  %v502_v15 = vld [vmem:[%s11557_s17 + $0x50] sm:$0xff] }
  0x16   : > { %v615_v22 = vcombine.high %v607_v12, %v607_v12  ;;  %v632_v24 = vcombine.high %v624_v14, %v624_v14  ;;  %v656_v27 = vcombine.high %v648_v18, %v648_v18  ;;  %v672_v28 = vrot.slane %v658_v19, %v11559_v8 }
  0x17   : > { %v673_v29 = vcombine.high %v665_v20, %v665_v20  ;;  %v616_v30 = vcombine.high %v614_v21, %v614_v21  ;;  %v633_v31 = vcombine.high %v631_v23, %v631_v23  ;;  %v657_v34 = vcombine.high %v655_v26, %v655_v26 }
  0x18   : > { %v1338_v32 = vcombine.low %v607_v12, %v615_v22  ;;  %v1355_v33 = vcombine.low %v624_v14, %v632_v24  ;;  %v1372_v35 = vcombine.low %v10192_v25, %v648_v18  ;;  %v1373_v36 = vcombine.low %v656_v27, %v655_v26 }
  0x19   : > { %v1390_v37 = vcombine.low %v673_v29, %v672_v28  ;;  %v1339_v39 = vcombine.low %v614_v21, %v616_v30  ;;  %v1356_v41 = vcombine.low %v631_v23, %v633_v31  ;;  %v1389_v46 = vcombine.low %v657_v34, %v665_v20  ;;  %v504_v29 = vld [vmem:[%s11557_s17 + $0x60] sm:$0xff] }
  0x1a   : > { %v1346_v40 = vrot.slane %v1338_v32, %v11559_v8  ;;  %v1363_v42 = vrot.slane %v1355_v33, %v11559_v8  ;;  %v1380_v44 = vrot.slane %v1372_v35, %v11559_v8  ;;  %v1387_v45 = vrot.slane %v1373_v36, %v11559_v8 }
  0x1b   : > { %v1353_v48 = vrot.slane %v1339_v39, %v11559_v8  ;;  %v1370_v49 = vrot.slane %v1356_v41, %v11559_v8  ;;  %v674_v50 = vcombine.high %v672_v28, %v672_v28  ;;  %v1404_v51 = vrot.slane %v1390_v37, %v11559_v8 }
  0x1c   : > { %v682_v52 = vcombine.high %v498_v43, %v498_v43  ;;  %v689_v53 = vrot.slane %v498_v43, %v11559_v8  ;;  %v1397_v56 = vrot.slane %v1389_v46, %v11559_v8  ;;  %v706_v57 = vrot.slane %v499_v47, %v11559_v8 }
  0x1d   : > { %v1354_v54 = vcombine.low %v1346_v40, %v1353_v48  ;;  %v1371_v55 = vcombine.low %v1363_v42, %v1370_v49  ;;  %v1406_v60 = vcombine.low %v674_v50, %v11413_v38  ;;  %v1388_v63 = vcombine.low %v1380_v44, %v1387_v45  ;;  %v505_v38 = vld [vmem:[%s11557_s17 + $0x68] sm:$0xff]  ;;  %v11414_v40 = vld.sshfl [vmem:[%s11557_s17 + $0x58] sm:$0x3 pattern:$0x76325410] }
  0x1e   : > { %v696_v58 = vrot.slane %v682_v52, %v11559_v8  ;;  %v697_v59 = vcombine.high %v689_v53, %v689_v53  ;;  %v714_v0 = vcombine.high %v706_v57, %v706_v57  ;;  %v9278_v1 = vrot.slane %v498_v43, 1 }
  0x1f   : > { %v2067_v62 = vpack.c.bf16 %v1371_v55, %v1354_v54  ;;  %v9279_v5 = vrot.slane %v499_v47, 1  ;;  %v699_v7 = vcombine.high %v499_v47, %v499_v47  ;;  %v1405_v9 = vcombine.low %v1397_v56, %v1404_v51  ;;  %v507_v55 = vld [vmem:[%s11557_s17 + $0x78] sm:$0xff] }
  0x20   : > { %v698_v3 = vcombine.high %v696_v58, %v696_v58  ;;  %v1407_v4 = vcombine.low %v689_v53, %v697_v59  ;;  %v1424_v10 = vcombine.low %v706_v57, %v714_v0  ;;  %v723_v11 = vcombine.high %v501_v61, %v501_v61 }
  0x21   : > { %10792 = vmatmul.mubr.msk.bf16.vlgmr.msra.gmra.mxu0 %vm2096_vm2, %v2067_v62  ;;  %v730_v12 = vrot.slane %v501_v61, %v11559_v8  ;;  %v1414_v13 = vrot.slane %v1406_v60, %v11559_v8  ;;  %v713_v16 = vrot.slane %v699_v7, %v11559_v8  ;;  %v722_v19 = vrot.slane %v500_v6, %v11559_v8 }
  0x22   : > { %10795 = vmatprep.mubr.msk.bf16.mxu0 %vm11454_vm1, %v11453_v2  ;;  %v1423_v14 = vcombine.low %v696_v58, %v698_v3  ;;  %v1421_v17 = vrot.slane %v1407_v4, %v11559_v8  ;;  %v1438_v18 = vrot.slane %v1424_v10, %v11559_v8  ;;  %v737_v20 = vrot.slane %v723_v11, %v11559_v8  ;;  %v11415_v3 = vld.sshfl [vmem:[%s11557_s17 + $0x70] sm:$0x3 pattern:$0x76325410]  ;;  %v508_v4 = vld [vmem:[%s11557_s17 + $0x80] sm:$0xff] }
  0x23   : > { %v715_v22 = vcombine.high %v713_v16, %v713_v16  ;;  %v738_v23 = vcombine.high %v730_v12, %v730_v12  ;;  %v11603_v24 = vsel %vm9272_vm3, %v9278_v1, %v9279_v5  ;;  %v2068_v25 = vpack.c.bf16 %v1405_v9, %v1388_v63 }
  0x24   : > { %v1431_v21 = vrot.slane %v1423_v14, %v11559_v8  ;;  %17032 = vst [vmem:[#allocation2_spill] sm:$0xff] %v11603_v24  ;;  %v739_v26 = vcombine.high %v737_v20, %v737_v20  ;;  %v747_v27 = vrot.slane %v502_v15, %v11559_v8  ;;  %v9281_v28 = vrot.slane %v500_v6, 1 }
  0x25   : > { %v740_v30 = vcombine.high %v502_v15, %v502_v15  ;;  %v1422_v31 = vcombine.low %v1414_v13, %v1421_v17  ;;  %v1441_v32 = vcombine.low %v722_v19, %v730_v12  ;;  %v1440_v35 = vcombine.low %v713_v16, %v715_v22  ;;  %v510_v17 = vld [vmem:[%s11557_s17 + $0x90] sm:$0xff]  ;;  %v11416_v22 = vld.sshfl [vmem:[%s11557_s17 + $0x88] sm:$0x3 pattern:$0x76325410] }
  0x26   : > { %v11608_v33 = vsel %vm9272_vm3, %v9279_v5, %v9281_v28  ;;  %v1439_v34 = vcombine.low %v1431_v21, %v1438_v18  ;;  %v1457_v36 = vcombine.low %v738_v23, %v737_v20  ;;  %v1458_v39 = vcombine.low %v739_v26, %v747_v27 }
  0x27   : > { %17033 = vst [vmem:[#allocation3_spill] sm:$0xff] %v11608_v33  ;;  %v754_v41 = vrot.slane %v740_v30, %v11559_v8  ;;  %v764_v42 = vcombine.high %v504_v29, %v504_v29  ;;  %v771_v43 = vrot.slane %v504_v29, %v11559_v8  ;;  %v1455_v44 = vrot.slane %v1441_v32, %v11559_v8  ;;  %v511_v29 = vld [vmem:[%s11557_s17 + $0x98] sm:$0xff] }
  0x28   : > { %v755_v45 = vcombine.high %v747_v27, %v747_v27  ;;  %v781_v47 = vcombine.high %v505_v38, %v505_v38  ;;  %v2069_v48 = vpack.c.bf16 %v1439_v34, %v1422_v31  ;;  %v1448_v49 = vrot.slane %v1440_v35, %v11559_v8 }
  0x29   : > { %10796 = vmatmul.mubr.msk.bf16.gmra.mxu0 %vm2096_vm2, %v2068_v25  ;;  %v778_v46 = vrot.slane %v764_v42, %v11559_v8  ;;  %v1465_v50 = vrot.slane %v1457_v36, %v11559_v8  ;;  %v1472_v51 = vrot.slane %v1458_v39, %v11559_v8  ;;  %v756_v52 = vcombine.high %v754_v41, %v754_v41 }
  0x2a   : > { %10799 = vmatprep.mubr.msk.bf16.mxu0 %vm11454_vm1, %v11453_v2  ;;  %v779_v53 = vcombine.high %v771_v43, %v771_v43  ;;  %v788_v56 = vrot.slane %v505_v38, %v11559_v8  ;;  %v1474_v57 = vcombine.low %v755_v45, %v754_v41  ;;  %v795_v58 = vrot.slane %v781_v47, %v11559_v8 }
  0x2b   : > { %v780_v54 = vcombine.high %v778_v46, %v778_v46  ;;  %v1456_v59 = vcombine.low %v1448_v49, %v1455_v44  ;;  %v805_v60 = vcombine.high %v507_v55, %v507_v55  ;;  %v812_v61 = vrot.slane %v507_v55, %v11559_v8  ;;  %v514_v49 = vld [vmem:[%s11557_s17 + $0xb0] sm:$0xff] }
  0x2c   : > { %v1473_v62 = vcombine.low %v1465_v50, %v1472_v51  ;;  %v1475_v63 = vcombine.low %v756_v52, %v11414_v40  ;;  %v1491_v0 = vcombine.low %v771_v43, %v779_v53  ;;  %v796_v5 = vcombine.high %v788_v56, %v788_v56  ;;  %v11417_v52 = vld.sshfl [vmem:[%s11557_s17 + $0xa0] sm:$0x3 pattern:$0x76325410]  ;;  %v513_v53 = vld [vmem:[%s11557_s17 + $0xa8] sm:$0xff] }
  0x2d   : > { %v1492_v1 = vcombine.low %v778_v46, %v780_v54  ;;  %v1482_v6 = vrot.slane %v1474_v57, %v11559_v8  ;;  %v797_v7 = vcombine.high %v795_v58, %v795_v58  ;;  %v819_v9 = vrot.slane %v805_v60, %v11559_v8 }
  0x2e   : > { %v820_v10 = vcombine.high %v812_v61, %v812_v61  ;;  %v822_v11 = vcombine.high %v508_v4, %v508_v4  ;;  %v2070_v12 = vpack.c.bf16 %v1473_v62, %v1456_v59  ;;  %v1489_v13 = vrot.slane %v1475_v63, %v11559_v8 }
  0x2f   : > { %v1499_v14 = vrot.slane %v1491_v0, %v11559_v8  ;;  %v1506_v15 = vrot.slane %v1492_v1, %v11559_v8  ;;  %v1508_v16 = vcombine.low %v788_v56, %v796_v5  ;;  %v1509_v18 = vcombine.low %v795_v58, %v797_v7  ;;  %v11418_v7 = vld.sshfl [vmem:[%s11557_s17 + $0xb8] sm:$0x3 pattern:$0x76325410] }
  0x30   : > { %v829_v19 = vrot.slane %v508_v4, %v11559_v8  ;;  %v1525_v20 = vcombine.low %v11415_v3, %v812_v61  ;;  %v1526_v21 = vcombine.low %v820_v10, %v819_v9  ;;  %v836_v23 = vrot.slane %v822_v11, %v11559_v8 }
  0x31   : > { %10800 = vmatmul.mubr.msk.bf16.gmra.mxu0 %vm2096_vm2, %v2069_v48  ;;  %v1490_v25 = vcombine.low %v1482_v6, %v1489_v13  ;;  %v1507_v26 = vcombine.low %v1499_v14, %v1506_v15  ;;  %v853_v27 = vrot.slane %v510_v17, %v11559_v8  ;;  %v1516_v28 = vrot.slane %v1508_v16, %v11559_v8  ;;  %v516_v13 = vld [vmem:[%s11557_s17 + $0xc0] sm:$0xff]  ;;  %v517_v15 = vld [vmem:[%s11557_s17 + $0xc8] sm:$0xff] }
  0x32   : > { %10803 = vmatprep.mubr.msk.bf16.mxu0 %vm11454_vm1, %v11453_v2  ;;  %v1523_v30 = vrot.slane %v1509_v18, %v11559_v8  ;;  %v821_v31 = vcombine.high %v819_v9, %v819_v9  ;;  %v837_v32 = vcombine.high %v829_v19, %v829_v19  ;;  %v1533_v34 = vrot.slane %v1525_v20, %v11559_v8 }
  0x33   : > { %v1540_v35 = vrot.slane %v1526_v21, %v11559_v8  ;;  %v838_v36 = vcombine.high %v836_v23, %v836_v23  ;;  %v846_v38 = vcombine.high %v510_v17, %v510_v17  ;;  %v2071_v39 = vpack.c.bf16 %v1507_v26, %v1490_v25 }
  0x34   : > { %v861_v40 = vcombine.high %v853_v27, %v853_v27  ;;  %v863_v41 = vcombine.high %v511_v29, %v511_v29  ;;  %v1524_v42 = vcombine.low %v1516_v28, %v1523_v30  ;;  %v1542_v43 = vcombine.low %v821_v31, %v829_v19 }
  0x35   : > { %v1543_v44 = vcombine.low %v837_v32, %v836_v23  ;;  %v1541_v45 = vcombine.low %v1533_v34, %v1540_v35  ;;  %v1559_v46 = vcombine.low %v838_v36, %v11416_v22  ;;  %v860_v47 = vrot.slane %v846_v38, %v11559_v8 }
  0x36   : > { %v870_v48 = vrot.slane %v511_v29, %v11559_v8  ;;  %v1560_v50 = vcombine.low %v853_v27, %v861_v40  ;;  %v877_v51 = vrot.slane %v863_v41, %v11559_v8  ;;  %v1550_v54 = vrot.slane %v1542_v43, %v11559_v8 }
  0x37   : > { %v1557_v55 = vrot.slane %v1543_v44, %v11559_v8  ;;  %v887_v56 = vcombine.high %v513_v53, %v513_v53  ;;  %v904_v57 = vcombine.high %v514_v49, %v514_v49  ;;  %v2072_v58 = vpack.c.bf16 %v1541_v45, %v1524_v42 }
  0x38   : > { %v1567_v59 = vrot.slane %v1559_v46, %v11559_v8  ;;  %v862_v60 = vcombine.high %v860_v47, %v860_v47  ;;  %v878_v61 = vcombine.high %v870_v48, %v870_v48  ;;  %v1574_v62 = vrot.slane %v1560_v50, %v11559_v8  ;;  %v520_v50 = vld [vmem:[%s11557_s17 + $0xe0] sm:$0xff] }
  0x39   : > { %10804 = vmatmul.mubr.msk.bf16.gmra.mxu0 %vm2096_vm2, %v2070_v12  ;;  %v879_v63 = vcombine.high %v877_v51, %v877_v51  ;;  %v894_v0 = vrot.slane %v513_v53, %v11559_v8  ;;  %v901_v1 = vrot.slane %v887_v56, %v11559_v8  ;;  %v911_v3 = vrot.slane %v514_v49, %v11559_v8 }
  0x3a   : > { %10807 = vmatprep.mubr.msk.bf16.mxu0 %vm11454_vm1, %v11453_v2  ;;  %v918_v4 = vrot.slane %v904_v57, %v11559_v8  ;;  %v1576_v5 = vcombine.low %v860_v47, %v862_v60  ;;  %v1577_v6 = vcombine.low %v870_v48, %v878_v61  ;;  %v1558_v9 = vcombine.low %v1550_v54, %v1557_v55  ;;  %v11419_v55 = vld.sshfl [vmem:[%s11557_s17 + $0xd0] sm:$0x3 pattern:$0x76325410] }
  0x3b   : > { %v1575_v10 = vcombine.low %v1567_v59, %v1574_v62  ;;  %v1593_v11 = vcombine.low %v877_v51, %v879_v63  ;;  %v1594_v12 = vcombine.low %v11417_v52, %v894_v0  ;;  %v902_v14 = vcombine.high %v894_v0, %v894_v0  ;;  %v522_v62 = vld [vmem:[%s11557_s17 + $0xf0] sm:$0xff] }
  0x3c   : > { %v903_v16 = vcombine.high %v901_v1, %v901_v1  ;;  %v919_v17 = vcombine.high %v911_v3, %v911_v3  ;;  %v920_v18 = vcombine.high %v918_v4, %v918_v4  ;;  %v1584_v19 = vrot.slane %v1576_v5, %v11559_v8 }
  0x3d   : > { %v1591_v20 = vrot.slane %v1577_v6, %v11559_v8  ;;  %v928_v21 = vcombine.high %v516_v13, %v516_v13  ;;  %v2073_v22 = vpack.c.bf16 %v1575_v10, %v1558_v9  ;;  %v1601_v23 = vrot.slane %v1593_v11, %v11559_v8  ;;  %v523_v11 = vld [vmem:[%s11557_s17 + $0xf8] sm:$0xff] }
  0x3e   : > { %v1608_v25 = vrot.slane %v1594_v12, %v11559_v8  ;;  %v945_v26 = vcombine.high %v517_v15, %v517_v15  ;;  %v1610_v27 = vcombine.low %v902_v14, %v901_v1  ;;  %v1611_v28 = vcombine.low %v903_v16, %v911_v3  ;;  %v11420_v14 = vld.sshfl [vmem:[%s11557_s17 + $0xe8] sm:$0x3 pattern:$0x76325410] }
  0x3f   : > { %v1627_v29 = vcombine.low %v919_v17, %v918_v4  ;;  %v1628_v30 = vcombine.low %v920_v18, %v11418_v7  ;;  %v935_v31 = vrot.slane %v516_v13, %v11559_v8  ;;  %v942_v32 = vrot.slane %v928_v21, %v11559_v8 }
  0x40   : > { %v1592_v34 = vcombine.low %v1584_v19, %v1591_v20  ;;  %v1609_v35 = vcombine.low %v1601_v23, %v1608_v25  ;;  %v952_v36 = vrot.slane %v517_v15, %v11559_v8  ;;  %v959_v38 = vrot.slane %v945_v26, %v11559_v8 }
  0x41   : > { %10808 = vmatmul.mubr.msk.bf16.gmra.mxu0 %vm2096_vm2, %v2071_v39  ;;  %v519_v39 = vld [vmem:[%s11557_s17 + $0xd8] sm:$0xff]  ;;  %v1618_v40 = vrot.slane %v1610_v27, %v11559_v8  ;;  %v1625_v41 = vrot.slane %v1611_v28, %v11559_v8  ;;  %v1635_v42 = vrot.slane %v1627_v29, %v11559_v8  ;;  %v1642_v43 = vrot.slane %v1628_v30, %v11559_v8 }
  0x42   : > { %10811 = vmatprep.mubr.msk.bf16.mxu0 %vm11454_vm1, %v11453_v2  ;;  %v943_v44 = vcombine.high %v935_v31, %v935_v31  ;;  %v944_v45 = vcombine.high %v942_v32, %v942_v32  ;;  %v969_v46 = vcombine.high %v519_v39, %v519_v39  ;;  %v2074_v47 = vpack.c.bf16 %v1609_v35, %v1592_v34 }
  0x43   : > { %v960_v48 = vcombine.high %v952_v36, %v952_v36  ;;  %v961_v49 = vcombine.high %v959_v38, %v959_v38  ;;  %v1626_v51 = vcombine.low %v1618_v40, %v1625_v41  ;;  %v1643_v52 = vcombine.low %v1635_v42, %v1642_v43  ;;  %v11421_v42 = vld.sshfl [vmem:[%s11557_s17 + $0x100] sm:$0x3 pattern:$0x76325410]  ;;  %v526_v43 = vld [vmem:[%s11557_s17 + $0x110] sm:$0xff] }
  0x44   : > { %v1644_v53 = vcombine.low %v935_v31, %v943_v44  ;;  %v1645_v54 = vcombine.low %v942_v32, %v944_v45  ;;  %v976_v56 = vrot.slane %v519_v39, %v11559_v8  ;;  %v983_v57 = vrot.slane %v969_v46, %v11559_v8 }
  0x45   : > { %v1662_v59 = vcombine.low %v959_v38, %v961_v49  ;;  %v986_v60 = vcombine.high %v520_v50, %v520_v50  ;;  %v993_v61 = vrot.slane %v520_v50, %v11559_v8  ;;  %v2075_v63 = vpack.c.bf16 %v1643_v52, %v1626_v51 }
  0x46   : > { %v1652_v0 = vrot.slane %v1644_v53, %v11559_v8  ;;  %v1659_v1 = vrot.slane %v1645_v54, %v11559_v8  ;;  %v984_v3 = vcombine.high %v976_v56, %v976_v56  ;;  %v985_v4 = vcombine.high %v983_v57, %v983_v57 }
  0x47   : > { %v1010_v5 = vcombine.high %v522_v62, %v522_v62  ;;  %v1676_v7 = vrot.slane %v1662_v59, %v11559_v8  ;;  %v1000_v9 = vrot.slane %v986_v60, %v11559_v8  ;;  %v1001_v10 = vcombine.high %v993_v61, %v993_v61 }
  0x48   : > { %v1678_v12 = vcombine.low %v11419_v55, %v976_v56  ;;  %v1679_v13 = vcombine.low %v984_v3, %v983_v57  ;;  %v1017_v15 = vrot.slane %v522_v62, %v11559_v8  ;;  %v1034_v17 = vrot.slane %v523_v11, %v11559_v8 }
  0x49   : > { %10812 = vmatmul.mubr.msk.bf16.gmra.mxu0 %vm2096_vm2, %v2072_v58  ;;  %v1661_v58 = vcombine.low %v952_v36, %v960_v48  ;;  %v1024_v16 = vrot.slane %v1010_v5, %v11559_v8  ;;  %v1660_v18 = vcombine.low %v1652_v0, %v1659_v1  ;;  %v1695_v20 = vcombine.low %v985_v4, %v993_v61  ;;  %v528_v48 = vld [vmem:[%s11557_s17 + $0x120] sm:$0xff]  ;;  %v529_v1 = vld [vmem:[%s11557_s17 + $0x128] sm:$0xff]  ;;  %v11422_v4 = vld.sshfl [vmem:[%s11557_s17 + $0x118] sm:$0x3 pattern:$0x76325410] }
  0x4a   : > { %10815 = vmatprep.mubr.msk.bf16.mxu0 %vm11454_vm1, %v11453_v2  ;;  %v1696_v21 = vcombine.low %v1001_v10, %v1000_v9  ;;  %v1686_v23 = vrot.slane %v1678_v12, %v11559_v8  ;;  %v1002_v25 = vcombine.high %v1000_v9, %v1000_v9  ;;  %v1027_v26 = vcombine.high %v523_v11, %v523_v11 }
  0x4b   : > { %v1669_v6 = vrot.slane %v1661_v58, %v11559_v8  ;;  %v1693_v27 = vrot.slane %v1679_v13, %v11559_v8  ;;  %v1025_v28 = vcombine.high %v1017_v15, %v1017_v15  ;;  %v1026_v29 = vcombine.high %v1024_v16, %v1024_v16 }
  0x4c   : > { %v1042_v30 = vcombine.high %v1034_v17, %v1034_v17  ;;  %v1703_v32 = vrot.slane %v1695_v20, %v11559_v8  ;;  %v1710_v34 = vrot.slane %v1696_v21, %v11559_v8  ;;  %v1712_v36 = vcombine.low %v1002_v25, %v11420_v14  ;;  %v11423_v25 = vld.sshfl [vmem:[%s11557_s17 + $0x130] sm:$0x3 pattern:$0x76325410] }
  0x4d   : > { %v1677_v19 = vcombine.low %v1669_v6, %v1676_v7  ;;  %v1041_v38 = vrot.slane %v1027_v26, %v11559_v8  ;;  %v1713_v39 = vcombine.low %v1017_v15, %v1025_v28  ;;  %v1729_v40 = vcombine.low %v1024_v16, %v1026_v29 }
  0x4e   : > { %v1730_v41 = vcombine.low %v1034_v17, %v1042_v30  ;;  %v1694_v45 = vcombine.low %v1686_v23, %v1693_v27  ;;  %v1711_v46 = vcombine.low %v1703_v32, %v1710_v34  ;;  %v1720_v49 = vrot.slane %v1712_v36, %v11559_v8  ;;  %v532_v32 = vld [vmem:[%s11557_s17 + $0x140] sm:$0xff] }
  0x4f   : > { %v2076_v31 = vpack.c.bf16 %v1677_v19, %v1660_v18  ;;  %v1043_v50 = vcombine.high %v1041_v38, %v1041_v38  ;;  %v1075_v51 = vrot.slane %v526_v43, %v11559_v8  ;;  %v1727_v52 = vrot.slane %v1713_v39, %v11559_v8  ;;  %v531_v19 = vld [vmem:[%s11557_s17 + $0x138] sm:$0xff] }
  0x50   : > { %v1737_v53 = vrot.slane %v1729_v40, %v11559_v8  ;;  %v1744_v54 = vrot.slane %v1730_v41, %v11559_v8  ;;  %v2077_v56 = vpack.c.bf16 %v1711_v46, %v1694_v45  ;;  %v1068_v58 = vcombine.high %v526_v43, %v526_v43  ;;  %v534_v45 = vld [vmem:[%s11557_s17 + $0x150] sm:$0xff] }
  0x51   : > { %10816 = vmatmul.mubr.msk.bf16.gmra.mxu0 %vm2096_vm2, %v2073_v22  ;;  %v525_v22 = vld [vmem:[%s11557_s17 + $0x108] sm:$0xff]  ;;  %v1092_v59 = vcombine.high %v528_v48, %v528_v48  ;;  %v1728_v61 = vcombine.low %v1720_v49, %v1727_v52  ;;  %v1099_v6 = vrot.slane %v528_v48, %v11559_v8  ;;  %v1083_v10 = vcombine.high %v1075_v51, %v1075_v51 }
  0x52   : > { %10819 = vmatprep.mubr.msk.bf16.mxu0 %vm11454_vm1, %v11453_v2  ;;  %v1051_v35 = vcombine.high %v525_v22, %v525_v22  ;;  %v1058_v44 = vrot.slane %v525_v22, %v11559_v8  ;;  %v1745_v62 = vcombine.low %v1737_v53, %v1744_v54  ;;  %v1082_v5 = vrot.slane %v1068_v58, %v11559_v8  ;;  %v11424_v54 = vld.sshfl [vmem:[%s11557_s17 + $0x148] sm:$0x3 pattern:$0x76325410] }
  0x53   : > { %v1106_v7 = vrot.slane %v1092_v59, %v11559_v8  ;;  %v1109_v11 = vcombine.high %v529_v1, %v529_v1  ;;  %v1107_v17 = vcombine.high %v1099_v6, %v1099_v6  ;;  %v1116_v20 = vrot.slane %v529_v1, %v11559_v8 }
  0x54   : > { %v1066_v55 = vcombine.high %v1058_v44, %v1058_v44  ;;  %v1747_v60 = vcombine.low %v11421_v42, %v1058_v44  ;;  %v2078_v12 = vpack.c.bf16 %v1745_v62, %v1728_v61  ;;  %v1084_v16 = vcombine.high %v1082_v5, %v1082_v5 }
  0x55   : > { %v1108_v18 = vcombine.high %v1106_v7, %v1106_v7  ;;  %v1123_v21 = vrot.slane %v1109_v11, %v11559_v8  ;;  %v1780_v23 = vcombine.low %v1083_v10, %v1082_v5  ;;  %v1133_v26 = vcombine.high %v531_v19, %v531_v19 }
  0x56   : > { %v1761_v9 = vrot.slane %v1747_v60, %v11559_v8  ;;  %v1140_v27 = vrot.slane %v531_v19, %v11559_v8  ;;  %v1781_v29 = vcombine.low %v1084_v16, %v11422_v4  ;;  %v1797_v30 = vcombine.low %v1099_v6, %v1107_v17  ;;  %v537_v17 = vld [vmem:[%s11557_s17 + $0x168] sm:$0xff] }
  0x57   : > { %v1124_v34 = vcombine.high %v1116_v20, %v1116_v20  ;;  %v1788_v36 = vrot.slane %v1780_v23, %v11559_v8  ;;  %v1150_v40 = vcombine.high %v532_v32, %v532_v32  ;;  %v1157_v48 = vrot.slane %v532_v32, %v11559_v8 }
  0x58   : > { %v1148_v39 = vcombine.high %v1140_v27, %v1140_v27  ;;  %v1795_v42 = vrot.slane %v1781_v29, %v11559_v8  ;;  %v1805_v43 = vrot.slane %v1797_v30, %v11559_v8  ;;  %v1831_v49 = vcombine.low %v11423_v25, %v1140_v27 }
  0x59   : > { %10820 = vmatmul.mubr.msk.bf16.gmra.mxu0 %vm2096_vm2, %v2074_v47  ;;  %v1065_v47 = vrot.slane %v1051_v35, %v11559_v8  ;;  %v1125_v35 = vcombine.high %v1123_v21, %v1123_v21  ;;  %v1814_v46 = vcombine.low %v1116_v20, %v1124_v34  ;;  %v1165_v60 = vcombine.high %v1157_v48, %v1157_v48 }
  0x5a   : > { %10823 = vmatprep.mubr.msk.bf16.mxu0 %vm11454_vm1, %v11453_v2  ;;  %v1796_v52 = vcombine.low %v1788_v36, %v1795_v42  ;;  %v1839_v61 = vrot.slane %v1831_v49, %v11559_v8  ;;  %v1215_v20 = vcombine.high %v537_v17, %v537_v17  ;;  %v1222_v29 = vrot.slane %v537_v17, %v11559_v8  ;;  %v11426_v36 = vld.sshfl [vmem:[%s11557_s17 + $0x178] sm:$0x3 pattern:$0x76325410]  ;;  %v540_v42 = vld [vmem:[%s11557_s17 + $0x180] sm:$0xff] }
  0x5b   : > { %v1067_v57 = vcombine.high %v1065_v47, %v1065_v47  ;;  %v1763_v0 = vcombine.low %v1066_v55, %v1065_v47  ;;  %v1815_v47 = vcombine.low %v1123_v21, %v1125_v35  ;;  %v1181_v55 = vrot.slane %v534_v45, %v11559_v8 }
  0x5c   : > { %v1229_v30 = vrot.slane %v1215_v20, %v11559_v8  ;;  %v1256_v49 = vcombine.high %v540_v42, %v540_v42 }
  0x5d   : > { %v1764_v3 = vcombine.low %v1067_v57, %v1075_v51  ;;  %v1771_v14 = vrot.slane %v1763_v0, %v11559_v8  ;;  %v1164_v51 = vrot.slane %v1150_v40, %v11559_v8  ;;  %v1822_v57 = vrot.slane %v1814_v46, %v11559_v8 }
  0x5e   : > { %v1829_v58 = vrot.slane %v1815_v47, %v11559_v8  ;;  %v1189_v1 = vcombine.high %v1181_v55, %v1181_v55 }
  0x5f   : > { %v1778_v15 = vrot.slane %v1764_v3, %v11559_v8  ;;  %v1174_v3 = vcombine.high %v534_v45, %v534_v45  ;;  %v1849_v6 = vcombine.low %v1165_v60, %v1164_v51  ;;  %v1231_v45 = vcombine.high %v1229_v30, %v1229_v30 }
  0x60   : > { %v1270_v60 = vrot.slane %v1256_v49, %v11559_v8 }
  0x61   : > { %10824 = vmatmul.mubr.msk.bf16.gmra.mxu0 %vm2096_vm2, %v2075_v63  ;;  %v1746_v63 = vcombine.low %v1041_v38, %v1043_v50  ;;  %v1779_v28 = vcombine.low %v1771_v14, %v1778_v15  ;;  %v1147_v38 = vrot.slane %v1133_v26, %v11559_v8  ;;  %v11425_v14 = vld.sshfl [vmem:[%s11557_s17 + $0x160] sm:$0x3 pattern:$0x76325410]  ;;  %v1188_v15 = vrot.slane %v1174_v3, %v11559_v8  ;;  %v543_v3 = vld [vmem:[%s11557_s17 + $0x198] sm:$0xff] }
  0x62   : > { %10827 = vmatprep.mubr.msk.bf16.mxu0 %vm11454_vm1, %v11453_v2  ;;  %v1863_v19 = vrot.slane %v1849_v6, %v11559_v8 }
  0x63   : > { %v1754_v13 = vrot.slane %v1746_v63, %v11559_v8  ;;  %v1832_v50 = vcombine.low %v1148_v39, %v1147_v38  ;;  %v1149_v59 = vcombine.high %v1147_v38, %v1147_v38  ;;  %v1166_v63 = vcombine.high %v1164_v51, %v1164_v51 }
  0x64   : > { %v1190_v27 = vcombine.high %v1188_v15, %v1188_v15 }
  0x65   : > { %v1762_v22 = vcombine.low %v1754_v13, %v1761_v9  ;;  %v1846_v62 = vrot.slane %v1832_v50, %v11559_v8  ;;  %v1848_v5 = vcombine.low %v1149_v59, %v1157_v48  ;;  %v1865_v10 = vcombine.low %v1166_v63, %v11424_v54 }
  0x66   : > { %v1866_v13 = vcombine.low %v1181_v55, %v1189_v1  ;;  %v1882_v39 = vcombine.low %v1188_v15, %v1190_v27  ;;  %v1263_v59 = vrot.slane %v540_v42, %v11559_v8 }
  0x67   : > { %v2079_v41 = vpack.c.bf16 %v1779_v28, %v1762_v22  ;;  %v1847_v9 = vcombine.low %v1839_v61, %v1846_v62  ;;  %v1873_v23 = vrot.slane %v1865_v10, %v11559_v8 }
  0x68   : > { %v1880_v26 = vrot.slane %v1866_v13, %v11559_v8  ;;  %v1297_v13 = vcombine.high %v543_v3, %v543_v3 }
  0x69   : > { %10828 = vmatmul.mubr.msk.bf16.gmra.mxu0 %vm2096_vm2, %v2076_v31  ;;  %v1798_v31 = vcombine.low %v1106_v7, %v1108_v18  ;;  %v1830_v7 = vcombine.low %v1822_v57, %v1829_v58  ;;  %v1856_v18 = vrot.slane %v1848_v5, %v11559_v8 }
  0x6a   : > { %10831 = vmatprep.mubr.msk.bf16.mxu0 %vm11454_vm1, %v11453_v2  ;;  %v1881_v38 = vcombine.low %v1873_v23, %v1880_v26  ;;  %v1311_v23 = vrot.slane %v1297_v13, %v11559_v8 }
  0x6b   : > { %v1812_v44 = vrot.slane %v1798_v31, %v11559_v8  ;;  %v2081_v22 = vpack.c.bf16 %v1847_v9, %v1830_v7  ;;  %v1864_v34 = vcombine.low %v1856_v18, %v1863_v19  ;;  %v1271_v7 = vcombine.high %v1263_v59, %v1263_v59 }
  0x6c   : > { %v1272_v9 = vcombine.high %v1270_v60, %v1270_v60 }
  0x6d   : > { %v1813_v53 = vcombine.low %v1805_v43, %v1812_v44  ;;  %v541_v43 = vld [vmem:[%s11557_s17 + $0x188] sm:$0xff]  ;;  %v1230_v44 = vcombine.high %v1222_v29, %v1222_v29  ;;  %v2082_v51 = vpack.c.bf16 %v1881_v38, %v1864_v34  ;;  %v1950_v17 = vcombine.low %v1263_v59, %v1271_v7 }
  0x6e   : > { %v1273_v50 = vcombine.high %v541_v43, %v541_v43  ;;  %v1280_v61 = vrot.slane %v541_v43, %v11559_v8  ;;  %v1951_v18 = vcombine.low %v1270_v60, %v1272_v9  ;;  %v1313_v34 = vcombine.high %v1311_v23, %v1311_v23  ;;  %v3297_v60 = vld [vmem:[%s16782_s1] sm:$0xff] }
  0x6f   : > { %v2080_v0 = vpack.c.bf16 %v1813_v53, %v1796_v52  ;;  %v1890_v52 = vrot.slane %v1882_v39, %v11559_v8  ;;  %v1916_v55 = vcombine.low %v1230_v44, %v1229_v30  ;;  %v10250_v44 = vld [vmem:[%s16787_s6 + $0x2] sm:$0x3] }
  0x70   : > { %v1287_v62 = vrot.slane %v1273_v50, %v11559_v8  ;;  %v1288_v10 = vcombine.high %v1280_v61, %v1280_v61  ;;  %11251 = vmatprep.subr.msk.bf16.mxu0 %vm6254_vm4, %v10250_v44  ;;  %11252 = vmatprep.subr.msk.bf16.mxu1 %vm6254_vm4, %v10250_v44 }
  0x71   : > { %10832 = vmatmul.mubr.msk.bf16.gmra.mxu0 %vm2096_vm2, %v2077_v56  ;;  %v535_v56 = vld [vmem:[%s11557_s17 + $0x158] sm:$0xff]  ;;  %v1924_v1 = vrot.slane %v1916_v55, %v11559_v8  ;;  %v11842_v55 = vld [vmem:[%s16787_s6 + $0x6] sm:$0x3] }
  0x72   : > { %10835 = vmatprep.mubr.msk.bf16.mxu0 %vm11454_vm1, %v11453_v2  ;;  %v1191_v4 = vcombine.high %v535_v56, %v535_v56  ;;  %v1198_v11 = vrot.slane %v535_v56, %v11559_v8  ;;  %v1967_v19 = vcombine.low %v1280_v61, %v1288_v10  ;;  %v3298_v61 = vld [vmem:[%s16782_s1 + $0x8] sm:$0xff] }
  0x73   : > { %v11876_v7 = vrot.slane %v3298_v61, %v11559_v8 }
  0x74   : > { %v1205_v16 = vrot.slane %v1191_v4, %v11559_v8  ;;  %v1206_v25 = vcombine.high %v1198_v11, %v1198_v11  ;;  %v1975_v30 = vrot.slane %v1967_v19, %v11559_v8 }
  0x76   : > { %v1207_v28 = vcombine.high %v1205_v16, %v1205_v16  ;;  %v1883_v35 = vcombine.low %v1198_v11, %v1206_v25  ;;  %v1289_v11 = vcombine.high %v1287_v62, %v1287_v62 }
  0x78   : > { %v1899_v40 = vcombine.low %v1205_v16, %v1207_v28  ;;  %v1897_v48 = vrot.slane %v1883_v35, %v11559_v8  ;;  %v1968_v20 = vcombine.low %v1287_v62, %v1289_v11  ;;  %v1958_v28 = vrot.slane %v1950_v17, %v11559_v8  ;;  %v3306_v11 = vld [vmem:[%s16782_s1 + $0x48] sm:$0xff]  ;;  %v3309_v17 = vld [vmem:[%s16782_s1 + $0x60] sm:$0xff] }
  0x79   : > { %10836 = vmatmul.mubr.msk.bf16.gmra.mxu0 %vm2096_vm2, %v2078_v12  ;;  %v538_v12 = vld [vmem:[%s11557_s17 + $0x170] sm:$0xff]  ;;  %v3405_v62 = vcombine.high %v3297_v60, %v3297_v60 }
  0x7a   : > { %10839 = vmatprep.mubr.msk.bf16.mxu0 %vm11454_vm1, %v11453_v2  ;;  %v1232_v21 = vcombine.high %v538_v12, %v538_v12  ;;  %v1239_v31 = vrot.slane %v538_v12, %v11559_v8  ;;  %v1907_v53 = vrot.slane %v1899_v40, %v11559_v8  ;;  %v1898_v63 = vcombine.low %v1890_v52, %v1897_v48 }
  0x7c   : > { %v1246_v32 = vrot.slane %v1232_v21, %v11559_v8  ;;  %v1247_v46 = vcombine.high %v1239_v31, %v1239_v31  ;;  %v1917_v56 = vcombine.low %v1231_v45, %v1239_v31  ;;  %v11427_v21 = vld.sshfl [vmem:[%s11557_s17 + $0x190] sm:$0x3 pattern:$0x76325410]  ;;  %v1982_v31 = vrot.slane %v1968_v20, %v11559_v8 }
  0x7e   : > { %v1248_v47 = vcombine.high %v1246_v32, %v1246_v32  ;;  %v1933_v57 = vcombine.low %v1247_v46, %v1246_v32  ;;  %v1931_v4 = vrot.slane %v1917_v56, %v11559_v8  ;;  %v1983_v39 = vcombine.low %v1975_v30, %v1982_v31 }
  0x80   : > { %v1934_v58 = vcombine.low %v1248_v47, %v11426_v36  ;;  %v1941_v5 = vrot.slane %v1933_v57, %v11559_v8  ;;  %v1932_v15 = vcombine.low %v1924_v1, %v1931_v4  ;;  %v6256_v47 = vsel %vm6254_vm4, %v10250_v44, 0  ;;  %v3303_v1 = vld [vmem:[%s16782_s1 + $0x30] sm:$0xff] }
  0x81   : > { %10840 = vmatmul.mubr.msk.bf16.gmra.mxu0 %vm2096_vm2, %v2079_v41  ;;  %v1900_v41 = vcombine.low %v11425_v14, %v1222_v29  ;;  %v544_v14 = vld [vmem:[%s11557_s17 + $0x1a0] sm:$0xff]  ;;  %v1965_v29 = vrot.slane %v1951_v18, %v11559_v8  ;;  %11250 = vmatpush3.bf16.msra.mxu1 %v6256_v47  ;;  %v11870_v4 = vrot.slane %v3405_v62, %v11559_v8 }
  0x82   : > { %10843 = vmatprep.mubr.msk.bf16.mxu0 %vm11454_vm1, %v11453_v2  ;;  %v1948_v6 = vrot.slane %v1934_v58, %v11559_v8  ;;  %v1314_v25 = vcombine.high %v544_v14, %v544_v14  ;;  %v1321_v26 = vrot.slane %v544_v14, %v11559_v8  ;;  %10876 = vmatpush3.bf16.msra.mxu0 %v6256_v47  ;;  %v3307_v14 = vld [vmem:[%s16782_s1 + $0x50] sm:$0xff] }
  0x83   : > { %v1914_v54 = vrot.slane %v1900_v41, %v11559_v8  ;;  %v1966_v38 = vcombine.low %v1958_v28, %v1965_v29  ;;  %11255 = vmatprep.subr.msk.bf16.mxu0 %vm6254_vm4, %v11842_v55  ;;  %v3487_v13 = vcombine.high %v3303_v1, %v3303_v1  ;;  %v3421_v19 = vcombine.high %v11870_v4, %v11870_v4  ;;  %v3312_v28 = vld [vmem:[%s16782_s1 + $0x78] sm:$0xff] }
  0x84   : > { %v1949_v16 = vcombine.low %v1941_v5, %v1948_v6  ;;  %v1328_v35 = vrot.slane %v1314_v25, %v11559_v8  ;;  %v1329_v36 = vcombine.high %v1321_v26, %v1321_v26  ;;  %v2001_v42 = vcombine.low %v1313_v34, %v1321_v26  ;;  %v3304_v6 = vld [vmem:[%s16782_s1 + $0x38] sm:$0xff] }
  0x85   : > { %v2085_v45 = vpack.c.bf16 %v1983_v39, %v1966_v38  ;;  %v3545_v26 = vcombine.high %v3307_v14, %v3307_v14  ;;  %v11919_v30 = vrot.slane %v3303_v1, %v11559_v8  ;;  %v11922_v31 = vrot.slane %v3487_v13, %v11559_v8  ;;  %v11938_v39 = vld [vmem:[%s16786_s5] ss:$0 sm:$0xff] }
  0x86   : > { %v2084_v27 = vpack.c.bf16 %v1949_v16, %v1932_v15  ;;  %v2002_v43 = vcombine.low %v1329_v36, %v1328_v35  ;;  %v2009_v49 = vrot.slane %v2001_v42, %v11559_v8  ;;  %v3504_v16 = vcombine.high %v3304_v6, %v3304_v6 }
  0x87   : > { %v11933_v38 = vrot.slane %v3306_v11, %v11559_v8  ;;  %v11954_v47 = vrot.slane %v3309_v17, %v11559_v8  ;;  %v11982_v62 = vrot.slane %v3312_v28, %v11559_v8 }
  0x88   : > { %v2016_v50 = vrot.slane %v2002_v43, %v11559_v8  ;;  %v11930_v36 = vrot.slane %v3504_v16, %v11559_v8  ;;  %v3610_v43 = vcombine.high %v3312_v28, %v3312_v28  ;;  %v12010_v28 = vsel %vm6254_vm4, %v11842_v55, 0  ;;  %v3318_v55 = vld [vmem:[%s16782_s1 + $0xa8] sm:$0xff] }
  0x89   : > { %10844 = vmatmul.mubr.msk.bf16.gmra.mxu0 %vm2096_vm2, %v2080_v0  ;;  %v1915_v0 = vcombine.low %v1907_v53, %v1914_v54  ;;  %v1330_v53 = vcombine.high %v1328_v35, %v1328_v35  ;;  %v10193_v54 = vld.sshfl [vmem:[%s11557_s17 + $0x1a8] sm:$0x3 pattern:$0x76325410]  ;;  %v11927_v35 = vrot.slane %v3304_v6, %v11559_v8  ;;  %v3315_v6 = vld [vmem:[%s16782_s1 + $0x90] sm:$0xff]  ;;  %v3692_v1 = vcombine.high %v3318_v55, %v3318_v55 }
  0x8a   : > { %10847 = vmatprep.mubr.msk.bf16.mxu0 %vm11454_vm1, %v11453_v2  ;;  %v2017_v52 = vcombine.low %v2009_v49, %v2016_v50 }
  0x8b   : > { %v2083_v12 = vpack.c.bf16 %v1915_v0, %v1898_v63  ;;  %v2018_v57 = vcombine.low %v1330_v53, %v10193_v54  ;;  %v3300_v63 = vld [vmem:[%s16782_s1 + $0x18] sm:$0xff]  ;;  %v3422_v0 = vcombine.high %v3298_v61, %v3298_v61 }
  0x8c   : > { %v3446_v5 = vcombine.high %v3300_v63, %v3300_v63  ;;  %v11879_v9 = vrot.slane %v3300_v63, %v11559_v8  ;;  %v11985_v63 = vrot.slane %v3610_v43, %v11559_v8 }
  0x8d   : > { %v2025_v58 = vrot.slane %v2018_v57, %v11559_v8 }
  0x8e   : > { %v11901_v20 = vrot.slane %v3446_v5, %v11559_v8  ;;  %17034 = vst [vmem:[#allocation4_spill] sm:$0xff] %v11985_v63  ;;  %v17058_v34 = vcombine.high %v11879_v9, %v11879_v9 }
  0x8f   : > { %v2087_v59 = vpack.c.bf16 %v2025_v58, %v2025_v58  ;;  %v3313_v58 = vld [vmem:[%s16782_s1 + $0x80] sm:$0xff] }
  0x90   : > { %v12001_v16 = vrot.slane %v3313_v58, %v11559_v8 }
  0x91   : > { %10848 = vmatmul.mubr.msk.bf16.gmra.mxu0 %vm2096_vm2, %v2081_v22  ;;  %v1304_v22 = vrot.slane %v543_v3, %v11559_v8  ;;  %v11867_v3 = vrot.slane %v3297_v60, %v11559_v8 }
  0x92   : > { %10851 = vmatprep.mubr.msk.bf16.mxu0 %vm11454_vm1, %v11453_v2  ;;  %17035 = vst [vmem:[#allocation5_spill] sm:$0xff] %v12001_v16 }
  0x93   : > { %v1312_v32 = vcombine.high %v1304_v22, %v1304_v22  ;;  %v1984_v40 = vcombine.low %v11427_v21, %v1304_v22  ;;  %v3420_v18 = vcombine.high %v11867_v3, %v11867_v3  ;;  %v3528_v21 = vcombine.high %v3306_v11, %v3306_v11 }
  0x94   : > { %v3437_v22 = vcombine.high %v11876_v7, %v11876_v7 }
  0x95   : > { %v1985_v41 = vcombine.low %v1312_v32, %v1311_v23  ;;  %v1992_v46 = vrot.slane %v1984_v40, %v11559_v8  ;;  %v3569_v32 = vcombine.high %v3309_v17, %v3309_v17  ;;  %v3316_v17 = vld [vmem:[%s16782_s1 + $0x98] sm:$0xff] }
  0x97   : > { %v1999_v48 = vrot.slane %v1985_v41, %v11559_v8  ;;  %v11943_v41 = vrot.slane %v3528_v21, %v11559_v8 }
  0x99   : > { %10852 = vmatmul.mubr.msk.bf16.gmra.mxu0 %vm2096_vm2, %v2082_v51  ;;  %v2000_v51 = vcombine.low %v1992_v46, %v1999_v48  ;;  %v11951_v46 = vrot.slane %v3545_v26, %v11559_v8 }
  0x9a   : > { %10855 = vmatprep.mubr.msk.bf16.mxu0 %vm11454_vm1, %v11453_v2 }
  0x9b   : > { %v2086_v56 = vpack.c.bf16 %v2017_v52, %v2000_v51  ;;  %v11961_v51 = vrot.slane %v3569_v32, %v11559_v8 }
  0xa1   : > { %10856 = vmatmul.mubr.msk.bf16.gmra.mxu0 %vm2096_vm2, %v2083_v12  ;;  %v11885_v12 = vrot.slane %v3422_v0, %v11559_v8 }
  0xa2   : > { %10859 = vmatprep.mubr.msk.bf16.mxu0 %vm11454_vm1, %v11453_v2 }
  0xa3   : > { %v3438_v29 = vcombine.high %v11885_v12, %v11885_v12 }
  0xa9   : > { %10860 = vmatmul.mubr.msk.bf16.gmra.mxu0 %vm2096_vm2, %v2084_v27  ;;  %v3310_v27 = vld [vmem:[%s16782_s1 + $0x68] sm:$0xff] }
  0xaa   : > { %10863 = vmatprep.mubr.msk.bf16.mxu0 %vm11454_vm1, %v11453_v2  ;;  %v3586_v42 = vcombine.high %v3310_v27, %v3310_v27  ;;  %v11964_v52 = vrot.slane %v3310_v27, %v11559_v8 }
  0xac   : > { %v11979_v61 = vrot.slane %v3586_v42, %v11559_v8  ;;  %v12028_v42 = vrot.slane %v3315_v6, %v11559_v8 }
  0xae   : > { %17037 = vst [vmem:[#allocation7_spill] sm:$0xff] %v12028_v42 }
  0xb1   : > { %10864 = vmatmul.mubr.msk.bf16.gmra.mxu0 %vm2096_vm2, %v2085_v45  ;;  %v11948_v45 = vrot.slane %v3307_v14, %v11559_v8  ;;  %v3627_v14 = vcombine.high %v3313_v58, %v3313_v58 }
  0xb2   : > { %10867 = vmatprep.mubr.msk.bf16.mxu0 %vm11454_vm1, %v11453_v2 }
  0xb3   : > { %v12023_v37 = vrot.slane %v3627_v14, %v11559_v8 }
  0xb5   : > { %17036 = vst [vmem:[#allocation6_spill] sm:$0xff] %v12023_v37 }
  0xb9   : > { %10868 = vmatmul.mubr.msk.bf16.gmra.mxu0 %vm2096_vm2, %v2086_v56 }
  0xba   : > { %10871 = vmatprep.mubr.msk.bf16.mxu0 %vm11454_vm1, %v11453_v2  ;;  %v3301_v2 = vld [vmem:[%s16782_s1 + $0x20] sm:$0xff] }
  0xbb   : > { %v3463_v10 = vcombine.high %v3301_v2, %v3301_v2  ;;  %v11891_v15 = vrot.slane %v3301_v2, %v11559_v8 }
  0xbd   : > { %v11908_v25 = vrot.slane %v3463_v10, %v11559_v8 }
  0xc1   : > { %10872 = vmatmul.mubr.msk.bf16.gmra.mxu0 %vm2096_vm2, %v2087_v59 }
  0xe1   : > { %v2198_v48 = vpop.f32.mrf.mxu0 }
  0xe2   : > { %v2199_v53 = vadd.f32 %v11938_v39, %v2198_v48  ;;  %v12031_v48 = vrot.slane %v3316_v17, %v11559_v8 }
  0xe3   : > { %v10793_v59 = vpop.f32.mrf.mxu0 }
  0xe4   : > { %v2364_v0 = vmax.f32 %v2199_v53, 0.0  ;;  %v3651_v53 = vcombine.high %v3315_v6, %v3315_v6  ;;  %17038 = vst [vmem:[#allocation8_spill] sm:$0xff] %v12031_v48 }
  0xe5   : > { %v2201_v10 = vpop.f32.mrf.mxu0 }
  0xe6   : > { %v2446_v21 = vcombine.high %v2364_v0, %v2364_v0  ;;  %v2453_v26 = vrot.slane %v2364_v0, %v11559_v8  ;;  %v2202_v27 = vadd.f32 %v11938_v39, %v2201_v10  ;;  %v3668_v10 = vcombine.high %v3316_v17, %v3316_v17 }
  0xe7   : > { %v10794_v32 = vpop.f32.mrf.mxu0  ;;  %v12044_v6 = vrot.slane %v3651_v53, %v11559_v8  ;;  %v12047_v17 = vrot.slane %v3318_v55, %v11559_v8 }
  0xe8   : > { %v2460_v58 = vrot.slane %v2446_v21, %v11559_v8  ;;  %v2461_v59 = vcombine.high %v2453_v26, %v2453_v26  ;;  %v2365_v0 = vmax.f32 %v2202_v27, 0.0  ;;  %v4305_v27 = vmul.f32 %v11867_v3, %v2453_v26 }
  0xe9   : > { %v2206_v32 = vpop.f32.mrf.mxu0  ;;  %17041 = vst [vmem:[#allocation11_spill] sm:$0xff] %v12044_v6  ;;  %17042 = vst [vmem:[#allocation12_spill] sm:$0xff] %v12047_v17 }
  0xea   : > { %v2462_v21 = vcombine.high %v2460_v58, %v2460_v58  ;;  %v12037_v13 = vmul.f32 %v3420_v18, %v2461_v59  ;;  %v12040_v14 = vmul.f32 %v11870_v4, %v2460_v58  ;;  %v2463_v11 = vcombine.high %v2365_v0, %v2365_v0 }
  0xeb   : > { %v2470_v43 = vrot.slane %v2365_v0, %v11559_v8  ;;  %v10797_v5 = vpop.f32.mrf.mxu0  ;;  %v2207_v0 = vadd.f32 %v11938_v39, %v2206_v32  ;;  %v10234_v57 = vrot.slane %v4305_v27, 9 }
  0xec   : > { %17039 = vst [vmem:[#allocation9_spill] sm:$0xff] %v12037_v13  ;;  %17040 = vst [vmem:[#allocation10_spill] sm:$0xff] %v12040_v14  ;;  %v12052_v26 = vmul.f32 %v3421_v19, %v2462_v21  ;;  %v4595_v3 = vcombine.low %v4305_v27, %v12037_v13  ;;  %v5213_v18 = vrot.slane %v12037_v13, 7  ;;  %v12059_v5 = vrot.slane %v3668_v10, %v11559_v8  ;;  %v12089_v10 = vld.sshfl [vmem:[%s16782_s1 + $0xb0] sm:$0xff pattern:$0x76325410] }
  0xed   : > { %v2477_v58 = vrot.slane %v2463_v11, %v11559_v8  ;;  %v2478_v59 = vcombine.high %v2470_v43, %v2470_v43  ;;  %v12065_v4 = vmul.f32 %v11876_v7, %v2470_v43  ;;  %v2209_v19 = vpop.f32.mrf.mxu0  ;;  %17049 = vst [vmem:[#allocation17_spill] sm:$0xff] %v12089_v10  ;;  %v2366_v55 = vmax.f32 %v2207_v0, 0.0  ;;  %v10216_v27 = vld.sshfl [vmem:[%s16782_s1 + $0x10] sm:$0x3 pattern:$0x76325410] }
  0xee   : > { %17043 = vst [vmem:[#allocation13_spill] sm:$0xff] %v12052_v26  ;;  %17044 = vst [vmem:[#allocation14_spill] sm:$0xff] %v12059_v5  ;;  %v5215_v2 = vrot.slane %v5213_v18, 2  ;;  %v12123_v7 = vrot.slane %v3692_v1, %v11559_v8  ;;  %v12126_v11 = vrot.slane %v4595_v3, %v11559_v8  ;;  %v12139_v0 = vsel %vm12112_vm11, %v10234_v57, %v5213_v18 }
  0xef   : > { %17045 = vst [vmem:[#allocation15_spill] sm:$0xff] %v12065_v4  ;;  %v2479_v43 = vcombine.high %v2477_v58, %v2477_v58  ;;  %v12083_v53 = vmul.f32 %v3437_v22, %v2478_v59  ;;  %v10798_v21 = vpop.f32.mrf.mxu0  ;;  %v12092_v60 = vmul.f32 %v11885_v12, %v2477_v58  ;;  %v5216_v12 = vrot.slane %v12040_v14, 7 }
  0xf0   : > { %17054 = vst [vmem:[#allocation20_spill] sm:$0xff] %v12123_v7  ;;  %17055 = vst [vmem:[#allocation21_spill] sm:$0xff] %v12126_v11  ;;  %v5222_v54 = vrot.slane %v12065_v4, 7  ;;  %v2480_v3 = vcombine.high %v2366_v55, %v2366_v55 }
  0xf1   : > { %17048 = vst [vmem:[#allocation16_spill] sm:$0xff] %v12083_v53  ;;  %17050 = vst [vmem:[#allocation18_spill] sm:$0xff] %v12092_v60  ;;  %v12101_v22 = vmul.f32 %v3438_v29, %v2479_v43  ;;  %v2214_v59 = vpop.f32.mrf.mxu0  ;;  %v5219_v29 = vrot.slane %v12052_v26, 7  ;;  %v12130_v56 = vsel %vm12112_vm11, %v5215_v2, %v5216_v12  ;;  %v2210_v43 = vadd.f32 %v11938_v39, %v2209_v19 }
  0xf2   : > { %v5218_v2 = vrot.slane %v5216_v12, 2  ;;  %v2215_v44 = vadd.f32 %v11938_v39, %v2214_v59  ;;  %v5225_v19 = vrot.slane %v12083_v53, 7  ;;  %v2494_v40 = vrot.slane %v2480_v3, %v11559_v8 }
  0xf3   : > { %17051 = vst [vmem:[#allocation19_spill] sm:$0xff] %v12101_v22  ;;  %v10801_v58 = vpop.f32.mrf.mxu0  ;;  %v5221_v50 = vrot.slane %v5219_v29, 2  ;;  %v2367_v49 = vmax.f32 %v2210_v43, 0.0  ;;  %v5224_v23 = vrot.slane %v5222_v54, 2  ;;  %v5231_v1 = vrot.slane %v12101_v22, 7 }
  0xf4   : > { %v2487_v58 = vrot.slane %v2366_v55, %v11559_v8  ;;  %v17057_v43 = vrot.slane %v12092_v60, 7  ;;  %v2496_v33 = vcombine.high %v2494_v40, %v2494_v40  ;;  %v12157_v13 = vmul.f32 %v17058_v34, %v2494_v40 }
  0xf5   : > { %v2217_v32 = vpop.f32.mrf.mxu0  ;;  %v2497_v55 = vcombine.high %v2367_v49, %v2367_v49  ;;  %v2504_v12 = vrot.slane %v2367_v49, %v11559_v8  ;;  %v2368_v53 = vmax.f32 %v2215_v44, 0.0  ;;  %v12166_v49 = vsel %vm12112_vm11, %v5221_v50, %v5222_v54 }
  0xf6   : > { %v12148_v57 = vmul.f32 %v10216_v27, %v2487_v58  ;;  %v5230_v24 = vrot.slane %v17057_v43, 2  ;;  %v2495_v59 = vcombine.high %v2487_v58, %v2487_v58  ;;  %17059 = vst [vmem:[#allocation23_spill] sm:$0xff] %v12157_v13  ;;  %v12168_v58 = vrot.slane %v5225_v19, 2 }
  0xf7   : > { %v10802_v18 = vpop.f32.mrf.mxu0  ;;  %v2512_v11 = vcombine.high %v2504_v12, %v2504_v12  ;;  %v12171_v43 = vmul.f32 %v11901_v20, %v2496_v33  ;;  %v17061_v34 = vcombine.high %v11901_v20, %v11901_v20  ;;  %v5233_v27 = vrot.slane %v5231_v1, 2 }
  0xf8   : > { %17056 = vst [vmem:[#allocation22_spill] sm:$0xff] %v12148_v57  ;;  %v2511_v18 = vrot.slane %v2497_v55, %v11559_v8  ;;  %v5238_v55 = vrot.slane %v12157_v13, 7  ;;  %v12181_v44 = vsel %vm12112_vm11, %v5218_v2, %v5219_v29  ;;  %v4314_v50 = vmul.f32 %v11879_v9, %v2495_v59 }
  0xf9   : > { %v12159_v3 = vpop.f32.mrf.mxu0  ;;  %17060 = vst [vmem:[#allocation24_spill] sm:$0xff] %v12171_v43  ;;  %v12176_v40 = vmul.f32 %v17061_v34, %v2504_v12  ;;  %v5241_v54 = vrot.slane %v12171_v43, 7  ;;  %v12188_v20 = vmul.f32 %v11891_v15, %v2512_v11  ;;  %v17064_v34 = vcombine.high %v11891_v15, %v11891_v15 }
  0xfa   : > { %v2513_v22 = vcombine.high %v2511_v18, %v2511_v18  ;;  %v2514_v2 = vcombine.high %v2368_v53, %v2368_v53  ;;  %v5240_v59 = vrot.slane %v5238_v55, 2  ;;  %v5234_v10 = vrot.slane %v12148_v57, 7 }
  0xfb   : > { %17062 = vst [vmem:[#allocation25_spill] sm:$0xff] %v12176_v40  ;;  %v10805_v4 = vpop.f32.mrf.mxu0  ;;  %17063 = vst [vmem:[#allocation26_spill] sm:$0xff] %v12188_v20  ;;  %v12197_v29 = vmul.f32 %v17064_v34, %v2511_v18  ;;  %v5243_v26 = vrot.slane %v5241_v54, 2  ;;  %v5244_v33 = vrot.slane %v12176_v40, 7  ;;  %v5247_v11 = vrot.slane %v12188_v20, 7 }
  0xfc   : > { %v12192_v4 = vsel %vm12112_vm11, %v5230_v24, %v5231_v1  ;;  %v12200_v9 = vmul.f32 %v11908_v25, %v2513_v22  ;;  %v2521_v1 = vrot.slane %v2368_v53, %v11559_v8  ;;  %v2218_v15 = vadd.f32 %v11938_v39, %v2217_v32 }
  0xfd   : > { %v2225_v12 = vpop.f32.mrf.mxu0  ;;  %17065 = vst [vmem:[#allocation27_spill] sm:$0xff] %v12197_v29  ;;  %v5250_v24 = vrot.slane %v12197_v29, 7  ;;  %v4629_v18 = vcombine.low %v4314_v50, %v12157_v13  ;;  %v5246_v22 = vrot.slane %v5244_v33, 2  ;;  %v12212_v7 = vsel %vm12112_vm11, %v5224_v23, %v5225_v19 }
  0xfe   : > { %17066 = vst [vmem:[#allocation28_spill] sm:$0xff] %v12200_v9  ;;  %v5253_v34 = vrot.slane %v12200_v9, 7  ;;  %v10235_v57 = vrot.slane %v4314_v50, 9  ;;  %v5242_v13 = vsel %vm12112_vm11, %v5240_v59, %v5241_v54  ;;  %v5245_v23 = vsel %vm12112_vm11, %v5243_v26, %v5244_v33 }
  0xff   : > { %v10806_v14 = vpop.f32.mrf.mxu0  ;;  %v5249_v19 = vrot.slane %v5247_v11, 2  ;;  %v2528_v5 = vrot.slane %v2514_v2, %v11559_v8  ;;  %v5248_v50 = vsel %vm12112_vm11, %v5246_v22, %v5247_v11  ;;  %v5252_v53 = vrot.slane %v5250_v24, 2 }
 0x100   : > { %v12218_v14 = vsel %vm12112_vm11, %v5233_v27, %v5234_v10  ;;  %v10217_v10 = vld.sshfl [vmem:[%s16782_s1 + $0x28] sm:$0x3 pattern:$0x76325410]  ;;  %v2529_v48 = vcombine.high %v2521_v1, %v2521_v1  ;;  %v17067_v32 = vcombine.high %v11908_v25, %v11908_v25  ;;  %v5255_v33 = vrot.slane %v5253_v34, 2 }
 0x101   : > { %v12214_v17 = vpop.f32.mrf.mxu0  ;;  %v2530_v2 = vcombine.high %v2528_v5, %v2528_v5  ;;  %v2369_v59 = vmax.f32 %v2218_v15, 0.0  ;;  %v5239_v11 = vsel %vm12112_vm11, %v10235_v57, %v5238_v55  ;;  %v5254_v15 = vsel %vm12112_vm11, %v5252_v53, %v5253_v34 }
 0x102   : > { %v12237_v54 = vmul.f32 %v17067_v32, %v2521_v1  ;;  %v4322_v22 = vmul.f32 %v10217_v10, %v2529_v48  ;;  %v5645_v25 = vcombine.low %v5239_v11, %v5242_v13  ;;  %v5251_v1 = vsel %vm12112_vm11, %v5249_v19, %v5250_v24 }
 0x103   : > { %v10809_v27 = vpop.f32.mrf.mxu0  ;;  %v5646_v32 = vcombine.low %v5245_v23, %v5248_v50  ;;  %v2531_v26 = vcombine.high %v2369_v59, %v2369_v59  ;;  %v12259_v48 = vmul.f32 %v11919_v30, %v2528_v5  ;;  %v2223_v23 = vadd.f32 %v11938_v39, %v12159_v3 }
 0x104   : > { %v12244_v27 = vrot.slane %v4629_v18, %v11559_v8  ;;  %v5256_v42 = vrot.slane %v12237_v54, 7  ;;  %v17068_v18 = vcombine.high %v11919_v30, %v11919_v30  ;;  %v5259_v57 = vrot.slane %v4322_v22, 7 }
 0x105   : > { %v12241_v6 = vpop.f32.mrf.mxu0  ;;  %17069 = vst [vmem:[#allocation29_spill] sm:$0xff] %v12259_v48  ;;  %v6683_v55 = vcombine.low %v12237_v54, %v4322_v22  ;;  %v2545_v53 = vrot.slane %v2531_v26, %v11559_v8  ;;  %v2226_v30 = vadd.f32 %v11938_v39, %v2225_v12  ;;  %v5662_v19 = vcombine.low %v5251_v1, %v5254_v15 }
 0x106   : > { %v12256_v16 = vmul.f32 %v17068_v18, %v2530_v2  ;;  %v5258_v63 = vrot.slane %v5256_v42, 2  ;;  %v5257_v13 = vsel %vm12112_vm11, %v5255_v33, %v5256_v42  ;;  %v12276_v42 = vrot.slane %v5646_v32, %v11559_v8 }
 0x107   : > { %v10810_v37 = vpop.f32.mrf.mxu0  ;;  %v12284_v3 = vmul.f32 %v11927_v35, %v2545_v53  ;;  %v12287_v12 = vrot.slane %v5645_v25, %v11559_v8  ;;  %v17071_v11 = vcombine.high %v11922_v31, %v11922_v31  ;;  %v2370_v18 = vmax.f32 %v2223_v23, 0.0 }
 0x108   : > { %v2538_v37 = vrot.slane %v2369_v59, %v11559_v8  ;;  %v5260_v34 = vsel %vm12112_vm11, %v5258_v63, %v5259_v57  ;;  %v4663_v33 = vcombine.low %v12259_v48, %v12256_v16  ;;  %v2547_v59 = vcombine.high %v2545_v53, %v2545_v53 }
 0x109   : > { %v12265_v24 = vpop.f32.mrf.mxu0  ;;  %v5663_v63 = vcombine.low %v5257_v13, %v5260_v34  ;;  %v2371_v25 = vmax.f32 %v2226_v30, 0.0  ;;  %v12305_v13 = vrot.slane %v5662_v19, %v11559_v8  ;;  %v12318_v30 = vrot.slane %v6683_v55, %v11559_v8 }
 0x10a   : > { %v2546_v10 = vcombine.high %v2538_v37, %v2538_v37  ;;  %v12281_v26 = vmul.f32 %v11922_v31, %v2538_v37  ;;  %v12311_v53 = vrot.slane %v4663_v33, %v11559_v8  ;;  %v17073_v19 = vcombine.high %v11927_v35, %v11927_v35 }
 0x10b   : > { %v10813_v50 = vpop.f32.mrf.mxu0  ;;  %v12315_v23 = vrot.slane %v5663_v63, %v11559_v8  ;;  %17072 = vst [vmem:[#allocation31_spill] sm:$0xff] %v12318_v30  ;;  %v17075_v33 = vrot.slane %v12092_v60, 7  ;;  %v2548_v35 = vcombine.high %v2370_v18, %v2370_v18 }
 0x10c   : > { %17070 = vst [vmem:[#allocation30_spill] sm:$0xff] %v12281_v26  ;;  %v12294_v22 = vmul.f32 %v17071_v11, %v2546_v10  ;;  %v6699_v15 = vcombine.low %v12256_v16, %v12281_v26  ;;  %v12323_v50 = vmul.f32 %v17073_v19, %v2547_v59  ;;  %v2555_v59 = vrot.slane %v2370_v18, %v11559_v8 }
 0x10d   : > { %v12296_v1 = vpop.f32.mrf.mxu0  ;;  %v12336_v63 = vsel %vm12112_vm11, %v12168_v58, %v17075_v33  ;;  %v2565_v19 = vcombine.high %v2371_v25, %v2371_v25  ;;  %v10218_v58 = vld.sshfl [vmem:[%s16782_s1 + $0x40] sm:$0x3 pattern:$0x76325410]  ;;  %v2572_v33 = vrot.slane %v2371_v25, %v11559_v8  ;;  %v2562_v32 = vrot.slane %v2548_v35, %v11559_v8 }
 0x10e   : > { %v6700_v37 = vcombine.low %v12294_v22, %v12284_v3  ;;  %17074 = vst [vmem:[#allocation32_spill] sm:$0xff] %v12323_v50  ;;  %v12326_v11 = vrot.slane %v6699_v15, %v11559_v8  ;;  %v4664_v15 = vcombine.low %v12281_v26, %v12294_v22  ;;  %v2563_v2 = vcombine.high %v2555_v59, %v2555_v59 }
 0x10f   : > { %v10814_v34 = vpop.f32.mrf.mxu0  ;;  %v12353_v18 = vmul.f32 %v11930_v36, %v2555_v59  ;;  %v2579_v5 = vrot.slane %v2565_v19, %v11559_v8  ;;  %v2580_v31 = vcombine.high %v2572_v33, %v2572_v33  ;;  %v17077_v25 = vrot.slane %v12281_v26, 7 }
 0x110   : > { %v12329_v34 = vrot.slane %v6700_v37, %v11559_v8  ;;  %v2564_v35 = vcombine.high %v2562_v32, %v2562_v32  ;;  %v17079_v59 = vcombine.high %v11930_v36, %v11930_v36  ;;  %v12372_v60 = vmul.f32 %v10218_v58, %v2562_v32 }
 0x111   : > { %v12338_v55 = vpop.f32.mrf.mxu0  ;;  %v12375_v37 = vrot.slane %v4664_v15, %v11559_v8  ;;  %v5612_v32 = vcombine.low %v12181_v44, %v12166_v49  ;;  %v17083_v15 = vrot.slane %v12294_v22, 7  ;;  %v17085_v49 = vcombine.high %v11933_v38, %v11933_v38 }
 0x112   : > { %v6715_v10 = vcombine.low %v12326_v11, %v12329_v34  ;;  %v4680_v11 = vcombine.low %v12284_v3, %v12323_v50  ;;  %v12370_v19 = vmul.f32 %v17079_v59, %v2563_v2  ;;  %v17080_v34 = vrot.slane %v12284_v3, 7 }
 0x113   : > { %v10817_v57 = vpop.f32.mrf.mxu0  ;;  %v12386_v2 = vmul.f32 %v11943_v41, %v2580_v31  ;;  %v12392_v58 = vrot.slane %v17083_v15, 2  ;;  %v12402_v31 = vmul.f32 %v11933_v38, %v2564_v35  ;;  %v12407_v44 = vmul.f32 %v17085_v49, %v2572_v33 }
 0x114   : > { %v12365_v57 = vrot.slane %v17077_v25, 2  ;;  %v12379_v48 = vrot.slane %v17080_v34, 2  ;;  %v2581_v25 = vcombine.high %v2579_v5, %v2579_v5  ;;  %v4681_v34 = vcombine.low %v12353_v18, %v12370_v19 }
 0x115   : > { %v12361_v30 = vpop.f32.mrf.mxu0  ;;  %17082 = vst [vmem:[#allocation36_spill] sm:$0xff] %v12386_v2  ;;  %17086 = vst [vmem:[#allocation38_spill] sm:$0xff] %v12407_v44  ;;  %v17087_v15 = vcombine.high %v11943_v41, %v11943_v41  ;;  %v17090_v49 = vrot.slane %v12353_v18, 7  ;;  %v10237_v41 = vrot.slane %v12402_v31, 9 }
 0x116   : > { %17076 = vst [vmem:[#allocation33_spill] sm:$0xff] %v12361_v30  ;;  %17078 = vst [vmem:[#allocation34_spill] sm:$0xff] %v12365_v57  ;;  %v6716_v30 = vcombine.low %v12323_v50, %v12353_v18  ;;  %v12415_v59 = vmul.f32 %v11948_v45, %v2581_v25 }
 0x117   : > { %17081 = vst [vmem:[#allocation35_spill] sm:$0xff] %v12379_v48  ;;  %v10818_v26 = vpop.f32.mrf.mxu0  ;;  %v12412_v36 = vmul.f32 %v17087_v15, %v2579_v5  ;;  %v12426_v50 = vrot.slane %v17090_v49, 2  ;;  %v17091_v5 = vcombine.low %v12139_v0, %v12130_v56 }
 0x118   : > { %v6717_v26 = vcombine.low %v12370_v19, %v12372_v60  ;;  %17089 = vst [vmem:[#allocation40_spill] sm:$0xff] %v12415_v59  ;;  %v6724_v35 = vrot.slane %v6716_v30, %v11559_v8  ;;  %v12436_v30 = vrot.slane %v4681_v34, %v11559_v8 }
 0x119   : > { %v12399_v57 = vpop.f32.mrf.mxu0  ;;  %17088 = vst [vmem:[#allocation39_spill] sm:$0xff] %v12412_v36  ;;  %v5619_v25 = vrot.slane %v17091_v5, %v11559_v8  ;;  %v5628_v5 = vcombine.low %v12212_v7, %v12336_v63  ;;  %v17095_v7 = vcombine.low %v12171_v43, %v12176_v40 }
 0x11a   : > { %17084 = vst [vmem:[#allocation37_spill] sm:$0xff] %v12399_v57  ;;  %v12420_v57 = vrot.slane %v4680_v11, %v11559_v8  ;;  %v6731_v38 = vrot.slane %v6717_v26, %v11559_v8  ;;  %v5626_v11 = vrot.slane %v5612_v32, %v11559_v8  ;;  %v17092_v26 = vrot.slane %v12370_v19, 7 }
 0x11b   : > { %v10821_v33 = vpop.f32.mrf.mxu0  ;;  %v4644_v63 = vrot.slane %v17095_v7, %v11559_v8  ;;  %v16843_v7 = vrot.slane %v12412_v36, 7 }
 0x11c   : > { %v12440_v15 = vrot.slane %v17092_v26, 2  ;;  %v6732_v49 = vcombine.low %v6724_v35, %v6731_v38  ;;  %v17094_v35 = vcombine.low %v12192_v4, %v12218_v14  ;;  %v2231_v26 = vadd.f32 %v11938_v39, %v12214_v17 }
 0x11d   : > { %v12443_v48 = vpop.f32.mrf.mxu0  ;;  %v5288_v33 = vrot.slane %v12407_v44, 7  ;;  %v17096_v17 = vcombine.low %v12188_v20, %v12197_v29  ;;  %v5627_v0 = vcombine.low %v5619_v25, %v5626_v11  ;;  %v2239_v25 = vadd.f32 %v11938_v39, %v12265_v24 }
 0x11e   : > { %v12452_v34 = vpack.c.bf16 %v6732_v49, %v6715_v10  ;;  %v5643_v38 = vrot.slane %v17094_v35, %v11559_v8  ;;  %v2234_v10 = vadd.f32 %v11938_v39, %v12241_v6  ;;  %v5636_v49 = vrot.slane %v5628_v5, %v11559_v8 }
 0x11f   : > { %v10822_v56 = vpop.f32.mrf.mxu0  ;;  %v2372_v4 = vmax.f32 %v2231_v26, 0.0  ;;  %v4654_v14 = vrot.slane %v17096_v17, %v11559_v8  ;;  %v4696_v6 = vcombine.low %v12420_v57, %v12436_v30 }
 0x120   : > { %17093 = vst [vmem:[#allocation41_spill] sm:$0xff] %v12452_v34  ;;  %v17097_v56 = vcombine.low %v12200_v9, %v12237_v54  ;;  %v2373_v5 = vmax.f32 %v2234_v10, 0.0  ;;  %v5644_v26 = vcombine.low %v5636_v49, %v5643_v38  ;;  %v17099_v54 = vcombine.low %v12287_v12, %v12276_v42  ;;  %v10219_v42 = vld.sshfl [vmem:[%s16782_s1 + $0x58] sm:$0x3 pattern:$0x76325410] }
 0x121   : > { %v12479_v32 = vpop.f32.mrf.mxu0  ;;  %v2582_v34 = vcombine.high %v2372_v4, %v2372_v4  ;;  %v2589_v40 = vrot.slane %v2372_v4, %v11559_v8  ;;  %v4645_v10 = vcombine.low %v12244_v27, %v4644_v63  ;;  %v16841_v4 = vrot.slane %v12415_v59, 7 }
 0x122   : > { %v4661_v35 = vrot.slane %v17097_v56, %v11559_v8  ;;  %17098 = vst [vmem:[#allocation42_spill] sm:$0xff] %v12479_v32  ;;  %v2599_v20 = vcombine.high %v2373_v5, %v2373_v5  ;;  %v2606_v43 = vrot.slane %v2373_v5, %v11559_v8  ;;  %v17100_v56 = vcombine.low %v12305_v13, %v12315_v23 }
 0x123   : > { %v10825_v17 = vpop.f32.mrf.mxu0  ;;  %v6187_v11 = vpack.c.bf16 %v5644_v26, %v5627_v0  ;;  %v2596_v30 = vrot.slane %v2582_v34, %v11559_v8  ;;  %v2597_v38 = vcombine.high %v2589_v40, %v2589_v40  ;;  %v17103_v12 = vcombine.high %v11948_v45, %v11948_v45 }
 0x124   : > { %v4662_v29 = vcombine.low %v4654_v14, %v4661_v35  ;;  %v12492_v57 = vpack.c.bf16 %v17100_v56, %v17099_v54  ;;  %v2613_v24 = vrot.slane %v2599_v20, %v11559_v8  ;;  %v2614_v23 = vcombine.high %v2606_v43, %v2606_v43 }
 0x125   : > { %v12498_v49 = vpop.f32.mrf.mxu0  ;;  %v12507_v13 = vmul.f32 %v17103_v12, %v2589_v40  ;;  %10877 = vmatprep.mubr.msk.bf16.mxu0 %vm6205_vm12, %v6187_v11  ;;  %v2598_v0 = vcombine.high %v2596_v30, %v2596_v30  ;;  %v12512_v27 = vmul.f32 %v11951_v46, %v2597_v38  ;;  %v17106_v34 = vcombine.high %v11951_v46, %v11951_v46 }
 0x126   : > { %17101 = vst [vmem:[#allocation43_spill] sm:$0xff] %v12492_v57  ;;  %17102 = vst [vmem:[#allocation44_spill] sm:$0xff] %v12498_v49  ;;  %v12519_v14 = vpack.c.bf16 %v4662_v29, %v4645_v10  ;;  %v12523_v45 = vsel %vm12112_vm11, %v10237_v41, %v5288_v33  ;;  %v12525_v40 = vrot.slane %v5288_v33, 2  ;;  %v2615_v20 = vcombine.high %v2613_v24, %v2613_v24 }
 0x127   : > { %17104 = vst [vmem:[#allocation45_spill] sm:$0xff] %v12507_v13  ;;  %17105 = vst [vmem:[#allocation46_spill] sm:$0xff] %v12512_v27  ;;  %v12517_v63 = vmul.f32 %v17106_v34, %v2596_v30  ;;  %v10826_v35 = vpop.f32.mrf.mxu0  ;;  %10878 = vmatmul.mubr.msk.bf16.vlgmr.msra.gmra.mxu0 %vm6205_vm12, %v12492_v57  ;;  %v2242_v5 = vadd.f32 %v11938_v39, %v12296_v1  ;;  %v12531_v26 = vmul.f32 %v10219_v42, %v2598_v0 }
 0x128   : > { %17108 = vst [vmem:[#allocation48_spill] sm:$0xff] %v12519_v14  ;;  %v17110_v46 = vcombine.high %v11954_v47, %v11954_v47  ;;  %v12539_v17 = vmul.f32 %v11961_v51, %v2613_v24  ;;  %10979 = vmatprep.mubr.msk.bf16.mxu0 %vm6205_vm12, %v12519_v14  ;;  %v2374_v41 = vmax.f32 %v2239_v25, 0.0  ;;  %10978 = vmatpush3.bf16.msra.mxu0 %v12010_v28  ;;  %v5299_v1 = vrot.slane %v16841_v4, 2 }
 0x129   : > { %17107 = vst [vmem:[#allocation47_spill] sm:$0xff] %v12517_v63  ;;  %17109 = vst [vmem:[#allocation49_spill] sm:$0xff] %v12531_v26  ;;  %v12544_v33 = vpop.f32.mrf.mxu0  ;;  %v5300_v54 = vrot.slane %v12507_v13, 7  ;;  %v17112_v11 = vcombine.high %v11961_v51, %v11961_v51  ;;  %v17113_v38 = vrot.slane %v12386_v2, 7  ;;  %v16839_v28 = vrot.slane %v12512_v27, 7 }
 0x12a   : > { %v12536_v29 = vmul.f32 %v17110_v46, %v2614_v23  ;;  %17111 = vst [vmem:[#allocation50_spill] sm:$0xff] %v12544_v33  ;;  %v16840_v10 = vrot.slane %v12517_v63, 7  ;;  %v12566_v24 = vrot.slane %v16843_v7, 2  ;;  %v4341_v51 = vmul.f32 %v11954_v47, %v2606_v43 }
 0x12b   : > { %v12554_v30 = vmul.f32 %v17112_v11, %v2615_v20  ;;  %v12558_v25 = vrot.slane %v17113_v38, 2  ;;  %v10829_v12 = vpop.f32.mrf.mxu0  ;;  %v2375_v23 = vmax.f32 %v2242_v5, 0.0  ;;  %v17114_v0 = vcombine.low %v12311_v53, %v12375_v37 }
 0x12c   : > { %v6767_v46 = vcombine.low %v12536_v29, %v12539_v17  ;;  %v2616_v11 = vcombine.high %v2374_v41, %v2374_v41  ;;  %v12585_v43 = vsel %vm12112_vm11, %v5299_v1, %v5300_v54  ;;  %v12587_v53 = vrot.slane %v5300_v54, 2 }
 0x12d   : > { %v12572_v34 = vpack.c.bf16 %v4696_v6, %v17114_v0  ;;  %v16842_v20 = vrot.slane %v12554_v30, 7  ;;  %v12579_v38 = vpop.f32.mrf.mxu0  ;;  %v2623_v37 = vrot.slane %v2374_v41, %v11559_v8  ;;  %v12592_v6 = vrot.slane %v16839_v28, 2 }
 0x12e   : > { %17116 = vst [vmem:[#allocation52_spill] sm:$0xff] %v12579_v38  ;;  %v12596_v5 = vrot.slane %v16840_v10, 2  ;;  %v5313_v12 = vrot.slane %v12536_v29, 7  ;;  %v2630_v0 = vrot.slane %v2616_v11, %v11559_v8  ;;  %v2633_v41 = vcombine.high %v2375_v23, %v2375_v23  ;;  %v17132_v38 = vld [vmem:[#allocation29_spill] sm:$0xff] }
 0x12f   : > { %17115 = vst [vmem:[#allocation51_spill] sm:$0xff] %v12572_v34  ;;  %v10830_v42 = vpop.f32.mrf.mxu0  ;;  %v5321_v1 = vrot.slane %v16842_v20, 2  ;;  %v2631_v54 = vcombine.high %v2623_v37, %v2623_v37  ;;  %v12603_v56 = vmul.f32 %v11964_v52, %v2623_v37  ;;  %10980 = vmatmul.mubr.msk.bf16.vlgmr.msra.gmra.mxu0 %vm6205_vm12, %v12572_v34  ;;  %v4731_v28 = vcombine.low %v4341_v51, %v12536_v29 }
 0x130   : > { %v2632_v10 = vcombine.high %v2630_v0, %v2630_v0  ;;  %v12609_v4 = vmul.f32 %v11979_v61, %v2630_v0  ;;  %v2640_v11 = vrot.slane %v2375_v23, %v11559_v8  ;;  %v10220_v42 = vld.sshfl [vmem:[%s16782_s1 + $0x70] sm:$0x3 pattern:$0x76325410]  ;;  %v17118_v37 = vcombine.high %v11964_v52, %v11964_v52 }
 0x131   : > { %v12615_v20 = vpop.f32.mrf.mxu0  ;;  %v5322_v47 = vrot.slane %v12603_v56, 7  ;;  %v6768_v29 = vcombine.low %v12554_v30, %v12603_v56  ;;  %v2647_v0 = vrot.slane %v2633_v41, %v11559_v8  ;;  %v5315_v35 = vrot.slane %v5313_v12, 2 }
 0x132   : > { %17117 = vst [vmem:[#allocation53_spill] sm:$0xff] %v12615_v20  ;;  %v12620_v7 = vmul.f32 %v17118_v37, %v2631_v54  ;;  %v17119_v57 = vcombine.high %v11979_v61, %v11979_v61  ;;  %v16849_v14 = vrot.slane %v12609_v4, 7  ;;  %v5316_v37 = vrot.slane %v12539_v17, 7 }
 0x133   : > { %v10833_v52 = vpop.f32.mrf.mxu0  ;;  %v12638_v9 = vsel %vm12112_vm11, %v5321_v1, %v5322_v47  ;;  %v4349_v41 = vmul.f32 %v10220_v42, %v2640_v11  ;;  %v12641_v23 = vrot.slane %v6767_v46, %v11559_v8  ;;  %v12652_v54 = vrot.slane %v4731_v28, %v11559_v8 }
 0x134   : > { %v12630_v34 = vmul.f32 %v17119_v57, %v2632_v10  ;;  %17120 = vst [vmem:[#allocation54_spill] sm:$0xff] %v12638_v9  ;;  %v5330_v61 = vrot.slane %v16849_v14, 2  ;;  %v12647_v10 = vrot.slane %v6768_v29, %v11559_v8  ;;  %v10238_v20 = vrot.slane %v4341_v51, 9  ;;  %v17127_v51 = vld [vmem:[#allocation4_spill] sm:$0xff] }
 0x135   : > { %17121 = vst [vmem:[#allocation55_spill] sm:$0xff] %v12641_v23  ;;  %v12649_v52 = vpop.f32.mrf.mxu0  ;;  %17124 = vst [vmem:[#allocation58_spill] sm:$0xff] %v12652_v54  ;;  %v6784_v1 = vcombine.low %v12620_v7, %v12609_v4  ;;  %v2649_v42 = vcombine.high %v2647_v0, %v2647_v0  ;;  %v12658_v46 = vsel %vm12112_vm11, %v5315_v35, %v5316_v37  ;;  %v5334_v9 = vrot.slane %v4349_v41, 7 }
 0x136   : > { %v5331_v57 = vrot.slane %v12630_v34, 7  ;;  %17122 = vst [vmem:[#allocation56_spill] sm:$0xff] %v12647_v10  ;;  %17123 = vst [vmem:[#allocation57_spill] sm:$0xff] %v12649_v52  ;;  %v2648_v29 = vcombine.high %v2640_v11, %v2640_v11  ;;  %v17125_v52 = vcombine.high %v11982_v62, %v11982_v62  ;;  %v6785_v54 = vcombine.low %v12630_v34, %v4349_v41 }
 0x137   : > { %v10834_v33 = vpop.f32.mrf.mxu0  ;;  %v12668_v49 = vmul.f32 %v17127_v51, %v2649_v42  ;;  %v12673_v35 = vsel %vm12112_vm11, %v10238_v20, %v5313_v12  ;;  %v12675_v32 = vrot.slane %v5316_v37, 2  ;;  %v2247_v11 = vadd.f32 %v11938_v39, %v12338_v55 }
 0x138   : > { %v5333_v14 = vrot.slane %v5331_v57, 2  ;;  %v12665_v28 = vmul.f32 %v17125_v52, %v2647_v0  ;;  %v12679_v33 = vsel %vm12112_vm11, %v5330_v61, %v5331_v57  ;;  %v12690_v41 = vrot.slane %v6784_v1, %v11559_v8 }
 0x139   : > { %17128 = vst [vmem:[#allocation4_spill] sm:$0xff] %v12668_v49  ;;  %v12683_v0 = vpop.f32.mrf.mxu0  ;;  %v12693_v20 = vrot.slane %v6785_v54, %v11559_v8  ;;  %v12701_v61 = vrot.slane %v5322_v47, 2  ;;  %v4350_v57 = vmul.f32 %v11982_v62, %v2648_v29  ;;  %v2376_v42 = vmax.f32 %v2247_v11, 0.0 }
 0x13a   : > { %17126 = vst [vmem:[#allocation59_spill] sm:$0xff] %v12665_v28  ;;  %v12687_v52 = vsel %vm12112_vm11, %v5333_v14, %v5334_v9  ;;  %17129 = vst [vmem:[#allocation60_spill] sm:$0xff] %v12690_v41  ;;  %v17131_v12 = vrot.slane %v12256_v16, 7  ;;  %v17133_v37 = vrot.slane %v17132_v38, 9  ;;  %v17136_v9 = vld [vmem:[#allocation34_spill] sm:$0xff]  ;;  %v17137_v29 = vrot.slane %v12284_v3, 7 }
 0x13b   : > { %17130 = vst [vmem:[#allocation61_spill] sm:$0xff] %v12693_v20  ;;  %v10837_v14 = vpop.f32.mrf.mxu0  ;;  %v2650_v38 = vcombine.high %v2376_v42, %v2376_v42 }
 0x13c   : > { %v5264_v47 = vsel %vm12112_vm11, %v17133_v37, %v17131_v12  ;;  %v17134_v55 = vmov %v17131_v12  ;;  %v17135_v14 = vrot.slane %v12294_v22, 7  ;;  %v5273_v11 = vsel %vm12112_vm11, %v12392_v58, %v17137_v29  ;;  %v17138_v37 = vld [vmem:[#allocation32_spill] sm:$0xff] }
 0x13d   : > { %v5265_v10 = vrot.slane %v17134_v55, 2  ;;  %v12727_v1 = vpop.f32.mrf.mxu0  ;;  %v2657_v12 = vrot.slane %v2376_v42, %v11559_v8  ;;  %v17139_v16 = vrot.slane %v17138_v37, 7  ;;  %v17140_v55 = vld [vmem:[#allocation35_spill] sm:$0xff]  ;;  %v17144_v58 = vrot.slane %v12370_v19, 7 }
 0x13e   : > { %v5270_v62 = vsel %vm12112_vm11, %v17136_v9, %v17135_v14  ;;  %v17142_v14 = vld [vmem:[#allocation30_spill] sm:$0xff]  ;;  %v17145_v29 = vrot.slane %v12372_v60, 7  ;;  %v17148_v19 = vrot.slane %v12353_v18, 7  ;;  %v17149_v60 = vrot.slane %v12668_v49, 7 }
 0x13f   : > { %v5276_v22 = vsel %vm12112_vm11, %v17140_v55, %v17139_v16  ;;  %v17141_v54 = vmov %v17139_v16  ;;  %v17143_v3 = vrot.slane %v17142_v14, 7  ;;  %v5282_v42 = vsel %vm12112_vm11, %v12426_v50, %v17144_v58  ;;  %v10838_v37 = vpop.f32.mrf.mxu0 }
 0x140   : > { %v5277_v9 = vrot.slane %v17141_v54, 2  ;;  %v5285_v16 = vsel %vm12112_vm11, %v12440_v15, %v17145_v29  ;;  %v5680_v55 = vcombine.low %v5270_v62, %v5273_v11  ;;  %v2664_v54 = vrot.slane %v2650_v38, %v11559_v8  ;;  %v17151_v29 = vld [vmem:[#allocation5_spill] sm:$0xff] }
 0x141   : > { %v5267_v20 = vsel %vm12112_vm11, %v5265_v10, %v17143_v3  ;;  %v2665_v14 = vcombine.high %v2657_v12, %v2657_v12  ;;  %v17146_v10 = vcombine.high %v17127_v51, %v17127_v51  ;;  %v5343_v58 = vrot.slane %v17149_v60, 2  ;;  %v12763_v11 = vpop.f32.mrf.mxu0 }
 0x142   : > { %v5279_v50 = vsel %vm12112_vm11, %v5277_v9, %v17148_v19  ;;  %v5679_v41 = vcombine.low %v5264_v47, %v5267_v20  ;;  %v5697_v62 = vcombine.low %v5282_v42, %v5285_v16  ;;  %17150 = vst [vmem:[#allocation34_spill] sm:$0xff] %v12763_v11  ;;  %v2666_v38 = vcombine.high %v2664_v54, %v2664_v54 }
 0x143   : > { %v12755_v3 = vmul.f32 %v17146_v10, %v2657_v12  ;;  %v5696_v15 = vcombine.low %v5276_v22, %v5279_v50  ;;  %v12766_v37 = vmul.f32 %v17151_v29, %v2665_v14  ;;  %v5694_v18 = vrot.slane %v5680_v55, %v11559_v8  ;;  %v10841_v47 = vpop.f32.mrf.mxu0  ;;  %v17155_v14 = vld [vmem:[#allocation6_spill] sm:$0xff] }
 0x144   : > { %v16856_v12 = vrot.slane %v12620_v7, 7  ;;  %v10239_v9 = vrot.slane %v4350_v57, 9  ;;  %v5711_v20 = vrot.slane %v5697_v62, %v11559_v8  ;;  %v4765_v22 = vcombine.low %v4350_v57, %v12665_v28 }
 0x145   : > { %17147 = vst [vmem:[#allocation29_spill] sm:$0xff] %v12755_v3  ;;  %17152 = vst [vmem:[#allocation32_spill] sm:$0xff] %v12766_v37  ;;  %v16853_v10 = vrot.slane %v12755_v3, 7  ;;  %v17153_v42 = vcombine.high %v17151_v29, %v17151_v29  ;;  %v12781_v19 = vmul.f32 %v17155_v14, %v2666_v38  ;;  %v5687_v55 = vrot.slane %v5679_v41, %v11559_v8 }
 0x146   : > { %v5338_v50 = vrot.slane %v12665_v28, 7  ;;  %v5704_v62 = vrot.slane %v5696_v15, %v11559_v8  ;;  %v17158_v47 = vcombine.low %v12402_v31, %v12407_v44  ;;  %v17159_v57 = vcombine.low %v12386_v2, %v12412_v36 }
 0x147   : > { %v12778_v16 = vmul.f32 %v17153_v42, %v2664_v54  ;;  %17156 = vst [vmem:[#allocation30_spill] sm:$0xff] %v12781_v19  ;;  %v12789_v60 = vsel %vm12112_vm11, %v5343_v58, %v16853_v10  ;;  %v12794_v54 = vpop.f32.mrf.mxu0  ;;  %v5695_v29 = vcombine.low %v5687_v55, %v5694_v18  ;;  %v17160_v51 = vcombine.low %v12415_v59, %v12507_v13 }
 0x148   : > { %17157 = vst [vmem:[#allocation5_spill] sm:$0xff] %v12794_v54  ;;  %v4705_v58 = vrot.slane %v17158_v47, %v11559_v8  ;;  %v5712_v42 = vcombine.low %v5704_v62, %v5711_v20  ;;  %v4712_v15 = vrot.slane %v17159_v57, %v11559_v8  ;;  %v17161_v18 = vcombine.low %v12512_v27, %v12517_v63  ;;  %v17162_v62 = vld [vmem:[#allocation33_spill] sm:$0xff] }
 0x149   : > { %17154 = vst [vmem:[#allocation35_spill] sm:$0xff] %v12778_v16  ;;  %v4722_v38 = vrot.slane %v17160_v51, %v11559_v8  ;;  %v10842_v41 = vpop.f32.mrf.mxu0  ;;  %v12818_v31 = vrot.slane %v16856_v12, 2  ;;  %v12821_v20 = vrot.slane %v4765_v22, %v11559_v8  ;;  %v2250_v57 = vadd.f32 %v11938_v39, %v17162_v62  ;;  %v17163_v47 = vld [vmem:[#allocation37_spill] sm:$0xff] }
 0x14a   : > { %v4729_v55 = vrot.slane %v17161_v18, %v11559_v8  ;;  %v2255_v10 = vadd.f32 %v11938_v39, %v17163_v47  ;;  %v12829_v51 = vsel %vm12112_vm11, %v10239_v9, %v5338_v50  ;;  %v12831_v28 = vpack.c.bf16 %v5712_v42, %v5695_v29 }
 0x14b   : > { %v4713_v41 = vcombine.low %v4705_v58, %v4712_v15  ;;  %v12833_v23 = vpop.f32.mrf.mxu0  ;;  %v12835_v12 = vrot.slane %v5338_v50, 2  ;;  %v2377_v13 = vmax.f32 %v2250_v57, 0.0  ;;  %v16859_v9 = vrot.slane %v12781_v19, 7 }
 0x14c   : > { %17164 = vst [vmem:[#allocation6_spill] sm:$0xff] %v12831_v28  ;;  %v4730_v18 = vcombine.low %v4722_v38, %v4729_v55  ;;  %17165 = vst [vmem:[#allocation33_spill] sm:$0xff] %v12833_v23  ;;  %v2378_v62 = vmax.f32 %v2255_v10, 0.0  ;;  %10881 = vmatprep.mubr.msk.bf16.mxu1 %vm6205_vm12, %v12831_v28  ;;  %v17167_v55 = vrot.slane %v12386_v2, 7  ;;  %v17168_v47 = vrot.slane %v12412_v36, 7 }
 0x14d   : > { %v10845_v38 = vpop.f32.mrf.mxu0  ;;  %v2667_v58 = vcombine.high %v2377_v13, %v2377_v13  ;;  %v2674_v50 = vrot.slane %v2377_v13, %v11559_v8  ;;  %v10221_v10 = vld.sshfl [vmem:[%s16782_s1 + $0x88] sm:$0x3 pattern:$0x76325410]  ;;  %v17171_v22 = vcombine.high %v17155_v14, %v17155_v14  ;;  %v17173_v44 = vrot.slane %v12517_v63, 7 }
 0x14e   : > { %v12844_v29 = vpack.c.bf16 %v4730_v18, %v4713_v41  ;;  %v2684_v42 = vcombine.high %v2378_v62, %v2378_v62  ;;  %v2691_v15 = vrot.slane %v2378_v62, %v11559_v8  ;;  %v5292_v57 = vsel %vm12112_vm11, %v12525_v40, %v17167_v55 }
 0x14f   : > { %v5295_v13 = vsel %vm12112_vm11, %v12558_v25, %v17168_v47  ;;  %v17169_v41 = vrot.slane %v12415_v59, 7  ;;  %v17170_v62 = vrot.slane %v12512_v27, 7  ;;  %v2681_v40 = vrot.slane %v2667_v58, %v11559_v8  ;;  %v12880_v47 = vpop.f32.mrf.mxu0 }
 0x150   : > { %17166 = vst [vmem:[#allocation37_spill] sm:$0xff] %v12844_v29  ;;  %10983 = vmatprep.mubr.msk.bf16.mxu0 %vm6205_vm12, %v12844_v29  ;;  %v2682_v55 = vcombine.high %v2674_v50, %v2674_v50  ;;  %v12877_v39 = vmul.f32 %v17171_v22, %v2674_v50  ;;  %v2698_v25 = vrot.slane %v2684_v42, %v11559_v8  ;;  %17172 = vst [vmem:[#allocation62_spill] sm:$0xff] %v12880_v47 }
 0x151   : > { %v5298_v18 = vsel %vm12112_vm11, %v12566_v24, %v17169_v41  ;;  %v5304_v38 = vsel %vm12112_vm11, %v12587_v53, %v17170_v62  ;;  %v5355_v24 = vrot.slane %v16859_v9, 2  ;;  %v2699_v41 = vcombine.high %v2691_v15, %v2691_v15  ;;  %v10846_v9 = vpop.f32.mrf.mxu0 }
 0x152   : > { %v5307_v53 = vsel %vm12112_vm11, %v12592_v6, %v17173_v44  ;;  %v17174_v58 = vrot.slane %v12531_v26, 7  ;;  %v2683_v22 = vcombine.high %v2681_v40, %v2681_v40  ;;  %v4358_v50 = vmul.f32 %v10221_v10, %v2682_v55  ;;  %v17175_v6 = vld [vmem:[#allocation7_spill] sm:$0xff] }
 0x153   : > { %v5713_v62 = vcombine.low %v12523_v45, %v5292_v57  ;;  %v5356_v28 = vrot.slane %v12877_v39, 7  ;;  %v2700_v29 = vcombine.high %v2698_v25, %v2698_v25  ;;  %v5714_v63 = vcombine.low %v5295_v13, %v5298_v18  ;;  %v17177_v55 = vld [vmem:[#allocation11_spill] sm:$0xff] }
 0x154   : > { %v5310_v14 = vsel %vm12112_vm11, %v12596_v5, %v17174_v58  ;;  %v5730_v44 = vcombine.low %v12585_v43, %v5304_v38  ;;  %v12900_v26 = vmul.f32 %v17175_v6, %v2681_v40  ;;  %v17176_v5 = vcombine.high %v17175_v6, %v17175_v6  ;;  %v17181_v40 = vld [vmem:[#allocation8_spill] sm:$0xff] }
 0x155   : > { %v6819_v10 = vcombine.low %v12877_v39, %v4358_v50  ;;  %v12909_v42 = vmul.f32 %v17177_v55, %v2691_v15  ;;  %v17178_v45 = vrot.slane %v12755_v3, 7  ;;  %v17179_v57 = vrot.slane %v12766_v37, 7 }
 0x156   : > { %v12905_v58 = vmul.f32 %v17176_v5, %v2683_v22  ;;  %v12921_v13 = vsel %vm12112_vm11, %v5355_v24, %v5356_v28  ;;  %v17180_v18 = vcombine.high %v17177_v55, %v17177_v55  ;;  %v12930_v22 = vmul.f32 %v17181_v40, %v2698_v25 }
 0x157   : > { %v12913_v9 = vrot.slane %v17178_v45, 2  ;;  %v12917_v43 = vrot.slane %v17179_v57, 2  ;;  %v17182_v6 = vcombine.high %v17181_v40, %v17181_v40  ;;  %v5731_v45 = vcombine.low %v5307_v53, %v5310_v14 }
 0x158   : > { %v12926_v38 = vmul.f32 %v17180_v18, %v2699_v41  ;;  %v16869_v15 = vrot.slane %v12905_v58, 7  ;;  %v17183_v57 = vrot.slane %v12778_v16, 7  ;;  %v5721_v27 = vrot.slane %v5713_v62, %v11559_v8 }
 0x159   : > { %v12935_v5 = vmul.f32 %v17182_v6, %v2700_v29  ;;  %v5728_v41 = vrot.slane %v5714_v63, %v11559_v8  ;;  %v5738_v55 = vrot.slane %v5730_v44, %v11559_v8  ;;  %v5359_v18 = vrot.slane %v4358_v50, 7 }
 0x15a   : > { %v12939_v24 = vrot.slane %v17183_v57, 2  ;;  %v10240_v25 = vrot.slane %v12900_v26, 9  ;;  %v5365_v59 = vrot.slane %v16869_v15, 2  ;;  %v16868_v29 = vrot.slane %v12909_v42, 7  ;;  %v12970_v57 = vld [vmem:[%s16786_s5] ss:$0 sm:$0xff] }
 0x15b   : > { %v4799_v53 = vcombine.low %v12900_v26, %v12905_v58  ;;  %v5358_v14 = vrot.slane %v5356_v28, 2  ;;  %v6835_v63 = vcombine.low %v12905_v58, %v12909_v42  ;;  %v6836_v44 = vcombine.low %v12926_v38, %v12930_v22 }
 0x15c   : > { %v12958_v50 = vsel %vm12112_vm11, %v5365_v59, %v16868_v29  ;;  %v5745_v26 = vrot.slane %v5731_v45, %v11559_v8  ;;  %v5729_v6 = vcombine.low %v5721_v27, %v5728_v41  ;;  %v2258_v59 = vadd.f32 %v12970_v57, %v12443_v48 }
 0x15d   : > { %v12965_v28 = vrot.slane %v6835_v63, %v11559_v8  ;;  %v17185_v40 = vcombine.low %v12539_v17, %v12554_v30  ;;  %v12979_v15 = vrot.slane %v6836_v44, %v11559_v8  ;;  %v17187_v27 = vcombine.low %v12603_v56, %v12620_v7  ;;  %v17190_v44 = vld [vmem:[#allocation42_spill] sm:$0xff] }
 0x15e   : > { %v5746_v45 = vcombine.low %v5738_v55, %v5745_v26  ;;  %v17188_v63 = vcombine.low %v12609_v4, %v12630_v34  ;;  %v12991_v48 = vsel %vm12112_vm11, %v5358_v14, %v5359_v18  ;;  %v12994_v17 = vrot.slane %v6819_v10, %v11559_v8 }
 0x15f   : > { %17184 = vst [vmem:[#allocation7_spill] sm:$0xff] %v12965_v28  ;;  %v4746_v29 = vrot.slane %v17185_v40, %v11559_v8  ;;  %17186 = vst [vmem:[#allocation11_spill] sm:$0xff] %v12979_v15  ;;  %v4756_v41 = vrot.slane %v17187_v27, %v11559_v8  ;;  %v2379_v40 = vmax.f32 %v2258_v59, 0.0  ;;  %v2263_v55 = vadd.f32 %v12970_v57, %v17190_v44  ;;  %v17192_v27 = vld [vmem:[#allocation58_spill] sm:$0xff]  ;;  %v13009_v59 = vpop.f32.mrf.mxu0 }
 0x160   : > { %v4763_v62 = vrot.slane %v17188_v63, %v11559_v8  ;;  %17189 = vst [vmem:[#allocation8_spill] sm:$0xff] %v12994_v17  ;;  %v13000_v26 = vpack.c.bf16 %v5746_v45, %v5729_v6  ;;  %v17193_v14 = vrot.slane %v12554_v30, 7  ;;  %17194 = vst [vmem:[#allocation58_spill] sm:$0xff] %v13009_v59  ;;  %v17195_v6 = vrot.slane %v12935_v5, 7 }
 0x161   : > { %v4747_v36 = vcombine.low %v17192_v27, %v4746_v29  ;;  %v2701_v63 = vcombine.high %v2379_v40, %v2379_v40  ;;  %v2708_v2 = vrot.slane %v2379_v40, %v11559_v8  ;;  %v2380_v18 = vmax.f32 %v2263_v55, 0.0  ;;  %v10222_v29 = vld.sshfl [vmem:[%s16782_s1 + $0xa0] sm:$0x3 pattern:$0x76325410]  ;;  %v10849_v56 = vpop.f32.mrf.mxu0 }
 0x162   : > { %17191 = vst [vmem:[#allocation42_spill] sm:$0xff] %v13000_v26  ;;  %v4764_v34 = vcombine.low %v4756_v41, %v4763_v62  ;;  %v5320_v10 = vsel %vm12112_vm11, %v12675_v32, %v17193_v14  ;;  %v5377_v45 = vrot.slane %v17195_v6, 2  ;;  %10882 = vmatmul.mubr.msk.bf16.vlgmr.msra.gmra.mxu1 %vm6205_vm12, %v13000_v26  ;;  %v17197_v62 = vld [vmem:[#allocation54_spill] sm:$0xff]  ;;  %v17201_v26 = vld [vmem:[#allocation12_spill] sm:$0xff]  ;;  %v17218_v28 = vrot.slane %v12930_v22, 7 }
 0x163   : > { %v5748_v41 = vcombine.low %v5320_v10, %v17197_v62  ;;  %v2715_v32 = vrot.slane %v2701_v63, %v11559_v8  ;;  %v2716_v40 = vcombine.high %v2708_v2, %v2708_v2  ;;  %v17198_v55 = vld [vmem:[#allocation14_spill] sm:$0xff]  ;;  %v2718_v14 = vcombine.high %v2380_v18, %v2380_v18 }
 0x164   : > { %v13020_v30 = vpack.c.bf16 %v4764_v34, %v4747_v36  ;;  %v13025_v27 = vmul.f32 %v17198_v55, %v2708_v2  ;;  %v2725_v36 = vrot.slane %v2380_v18, %v11559_v8  ;;  %v17199_v34 = vrot.slane %v12609_v4, 7 }
 0x165   : > { %v2717_v10 = vcombine.high %v2715_v32, %v2715_v32  ;;  %v17200_v2 = vcombine.high %v17198_v55, %v17198_v55  ;;  %v13042_v62 = vmul.f32 %v10222_v29, %v2715_v32  ;;  %v2732_v18 = vrot.slane %v2718_v14, %v11559_v8  ;;  %v17206_v14 = vld [vmem:[#allocation20_spill] sm:$0xff] }
 0x166   : > { %17196 = vst [vmem:[#allocation63_spill] sm:$0xff] %v13020_v30  ;;  %10984 = vmatmul.mubr.msk.bf16.gmra.mxu0 %vm6205_vm12, %v13020_v30  ;;  %v5329_v63 = vsel %vm12112_vm11, %v12818_v31, %v17199_v34  ;;  %v16876_v44 = vrot.slane %v13025_v27, 7  ;;  %v6852_v6 = vcombine.low %v12935_v5, %v13025_v27  ;;  %v2733_v4 = vcombine.high %v2725_v36, %v2725_v36 }
 0x167   : > { %v13040_v56 = vmul.f32 %v17200_v2, %v2716_v40  ;;  %v17202_v30 = vcombine.high %v17201_v26, %v17201_v26  ;;  %v13054_v34 = vrot.slane %v4799_v53, %v11559_v8  ;;  %v17204_v40 = vrot.slane %v12905_v58, 7 }
 0x168   : > { %v13063_v32 = vmul.f32 %v17201_v26, %v2717_v10  ;;  %v13069_v55 = vsel %vm12112_vm11, %v5377_v45, %v16876_v44  ;;  %v3708_v58 = vcombine.high %v17206_v14, %v17206_v14  ;;  %v2734_v45 = vcombine.high %v2732_v18, %v2732_v18 }
 0x169   : > { %v13051_v31 = vmul.f32 %v17202_v30, %v2725_v36  ;;  %v13060_v29 = vsel %vm12112_vm11, %v10240_v25, %v17204_v40  ;;  %v13071_v30 = vpop.f32.mrf.mxu0  ;;  %v6853_v53 = vcombine.low %v13040_v56, %v13042_v62  ;;  %v17207_v25 = vrot.slane %v12620_v7, 7 }
 0x16a   : > { %17205 = vst [vmem:[#allocation14_spill] sm:$0xff] %v13071_v30  ;;  %v5762_v36 = vrot.slane %v5748_v41, %v11559_v8  ;;  %v10241_v10 = vrot.slane %v13063_v32, 9  ;;  %v13085_v2 = vmul.f32 %v17206_v14, %v2733_v4  ;;  %v13088_v17 = vrot.slane %v6852_v6, %v11559_v8  ;;  %v17224_v30 = vld [vmem:[#allocation50_spill] sm:$0xff] }
 0x16b   : > { %17203 = vst [vmem:[#allocation54_spill] sm:$0xff] %v13051_v31  ;;  %v5326_v26 = vsel %vm12112_vm11, %v12701_v61, %v17207_v25  ;;  %v10850_v44 = vpop.f32.mrf.mxu0  ;;  %v13091_v15 = vrot.slane %v6853_v53, %v11559_v8  ;;  %v16879_v61 = vrot.slane %v13051_v31, 7  ;;  %v17211_v41 = vrot.slane %v12909_v42, 7 }
 0x16c   : > { %17208 = vst [vmem:[#allocation12_spill] sm:$0xff] %v13085_v2  ;;  %v5764_v40 = vcombine.low %v5326_v26, %v5329_v63  ;;  %17209 = vst [vmem:[#allocation20_spill] sm:$0xff] %v13088_v17  ;;  %v17212_v4 = vrot.slane %v12926_v38, 7  ;;  %v17213_v44 = vld [vmem:[#allocation17_spill] sm:$0xff]  ;;  %v17215_v6 = vcombine.low %v12673_v35, %v12658_v46  ;;  %v13113_v7 = vmul.f32 %v3708_v58, %v2732_v18  ;;  %v3321_v35 = vld [vmem:[%s16782_s1 + $0xc0] sm:$0xff] }
 0x16d   : > { %17210 = vst [vmem:[#allocation64_spill] sm:$0xff] %v13091_v15  ;;  %v13098_v25 = vrot.slane %v17211_v41, 2  ;;  %v13105_v63 = vmul.f32 %v17213_v44, %v2734_v45  ;;  %v13119_v41 = vsel %vm12112_vm11, %v10241_v10, %v16879_v61  ;;  %v17217_v45 = vcombine.low %v12679_v33, %v12687_v52  ;;  %v5187_v10 = vld [vmem:[%s16787_s6] sm:$0x3]  ;;  %v11364_v61 = vld [vmem:[%s16782_s1 + $0xb0] sm:$0xff] }
 0x16e   : > { %v13102_v14 = vrot.slane %v17212_v4, 2  ;;  %v5755_v53 = vrot.slane %v17215_v6, %v11559_v8  ;;  %17216 = vst [vmem:[#allocation65_spill] sm:$0xff] %v13113_v7  ;;  %v13127_v46 = vrot.slane %v17218_v28, 2  ;;  %v13137_v6 = vpop.f32.mrf.mxu0  ;;  %v5772_v28 = vrot.slane %v5764_v40, %v11559_v8  ;;  %11253 = vmatprep.subr.msk.bf16.mxu1 %vm6254_vm4, %v5187_v10 }
 0x16f   : > { %17214 = vst [vmem:[#allocation17_spill] sm:$0xff] %v13105_v63  ;;  %v5779_v4 = vrot.slane %v17217_v45, %v11559_v8  ;;  %17219 = vst [vmem:[#allocation66_spill] sm:$0xff] %v13137_v6  ;;  %v17220_v45 = vld [vmem:[#allocation44_spill] sm:$0xff]  ;;  %v5384_v58 = vrot.slane %v13042_v62, 7  ;;  %v3709_v18 = vcombine.high %v11364_v61, %v11364_v61  ;;  %v17221_v40 = vcombine.low %v12668_v49, %v12755_v3 }
 0x170   : > { %v5763_v52 = vcombine.low %v5755_v53, %v5762_v36  ;;  %v2266_v26 = vadd.f32 %v12970_v57, %v17220_v45  ;;  %v3724_v36 = vcombine.high %v17213_v44, %v17213_v44  ;;  %v10853_v45 = vpop.f32.mrf.mxu0  ;;  %v17222_v62 = vcombine.low %v12766_v37, %v12778_v16 }
 0x171   : > { %v4780_v53 = vrot.slane %v17221_v40, %v11559_v8  ;;  %v5780_v33 = vcombine.low %v5772_v28, %v5779_v4  ;;  %v17223_v61 = vcombine.low %v12781_v19, %v12877_v39  ;;  %v3723_v44 = vrot.slane %v3709_v18, %v11559_v8 }
 0x172   : > { %v2381_v15 = vmax.f32 %v2266_v26, 0.0  ;;  %v4790_v10 = vrot.slane %v17222_v62, %v11559_v8  ;;  %v2271_v40 = vadd.f32 %v12970_v57, %v17224_v30  ;;  %v3733_v45 = vcombine.high %v3321_v35, %v3321_v35 }
 0x173   : > { %v4797_v17 = vrot.slane %v17223_v61, %v11559_v8  ;;  %v4781_v6 = vcombine.low %v12821_v20, %v4780_v53  ;;  %v13170_v4 = vpack.c.bf16 %v5780_v33, %v5763_v52  ;;  %v17226_v62 = vrot.slane %v13040_v56, 7  ;;  %v10223_v52 = vld.sshfl [vmem:[%s16782_s1 + $0xb8] sm:$0x3 pattern:$0x76325410] }
 0x174   : > { %v2735_v26 = vcombine.high %v2381_v15, %v2381_v15  ;;  %v2742_v28 = vrot.slane %v2381_v15, %v11559_v8  ;;  %v3725_v47 = vcombine.high %v3723_v44, %v3723_v44  ;;  %v2382_v39 = vmax.f32 %v2271_v40, 0.0 }
 0x175   : > { %17225 = vst [vmem:[#allocation44_spill] sm:$0xff] %v13170_v4  ;;  %v4798_v3 = vcombine.low %v4790_v10, %v4797_v17  ;;  %v5383_v59 = vrot.slane %v17226_v62, 2  ;;  %v3740_v61 = vrot.slane %v3321_v35, %v11559_v8  ;;  %10885 = vmatprep.mubr.msk.bf16.mxu1 %vm6205_vm12, %v13170_v4  ;;  %v17231_v18 = vrot.slane %v13025_v27, 7 }
 0x176   : > { %v2749_v20 = vrot.slane %v2735_v26, %v11559_v8  ;;  %v2750_v30 = vcombine.high %v2742_v28, %v2742_v28  ;;  %v2752_v53 = vcombine.high %v2382_v39, %v2382_v39  ;;  %v2759_v35 = vrot.slane %v2382_v39, %v11559_v8 }
 0x177   : > { %v13180_v33 = vpack.c.bf16 %v4798_v3, %v4781_v6  ;;  %v13188_v40 = vmul.f32 %v3724_v36, %v2742_v28  ;;  %v3747_v3 = vrot.slane %v3733_v45, %v11559_v8  ;;  %v3748_v17 = vcombine.high %v3740_v61, %v3740_v61 }
 0x178   : > { %v2751_v10 = vcombine.high %v2749_v20, %v2749_v20  ;;  %v13190_v62 = vmul.f32 %v3723_v44, %v2750_v30  ;;  %v13195_v6 = vmul.f32 %v3725_v47, %v2749_v20  ;;  %v2766_v26 = vrot.slane %v2752_v53, %v11559_v8 }
 0x179   : > { %17227 = vst [vmem:[#allocation50_spill] sm:$0xff] %v13180_v33  ;;  %17228 = vst [vmem:[#allocation67_spill] sm:$0xff] %v13188_v40  ;;  %10987 = vmatprep.mubr.msk.bf16.mxu0 %vm6205_vm12, %v13180_v33  ;;  %v2767_v15 = vcombine.high %v2759_v35, %v2759_v35  ;;  %v13200_v4 = vrot.slane %v17231_v18, 2  ;;  %v13204_v36 = vsel %vm12112_vm11, %v5383_v59, %v5384_v58  ;;  %v17233_v47 = vrot.slane %v13051_v31, 7 }
 0x17a   : > { %17229 = vst [vmem:[#allocation68_spill] sm:$0xff] %v13190_v62  ;;  %17230 = vst [vmem:[#allocation69_spill] sm:$0xff] %v13195_v6  ;;  %v13208_v28 = vmul.f32 %v10223_v52, %v2751_v10  ;;  %v17234_v39 = vrot.slane %v13085_v2, 7  ;;  %v17235_v18 = vrot.slane %v13105_v63, 7  ;;  %v17236_v58 = vrot.slane %v13113_v7, 7 }
 0x17b   : > { %v13212_v45 = vrot.slane %v17233_v47, 2  ;;  %v5400_v52 = vrot.slane %v13188_v40, 7  ;;  %v3749_v47 = vcombine.high %v3747_v3, %v3747_v3  ;;  %v13231_v33 = vmul.f32 %v3748_v17, %v2767_v15 }
 0x17c   : > { %17232 = vst [vmem:[#allocation70_spill] sm:$0xff] %v13208_v28  ;;  %v13216_v20 = vrot.slane %v17234_v39, 2  ;;  %v5399_v30 = vrot.slane %v17235_v18, 2  ;;  %v13224_v53 = vrot.slane %v17236_v58, 2  ;;  %v16887_v39 = vrot.slane %v13195_v6, 7 }
 0x17d   : > { %v13233_v18 = vmul.f32 %v3747_v3, %v2766_v26  ;;  %v2768_v23 = vcombine.high %v2766_v26, %v2766_v26  ;;  %v13235_v59 = vmul.f32 %v3740_v61, %v2759_v35  ;;  %v17237_v58 = vrot.slane %v12668_v49, 7  ;;  %v13260_v3 = vpop.f32.mrf.mxu0  ;;  %v17248_v49 = vld [vmem:[#allocation53_spill] sm:$0xff] }
 0x17e   : > { %v17238_v10 = vrot.slane %v12766_v37, 7  ;;  %v13253_v61 = vsel %vm12112_vm11, %v5399_v30, %v5400_v52  ;;  %v17239_v35 = vrot.slane %v12778_v16, 7  ;;  %17240 = vst [vmem:[#allocation71_spill] sm:$0xff] %v13260_v3  ;;  %v17241_v26 = vrot.slane %v12781_v19, 7 }
 0x17f   : > { %v5342_v54 = vsel %vm12112_vm11, %v12835_v12, %v17237_v58  ;;  %v13271_v17 = vrot.slane %v5400_v52, 2  ;;  %v17242_v15 = vrot.slane %v13190_v62, 7  ;;  %v4867_v52 = vcombine.low %v13235_v59, %v13231_v33 }
 0x180   : > { %v5348_v44 = vsel %vm12112_vm11, %v12913_v9, %v17238_v10  ;;  %v5351_v12 = vsel %vm12112_vm11, %v12917_v43, %v17239_v35  ;;  %v5354_v10 = vsel %vm12112_vm11, %v12939_v24, %v17241_v26  ;;  %v5781_v30 = vcombine.low %v12829_v51, %v5342_v54  ;;  %v3322_v24 = vld [vmem:[%s16782_s1 + $0xc8] sm:$0xff]  ;;  %v10854_v26 = vpop.f32.mrf.mxu0 }
 0x181   : > { %v5782_v58 = vcombine.low %v12789_v60, %v5348_v44  ;;  %v13275_v43 = vrot.slane %v17242_v15, 2  ;;  %v13279_v35 = vrot.slane %v16887_v39, 2  ;;  %v13285_v54 = vmul.f32 %v3749_v47, %v2768_v23  ;;  %v17244_v39 = vld [vmem:[#allocation52_spill] sm:$0xff] }
 0x182   : > { %v10242_v60 = vrot.slane %v13235_v59, 9  ;;  %v5789_v51 = vrot.slane %v5781_v30, %v11559_v8  ;;  %v5798_v15 = vcombine.low %v5351_v12, %v5354_v10  ;;  %v5799_v9 = vcombine.low %v12921_v13, %v12991_v48 }
 0x183   : > { %17243 = vst [vmem:[#allocation72_spill] sm:$0xff] %v13285_v54  ;;  %v5796_v44 = vrot.slane %v5782_v58, %v11559_v8  ;;  %v2274_v19 = vadd.f32 %v12970_v57, %v17244_v39  ;;  %v5413_v26 = vrot.slane %v13231_v33, 7  ;;  %v3750_v47 = vcombine.high %v3322_v24, %v3322_v24 }
 0x184   : > { %v3757_v16 = vrot.slane %v3322_v24, %v11559_v8  ;;  %v5806_v30 = vrot.slane %v5798_v15, %v11559_v8  ;;  %v5813_v58 = vrot.slane %v5799_v9, %v11559_v8  ;;  %v17245_v59 = vcombine.low %v12909_v42, %v12926_v38 }
 0x185   : > { %v5797_v23 = vcombine.low %v5789_v51, %v5796_v44  ;;  %v2383_v37 = vmax.f32 %v2274_v19, 0.0  ;;  %v3764_v13 = vrot.slane %v3750_v47, %v11559_v8  ;;  %v17246_v39 = vcombine.low %v12930_v22, %v12935_v5 }
 0x186   : > { %v4814_v12 = vrot.slane %v17245_v59, %v11559_v8  ;;  %v3765_v48 = vcombine.high %v3757_v16, %v3757_v16  ;;  %v17247_v24 = vcombine.low %v13025_v27, %v13040_v56  ;;  %v5814_v9 = vcombine.low %v5806_v30, %v5813_v58  ;;  %v13322_v27 = vpop.f32.mrf.mxu0 }
 0x187   : > { %v4824_v10 = vrot.slane %v17246_v39, %v11559_v8  ;;  %v2769_v19 = vcombine.high %v2383_v37, %v2383_v37  ;;  %v2776_v44 = vrot.slane %v2383_v37, %v11559_v8  ;;  %v3766_v47 = vcombine.high %v3764_v13, %v3764_v13  ;;  %v3324_v39 = vld [vmem:[%s16782_s1 + $0xd8] sm:$0xff]  ;;  %17249 = vst [vmem:[#allocation52_spill] sm:$0xff] %v13322_v27 }
 0x188   : > { %v4831_v51 = vrot.slane %v17247_v24, %v11559_v8  ;;  %v4815_v42 = vcombine.low %v13054_v34, %v4814_v12  ;;  %v2279_v3 = vadd.f32 %v12970_v57, %v17248_v49  ;;  %v13324_v30 = vpack.c.bf16 %v5814_v9, %v5797_v23  ;;  %v10857_v49 = vpop.f32.mrf.mxu0 }
 0x189   : > { %v2783_v37 = vrot.slane %v2769_v19, %v11559_v8  ;;  %v2784_v58 = vcombine.high %v2776_v44, %v2776_v44  ;;  %v13327_v34 = vmul.f32 %v3757_v16, %v2776_v44  ;;  %v5415_v12 = vrot.slane %v5413_v26, 2 }
 0x18a   : > { %v4832_v59 = vcombine.low %v4824_v10, %v4831_v51  ;;  %17250 = vst [vmem:[#allocation53_spill] sm:$0xff] %v13324_v30  ;;  %v16896_v24 = vrot.slane %v13285_v54, 7  ;;  %v2384_v51 = vmax.f32 %v2279_v3, 0.0  ;;  %10886 = vmatmul.mubr.msk.bf16.gmra.mxu1 %vm6205_vm12, %v13324_v30  ;;  %v3781_v9 = vrot.slane %v3324_v39, %v11559_v8 }
 0x18b   : > { %v2785_v15 = vcombine.high %v2783_v37, %v2783_v37  ;;  %v13334_v11 = vmul.f32 %v3765_v48, %v2784_v58  ;;  %v13336_v23 = vmul.f32 %v3764_v13, %v2783_v37  ;;  %v6904_v16 = vcombine.low %v13285_v54, %v13327_v34  ;;  %v10224_v37 = vld.sshfl [vmem:[%s16782_s1 + $0xd0] sm:$0x3 pattern:$0x76325410] }
 0x18c   : > { %v13330_v10 = vpack.c.bf16 %v4832_v59, %v4815_v42  ;;  %v2786_v19 = vcombine.high %v2384_v51, %v2384_v51  ;;  %v2793_v3 = vrot.slane %v2384_v51, %v11559_v8  ;;  %v3774_v44 = vcombine.high %v3324_v39, %v3324_v39 }
 0x18d   : > { %v13345_v42 = vrot.slane %v4867_v52, %v11559_v8  ;;  %v13349_v48 = vsel %vm12112_vm11, %v10242_v60, %v5413_v26  ;;  %v5416_v13 = vrot.slane %v13233_v18, 7  ;;  %v13352_v59 = vmul.f32 %v3766_v47, %v2785_v15 }
 0x18e   : > { %17251 = vst [vmem:[#allocation73_spill] sm:$0xff] %v13330_v10  ;;  %10988 = vmatmul.mubr.msk.bf16.gmra.mxu0 %vm6205_vm12, %v13330_v10  ;;  %17253 = vst [vmem:[#allocation75_spill] sm:$0xff] %v13349_v48  ;;  %v17254_v58 = vcombine.low %v13231_v33, %v13233_v18  ;;  %v13365_v51 = vrot.slane %v6904_v16, %v11559_v8  ;;  %v6920_v60 = vcombine.low %v13334_v11, %v13336_v23 }
 0x18f   : > { %17252 = vst [vmem:[#allocation74_spill] sm:$0xff] %v13345_v42  ;;  %v13371_v26 = vsel %vm12112_vm11, %v5415_v12, %v5416_v13  ;;  %v2800_v15 = vrot.slane %v2786_v19, %v11559_v8  ;;  %v2801_v47 = vcombine.high %v2793_v3, %v2793_v3  ;;  %v3789_v49 = vcombine.high %v3781_v9, %v3781_v9 }
 0x190   : > { %v13361_v39 = vrot.slane %v17254_v58, %v11559_v8  ;;  %17256 = vst [vmem:[#allocation77_spill] sm:$0xff] %v13365_v51  ;;  %17257 = vst [vmem:[#allocation78_spill] sm:$0xff] %v13371_v26  ;;  %v5421_v33 = vrot.slane %v16896_v24, 2  ;;  %v3788_v16 = vrot.slane %v3774_v44, %v11559_v8  ;;  %v4385_v52 = vmul.f32 %v10224_v37, %v2793_v3 }
 0x191   : > { %v5422_v30 = vrot.slane %v13327_v34, 7  ;;  %v5431_v12 = vrot.slane %v13352_v59, 7  ;;  %v2802_v27 = vcombine.high %v2800_v15, %v2800_v15  ;;  %v13382_v42 = vrot.slane %v5416_v13, 2 }
 0x192   : > { %17255 = vst [vmem:[#allocation76_spill] sm:$0xff] %v13361_v39  ;;  %v17259_v24 = vrot.slane %v13336_v23, 7  ;;  %v6921_v58 = vcombine.low %v13352_v59, %v4385_v52  ;;  %v4386_v44 = vmul.f32 %v3781_v9, %v2801_v47  ;;  %v13391_v37 = vmul.f32 %v3789_v49, %v2800_v15  ;;  %v3325_v9 = vld [vmem:[%s16782_s1 + $0xe0] sm:$0xff] }
 0x193   : > { %17258 = vst [vmem:[#allocation79_spill] sm:$0xff] %v13382_v42  ;;  %v13393_v10 = vmul.f32 %v3788_v16, %v2802_v27  ;;  %v13397_v13 = vsel %vm12112_vm11, %v5421_v33, %v5422_v30  ;;  %v13400_v51 = vrot.slane %v6920_v60, %v11559_v8  ;;  %v13412_v15 = vrot.slane %v5422_v30, 2  ;;  %v13418_v33 = vpop.f32.mrf.mxu0 }
 0x194   : > { %v5430_v54 = vrot.slane %v17259_v24, 2  ;;  %17260 = vst [vmem:[#allocation80_spill] sm:$0xff] %v13391_v37  ;;  %17262 = vst [vmem:[#allocation82_spill] sm:$0xff] %v13397_v13  ;;  %v13403_v19 = vrot.slane %v6921_v58, %v11559_v8  ;;  %v17265_v24 = vld [vmem:[#allocation57_spill] sm:$0xff]  ;;  %v17267_v47 = vrot.slane %v13334_v11, 7  ;;  %v5433_v60 = vrot.slane %v5431_v12, 2 }
 0x195   : > { %17261 = vst [vmem:[#allocation81_spill] sm:$0xff] %v13393_v10  ;;  %17263 = vst [vmem:[#allocation83_spill] sm:$0xff] %v13400_v51  ;;  %v2282_v39 = vadd.f32 %v12970_v57, %v17265_v24  ;;  %v4901_v30 = vcombine.low %v4386_v44, %v13391_v37  ;;  %v5434_v26 = vrot.slane %v4385_v52, 7  ;;  %v3790_v48 = vcombine.high %v3788_v16, %v3788_v16  ;;  %v10858_v13 = vpop.f32.mrf.mxu0 }
 0x196   : > { %17264 = vst [vmem:[#allocation84_spill] sm:$0xff] %v13403_v19  ;;  %17266 = vst [vmem:[#allocation57_spill] sm:$0xff] %v13412_v15  ;;  %v13416_v49 = vrot.slane %v17267_v47, 2  ;;  %v13422_v58 = vsel %vm12112_vm11, %v5430_v54, %v5431_v12  ;;  %v3798_v47 = vrot.slane %v3325_v9, %v11559_v8  ;;  %v3791_v42 = vcombine.high %v3325_v9, %v3325_v9 }
 0x197   : > { %17268 = vst [vmem:[#allocation85_spill] sm:$0xff] %v13418_v33  ;;  %v2385_v27 = vmax.f32 %v2282_v39, 0.0  ;;  %v17269_v54 = vrot.slane %v12930_v22, 7  ;;  %v17270_v39 = vrot.slane %v12926_v38, 7  ;;  %v17271_v16 = vrot.slane %v12935_v5, 7 }
 0x198   : > { %v3806_v24 = vcombine.high %v3798_v47, %v3798_v47  ;;  %v5815_v22 = vcombine.low %v13060_v29, %v12958_v50  ;;  %v5438_v5 = vrot.slane %v13391_v37, 7  ;;  %v13459_v50 = vsel %vm12112_vm11, %v5433_v60, %v5434_v26 }
 0x199   : > { %v2803_v15 = vcombine.high %v2385_v27, %v2385_v27  ;;  %v2810_v33 = vrot.slane %v2385_v27, %v11559_v8  ;;  %v5373_v12 = vsel %vm12112_vm11, %v13102_v14, %v17269_v54  ;;  %v5370_v52 = vsel %vm12112_vm11, %v13098_v25, %v17270_v39 }
 0x19a   : > { %v5376_v13 = vsel %vm12112_vm11, %v13127_v46, %v17271_v16  ;;  %v17272_v14 = vrot.slane %v13040_v56, 7  ;;  %v5816_v54 = vcombine.low %v5370_v52, %v5373_v12  ;;  %v10243_v25 = vrot.slane %v4386_v44, 9  ;;  %v13464_v16 = vpop.f32.mrf.mxu0 }
 0x19b   : > { %v2817_v9 = vrot.slane %v2803_v15, %v11559_v8  ;;  %v2818_v27 = vcombine.high %v2810_v33, %v2810_v33  ;;  %v5832_v39 = vcombine.low %v5376_v13, %v13069_v55  ;;  %v3805_v15 = vrot.slane %v3791_v42, %v11559_v8  ;;  %17274 = vst [vmem:[#allocation87_spill] sm:$0xff] %v13464_v16 }
 0x19c   : > { %v5382_v38 = vsel %vm12112_vm11, %v13200_v4, %v17272_v14  ;;  %v13466_v4 = vmul.f32 %v3790_v48, %v2810_v33  ;;  %v5823_v44 = vrot.slane %v5815_v22, %v11559_v8  ;;  %v5830_v12 = vrot.slane %v5816_v54, %v11559_v8  ;;  %v13526_v33 = vld [vmem:[%s16782_s1 + $0xf8] sm:$0xff] }
 0x19d   : > { %v5833_v46 = vcombine.low %v5382_v38, %v13204_v36  ;;  %v2819_v29 = vcombine.high %v2817_v9, %v2817_v9  ;;  %v13462_v56 = vmul.f32 %v3798_v47, %v2818_v27  ;;  %v13472_v36 = vrot.slane %v4901_v30, %v11559_v8  ;;  %v10861_v47 = vpop.f32.mrf.mxu0  ;;  %v3327_v30 = vld [vmem:[%s16782_s1 + $0xf0] sm:$0xff] }
 0x19e   : > { %17275 = vst [vmem:[#allocation88_spill] sm:$0xff] %v13466_v4  ;;  %v16903_v26 = vrot.slane %v13393_v10, 7  ;;  %v13475_v60 = vmul.f32 %v3806_v24, %v2817_v9  ;;  %v13481_v48 = vsel %vm12112_vm11, %v10243_v25, %v5438_v5  ;;  %v5831_v52 = vcombine.low %v5823_v44, %v5830_v12 }
 0x19f   : > { %17273 = vst [vmem:[#allocation86_spill] sm:$0xff] %v13462_v56  ;;  %v5847_v55 = vrot.slane %v5833_v46, %v11559_v8  ;;  %v13477_v42 = vmul.f32 %v3805_v15, %v2819_v29  ;;  %v5840_v13 = vrot.slane %v5832_v39, %v11559_v8  ;;  %v13489_v22 = vrot.slane %v5438_v5, 2 }
 0x1a0   : > { %17276 = vst [vmem:[#allocation89_spill] sm:$0xff] %v13475_v60  ;;  %v17278_v27 = vcombine.low %v13063_v32, %v13051_v31  ;;  %v17279_v54 = vcombine.low %v13085_v2, %v13113_v7  ;;  %v17280_v5 = vcombine.low %v13105_v63, %v13188_v40  ;;  %v17281_v46 = vcombine.low %v13190_v62, %v13195_v6 }
 0x1a1   : > { %17277 = vst [vmem:[#allocation90_spill] sm:$0xff] %v13477_v42  ;;  %v5848_v38 = vcombine.low %v5840_v13, %v5847_v55  ;;  %v5443_v32 = vrot.slane %v16903_v26, 2  ;;  %v2287_v12 = vadd.f32 %v12970_v57, %v12683_v0  ;;  %v3822_v55 = vrot.slane %v3327_v30, %v11559_v8 }
 0x1a2   : > { %v4841_v14 = vrot.slane %v17278_v27, %v11559_v8  ;;  %v4848_v25 = vrot.slane %v17279_v54, %v11559_v8  ;;  %v4858_v39 = vrot.slane %v17280_v5, %v11559_v8  ;;  %v4865_v29 = vrot.slane %v17281_v46, %v11559_v8 }
 0x1a3   : > { %v13518_v47 = vpack.c.bf16 %v5848_v38, %v5831_v52  ;;  %v2290_v54 = vadd.f32 %v12970_v57, %v12727_v1  ;;  %v5444_v5 = vrot.slane %v13466_v4, 7  ;;  %v2386_v46 = vmax.f32 %v2287_v12, 0.0  ;;  %v13555_v52 = vpop.f32.mrf.mxu0 }
 0x1a4   : > { %v4849_v13 = vcombine.low %v4841_v14, %v4848_v25  ;;  %v4866_v27 = vcombine.low %v4858_v39, %v4865_v29  ;;  %v3807_v9 = vcombine.high %v3805_v15, %v3805_v15  ;;  %v3815_v3 = vcombine.high %v3327_v30, %v3327_v30  ;;  %v10225_v30 = vld.sshfl [vmem:[%s16782_s1 + $0xe8] sm:$0x3 pattern:$0x76325410]  ;;  %17284 = vst [vmem:[#allocation93_spill] sm:$0xff] %v13555_v52 }
 0x1a5   : > { %17282 = vst [vmem:[#allocation91_spill] sm:$0xff] %v13518_v47  ;;  %10889 = vmatprep.mubr.msk.bf16.mxu1 %vm6205_vm12, %v13518_v47  ;;  %v2387_v1 = vmax.f32 %v2290_v54, 0.0  ;;  %v2820_v15 = vcombine.high %v2386_v46, %v2386_v46  ;;  %v2827_v25 = vrot.slane %v2386_v46, %v11559_v8  ;;  %v3830_v29 = vcombine.high %v3822_v55, %v3822_v55  ;;  %v10862_v51 = vpop.f32.mrf.mxu0 }
 0x1a6   : > { %v13533_v14 = vpack.c.bf16 %v4866_v27, %v4849_v13  ;;  %v3829_v39 = vrot.slane %v3815_v3, %v11559_v8  ;;  %v3839_v27 = vrot.slane %v13526_v33, %v11559_v8  ;;  %v13551_v0 = vsel %vm12112_vm11, %v5443_v32, %v5444_v5 }
 0x1a7   : > { %v2837_v12 = vcombine.high %v2387_v1, %v2387_v1  ;;  %v2844_v13 = vrot.slane %v2387_v1, %v11559_v8  ;;  %v2834_v54 = vrot.slane %v2820_v15, %v11559_v8  ;;  %v2835_v26 = vcombine.high %v2827_v25, %v2827_v25 }
 0x1a8   : > { %17283 = vst [vmem:[#allocation92_spill] sm:$0xff] %v13533_v14  ;;  %10991 = vmatprep.mubr.msk.bf16.mxu0 %vm6205_vm12, %v13533_v14  ;;  %v13547_v46 = vmul.f32 %v3807_v9, %v2827_v25  ;;  %v3831_v3 = vcombine.high %v3829_v39, %v3829_v39  ;;  %v13557_v1 = vrot.slane %v5444_v5, 2  ;;  %v17285_v47 = vrot.slane %v13462_v56, 7 }
 0x1a9   : > { %v2851_v24 = vrot.slane %v2837_v12, %v11559_v8  ;;  %v2852_v38 = vcombine.high %v2844_v13, %v2844_v13  ;;  %v2836_v9 = vcombine.high %v2834_v54, %v2834_v54  ;;  %v4394_v25 = vmul.f32 %v10225_v30, %v2835_v26 }
 0x1aa   : > { %v13561_v15 = vrot.slane %v17285_v47, 2  ;;  %v17286_v14 = vrot.slane %v13477_v42, 7  ;;  %v5456_v32 = vrot.slane %v13547_v46, 7  ;;  %v3847_v44 = vcombine.high %v3839_v27, %v3839_v27 }
 0x1ab   : > { %v2853_v19 = vcombine.high %v2851_v24, %v2851_v24  ;;  %v13566_v12 = vmul.f32 %v3822_v55, %v2834_v54  ;;  %v13568_v40 = vmul.f32 %v3830_v29, %v2836_v9  ;;  %v6955_v5 = vcombine.low %v13547_v46, %v4394_v25 }
 0x1ac   : > { %v5455_v37 = vrot.slane %v17286_v14, 2  ;;  %v13571_v31 = vmul.f32 %v3831_v3, %v2852_v38  ;;  %v17287_v47 = vrot.slane %v13475_v60, 7  ;;  %v13577_v26 = vmul.f32 %v3829_v39, %v2844_v13  ;;  %v13596_v13 = vpop.f32.mrf.mxu0 }
 0x1ad   : > { %v17288_v14 = vrot.slane %v13085_v2, 7  ;;  %v17289_v55 = vrot.slane %v13113_v7, 7  ;;  %v5458_v38 = vrot.slane %v5456_v32, 2  ;;  %v5459_v29 = vrot.slane %v4394_v25, 7  ;;  %17291 = vst [vmem:[#allocation94_spill] sm:$0xff] %v13596_v13 }
 0x1ae   : > { %v13575_v52 = vrot.slane %v17287_v47, 2  ;;  %v13589_v54 = vmul.f32 %v3839_v27, %v2851_v24  ;;  %v17290_v3 = vrot.slane %v13105_v63, 7  ;;  %v13600_v9 = vmul.f32 %v3847_v44, %v2853_v19 }
 0x1af   : > { %v5392_v51 = vsel %vm12112_vm11, %v13212_v45, %v17288_v14  ;;  %v5395_v30 = vsel %vm12112_vm11, %v13216_v20, %v17289_v55  ;;  %v17292_v47 = vrot.slane %v13190_v62, 7  ;;  %v17293_v24 = vrot.slane %v13195_v6, 7  ;;  %v10865_v14 = vpop.f32.mrf.mxu0 }
 0x1b0   : > { %v5398_v39 = vsel %vm12112_vm11, %v13224_v53, %v17290_v3  ;;  %v4935_v53 = vcombine.low %v13566_v12, %v13568_v40  ;;  %v13616_v25 = vsel %vm12112_vm11, %v5455_v37, %v5456_v32  ;;  %v10244_v19 = vrot.slane %v13566_v12, 9 }
 0x1b1   : > { %v5404_v20 = vsel %vm12112_vm11, %v13271_v17, %v17292_v47  ;;  %v5407_v27 = vsel %vm12112_vm11, %v13275_v43, %v17293_v24  ;;  %v5463_v17 = vrot.slane %v13568_v40, 7  ;;  %v13623_v55 = vrot.slane %v6955_v5, %v11559_v8  ;;  %v17298_v43 = vld [vmem:[#allocation34_spill] sm:$0xff] }
 0x1b2   : > { %v6971_v3 = vcombine.low %v13568_v40, %v13577_v26  ;;  %v13630_v37 = vsel %vm12112_vm11, %v5458_v38, %v5459_v29  ;;  %v6972_v32 = vcombine.low %v13571_v31, %v13589_v54  ;;  %v17295_v12 = vrot.slane %v13208_v28, 7  ;;  %v17303_v40 = vld [vmem:[#allocation74_spill] sm:$0xff] }
 0x1b3   : > { %17294 = vst [vmem:[#allocation95_spill] sm:$0xff] %v13623_v55  ;;  %v5849_v5 = vcombine.low %v13119_v41, %v5392_v51  ;;  %v5850_v14 = vcombine.low %v5395_v30, %v5398_v39  ;;  %v5866_v38 = vcombine.low %v13253_v61, %v5404_v20  ;;  %v3832_v30 = vcombine.high %v13526_v33, %v13526_v33 }
 0x1b4   : > { %v5410_v47 = vsel %vm12112_vm11, %v13279_v35, %v17295_v12  ;;  %v13645_v29 = vrot.slane %v6971_v3, %v11559_v8  ;;  %v13648_v44 = vrot.slane %v6972_v32, %v11559_v8  ;;  %v2295_v35 = vadd.f32 %v12970_v57, %v17298_v43  ;;  %v17299_v43 = vld [vmem:[#allocation72_spill] sm:$0xff] }
 0x1b5   : > { %v5867_v45 = vcombine.low %v5407_v27, %v5410_v47  ;;  %v5857_v41 = vrot.slane %v5849_v5, %v11559_v8  ;;  %v5864_v51 = vrot.slane %v5850_v14, %v11559_v8  ;;  %v5874_v12 = vrot.slane %v5866_v38, %v11559_v8  ;;  %v3330_v27 = vld [vmem:[%s16782_s1 + $0x108] sm:$0xff] }
 0x1b6   : > { %17296 = vst [vmem:[#allocation96_spill] sm:$0xff] %v13645_v29  ;;  %17297 = vst [vmem:[#allocation97_spill] sm:$0xff] %v13648_v44  ;;  %v2388_v20 = vmax.f32 %v2295_v35, 0.0  ;;  %v17300_v3 = vcombine.low %v13233_v18, %v17299_v43  ;;  %v3846_v5 = vrot.slane %v3832_v30, %v11559_v8  ;;  %v17301_v33 = vcombine.low %v13327_v34, %v13334_v11 }
 0x1b7   : > { %v5881_v39 = vrot.slane %v5867_v45, %v11559_v8  ;;  %v5865_v47 = vcombine.low %v5857_v41, %v5864_v51  ;;  %v17302_v45 = vcombine.low %v13336_v23, %v13352_v59  ;;  %v10226_v41 = vld.sshfl [vmem:[%s16782_s1 + $0x100] sm:$0x3 pattern:$0x76325410] }
 0x1b8   : > { %v4882_v32 = vrot.slane %v17300_v3, %v11559_v8  ;;  %v4892_v14 = vrot.slane %v17301_v33, %v11559_v8  ;;  %v2854_v61 = vcombine.high %v2388_v20, %v2388_v20  ;;  %v2861_v24 = vrot.slane %v2388_v20, %v11559_v8  ;;  %v17304_v3 = vld [vmem:[#allocation5_spill] sm:$0xff] }
 0x1b9   : > { %v4899_v38 = vrot.slane %v17302_v45, %v11559_v8  ;;  %v5882_v35 = vcombine.low %v5874_v12, %v5881_v39  ;;  %v3848_v51 = vcombine.high %v3846_v5, %v3846_v5  ;;  %v2298_v34 = vadd.f32 %v12970_v57, %v17304_v3  ;;  %v13714_v3 = vpop.f32.mrf.mxu0 }
 0x1ba   : > { %v4883_v18 = vcombine.low %v17303_v40, %v4882_v32  ;;  %v3856_v33 = vcombine.high %v3330_v27, %v3330_v27  ;;  %v2868_v59 = vrot.slane %v2854_v61, %v11559_v8  ;;  %v2869_v12 = vcombine.high %v2861_v24, %v2861_v24  ;;  %17308 = vst [vmem:[#allocation74_spill] sm:$0xff] %v13714_v3 }
 0x1bb   : > { %v4900_v30 = vcombine.low %v4892_v14, %v4899_v38  ;;  %v13683_v55 = vpack.c.bf16 %v5882_v35, %v5865_v47  ;;  %v13686_v39 = vmul.f32 %v3846_v5, %v2861_v24  ;;  %v3863_v40 = vrot.slane %v3330_v27, %v11559_v8 }
 0x1bc   : > { %v2389_v45 = vmax.f32 %v2298_v34, 0.0  ;;  %v16921_v14 = vrot.slane %v13600_v9, 7  ;;  %v13695_v38 = vmul.f32 %v3848_v51, %v2869_v12  ;;  %v4403_v47 = vmul.f32 %v10226_v41, %v2868_v59 }
 0x1bd   : > { %17305 = vst [vmem:[#allocation34_spill] sm:$0xff] %v13683_v55  ;;  %v13690_v32 = vpack.c.bf16 %v4900_v30, %v4883_v18  ;;  %10890 = vmatmul.mubr.msk.bf16.gmra.mxu1 %vm6205_vm12, %v13683_v55  ;;  %v3870_v61 = vrot.slane %v3856_v33, %v11559_v8  ;;  %v13699_v24 = vrot.slane %v4935_v53, %v11559_v8  ;;  %v5465_v51 = vrot.slane %v5463_v17, 2 }
 0x1be   : > { %v6988_v5 = vcombine.low %v13600_v9, %v13686_v39  ;;  %v2871_v27 = vcombine.high %v2389_v45, %v2389_v45  ;;  %v2878_v35 = vrot.slane %v2389_v45, %v11559_v8  ;;  %v13708_v18 = vsel %vm12112_vm11, %v10244_v19, %v5463_v17  ;;  %v3331_v19 = vld [vmem:[%s16782_s1 + $0x110] sm:$0xff] }
 0x1bf   : > { %17306 = vst [vmem:[#allocation72_spill] sm:$0xff] %v13690_v32  ;;  %10992 = vmatmul.mubr.msk.bf16.gmra.mxu0 %vm6205_vm12, %v13690_v32  ;;  %v17307_v41 = vrot.slane %v13577_v26, 7  ;;  %v2870_v53 = vcombine.high %v2868_v59, %v2868_v59  ;;  %v17309_v34 = vrot.slane %v13571_v31, 7  ;;  %v6989_v45 = vcombine.low %v13695_v38, %v4403_v47  ;;  %v10866_v32 = vpop.f32.mrf.mxu0 }
 0x1c0   : > { %v3871_v17 = vcombine.high %v3863_v40, %v3863_v40  ;;  %v2885_v59 = vrot.slane %v2871_v27, %v11559_v8  ;;  %v2886_v20 = vcombine.high %v2878_v35, %v2878_v35  ;;  %v3872_v55 = vcombine.high %v3870_v61, %v3870_v61 }
 0x1c1   : > { %v13712_v30 = vrot.slane %v17307_v41, 2  ;;  %v13718_v33 = vrot.slane %v17309_v34, 2  ;;  %v5477_v41 = vrot.slane %v16921_v14, 2  ;;  %v17310_v34 = vrot.slane %v13589_v54, 7 }
 0x1c2   : > { %v5478_v12 = vrot.slane %v13686_v39, 7  ;;  %v13734_v29 = vrot.slane %v6988_v5, %v11559_v8  ;;  %v13737_v28 = vrot.slane %v6989_v45, %v11559_v8  ;;  %v13739_v6 = vmul.f32 %v3863_v40, %v2870_v53 }
 0x1c3   : > { %v13730_v44 = vrot.slane %v17310_v34, 2  ;;  %v2887_v14 = vcombine.high %v2885_v59, %v2885_v59  ;;  %v3880_v27 = vrot.slane %v3331_v19, %v11559_v8  ;;  %v13742_v62 = vmul.f32 %v3870_v61, %v2886_v20 }
 0x1c4   : > { %17311 = vst [vmem:[#allocation5_spill] sm:$0xff] %v13734_v29  ;;  %17312 = vst [vmem:[#allocation98_spill] sm:$0xff] %v13737_v28  ;;  %v17314_v32 = vrot.slane %v13577_v26, 7  ;;  %v17315_v63 = vrot.slane %v13695_v38, 7  ;;  %v13754_v7 = vmul.f32 %v3871_v17, %v2878_v35  ;;  %v13760_v20 = vsel %vm12112_vm11, %v5477_v41, %v5478_v12  ;;  %v17321_v41 = vld [vmem:[#allocation79_spill] sm:$0xff] }
 0x1c5   : > { %17313 = vst [vmem:[#allocation99_spill] sm:$0xff] %v13742_v62  ;;  %v13762_v61 = vmul.f32 %v3872_v55, %v2885_v59  ;;  %v13764_v53 = vmul.f32 %v3880_v27, %v2887_v14  ;;  %v17319_v35 = vrot.slane %v13336_v23, 7  ;;  %v10245_v45 = vrot.slane %v13739_v6, 9  ;;  %v17323_v59 = vld [vmem:[#allocation57_spill] sm:$0xff] }
 0x1c6   : > { %v13748_v34 = vsel %vm12112_vm11, %v5465_v51, %v17314_v32  ;;  %v5483_v5 = vrot.slane %v17315_v63, 2  ;;  %17316 = vst [vmem:[#allocation100_spill] sm:$0xff] %v13754_v7  ;;  %v13766_v51 = vrot.slane %v5478_v12, 2  ;;  %v5484_v32 = vrot.slane %v4403_v47, 7 }
 0x1c7   : > { %17317 = vst [vmem:[#allocation101_spill] sm:$0xff] %v13762_v61  ;;  %17318 = vst [vmem:[#allocation102_spill] sm:$0xff] %v13764_v53  ;;  %v5429_v17 = vsel %vm12112_vm11, %v13416_v49, %v17319_v35  ;;  %v17320_v14 = vrot.slane %v17299_v43, 7  ;;  %v17322_v12 = vrot.slane %v13334_v11, 7  ;;  %v17324_v35 = vld [vmem:[#allocation82_spill] sm:$0xff]  ;;  %v17325_v43 = vcombine.low %v13422_v58, %v13459_v50  ;;  %v17326_v11 = vld [vmem:[#allocation75_spill] sm:$0xff] }
 0x1c8   : > { %v13790_v49 = vsel %vm12112_vm11, %v5483_v5, %v5484_v32  ;;  %v3873_v5 = vcombine.high %v3331_v19, %v3331_v19  ;;  %v17330_v58 = vcombine.low %v13393_v10, %v13466_v4 }
 0x1c9   : > { %v5420_v47 = vsel %vm12112_vm11, %v17321_v41, %v17320_v14  ;;  %v5426_v23 = vsel %vm12112_vm11, %v17323_v59, %v17322_v12  ;;  %v5915_v55 = vrot.slane %v17325_v43, %v11559_v8  ;;  %v5488_v14 = vrot.slane %v13754_v7, 7  ;;  %v17327_v41 = vld [vmem:[#allocation78_spill] sm:$0xff]  ;;  %v17329_v12 = vld [vmem:[#allocation33_spill] sm:$0xff] }
 0x1ca   : > { %v5884_v63 = vcombine.low %v5420_v47, %v17324_v35  ;;  %v5900_v40 = vcombine.low %v5426_v23, %v5429_v17  ;;  %v17328_v28 = vcombine.low %v17326_v11, %v17327_v41  ;;  %v2303_v59 = vadd.f32 %v12970_v57, %v17329_v12  ;;  %v17333_v43 = vld [vmem:[#allocation62_spill] sm:$0xff] }
 0x1cb   : > { %v4916_v50 = vrot.slane %v17330_v58, %v11559_v8  ;;  %v17331_v47 = vcombine.low %v13462_v56, %v13475_v60  ;;  %v3887_v19 = vrot.slane %v3873_v5, %v11559_v8  ;;  %v2306_v11 = vadd.f32 %v12970_v57, %v17333_v43 }
 0x1cc   : > { %v5891_v29 = vrot.slane %v17328_v28, %v11559_v8  ;;  %v5898_v32 = vrot.slane %v5884_v63, %v11559_v8  ;;  %v5908_v17 = vrot.slane %v5900_v40, %v11559_v8  ;;  %v3333_v28 = vld [vmem:[%s16782_s1 + $0x120] sm:$0xff]  ;;  %v2390_v35 = vmax.f32 %v2303_v59, 0.0 }
 0x1cd   : > { %v4926_v23 = vrot.slane %v17331_v47, %v11559_v8  ;;  %v17332_v40 = vcombine.low %v13477_v42, %v13547_v46  ;;  %v3888_v58 = vcombine.high %v3880_v27, %v3880_v27  ;;  %v4917_v47 = vcombine.low %v13472_v36, %v4916_v50 }
 0x1ce   : > { %v5899_v41 = vcombine.low %v5891_v29, %v5898_v32  ;;  %v5916_v12 = vcombine.low %v5908_v17, %v5915_v55  ;;  %v2888_v4 = vcombine.high %v2390_v35, %v2390_v35  ;;  %v2895_v2 = vrot.slane %v2390_v35, %v11559_v8  ;;  %v10227_v32 = vld.sshfl [vmem:[%s16782_s1 + $0x118] sm:$0x3 pattern:$0x76325410] }
 0x1cf   : > { %v4933_v63 = vrot.slane %v17332_v40, %v11559_v8  ;;  %v3897_v59 = vcombine.high %v3333_v28, %v3333_v28  ;;  %v3889_v5 = vcombine.high %v3887_v19, %v3887_v19  ;;  %v2391_v16 = vmax.f32 %v2306_v11, 0.0 }
 0x1d0   : > { %v13826_v13 = vpack.c.bf16 %v5916_v12, %v5899_v41  ;;  %v3904_v46 = vrot.slane %v3333_v28, %v11559_v8  ;;  %v16931_v40 = vrot.slane %v13742_v62, 7  ;;  %v2902_v57 = vrot.slane %v2888_v4, %v11559_v8 }
 0x1d1   : > { %v4934_v3 = vcombine.low %v4926_v23, %v4933_v63  ;;  %v2903_v29 = vcombine.high %v2895_v2, %v2895_v2  ;;  %v16930_v36 = vrot.slane %v13762_v61, 7  ;;  %v16929_v27 = vrot.slane %v13764_v53, 7 }
 0x1d2   : > { %17334 = vst [vmem:[#allocation79_spill] sm:$0xff] %v13826_v13  ;;  %10893 = vmatprep.mubr.msk.bf16.mxu1 %vm6205_vm12, %v13826_v13  ;;  %v2905_v17 = vcombine.high %v2391_v16, %v2391_v16  ;;  %v2912_v50 = vrot.slane %v2391_v16, %v11559_v8  ;;  %v2904_v23 = vcombine.high %v2902_v57, %v2902_v57  ;;  %v13861_v12 = vrot.slane %v5488_v14, 2 }
 0x1d3   : > { %v13831_v55 = vpack.c.bf16 %v4934_v3, %v4917_v47  ;;  %v13841_v28 = vmul.f32 %v3888_v58, %v2895_v2  ;;  %v13843_v4 = vmul.f32 %v3887_v19, %v2903_v29  ;;  %v3911_v3 = vrot.slane %v3897_v59, %v11559_v8 }
 0x1d4   : > { %v13848_v35 = vmul.f32 %v3889_v5, %v2902_v57  ;;  %v2919_v63 = vrot.slane %v2905_v17, %v11559_v8  ;;  %v2920_v43 = vcombine.high %v2912_v50, %v2912_v50  ;;  %v3912_v11 = vcombine.high %v3904_v46, %v3904_v46 }
 0x1d5   : > { %17335 = vst [vmem:[#allocation57_spill] sm:$0xff] %v13831_v55  ;;  %17336 = vst [vmem:[#allocation82_spill] sm:$0xff] %v13841_v28  ;;  %10995 = vmatprep.mubr.msk.bf16.mxu0 %vm6205_vm12, %v13831_v55  ;;  %v13857_v16 = vsel %vm12112_vm11, %v10245_v45, %v5488_v14  ;;  %v13859_v19 = vmul.f32 %v10227_v32, %v2904_v23  ;;  %v13865_v58 = vrot.slane %v16931_v40, 2  ;;  %v5499_v47 = vrot.slane %v16929_v27, 2 }
 0x1d6   : > { %17337 = vst [vmem:[#allocation75_spill] sm:$0xff] %v13843_v4  ;;  %17338 = vst [vmem:[#allocation78_spill] sm:$0xff] %v13848_v35  ;;  %v13873_v5 = vrot.slane %v16930_v36, 2  ;;  %v5500_v45 = vrot.slane %v13841_v28, 7  ;;  %v3913_v57 = vcombine.high %v3911_v3, %v3911_v3  ;;  %v16933_v29 = vrot.slane %v13843_v4, 7 }
 0x1d7   : > { %17339 = vst [vmem:[#allocation33_spill] sm:$0xff] %v13859_v19  ;;  %v16932_v32 = vrot.slane %v13848_v35, 7  ;;  %v13880_v17 = vmul.f32 %v3912_v11, %v2920_v43  ;;  %v13882_v23 = vmul.f32 %v3911_v3, %v2919_v63  ;;  %v2921_v27 = vcombine.high %v2919_v63, %v2919_v63 }
 0x1d8   : > { %v13884_v59 = vmul.f32 %v3904_v46, %v2912_v50  ;;  %v17340_v36 = vrot.slane %v13393_v10, 7  ;;  %v17341_v14 = vrot.slane %v13462_v56, 7  ;;  %v13902_v46 = vsel %vm12112_vm11, %v5499_v47, %v5500_v45 }
 0x1d9   : > { %v17342_v50 = vrot.slane %v13475_v60, 7  ;;  %v13921_v3 = vrot.slane %v5500_v45, 2 }
 0x1da   : > { %v5442_v40 = vsel %vm12112_vm11, %v13489_v22, %v17340_v36  ;;  %v5448_v2 = vsel %vm12112_vm11, %v13557_v1, %v17341_v14  ;;  %v17343_v1 = vrot.slane %v13477_v42, 7  ;;  %v3334_v14 = vld [vmem:[%s16782_s1 + $0x128] sm:$0xff] }
 0x1db   : > { %v5451_v22 = vsel %vm12112_vm11, %v13561_v15, %v17342_v50  ;;  %v5917_v11 = vcombine.low %v13481_v48, %v5442_v40  ;;  %v5918_v47 = vcombine.low %v13551_v0, %v5448_v2  ;;  %v13925_v15 = vrot.slane %v16933_v29, 2  ;;  %v13935_v48 = vld [vmem:[%s16787_s6 + $0xa] sm:$0x3] }
 0x1dc   : > { %v5454_v63 = vsel %vm12112_vm11, %v13575_v52, %v17343_v1  ;;  %v13929_v50 = vrot.slane %v16932_v32, 2  ;;  %17344 = vst [vmem:[#allocation62_spill] sm:$0xff] %v13935_v48  ;;  %v13937_v0 = vmul.f32 %v3913_v57, %v2921_v27  ;;  %v5003_v40 = vcombine.low %v13884_v59, %v13880_v17  ;;  %11257 = vmatprep.subr.msk.bf16.mxu0 %vm6254_vm4, %v13935_v48  ;;  %v13951_v27 = vld [vmem:[%s16786_s5] ss:$0 sm:$0xff] }
 0x1dd   : > { %v10246_v2 = vrot.slane %v13884_v59, 9  ;;  %v5932_v45 = vrot.slane %v5918_v47, %v11559_v8  ;;  %v5513_v1 = vrot.slane %v13880_v17, 7  ;;  %v5934_v52 = vcombine.low %v5451_v22, %v5454_v63  ;;  %v17345_v57 = vld [vmem:[#allocation58_spill] sm:$0xff] }
 0x1de   : > { %v5935_v32 = vcombine.low %v13616_v25, %v13630_v37  ;;  %v2311_v29 = vadd.f32 %v13951_v27, %v17345_v57  ;;  %v5516_v59 = vrot.slane %v13882_v23, 7  ;;  %v5925_v47 = vrot.slane %v5917_v11, %v11559_v8 }
 0x1df   : > { %v3914_v43 = vcombine.high %v3334_v14, %v3334_v14  ;;  %v3921_v41 = vrot.slane %v3334_v14, %v11559_v8  ;;  %v5942_v22 = vrot.slane %v5934_v52, %v11559_v8  ;;  %v17346_v37 = vcombine.low %v13577_v26, %v13571_v31 }
 0x1e0   : > { %v5949_v63 = vrot.slane %v5935_v32, %v11559_v8  ;;  %v2392_v25 = vmax.f32 %v2311_v29, 0.0  ;;  %v5933_v13 = vcombine.low %v5925_v47, %v5932_v45  ;;  %v17347_v11 = vcombine.low %v13589_v54, %v13600_v9 }
 0x1e1   : > { %v4950_v36 = vrot.slane %v17346_v37, %v11559_v8  ;;  %v3928_v57 = vrot.slane %v3914_v43, %v11559_v8  ;;  %v17348_v14 = vcombine.low %v13686_v39, %v13695_v38  ;;  %v3929_v60 = vcombine.high %v3921_v41, %v3921_v41  ;;  %v17349_v43 = vld [vmem:[#allocation14_spill] sm:$0xff] }
 0x1e2   : > { %v4960_v55 = vrot.slane %v17347_v11, %v11559_v8  ;;  %v5950_v32 = vcombine.low %v5942_v22, %v5949_v63  ;;  %v2922_v29 = vcombine.high %v2392_v25, %v2392_v25  ;;  %v2929_v42 = vrot.slane %v2392_v25, %v11559_v8  ;;  %v3336_v11 = vld [vmem:[%s16782_s1 + $0x138] sm:$0xff] }
 0x1e3   : > { %v4967_v52 = vrot.slane %v17348_v14, %v11559_v8  ;;  %v3930_v26 = vcombine.high %v3928_v57, %v3928_v57  ;;  %v4951_v45 = vcombine.low %v13699_v24, %v4950_v36  ;;  %v2314_v37 = vadd.f32 %v13951_v27, %v17349_v43  ;;  %v10228_v43 = vld.sshfl [vmem:[%s16782_s1 + $0x130] sm:$0x3 pattern:$0x76325410] }
 0x1e4   : > { %v13980_v56 = vpack.c.bf16 %v5950_v32, %v5933_v13  ;;  %v2936_v39 = vrot.slane %v2922_v29, %v11559_v8  ;;  %v2937_v22 = vcombine.high %v2929_v42, %v2929_v42  ;;  %v13983_v63 = vmul.f32 %v3921_v41, %v2929_v42 }
 0x1e5   : > { %v4968_v47 = vcombine.low %v4960_v55, %v4967_v52  ;;  %v5515_v25 = vrot.slane %v5513_v1, 2  ;;  %v16942_v14 = vrot.slane %v13937_v0, 7  ;;  %v2393_v24 = vmax.f32 %v2314_v37, 0.0 }
 0x1e6   : > { %17350 = vst [vmem:[#allocation58_spill] sm:$0xff] %v13980_v56  ;;  %10894 = vmatmul.mubr.msk.bf16.gmra.mxu1 %vm6205_vm12, %v13980_v56  ;;  %v2938_v55 = vcombine.high %v2936_v39, %v2936_v39  ;;  %v13990_v36 = vmul.f32 %v3929_v60, %v2937_v22  ;;  %v13992_v52 = vmul.f32 %v3928_v57, %v2936_v39 }
 0x1e7   : > { %v13986_v10 = vpack.c.bf16 %v4968_v47, %v4951_v45  ;;  %v3945_v13 = vrot.slane %v3336_v11, %v11559_v8  ;;  %v7040_v42 = vcombine.low %v13937_v0, %v13983_v63  ;;  %v2939_v41 = vcombine.high %v2393_v24, %v2393_v24 }
 0x1e8   : > { %v2946_v32 = vrot.slane %v2393_v24, %v11559_v8  ;;  %v3938_v29 = vcombine.high %v3336_v11, %v3336_v11  ;;  %v14003_v60 = vrot.slane %v5003_v40, %v11559_v8  ;;  %v14007_v57 = vsel %vm12112_vm11, %v10246_v2, %v5513_v1 }
 0x1e9   : > { %17351 = vst [vmem:[#allocation14_spill] sm:$0xff] %v13986_v10  ;;  %10996 = vmatmul.mubr.msk.bf16.gmra.mxu0 %vm6205_vm12, %v13986_v10  ;;  %17352 = vst [vmem:[#allocation103_spill] sm:$0xff] %v14007_v57  ;;  %v14009_v47 = vmul.f32 %v3930_v26, %v2938_v55  ;;  %v5521_v37 = vrot.slane %v16942_v14, 2  ;;  %v17353_v11 = vcombine.low %v13880_v17, %v13882_v23  ;;  %v14032_v55 = vrot.slane %v5516_v59, 2 }
 0x1ea   : > { %v14023_v40 = vrot.slane %v7040_v42, %v11559_v8  ;;  %v7056_v2 = vcombine.low %v13990_v36, %v13992_v52  ;;  %v14029_v1 = vsel %vm12112_vm11, %v5515_v25, %v5516_v59  ;;  %v2953_v26 = vrot.slane %v2939_v41, %v11559_v8  ;;  %v14057_v41 = vld [vmem:[%s16787_s6 + $0x4] sm:$0x3] }
 0x1eb   : > { %v14020_v39 = vrot.slane %v17353_v11, %v11559_v8  ;;  %17356 = vst [vmem:[#allocation106_spill] sm:$0xff] %v14029_v1  ;;  %v2954_v22 = vcombine.high %v2946_v32, %v2946_v32  ;;  %v3953_v24 = vcombine.high %v3945_v13, %v3945_v13  ;;  %v3952_v11 = vrot.slane %v3938_v29, %v11559_v8 }
 0x1ec   : > { %17355 = vst [vmem:[#allocation105_spill] sm:$0xff] %v14023_v40  ;;  %v4421_v42 = vmul.f32 %v10228_v43, %v2946_v32  ;;  %v5522_v14 = vrot.slane %v13983_v63, 7  ;;  %v5531_v56 = vrot.slane %v14009_v47, 7  ;;  %v2955_v25 = vcombine.high %v2953_v26, %v2953_v26 }
 0x1ed   : > { %17354 = vst [vmem:[#allocation104_spill] sm:$0xff] %v14020_v39  ;;  %v4422_v29 = vmul.f32 %v3945_v13, %v2954_v22  ;;  %v14050_v43 = vmul.f32 %v3953_v24, %v2953_v26  ;;  %v14060_v59 = vrot.slane %v7056_v2, %v11559_v8  ;;  %v17361_v26 = vld [vmem:[#allocation66_spill] sm:$0xff] }
 0x1ee   : > { %v7057_v17 = vcombine.low %v14009_v47, %v4421_v42  ;;  %v14048_v32 = vsel %vm12112_vm11, %v5521_v37, %v5522_v14  ;;  %v14052_v45 = vmul.f32 %v3952_v11, %v2955_v25  ;;  %v11366_v37 = vld [vmem:[%s16787_s6] sm:$0x3]  ;;  %v2319_v22 = vadd.f32 %v13951_v27, %v17361_v26 }
 0x1ef   : > { %17357 = vst [vmem:[#allocation107_spill] sm:$0xff] %v14048_v32  ;;  %17358 = vst [vmem:[#allocation108_spill] sm:$0xff] %v14050_v43  ;;  %v6468_v13 = vsel %vm6254_vm4, %v11366_v37, 0  ;;  %v3337_v24 = vld [vmem:[%s16782_s1 + $0x140] sm:$0xff]  ;;  %v14076_v25 = vrot.slane %v5522_v14, 2  ;;  %v5533_v39 = vrot.slane %v5531_v56, 2  ;;  %v5037_v14 = vcombine.low %v4422_v29, %v14050_v43 }
 0x1f0   : > { %17359 = vst [vmem:[#allocation109_spill] sm:$0xff] %v14060_v59  ;;  %v14063_v10 = vrot.slane %v7057_v17, %v11559_v8  ;;  %v17363_v17 = vrot.slane %v13990_v36, 7  ;;  %10910 = vmatpush3.bf16.msra.mxu1 %v6468_v13  ;;  %v17365_v37 = vrot.slane %v13992_v52, 7  ;;  %v2394_v57 = vmax.f32 %v2319_v22, 0.0 }
 0x1f1   : > { %17362 = vst [vmem:[#allocation66_spill] sm:$0xff] %v14076_v25  ;;  %11254 = vmatprep.subr.msk.bf16.mxu1 %vm6254_vm4, %v14057_v41  ;;  %v5534_v2 = vrot.slane %v4421_v42, 7  ;;  %v3962_v32 = vrot.slane %v3337_v24, %v11559_v8  ;;  %v10247_v13 = vrot.slane %v4422_v29, 9  ;;  %v17366_v25 = vrot.slane %v13589_v54, 7 }
 0x1f2   : > { %17360 = vst [vmem:[#allocation110_spill] sm:$0xff] %v14063_v10  ;;  %v14080_v40 = vrot.slane %v17363_v17, 2  ;;  %v5530_v48 = vrot.slane %v17365_v37, 2  ;;  %v3955_v17 = vcombine.high %v3337_v24, %v3337_v24  ;;  %v2963_v37 = vrot.slane %v2394_v57, %v11559_v8 }
 0x1f3   : > { %v5473_v1 = vsel %vm12112_vm11, %v13718_v33, %v17366_v25  ;;  %v14100_v22 = vsel %vm12112_vm11, %v5533_v39, %v5534_v2  ;;  %v5538_v26 = vrot.slane %v14050_v43, 7  ;;  %v3954_v10 = vcombine.high %v3952_v11, %v3952_v11 }
 0x1f4   : > { %17364 = vst [vmem:[#allocation111_spill] sm:$0xff] %v14080_v40  ;;  %v2956_v40 = vcombine.high %v2394_v57, %v2394_v57  ;;  %v2971_v24 = vcombine.high %v2963_v37, %v2963_v37  ;;  %v3970_v59 = vcombine.high %v3962_v32, %v3962_v32  ;;  %v17367_v57 = vrot.slane %v13571_v31, 7 }
 0x1f5   : > { %v3969_v33 = vrot.slane %v3955_v17, %v11559_v8  ;;  %v17368_v39 = vrot.slane %v13600_v9, 7  ;;  %v17369_v11 = vrot.slane %v13695_v38, 7  ;;  %v14127_v9 = vrot.slane %v5037_v14, %v11559_v8 }
 0x1f6   : > { %v2970_v29 = vrot.slane %v2956_v40, %v11559_v8  ;;  %v5470_v54 = vsel %vm12112_vm11, %v13712_v30, %v17367_v57  ;;  %v14121_v42 = vmul.f32 %v3962_v32, %v2971_v24  ;;  %v5951_v30 = vcombine.low %v13708_v18, %v13748_v34 }
 0x1f7   : > { %v5476_v2 = vsel %vm12112_vm11, %v13730_v44, %v17368_v39  ;;  %v5482_v40 = vsel %vm12112_vm11, %v13766_v51, %v17369_v11  ;;  %v5952_v25 = vcombine.low %v5470_v54, %v5473_v1  ;;  %v14131_v44 = vsel %vm12112_vm11, %v5530_v48, %v5531_v56  ;;  %v3339_v48 = vld [vmem:[%s16782_s1 + $0x150] sm:$0xff] }
 0x1f8   : > { %v2972_v31 = vcombine.high %v2970_v29, %v2970_v29  ;;  %v5968_v17 = vcombine.low %v5476_v2, %v13760_v20  ;;  %v14133_v38 = vmul.f32 %v3954_v10, %v2963_v37  ;;  %v5969_v51 = vcombine.low %v5482_v40, %v13790_v49 }
 0x1f9   : > { %v14138_v1 = vsel %vm12112_vm11, %v10247_v13, %v5538_v26  ;;  %v14140_v32 = vmul.f32 %v3970_v59, %v2970_v29  ;;  %v5966_v34 = vrot.slane %v5952_v25, %v11559_v8  ;;  %v14145_v20 = vrot.slane %v5538_v26, 2  ;;  %v14187_v59 = vld [vmem:[%s16782_s1 + $0x158] sm:$0xff] }
 0x1fa   : > { %17370 = vst [vmem:[#allocation112_spill] sm:$0xff] %v14133_v38  ;;  %v14142_v18 = vmul.f32 %v3969_v33, %v2972_v31  ;;  %v17372_v14 = vrot.slane %v14052_v45, 7  ;;  %v5959_v13 = vrot.slane %v5951_v30, %v11559_v8  ;;  %v5976_v26 = vrot.slane %v5968_v17, %v11559_v8  ;;  %v17377_v31 = vld [vmem:[#allocation71_spill] sm:$0xff] }
 0x1fb   : > { %v17373_v37 = vcombine.low %v13739_v6, %v13754_v7  ;;  %v5983_v24 = vrot.slane %v5969_v51, %v11559_v8  ;;  %v17374_v57 = vcombine.low %v13742_v62, %v13762_v61  ;;  %v17375_v39 = vcombine.low %v13764_v53, %v13841_v28 }
 0x1fc   : > { %17371 = vst [vmem:[#allocation113_spill] sm:$0xff] %v14142_v18  ;;  %v5543_v56 = vrot.slane %v17372_v14, 2  ;;  %v17376_v11 = vcombine.low %v13843_v4, %v13848_v35  ;;  %v5967_v25 = vcombine.low %v5959_v13, %v5966_v34  ;;  %v2322_v30 = vadd.f32 %v13951_v27, %v17377_v31 }
 0x1fd   : > { %v4977_v29 = vrot.slane %v17373_v37, %v11559_v8  ;;  %v4984_v54 = vrot.slane %v17374_v57, %v11559_v8  ;;  %v4994_v2 = vrot.slane %v17375_v39, %v11559_v8  ;;  %v3986_v17 = vrot.slane %v3339_v48, %v11559_v8  ;;  %v17378_v57 = vld [vmem:[#allocation52_spill] sm:$0xff] }
 0x1fe   : > { %v5001_v40 = vrot.slane %v17376_v11, %v11559_v8  ;;  %v5984_v51 = vcombine.low %v5976_v26, %v5983_v24  ;;  %v2327_v39 = vadd.f32 %v13951_v27, %v17378_v57  ;;  %v5544_v11 = vrot.slane %v14133_v38, 7 }
 0x1ff   : > { %v4985_v14 = vcombine.low %v4977_v29, %v4984_v54  ;;  %v2395_v49 = vmax.f32 %v2322_v30, 0.0  ;;  %v3971_v34 = vcombine.high %v3969_v33, %v3969_v33  ;;  %v3979_v13 = vcombine.high %v3339_v48, %v3339_v48  ;;  %v10229_v33 = vld.sshfl [vmem:[%s16782_s1 + $0x148] sm:$0x3 pattern:$0x76325410]  ;;  %v14215_v30 = vpop.f32.mrf.mxu0 }
 0x200   : > { %v5002_v37 = vcombine.low %v4994_v2, %v5001_v40  ;;  %v14192_v6 = vpack.c.bf16 %v5984_v51, %v5967_v25  ;;  %v2396_v29 = vmax.f32 %v2327_v39, 0.0  ;;  %v4003_v40 = vrot.slane %v14187_v59, %v11559_v8  ;;  %17381 = vst [vmem:[#allocation114_spill] sm:$0xff] %v14215_v30 }
 0x201   : > { %v2973_v24 = vcombine.high %v2395_v49, %v2395_v49  ;;  %v2980_v54 = vrot.slane %v2395_v49, %v11559_v8  ;;  %v3993_v2 = vrot.slane %v3979_v13, %v11559_v8  ;;  %v3994_v48 = vcombine.high %v3986_v17, %v3986_v17  ;;  %v10869_v13 = vpop.f32.mrf.mxu0 }
 0x202   : > { %17379 = vst [vmem:[#allocation71_spill] sm:$0xff] %v14192_v6  ;;  %v14194_v26 = vpack.c.bf16 %v5002_v37, %v4985_v14  ;;  %10897 = vmatprep.mubr.msk.bf16.mxu1 %vm6205_vm12, %v14192_v6  ;;  %v2990_v25 = vcombine.high %v2396_v29, %v2396_v29  ;;  %v2997_v49 = vrot.slane %v2396_v29, %v11559_v8 }
 0x203   : > { %v2987_v51 = vrot.slane %v2973_v24, %v11559_v8  ;;  %v2988_v14 = vcombine.high %v2980_v54, %v2980_v54  ;;  %v14210_v37 = vmul.f32 %v3971_v34, %v2980_v54  ;;  %v3995_v57 = vcombine.high %v3993_v2, %v3993_v2 }
 0x204   : > { %17380 = vst [vmem:[#allocation52_spill] sm:$0xff] %v14194_v26  ;;  %10999 = vmatprep.mubr.msk.bf16.mxu0 %vm6205_vm12, %v14194_v26  ;;  %v3004_v31 = vrot.slane %v2990_v25, %v11559_v8  ;;  %v3005_v10 = vcombine.high %v2997_v49, %v2997_v49  ;;  %v14219_v6 = vsel %vm12112_vm11, %v5543_v56, %v5544_v11  ;;  %v14228_v25 = vrot.slane %v5544_v11, 2 }
 0x205   : > { %17382 = vst [vmem:[#allocation115_spill] sm:$0xff] %v14219_v6  ;;  %v2989_v29 = vcombine.high %v2987_v51, %v2987_v51  ;;  %v14221_v26 = vmul.f32 %v10229_v33, %v2988_v14  ;;  %v4011_v24 = vcombine.high %v4003_v40, %v4003_v40  ;;  %v5556_v34 = vrot.slane %v14210_v37, 7 }
 0x206   : > { %v3006_v54 = vcombine.high %v3004_v31, %v3004_v31  ;;  %v14224_v43 = vmul.f32 %v3993_v2, %v2997_v49  ;;  %v14226_v39 = vmul.f32 %v3995_v57, %v3005_v10  ;;  %v4431_v28 = vmul.f32 %v3986_v17, %v2987_v51  ;;  %v14239_v10 = vpop.f32.mrf.mxu0 }
 0x207   : > { %17383 = vst [vmem:[#allocation116_spill] sm:$0xff] %v14221_v26  ;;  %v14230_v30 = vmul.f32 %v3994_v48, %v2989_v29  ;;  %v17384_v33 = vrot.slane %v14142_v18, 7  ;;  %v5558_v7 = vrot.slane %v5556_v34, 2  ;;  %v5559_v6 = vrot.slane %v14221_v26, 7  ;;  %17385 = vst [vmem:[#allocation117_spill] sm:$0xff] %v14239_v10 }
 0x208   : > { %v5072_v2 = vcombine.low %v14224_v43, %v14226_v39  ;;  %v17386_v11 = vrot.slane %v14121_v42, 7  ;;  %v17387_v17 = vrot.slane %v14140_v32, 7  ;;  %v14249_v51 = vmul.f32 %v4003_v40, %v3004_v31  ;;  %v10870_v31 = vpop.f32.mrf.mxu0 }
 0x209   : > { %v5555_v14 = vrot.slane %v17384_v33, 2  ;;  %v14251_v57 = vmul.f32 %v4011_v24, %v3006_v54  ;;  %v5071_v13 = vcombine.low %v4431_v28, %v14230_v30  ;;  %v5563_v29 = vrot.slane %v14230_v30, 7 }
 0x20a   : > { %v14243_v49 = vrot.slane %v17386_v11, 2  ;;  %v14247_v48 = vrot.slane %v17387_v17, 2  ;;  %v17388_v33 = vrot.slane %v13742_v62, 7  ;;  %v17389_v11 = vrot.slane %v13762_v61, 7  ;;  %v14288_v31 = vpop.f32.mrf.mxu0 }
 0x20b   : > { %v10248_v24 = vrot.slane %v4431_v28, 9  ;;  %v17390_v54 = vrot.slane %v13764_v53, 7  ;;  %v14285_v28 = vrot.slane %v5072_v2, %v11559_v8  ;;  %17392 = vst [vmem:[#allocation119_spill] sm:$0xff] %v14288_v31  ;;  %v17393_v2 = vrot.slane %v13843_v4, 7  ;;  %v17422_v4 = vld [vmem:[#allocation93_spill] sm:$0xff] }
 0x20c   : > { %v5492_v56 = vsel %vm12112_vm11, %v13861_v12, %v17388_v33  ;;  %v5495_v17 = vsel %vm12112_vm11, %v13865_v58, %v17389_v11  ;;  %v14274_v12 = vsel %vm6254_vm4, %v14057_v41, 0  ;;  %v14278_v33 = vsel %vm12112_vm11, %v5555_v14, %v5556_v34  ;;  %v10873_v41 = vpop.f32.mrf.mxu0 }
 0x20d   : > { %v5498_v26 = vsel %vm12112_vm11, %v13873_v5, %v17390_v54  ;;  %17391 = vst [vmem:[#allocation118_spill] sm:$0xff] %v14274_v12  ;;  %v14282_v58 = vsel %vm12112_vm11, %v5558_v7, %v5559_v6  ;;  %v5088_v5 = vcombine.low %v14249_v51, %v14251_v57  ;;  %v7107_v34 = vcombine.low %v14230_v30, %v14224_v43  ;;  %v17398_v12 = vld [vmem:[#allocation85_spill] sm:$0xff] }
 0x20e   : > { %v7108_v14 = vcombine.low %v14226_v39, %v14249_v51  ;;  %v14298_v7 = vrot.slane %v5071_v13, %v11559_v8  ;;  %v14302_v6 = vsel %vm12112_vm11, %v10248_v24, %v5563_v29  ;;  %v5504_v54 = vsel %vm12112_vm11, %v13921_v3, %v17393_v2  ;;  %v3342_v13 = vld [vmem:[%s16782_s1 + $0x168] sm:$0xff] }
 0x20f   : > { %v17394_v40 = vrot.slane %v13848_v35, 7  ;;  %v14318_v24 = vrot.slane %v7107_v34, %v11559_v8  ;;  %v17397_v31 = vrot.slane %v13859_v19, 7  ;;  %v5985_v2 = vcombine.low %v13857_v16, %v5492_v56  ;;  %v2361_v34 = vpop.f32.mrf.mxu0 }
 0x210   : > { %v14321_v11 = vrot.slane %v7108_v14, %v11559_v8  ;;  %v2330_v41 = vadd.f32 %v13951_v27, %v17398_v12  ;;  %v3996_v19 = vcombine.high %v14187_v59, %v14187_v59  ;;  %v17400_v59 = vcombine.low %v13983_v63, %v13990_v36  ;;  %v17402_v63 = vld [vmem:[#allocation87_spill] sm:$0xff] }
 0x211   : > { %v5507_v30 = vsel %vm12112_vm11, %v13925_v15, %v17394_v40  ;;  %17395 = vst [vmem:[#allocation120_spill] sm:$0xff] %v14318_v24  ;;  %v5510_v3 = vsel %vm12112_vm11, %v13929_v50, %v17397_v31  ;;  %v5986_v15 = vcombine.low %v5495_v17, %v5498_v26  ;;  %v6002_v40 = vcombine.low %v13902_v46, %v5504_v54  ;;  %v10874_v17 = vpop.f32.mrf.mxu0 }
 0x212   : > { %17396 = vst [vmem:[#allocation121_spill] sm:$0xff] %v14321_v11  ;;  %v6003_v10 = vcombine.low %v5507_v30, %v5510_v3  ;;  %v5993_v35 = vrot.slane %v5985_v2, %v11559_v8  ;;  %v4027_v50 = vrot.slane %v3342_v13, %v11559_v8  ;;  %v2397_v56 = vmax.f32 %v2330_v41, 0.0 }
 0x213   : > { %v6000_v16 = vrot.slane %v5986_v15, %v11559_v8  ;;  %v6010_v26 = vrot.slane %v6002_v40, %v11559_v8  ;;  %v4010_v12 = vrot.slane %v3996_v19, %v11559_v8  ;;  %v17399_v31 = vcombine.low %v13882_v23, %v13937_v0  ;;  %v10230_v23 = vld.sshfl [vmem:[%s16782_s1 + $0x160] sm:$0x3 pattern:$0x76325410] }
 0x214   : > { %v6017_v46 = vrot.slane %v6003_v10, %v11559_v8  ;;  %v5028_v30 = vrot.slane %v17400_v59, %v11559_v8  ;;  %v17401_v3 = vcombine.low %v13992_v52, %v14009_v47  ;;  %v3007_v40 = vcombine.high %v2397_v56, %v2397_v56 }
 0x215   : > { %v5018_v54 = vrot.slane %v17399_v31, %v11559_v8  ;;  %v6001_v10 = vcombine.low %v5993_v35, %v6000_v16  ;;  %v3014_v19 = vrot.slane %v2397_v56, %v11559_v8  ;;  %v4012_v41 = vcombine.high %v4010_v12, %v4010_v12 }
 0x216   : > { %v5035_v2 = vrot.slane %v17401_v3, %v11559_v8  ;;  %v6018_v15 = vcombine.low %v6010_v26, %v6017_v46  ;;  %v2335_v31 = vadd.f32 %v13951_v27, %v17402_v63  ;;  %v3021_v47 = vrot.slane %v3007_v40, %v11559_v8 }
 0x217   : > { %v5019_v34 = vcombine.low %v14003_v60, %v5018_v54  ;;  %v3022_v35 = vcombine.high %v3014_v19, %v3014_v19  ;;  %v4437_v16 = vmul.f32 %v4010_v12, %v3014_v19  ;;  %v16964_v26 = vrot.slane %v14251_v57, 7 }
 0x218   : > { %v5036_v17 = vcombine.low %v5028_v30, %v5035_v2  ;;  %v14361_v59 = vpack.c.bf16 %v6018_v15, %v6001_v10  ;;  %v2398_v56 = vmax.f32 %v2335_v31, 0.0  ;;  %v4020_v3 = vcombine.high %v3342_v13, %v3342_v13 }
 0x219   : > { %v5565_v14 = vrot.slane %v5563_v29, 2  ;;  %v3023_v60 = vcombine.high %v3021_v47, %v3021_v47  ;;  %v14369_v54 = vmul.f32 %v4012_v41, %v3022_v35  ;;  %v4439_v30 = vmul.f32 %v10230_v23, %v3021_v47 }
 0x21a   : > { %17403 = vst [vmem:[#allocation85_spill] sm:$0xff] %v14361_v59  ;;  %v14365_v46 = vpack.c.bf16 %v5036_v17, %v5019_v34  ;;  %10898 = vmatmul.mubr.msk.bf16.gmra.mxu1 %vm6205_vm12, %v14361_v59  ;;  %v17405_v2 = vrot.slane %v14224_v43, 7  ;;  %v7124_v12 = vcombine.low %v14251_v57, %v4437_v16  ;;  %v3024_v15 = vcombine.high %v2398_v56, %v2398_v56 }
 0x21b   : > { %v3031_v13 = vrot.slane %v2398_v56, %v11559_v8  ;;  %v14380_v29 = vrot.slane %v5088_v5, %v11559_v8  ;;  %v5089_v40 = vcombine.low %v4437_v16, %v14369_v54  ;;  %v4034_v19 = vrot.slane %v4020_v3, %v11559_v8 }
 0x21c   : > { %17404 = vst [vmem:[#allocation87_spill] sm:$0xff] %v14365_v46  ;;  %v14373_v10 = vrot.slane %v17405_v2, 2  ;;  %11000 = vmatmul.mubr.msk.bf16.gmra.mxu0 %vm6205_vm12, %v14365_v46  ;;  %v4035_v23 = vcombine.high %v4027_v50, %v4027_v50  ;;  %v5577_v34 = vrot.slane %v16964_v26, 2  ;;  %v16965_v17 = vrot.slane %v14369_v54, 7 }
 0x21d   : > { %v7125_v63 = vcombine.low %v14369_v54, %v4439_v30  ;;  %v14389_v31 = vmul.f32 %v4027_v50, %v3023_v60  ;;  %v5578_v47 = vrot.slane %v4437_v16, 7  ;;  %v3038_v5 = vrot.slane %v3024_v15, %v11559_v8  ;;  %v3343_v50 = vld [vmem:[%s16782_s1 + $0x170] sm:$0xff] }
 0x21e   : > { %v3039_v35 = vcombine.high %v3031_v13, %v3031_v13  ;;  %v14393_v56 = vrot.slane %v5089_v40, %v11559_v8  ;;  %v5583_v3 = vrot.slane %v16965_v17, 2  ;;  %v14398_v2 = vrot.slane %v7124_v12, %v11559_v8 }
 0x21f   : > { %v14401_v26 = vrot.slane %v7125_v63, %v11559_v8  ;;  %v17408_v16 = vrot.slane %v14226_v39, 7  ;;  %v3040_v15 = vcombine.high %v3038_v5, %v3038_v5  ;;  %v4036_v40 = vcombine.high %v4034_v19, %v4034_v19 }
 0x220   : > { %17406 = vst [vmem:[#allocation122_spill] sm:$0xff] %v14398_v2  ;;  %v14410_v41 = vmul.f32 %v4035_v23, %v3031_v13  ;;  %v17410_v12 = vrot.slane %v14224_v43, 7  ;;  %v5584_v59 = vrot.slane %v4439_v30, 7  ;;  %v14428_v13 = vsel %vm12112_vm11, %v5577_v34, %v5578_v47  ;;  %v17417_v43 = vld [vmem:[#allocation107_spill] sm:$0xff] }
 0x221   : > { %17407 = vst [vmem:[#allocation123_spill] sm:$0xff] %v14401_v26  ;;  %v14408_v60 = vrot.slane %v17408_v16, 2  ;;  %v17411_v16 = vrot.slane %v14249_v51, 7  ;;  %v4044_v23 = vrot.slane %v3343_v50, %v11559_v8  ;;  %v14431_v17 = vmul.f32 %v4034_v19, %v3039_v35 }
 0x222   : > { %17409 = vst [vmem:[#allocation124_spill] sm:$0xff] %v14410_v41  ;;  %v14418_v63 = vsel %vm12112_vm11, %v5565_v14, %v17410_v12  ;;  %v14435_v14 = vrot.slane %v5578_v47, 2  ;;  %v14439_v30 = vsel %vm12112_vm11, %v5583_v3, %v5584_v59  ;;  %v10249_v12 = vrot.slane %v14389_v31, 9  ;;  %v17414_v3 = vld [vmem:[#allocation66_spill] sm:$0xff] }
 0x223   : > { %v14424_v11 = vrot.slane %v17411_v16, 2  ;;  %v14442_v16 = vmul.f32 %v4036_v40, %v3038_v5  ;;  %v14444_v46 = vmul.f32 %v4044_v23, %v3040_v15  ;;  %v17412_v19 = vrot.slane %v13937_v0, 7  ;;  %v17416_v40 = vld [vmem:[#allocation111_spill] sm:$0xff] }
 0x224   : > { %v5588_v35 = vrot.slane %v14410_v41, 7  ;;  %v17413_v59 = vrot.slane %v13990_v36, 7  ;;  %v17415_v15 = vrot.slane %v13992_v52, 7 }
 0x225   : > { %v5520_v47 = vsel %vm12112_vm11, %v14032_v55, %v17412_v19  ;;  %v17418_v55 = vld [vmem:[#allocation103_spill] sm:$0xff]  ;;  %v17419_v19 = vld [vmem:[#allocation106_spill] sm:$0xff] }
 0x226   : > { %v5526_v5 = vsel %vm12112_vm11, %v17414_v3, %v17413_v59  ;;  %v5529_v34 = vsel %vm12112_vm11, %v17416_v40, %v17415_v15  ;;  %v6020_v0 = vcombine.low %v5520_v47, %v17417_v43  ;;  %v17420_v2 = vcombine.low %v17418_v55, %v17419_v19  ;;  %v3345_v47 = vld [vmem:[%s16782_s1 + $0x180] sm:$0xff] }
 0x227   : > { %v6036_v36 = vcombine.low %v5526_v5, %v5529_v34  ;;  %v17421_v59 = vcombine.low %v14131_v44, %v14100_v22  ;;  %v2338_v15 = vadd.f32 %v13951_v27, %v17422_v4  ;;  %v4037_v40 = vcombine.high %v3343_v50, %v3343_v50  ;;  %v17426_v19 = vld [vmem:[#allocation94_spill] sm:$0xff] }
 0x228   : > { %v6027_v24 = vrot.slane %v17420_v2, %v11559_v8  ;;  %v6034_v52 = vrot.slane %v6020_v0, %v11559_v8  ;;  %v4052_v43 = vcombine.high %v4044_v23, %v4044_v23  ;;  %v17423_v2 = vcombine.low %v14052_v45, %v14133_v38 }
 0x229   : > { %v6051_v3 = vrot.slane %v17421_v59, %v11559_v8  ;;  %v6044_v55 = vrot.slane %v6036_v36, %v11559_v8  ;;  %v17424_v22 = vcombine.low %v14121_v42, %v14140_v32  ;;  %v17425_v4 = vcombine.low %v14142_v18, %v14210_v37 }
 0x22a   : > { %v5052_v34 = vrot.slane %v17423_v2, %v11559_v8  ;;  %v6035_v23 = vcombine.low %v6027_v24, %v6034_v52  ;;  %v2399_v5 = vmax.f32 %v2338_v15, 0.0  ;;  %v4051_v0 = vrot.slane %v4037_v40, %v11559_v8 }
 0x22b   : > { %v5062_v44 = vrot.slane %v17424_v22, %v11559_v8  ;;  %v5069_v50 = vrot.slane %v17425_v4, %v11559_v8  ;;  %v2343_v36 = vadd.f32 %v13951_v27, %v17426_v19  ;;  %v6052_v59 = vcombine.low %v6044_v55, %v6051_v3  ;;  %v14509_v55 = vld [vmem:[%s16787_s6 + $0xe] sm:$0x3] }
 0x22c   : > { %v5053_v2 = vcombine.low %v14127_v9, %v5052_v34  ;;  %v4061_v38 = vcombine.high %v3345_v47, %v3345_v47  ;;  %v3041_v53 = vcombine.high %v2399_v5, %v2399_v5  ;;  %v3048_v22 = vrot.slane %v2399_v5, %v11559_v8 }
 0x22d   : > { %v5070_v26 = vcombine.low %v5062_v44, %v5069_v50  ;;  %v4053_v61 = vcombine.high %v4051_v0, %v4051_v0  ;;  %v2400_v62 = vmax.f32 %v2343_v36, 0.0  ;;  %v14498_v41 = vpack.c.bf16 %v6052_v59, %v6035_v23 }
 0x22e   : > { %v4068_v24 = vrot.slane %v3345_v47, %v11559_v8  ;;  %v4075_v52 = vrot.slane %v4061_v38, %v11559_v8  ;;  %v16983_v15 = vrot.slane %v14442_v16, 7  ;;  %v3055_v3 = vrot.slane %v3041_v53, %v11559_v8  ;;  %v17429_v53 = vld [vmem:[#allocation62_spill] sm:$0xff] }
 0x22f   : > { %17427 = vst [vmem:[#allocation66_spill] sm:$0xff] %v14498_v41  ;;  %v14500_v4 = vpack.c.bf16 %v5070_v26, %v5053_v2  ;;  %v3056_v9 = vcombine.high %v3048_v22, %v3048_v22  ;;  %v3058_v40 = vcombine.high %v2400_v62, %v2400_v62  ;;  %v16986_v34 = vrot.slane %v14444_v46, 7  ;;  %10901 = vmatprep.mubr.msk.bf16.mxu1 %vm6205_vm12, %v14498_v41 }
 0x230   : > { %v14514_v26 = vmul.f32 %v4052_v43, %v3048_v22  ;;  %v3065_v38 = vrot.slane %v2400_v62, %v11559_v8  ;;  %v8022_v47 = vsel %vm6254_vm4, %v17429_v53, 0  ;;  %v3057_v50 = vcombine.high %v3055_v3, %v3055_v3  ;;  %v10231_v43 = vld.sshfl [vmem:[%s16782_s1 + $0x178] sm:$0x3 pattern:$0x76325410] }
 0x231   : > { %17428 = vst [vmem:[#allocation111_spill] sm:$0xff] %v14500_v4  ;;  %11003 = vmatprep.mubr.msk.bf16.mxu0 %vm6205_vm12, %v14500_v4  ;;  %v14523_v23 = vmul.f32 %v4051_v0, %v3056_v9  ;;  %v14525_v5 = vmul.f32 %v4053_v61, %v3055_v3  ;;  %11046 = vmatpush3.bf16.msra.mxu0 %v8022_v47  ;;  %v14537_v0 = vrot.slane %v5588_v35, 2  ;;  %v17430_v61 = vrot.slane %v14431_v17, 7 }
 0x232   : > { %v3072_v19 = vrot.slane %v3058_v40, %v11559_v8  ;;  %v3073_v36 = vcombine.high %v3065_v38, %v3065_v38  ;;  %v4076_v62 = vcombine.high %v4068_v24, %v4068_v24  ;;  %v4077_v59 = vcombine.high %v4075_v52, %v4075_v52  ;;  %11259 = vmatprep.subr.msk.bf16.mxu0 %vm6254_vm4, %v14509_v55 }
 0x233   : > { %v14535_v2 = vsel %vm12112_vm11, %v10249_v12, %v5588_v35  ;;  %v14541_v22 = vrot.slane %v17430_v61, 2  ;;  %v14545_v3 = vrot.slane %v16983_v15, 2  ;;  %v5599_v9 = vrot.slane %v16986_v34, 2 }
 0x234   : > { %v3074_v53 = vcombine.high %v3072_v19, %v3072_v19  ;;  %v4449_v47 = vmul.f32 %v4068_v24, %v3065_v38  ;;  %v14551_v12 = vmul.f32 %v10231_v43, %v3057_v50  ;;  %v5600_v61 = vrot.slane %v14514_v26, 7 }
 0x235   : > { %v14557_v41 = vmul.f32 %v4076_v62, %v3073_v36  ;;  %v14559_v15 = vmul.f32 %v4075_v52, %v3072_v19  ;;  %v17432_v24 = vrot.slane %v14052_v45, 7  ;;  %v17433_v50 = vrot.slane %v14121_v42, 7 }
 0x236   : > { %v14561_v4 = vmul.f32 %v4077_v59, %v3074_v53  ;;  %v10317_v34 = vrot.slane %v4449_v47, 9  ;;  %v17434_v52 = vrot.slane %v14140_v32, 7 }
 0x237   : > { %17431 = vst [vmem:[#allocation107_spill] sm:$0xff] %v14559_v15  ;;  %v5542_v38 = vsel %vm12112_vm11, %v14145_v20, %v17432_v24  ;;  %v5548_v43 = vsel %vm12112_vm11, %v14228_v25, %v17433_v50  ;;  %v7477_v36 = vcombine.low %v4449_v47, %v14557_v41  ;;  %v7718_v59 = vrot.slane %v14557_v41, 7  ;;  %v17436_v50 = vld [vmem:[#allocation115_spill] sm:$0xff] }
 0x238   : > { %v5551_v19 = vsel %vm12112_vm11, %v14243_v49, %v17434_v52  ;;  %v7478_v62 = vcombine.low %v14559_v15, %v14561_v4  ;;  %v17435_v20 = vrot.slane %v14142_v18, 7  ;;  %v16987_v25 = vrot.slane %v14561_v4, 7 }
 0x239   : > { %v7979_v24 = vcombine.low %v14557_v41, %v14559_v15  ;;  %v6053_v49 = vcombine.low %v14138_v1, %v5542_v38  ;;  %v6054_v47 = vcombine.low %v17436_v50, %v5548_v43  ;;  %v14595_v52 = vsel %vm12112_vm11, %v5599_v9, %v5600_v61  ;;  %v17437_v50 = vld [vmem:[#allocation74_spill] sm:$0xff] }
 0x23a   : > { %v5554_v53 = vsel %vm12112_vm11, %v14247_v48, %v17435_v20  ;;  %v14599_v35 = vsel %vm12112_vm11, %v10317_v34, %v7718_v59  ;;  %v7720_v40 = vrot.slane %v7718_v59, 2  ;;  %v16991_v48 = vrot.slane %v14559_v15, 7  ;;  %v3346_v20 = vld [vmem:[%s16782_s1 + $0x188] sm:$0xff] }
 0x23b   : > { %v14605_v41 = vrot.slane %v5600_v61, 2  ;;  %v14608_v1 = vrot.slane %v7477_v36, %v11559_v8  ;;  %v14611_v38 = vrot.slane %v7478_v62, %v11559_v8  ;;  %v7726_v9 = vrot.slane %v16987_v25, 2 }
 0x23c   : > { %v14619_v34 = vsel %vm12112_vm11, %v7720_v40, %v16991_v48  ;;  %v6061_v43 = vrot.slane %v6053_v49, %v11559_v8  ;;  %v6068_v61 = vrot.slane %v6054_v47, %v11559_v8  ;;  %v6070_v59 = vcombine.low %v5551_v19, %v5554_v53  ;;  %v17477_v48 = vld [vmem:[#allocation28_spill] sm:$0xff] }
 0x23d   : > { %v6071_v62 = vcombine.low %v14278_v33, %v14282_v58  ;;  %v2346_v25 = vadd.f32 %v13951_v27, %v17437_v50  ;;  %v4078_v44 = vcombine.high %v3346_v20, %v3346_v20  ;;  %v4085_v40 = vrot.slane %v3346_v20, %v11559_v8 }
 0x23e   : > { %v6069_v15 = vcombine.low %v6061_v43, %v6068_v61  ;;  %v6078_v18 = vrot.slane %v6070_v59, %v11559_v8  ;;  %v17438_v49 = vcombine.low %v14298_v7, %v14285_v28  ;;  %v17439_v19 = vcombine.low %v14380_v29, %v14393_v56 }
 0x23f   : > { %v6085_v47 = vrot.slane %v6071_v62, %v11559_v8  ;;  %v2401_v33 = vmax.f32 %v2346_v25, 0.0  ;;  %v4092_v58 = vrot.slane %v4078_v44, %v11559_v8  ;;  %v17440_v27 = vrot.slane %v14226_v39, 7 }
 0x240   : > { %v14637_v53 = vpack.c.bf16 %v17439_v19, %v17438_v49  ;;  %v4093_v20 = vcombine.high %v4085_v40, %v4085_v40  ;;  %v17441_v28 = vrot.slane %v14249_v51, 7  ;;  %v17442_v29 = vrot.slane %v14251_v57, 7 }
 0x241   : > { %v5570_v43 = vsel %vm12112_vm11, %v14373_v10, %v17440_v27  ;;  %v17443_v56 = vrot.slane %v14369_v54, 7  ;;  %v6086_v44 = vcombine.low %v6078_v18, %v6085_v47  ;;  %v3075_v25 = vcombine.high %v2401_v33, %v2401_v33 }
 0x242   : > { %11004 = vmatmul.mubr.msk.bf16.gmra.mxu0 %vm6205_vm12, %v14637_v53  ;;  %v5573_v7 = vsel %vm12112_vm11, %v14408_v60, %v17441_v28  ;;  %v5576_v39 = vsel %vm12112_vm11, %v14424_v11, %v17442_v29  ;;  %v3082_v51 = vrot.slane %v2401_v33, %v11559_v8  ;;  %v4094_v61 = vcombine.high %v4092_v58, %v4092_v58 }
 0x243   : > { %v5582_v10 = vsel %vm12112_vm11, %v14435_v14, %v17443_v56  ;;  %v6087_v60 = vcombine.low %v14302_v6, %v14418_v63  ;;  %v6088_v59 = vcombine.low %v5570_v43, %v5573_v7  ;;  %v6104_v57 = vcombine.low %v5576_v39, %v14428_v13 }
 0x244   : > { %v6105_v62 = vcombine.low %v5582_v10, %v14439_v30  ;;  %v14668_v11 = vpack.c.bf16 %v6086_v44, %v6069_v15  ;;  %v3089_v54 = vrot.slane %v3075_v25, %v11559_v8  ;;  %v3090_v50 = vcombine.high %v3082_v51, %v3082_v51 }
 0x245   : > { %v14671_v49 = vmul.f32 %v4085_v40, %v3082_v51  ;;  %v6095_v18 = vrot.slane %v6087_v60, %v11559_v8  ;;  %v6102_v14 = vrot.slane %v6088_v59, %v11559_v8  ;;  %v6112_v19 = vrot.slane %v6104_v57, %v11559_v8  ;;  %v17448_v59 = vld [vmem:[#allocation124_spill] sm:$0xff] }
 0x246   : > { %17444 = vst [vmem:[#allocation103_spill] sm:$0xff] %v14668_v11  ;;  %v6119_v6 = vrot.slane %v6105_v62, %v11559_v8  ;;  %10902 = vmatmul.mubr.msk.bf16.gmra.mxu1 %vm6205_vm12, %v14668_v11  ;;  %v3091_v63 = vcombine.high %v3089_v54, %v3089_v54  ;;  %v14679_v13 = vmul.f32 %v4093_v20, %v3090_v50  ;;  %v17445_v40 = vrot.slane %v14523_v23, 7  ;;  %v17493_v50 = vld [vmem:[#allocation55_spill] sm:$0xff]  ;;  %v17564_v11 = vld [vmem:[#allocation78_spill] sm:$0xff] }
 0x247   : > { %v14681_v30 = vmul.f32 %v4092_v58, %v3089_v54  ;;  %v16990_v15 = vrot.slane %v14671_v49, 7  ;;  %v14687_v33 = vrot.slane %v7979_v24, %v11559_v8  ;;  %v7980_v27 = vcombine.low %v14561_v4, %v14671_v49 }
 0x248   : > { %v5605_v47 = vrot.slane %v17445_v40, 2  ;;  %v6120_v43 = vcombine.low %v6112_v19, %v6119_v6  ;;  %v14691_v28 = vmul.f32 %v4094_v61, %v3091_v63  ;;  %v7494_v20 = vcombine.low %v14671_v49, %v14679_v13  ;;  %v17497_v61 = vld [vmem:[#allocation61_spill] sm:$0xff] }
 0x249   : > { %v14699_v58 = vsel %vm12112_vm11, %v7726_v9, %v16990_v15  ;;  %v6103_v7 = vcombine.low %v6095_v18, %v6102_v14  ;;  %v17446_v29 = vrot.slane %v14525_v5, 7  ;;  %v5609_v39 = vrot.slane %v14551_v12, 7  ;;  %v17476_v15 = vld [vmem:[#allocation27_spill] sm:$0xff] }
 0x24a   : > { %v14705_v56 = vrot.slane %v7980_v27, %v11559_v8  ;;  %v7493_v44 = vcombine.low %v14608_v1, %v14611_v38  ;;  %v7495_v25 = vcombine.low %v14681_v30, %v14691_v28  ;;  %v7502_v9 = vrot.slane %v7494_v20, %v11559_v8 }
 0x24b   : > { %v5608_v24 = vrot.slane %v17446_v29, 2  ;;  %v14714_v51 = vpack.c.bf16 %v6120_v43, %v6103_v7  ;;  %v17449_v57 = vcombine.low %v14389_v31, %v17448_v59  ;;  %v17450_v1 = vcombine.low %v14431_v17, %v14442_v16 }
 0x24c   : > { %v7509_v54 = vrot.slane %v7495_v25, %v11559_v8  ;;  %v17451_v18 = vcombine.low %v14444_v46, %v14514_v26  ;;  %v17452_v31 = vcombine.low %v14523_v23, %v14525_v5  ;;  %v17453_v63 = vrot.slane %v14431_v17, 7 }
 0x24d   : > { %17447 = vst [vmem:[#allocation106_spill] sm:$0xff] %v14714_v51  ;;  %v5113_v62 = vrot.slane %v17449_v57, %v11559_v8  ;;  %v5120_v38 = vrot.slane %v17450_v1, %v11559_v8  ;;  %10905 = vmatprep.mubr.msk.bf16.mxu1 %vm6205_vm12, %v14714_v51  ;;  %v17454_v27 = vrot.slane %v14442_v16, 7  ;;  %v17455_v20 = vrot.slane %v14444_v46, 7 }
 0x24e   : > { %v5130_v14 = vrot.slane %v17451_v18, %v11559_v8  ;;  %v5137_v19 = vrot.slane %v17452_v31, %v11559_v8  ;;  %v5592_v40 = vsel %vm12112_vm11, %v14537_v0, %v17453_v63  ;;  %v7510_v29 = vcombine.low %v7502_v9, %v7509_v54  ;;  %v17460_v31 = vld [vmem:[#allocation13_spill] sm:$0xff]  ;;  %v17462_v63 = vld [vmem:[#allocation15_spill] sm:$0xff] }
 0x24f   : > { %v5121_v6 = vcombine.low %v5113_v62, %v5120_v38  ;;  %v5595_v43 = vsel %vm12112_vm11, %v14541_v22, %v17454_v27  ;;  %v5598_v7 = vsel %vm12112_vm11, %v14545_v3, %v17455_v20  ;;  %v17456_v57 = vrot.slane %v14523_v23, 7  ;;  %v17463_v27 = vld [vmem:[#allocation16_spill] sm:$0xff] }
 0x250   : > { %v5138_v25 = vcombine.low %v5130_v14, %v5137_v19  ;;  %v17457_v62 = vrot.slane %v14525_v5, 7  ;;  %v5610_v22 = vsel %vm12112_vm11, %v5608_v24, %v5609_v39  ;;  %v6121_v38 = vcombine.low %v14535_v2, %v5592_v40  ;;  %v17459_v14 = vld [vmem:[#allocation10_spill] sm:$0xff] }
 0x251   : > { %v5604_v0 = vsel %vm12112_vm11, %v14605_v41, %v17456_v57  ;;  %v6122_v18 = vcombine.low %v5595_v43, %v5598_v7  ;;  %v17461_v41 = vcombine.low %v17459_v14, %v17460_v31 }
 0x252   : > { %v5607_v1 = vsel %vm12112_vm11, %v5605_v47, %v17457_v62  ;;  %v6138_v3 = vcombine.low %v14595_v52, %v5604_v0  ;;  %v14767_v9 = vpack.c.bf16 %v5138_v25, %v5121_v6  ;;  %v17464_v47 = vcombine.low %v17462_v63, %v17463_v27  ;;  %v17465_v52 = vld [vmem:[#allocation18_spill] sm:$0xff]  ;;  %v17466_v6 = vld [vmem:[#allocation19_spill] sm:$0xff]  ;;  %v17468_v25 = vld [vmem:[#allocation21_spill] sm:$0xff] }
 0x253   : > { %v6139_v54 = vcombine.low %v5607_v1, %v5610_v22  ;;  %v4610_v19 = vrot.slane %v17461_v41, %v11559_v8  ;;  %v6129_v24 = vrot.slane %v6121_v38, %v11559_v8  ;;  %v6136_v2 = vrot.slane %v6122_v18, %v11559_v8  ;;  %v17470_v62 = vld [vmem:[#allocation23_spill] sm:$0xff]  ;;  %v17471_v1 = vld [vmem:[#allocation24_spill] sm:$0xff]  ;;  %v17473_v41 = vld [vmem:[#allocation25_spill] sm:$0xff] }
 0x254   : > { %17458 = vst [vmem:[#allocation93_spill] sm:$0xff] %v14767_v9  ;;  %v4620_v20 = vrot.slane %v17464_v47, %v11559_v8  ;;  %v6146_v39 = vrot.slane %v6138_v3, %v11559_v8  ;;  %v17467_v40 = vcombine.low %v17465_v52, %v17466_v6  ;;  %11007 = vmatprep.mubr.msk.bf16.mxu0 %vm6205_vm12, %v14767_v9  ;;  %v17474_v47 = vld [vmem:[#allocation26_spill] sm:$0xff] }
 0x255   : > { %v6153_v7 = vrot.slane %v6139_v54, %v11559_v8  ;;  %v4611_v57 = vcombine.low %v17468_v25, %v4610_v19  ;;  %v14788_v0 = vpack.c.bf16 %v7510_v29, %v7493_v44  ;;  %v17472_v22 = vcombine.low %v17470_v62, %v17471_v1  ;;  %v17479_v44 = vld [vmem:[#allocation38_spill] sm:$0xff]  ;;  %v17480_v29 = vld [vmem:[#allocation36_spill] sm:$0xff]  ;;  %v17485_v1 = vld [vmem:[#allocation45_spill] sm:$0xff] }
 0x256   : > { %v4627_v43 = vrot.slane %v17467_v40, %v11559_v8  ;;  %v6137_v18 = vcombine.low %v6129_v24, %v6136_v2  ;;  %v17475_v40 = vcombine.low %v17473_v41, %v17474_v47  ;;  %v17478_v54 = vcombine.low %v17476_v15, %v17477_v48  ;;  %v17483_v2 = vld [vmem:[#allocation40_spill] sm:$0xff] }
 0x257   : > { %17469 = vst [vmem:[#allocation94_spill] sm:$0xff] %v14788_v0  ;;  %v6673_v38 = vrot.slane %v17472_v22, %v11559_v8  ;;  %v6154_v19 = vcombine.low %v6146_v39, %v6153_v7  ;;  %11008 = vmatmul.mubr.msk.bf16.gmra.mxu0 %vm6205_vm12, %v14788_v0  ;;  %v17481_v25 = vcombine.low %v17479_v44, %v17480_v29  ;;  %v17486_v22 = vld [vmem:[#allocation46_spill] sm:$0xff]  ;;  %v17488_v7 = vld [vmem:[#allocation31_spill] sm:$0xff] }
 0x258   : > { %v4628_v3 = vcombine.low %v4620_v20, %v4627_v43  ;;  %v6680_v36 = vrot.slane %v17475_v40, %v11559_v8  ;;  %v6690_v60 = vrot.slane %v17478_v54, %v11559_v8  ;;  %v17482_v20 = vld [vmem:[#allocation39_spill] sm:$0xff]  ;;  %v17487_v41 = vcombine.low %v17485_v1, %v17486_v22  ;;  %v17490_v54 = vld [vmem:[#allocation49_spill] sm:$0xff] }
 0x259   : > { %v6741_v24 = vrot.slane %v17481_v25, %v11559_v8  ;;  %v17484_v43 = vcombine.low %v17482_v20, %v17483_v2  ;;  %v17489_v40 = vld [vmem:[#allocation47_spill] sm:$0xff]  ;;  %v14821_v29 = vpack.c.bf16 %v6154_v19, %v6137_v18  ;;  %v17494_v20 = vld [vmem:[#allocation56_spill] sm:$0xff] }
 0x25a   : > { %v6758_v48 = vrot.slane %v17487_v41, %v11559_v8  ;;  %v5171_v15 = vpack.c.bf16 %v4628_v3, %v4611_v57  ;;  %v6681_v39 = vcombine.low %v6673_v38, %v6680_v36  ;;  %v6698_v47 = vcombine.low %v6690_v60, %v17488_v7  ;;  %v17500_v36 = vld [vmem:[#allocation59_spill] sm:$0xff]  ;;  %v17501_v57 = vld [vmem:[#allocation4_spill] sm:$0xff] }
 0x25b   : > { %v6748_v62 = vrot.slane %v17484_v43, %v11559_v8  ;;  %v17491_v10 = vcombine.low %v17489_v40, %v17490_v54  ;;  %17492 = vst [vmem:[#allocation62_spill] sm:$0xff] %v14821_v29  ;;  %v17495_v2 = vcombine.low %v17493_v50, %v17494_v20  ;;  %v17496_v43 = vld [vmem:[#allocation60_spill] sm:$0xff]  ;;  %v17502_v60 = vcombine.low %v17500_v36, %v17501_v57  ;;  %v17507_v50 = vld [vmem:[#allocation35_spill] sm:$0xff]  ;;  %v17519_v36 = vld [vmem:[#allocation65_spill] sm:$0xff] }
 0x25c   : > { %v17498_v0 = vcombine.low %v17496_v43, %v17497_v61  ;;  %v14835_v3 = vpack.c.bf16 %v6698_v47, %v6681_v39  ;;  %v17505_v18 = vld [vmem:[#allocation32_spill] sm:$0xff]  ;;  %10906 = vmatmul.mubr.msk.bf16.gmra.mxu1 %vm6205_vm12, %v14821_v29  ;;  %v17511_v7 = vld [vmem:[#allocation11_spill] sm:$0xff]  ;;  %v17520_v57 = vld [vmem:[#allocation17_spill] sm:$0xff] }
 0x25d   : > { %v6765_v44 = vrot.slane %v17491_v10, %v11559_v8  ;;  %v6749_v25 = vcombine.low %v6741_v24, %v6748_v62  ;;  %v6809_v38 = vrot.slane %v17502_v60, %v11559_v8  ;;  %v17504_v10 = vld [vmem:[#allocation29_spill] sm:$0xff]  ;;  %v17508_v62 = vld [vmem:[#allocation30_spill] sm:$0xff]  ;;  %v17513_v54 = vld [vmem:[#allocation20_spill] sm:$0xff]  ;;  %v17521_v60 = vcombine.low %v17519_v36, %v17520_v57  ;;  %10911 = vmatprep.mubr.msk.bf16.mxu1 %vm6205_vm12, %v5171_v15 }
 0x25e   : > { %v14829_v1 = vpack.c.bf16 %v17498_v0, %v17495_v2  ;;  %17503 = vst [vmem:[#allocation74_spill] sm:$0xff] %v14835_v3  ;;  %v17506_v19 = vcombine.low %v17504_v10, %v17505_v18  ;;  %v17509_v41 = vcombine.low %v17507_v50, %v17508_v62  ;;  %v17510_v0 = vld [vmem:[#allocation7_spill] sm:$0xff]  ;;  %v17514_v39 = vld [vmem:[#allocation64_spill] sm:$0xff]  ;;  %11047 = vmatprep.mubr.msk.bf16.mxu0 %vm6205_vm12, %v14835_v3  ;;  %v17551_v29 = vld [vmem:[#allocation98_spill] sm:$0xff] }
 0x25f   : > { %v6766_v22 = vcombine.low %v6758_v48, %v6765_v44  ;;  %v17512_v40 = vcombine.low %v17510_v0, %v17511_v7  ;;  %v17515_v47 = vcombine.low %v17513_v54, %v17514_v39  ;;  %v17516_v44 = vld [vmem:[#allocation54_spill] sm:$0xff]  ;;  %v17517_v20 = vld [vmem:[#allocation12_spill] sm:$0xff]  ;;  %v6884_v10 = vrot.slane %v17521_v60, %v11559_v8  ;;  %v17522_v18 = vld [vmem:[#allocation67_spill] sm:$0xff] }
 0x260   : > { %17499 = vst [vmem:[#allocation115_spill] sm:$0xff] %v14829_v1  ;;  %v6816_v24 = vrot.slane %v17506_v19, %v11559_v8  ;;  %v6826_v61 = vrot.slane %v17509_v41, %v11559_v8  ;;  %v17518_v2 = vcombine.low %v17516_v44, %v17517_v20  ;;  %v17523_v19 = vld [vmem:[#allocation68_spill] sm:$0xff]  ;;  %v17525_v41 = vrot.slane %v14681_v30, 7  ;;  %v17528_v44 = vld [vmem:[#allocation69_spill] sm:$0xff]  ;;  %v17529_v20 = vld [vmem:[#allocation70_spill] sm:$0xff] }
 0x261   : > { %v14853_v48 = vpack.c.bf16 %v17515_v47, %v17512_v40  ;;  %v17524_v50 = vcombine.low %v17522_v18, %v17523_v19  ;;  %v14872_v7 = vpack.c.bf16 %v6766_v22, %v6749_v25  ;;  %v17527_v54 = vld [vmem:[#allocation8_spill] sm:$0xff]  ;;  %v17532_v60 = vld [vmem:[#allocation77_spill] sm:$0xff]  ;;  %v17534_v19 = vld [vmem:[#allocation83_spill] sm:$0xff] }
 0x262   : > { %v6877_v43 = vrot.slane %v17518_v2, %v11559_v8  ;;  %v7735_v0 = vrot.slane %v17525_v41, 2  ;;  %v6817_v40 = vcombine.low %v6809_v38, %v6816_v24  ;;  %v6834_v39 = vcombine.low %v6826_v61, %v17527_v54  ;;  %v17531_v57 = vld [vmem:[#allocation76_spill] sm:$0xff]  ;;  %v17539_v22 = vld [vmem:[#allocation81_spill] sm:$0xff] }
 0x263   : > { %v6894_v62 = vrot.slane %v17524_v50, %v11559_v8  ;;  %17526 = vst [vmem:[#allocation124_spill] sm:$0xff] %v14872_v7  ;;  %v17530_v2 = vcombine.low %v17528_v44, %v17529_v20  ;;  %v17533_v18 = vcombine.low %v17531_v57, %v17532_v60  ;;  %v17535_v50 = vld [vmem:[#allocation84_spill] sm:$0xff]  ;;  %v17544_v20 = vld [vmem:[#allocation89_spill] sm:$0xff] }
 0x264   : > { %v6885_v47 = vcombine.low %v6877_v43, %v6884_v10  ;;  %v17536_v15 = vcombine.low %v17534_v19, %v17535_v50  ;;  %v17538_v25 = vld [vmem:[#allocation80_spill] sm:$0xff]  ;;  %v14891_v61 = vpack.c.bf16 %v6834_v39, %v6817_v40  ;;  %v17542_v10 = vld [vmem:[#allocation86_spill] sm:$0xff]  ;;  %v3348_v40 = vld [vmem:[%s16782_s1 + $0x198] sm:$0xff] }
 0x265   : > { %v6901_v36 = vrot.slane %v17530_v2, %v11559_v8  ;;  %v17540_v38 = vcombine.low %v17538_v25, %v17539_v22  ;;  %v17541_v43 = vld [vmem:[#allocation88_spill] sm:$0xff]  ;;  %v17545_v2 = vld [vmem:[#allocation90_spill] sm:$0xff]  ;;  %v17553_v39 = vld [vmem:[#allocation41_spill] sm:$0xff] }
 0x266   : > { %v14885_v41 = vpack.c.bf16 %v17536_v15, %v17533_v18  ;;  %v17543_v54 = vcombine.low %v17541_v43, %v17542_v10  ;;  %v17546_v57 = vcombine.low %v17544_v20, %v17545_v2  ;;  %v17547_v19 = vld [vmem:[#allocation96_spill] sm:$0xff]  ;;  %v17548_v18 = vld [vmem:[#allocation97_spill] sm:$0xff]  ;;  %11048 = vmatmul.mubr.msk.bf16.vlgmr.msra.gmra.mxu0 %vm6205_vm12, %v17553_v39  ;;  %v17555_v43 = vld [vmem:[#allocation99_spill] sm:$0xff]  ;;  %v8532_v39 = vsel %vm6254_vm4, %v14509_v55, 0 }
 0x267   : > { %v6945_v24 = vrot.slane %v17540_v38, %v11559_v8  ;;  %v17549_v50 = vcombine.low %v17547_v19, %v17548_v18  ;;  %v17550_v15 = vld [vmem:[#allocation5_spill] sm:$0xff]  ;;  %v6902_v22 = vcombine.low %v6894_v62, %v6901_v36  ;;  %v17554_v38 = vld [vmem:[#allocation100_spill] sm:$0xff]  ;;  %v17558_v2 = vld [vmem:[#allocation102_spill] sm:$0xff]  ;;  %11051 = vmatprep.mubr.msk.bf16.mxu0 %vm6205_vm12, %v14872_v7  ;;  %11114 = vmatpush3.bf16.msra.mxu0 %v8532_v39 }
 0x268   : > { %17537 = vst [vmem:[#allocation10_spill] sm:$0xff] %v14885_v41  ;;  %v6952_v44 = vrot.slane %v17543_v54, %v11559_v8  ;;  %v6962_v60 = vrot.slane %v17546_v57, %v11559_v8  ;;  %v17552_v51 = vcombine.low %v17550_v15, %v17551_v29  ;;  %v17556_v10 = vcombine.low %v17554_v38, %v17555_v43  ;;  %v17557_v20 = vld [vmem:[#allocation101_spill] sm:$0xff]  ;;  %v17561_v19 = vld [vmem:[#allocation75_spill] sm:$0xff] }
 0x269   : > { %v17559_v57 = vcombine.low %v17557_v20, %v17558_v2  ;;  %v17563_v62 = vld [vmem:[#allocation95_spill] sm:$0xff]  ;;  %v17565_v38 = vld [vmem:[#allocation33_spill] sm:$0xff]  ;;  %v14936_v20 = vld [vmem:[%s16786_s5] ss:$0 sm:$0xff] }
 0x26a   : > { %v14907_v25 = vpack.c.bf16 %v17552_v51, %v17549_v50  ;;  %v7013_v54 = vrot.slane %v17556_v10, %v11559_v8  ;;  %v17560_v51 = vld [vmem:[#allocation82_spill] sm:$0xff]  ;;  %v6953_v15 = vcombine.low %v6945_v24, %v6952_v44  ;;  %v6970_v36 = vcombine.low %v6962_v60, %v17563_v62 }
 0x26b   : > { %v7020_v29 = vrot.slane %v17559_v57, %v11559_v8  ;;  %v17562_v18 = vcombine.low %v17560_v51, %v17561_v19  ;;  %v17566_v43 = vcombine.low %v17564_v11, %v17565_v38  ;;  %v17567_v2 = vld [vmem:[#allocation114_spill] sm:$0xff]  ;;  %v14940_v51 = vpack.c.bf16 %v6902_v22, %v6885_v47  ;;  %v17571_v47 = vld [vmem:[#allocation48_spill] sm:$0xff] }
 0x26c   : > { %v2351_v57 = vadd.f32 %v14936_v20, %v17567_v2  ;;  %v4109_v24 = vrot.slane %v3348_v40, %v11559_v8  ;;  %v14943_v44 = vpack.c.bf16 %v6970_v36, %v6953_v15  ;;  %v17569_v11 = vrot.slane %v14691_v28, 7  ;;  %10912 = vmatmul.mubr.msk.bf16.vlgmr.msra.gmra.mxu1 %vm6205_vm12, %v17571_v47  ;;  %v17575_v15 = vld [vmem:[#allocation109_spill] sm:$0xff]  ;;  %v17576_v36 = vld [vmem:[#allocation110_spill] sm:$0xff]  ;;  %v17578_v2 = vld [vmem:[#allocation51_spill] sm:$0xff] }
 0x26d   : > { %v7030_v50 = vrot.slane %v17562_v18, %v11559_v8  ;;  %v7037_v10 = vrot.slane %v17566_v43, %v11559_v8  ;;  %17568 = vst [vmem:[#allocation13_spill] sm:$0xff] %v14940_v51  ;;  %v7021_v19 = vcombine.low %v7013_v54, %v7020_v29  ;;  %v4102_v18 = vcombine.high %v3348_v40, %v3348_v40  ;;  %v14954_v43 = vld [vmem:[%s16787_s6 + $0x8] sm:$0x3]  ;;  %v17572_v54 = vld [vmem:[#allocation104_spill] sm:$0xff]  ;;  %v17573_v29 = vld [vmem:[#allocation105_spill] sm:$0xff] }
 0x26e   : > { %v2402_v62 = vmax.f32 %v2351_v57, 0.0  ;;  %v14949_v38 = vsel %vm12112_vm11, %v7735_v0, %v17569_v11  ;;  %17570 = vst [vmem:[#allocation15_spill] sm:$0xff] %v14954_v43  ;;  %v10232_v40 = vld.sshfl [vmem:[%s16782_s1 + $0x190] sm:$0x3 pattern:$0x76325410]  ;;  %v4117_v22 = vcombine.high %v4109_v24, %v4109_v24  ;;  %v17577_v0 = vcombine.low %v17575_v15, %v17576_v36  ;;  %10915 = vmatprep.mubr.msk.bf16.mxu1 %vm6205_vm12, %v17578_v2 }
 0x26f   : > { %v7038_v60 = vcombine.low %v7030_v50, %v7037_v10  ;;  %v17574_v50 = vcombine.low %v17572_v54, %v17573_v29  ;;  %v17579_v57 = vld [vmem:[#allocation118_spill] sm:$0xff]  ;;  %v17580_v54 = vrot.slane %v14691_v28, 7  ;;  %v4116_v15 = vrot.slane %v4102_v18, %v11559_v8  ;;  %11052 = vmatmul.mubr.msk.bf16.gmra.mxu0 %vm6205_vm12, %v14829_v1 }
 0x270   : > { %10944 = vmatpush3.bf16.msra.mxu1 %v17579_v57  ;;  %v3092_v47 = vcombine.high %v2402_v62, %v2402_v62  ;;  %v3099_v7 = vrot.slane %v2402_v62, %v11559_v8  ;;  %v17582_v62 = vcombine.low %v14679_v13, %v14681_v30  ;;  %v3349_v18 = vld [vmem:[%s16782_s1 + $0x1a0] sm:$0xff]  ;;  %11055 = vmatprep.mubr.msk.bf16.mxu0 %vm6205_vm12, %v14891_v61 }
 0x271   : > { %v14967_v10 = vpack.c.bf16 %v17577_v0, %v17574_v50  ;;  %v14972_v11 = vpack.c.bf16 %v7038_v60, %v7021_v19  ;;  %v7738_v29 = vrot.slane %v17580_v54, 2  ;;  %v17581_v50 = vld [vmem:[#allocation117_spill] sm:$0xff]  ;;  %11256 = vmatprep.subr.msk.bf16.mxu1 %vm6254_vm4, %v14954_v43  ;;  %v4126_v54 = vrot.slane %v3349_v18, %v11559_v8 }
 0x272   : > { %v2354_v36 = vadd.f32 %v14936_v20, %v17581_v50  ;;  %v3106_v19 = vrot.slane %v3092_v47, %v11559_v8  ;;  %v3107_v60 = vcombine.high %v3099_v7, %v3099_v7  ;;  %v4457_v0 = vmul.f32 %v10232_v40, %v3099_v7  ;;  %v17583_v47 = vld [vmem:[#allocation108_spill] sm:$0xff] }
 0x273   : > { %v14989_v55 = vrot.slane %v17582_v62, %v11559_v8  ;;  %v17584_v7 = vcombine.low %v17583_v47, %v14052_v45  ;;  %v17585_v50 = vld [vmem:[#allocation112_spill] sm:$0xff] }
 0x274   : > { %v2403_v57 = vmax.f32 %v2354_v36, 0.0  ;;  %v17586_v62 = vcombine.low %v17585_v50, %v14121_v42  ;;  %v3108_v39 = vcombine.high %v3106_v19, %v3106_v19  ;;  %v15007_v3 = vmul.f32 %v4109_v24, %v3107_v60  ;;  %v17588_v60 = vld [vmem:[#allocation37_spill] sm:$0xff] }
 0x275   : > { %v7081_v40 = vrot.slane %v17584_v7, %v11559_v8  ;;  %v15009_v1 = vmul.f32 %v4117_v22, %v3106_v19  ;;  %v7739_v36 = vrot.slane %v4457_v0, 7  ;;  %v7997_v43 = vcombine.low %v14691_v28, %v4457_v0  ;;  %10916 = vmatmul.mubr.msk.bf16.gmra.mxu1 %vm6205_vm12, %v17588_v60  ;;  %v17589_v0 = vld [vmem:[#allocation63_spill] sm:$0xff]  ;;  %v17598_v28 = vld [vmem:[#allocation73_spill] sm:$0xff] }
 0x276   : > { %v7088_v2 = vrot.slane %v17586_v62, %v11559_v8  ;;  %17587 = vst [vmem:[#allocation16_spill] sm:$0xff] %v15007_v3  ;;  %v3109_v9 = vcombine.high %v2403_v57, %v2403_v57  ;;  %v3116_v45 = vrot.slane %v2403_v57, %v11559_v8  ;;  %v15013_v7 = vmul.f32 %v4116_v15, %v3108_v39 }
 0x277   : > { %v15017_v42 = vsel %vm12112_vm11, %v7738_v29, %v7739_v36  ;;  %v8225_v50 = vcombine.low %v15007_v3, %v15009_v1  ;;  %v4118_v24 = vcombine.high %v4116_v15, %v4116_v15  ;;  %v8011_v22 = vrot.slane %v7997_v43, %v11559_v8  ;;  %10919 = vmatprep.mubr.msk.bf16.mxu1 %vm6205_vm12, %v17589_v0  ;;  %v17606_v3 = vld [vmem:[#allocation122_spill] sm:$0xff] }
 0x278   : > { %v7089_v47 = vcombine.low %v7081_v40, %v7088_v2  ;;  %v3123_v2 = vrot.slane %v3109_v9, %v11559_v8  ;;  %v4134_v19 = vcombine.high %v4126_v54, %v4126_v54  ;;  %v8727_v29 = vcombine.low %v15009_v1, %v15013_v7  ;;  %11056 = vmatmul.mubr.msk.bf16.gmra.mxu0 %vm6205_vm12, %v14853_v48 }
 0x279   : > { %v3124_v57 = vcombine.high %v3116_v45, %v3116_v45  ;;  %v4119_v40 = vcombine.high %v3349_v18, %v3349_v18  ;;  %v8012_v15 = vcombine.low %v14989_v55, %v8011_v22  ;;  %v15032_v39 = vmul.f32 %v4118_v24, %v3116_v45  ;;  %11059 = vmatprep.mubr.msk.bf16.mxu0 %vm6205_vm12, %v14940_v51  ;;  %v17592_v45 = vld [vmem:[#allocation116_spill] sm:$0xff] }
 0x27a   : > { %v3125_v62 = vcombine.high %v3123_v2, %v3123_v2  ;;  %v15038_v9 = vmul.f32 %v4134_v19, %v3123_v2  ;;  %v15043_v36 = vrot.slane %v8225_v50, %v11559_v8  ;;  %v17593_v24 = vcombine.low %v14210_v37, %v17592_v45 }
 0x27b   : > { %v15036_v43 = vmul.f32 %v4126_v54, %v3124_v57  ;;  %v4133_v18 = vrot.slane %v4119_v40, %v11559_v8  ;;  %v8226_v55 = vcombine.low %v15013_v7, %v15032_v39  ;;  %v15053_v54 = vrot.slane %v8727_v29, %v11559_v8  ;;  %v17595_v40 = vld [vmem:[#allocation50_spill] sm:$0xff]  ;;  %v17596_v29 = vld [vmem:[#allocation113_spill] sm:$0xff] }
 0x27c   : > { %17590 = vst [vmem:[#allocation18_spill] sm:$0xff] %v15038_v9  ;;  %17591 = vst [vmem:[#allocation19_spill] sm:$0xff] %v15043_v36  ;;  %v7105_v22 = vrot.slane %v17593_v24, %v11559_v8  ;;  %v17597_v45 = vcombine.low %v14140_v32, %v17596_v29  ;;  %v17600_v32 = vld [vmem:[#allocation22_spill] sm:$0xff] }
 0x27d   : > { %v8242_v2 = vcombine.low %v15036_v43, %v15038_v9  ;;  %v8728_v50 = vcombine.low %v15032_v39, %v15036_v43  ;;  %v15059_v19 = vmul.f32 %v4133_v18, %v3125_v62  ;;  %v15062_v57 = vrot.slane %v8226_v55, %v11559_v8  ;;  %10920 = vmatmul.mubr.msk.bf16.gmra.mxu1 %vm6205_vm12, %v17595_v40  ;;  %v17603_v62 = vld [vmem:[#allocation120_spill] sm:$0xff] }
 0x27e   : > { %v7098_v24 = vrot.slane %v17597_v45, %v11559_v8  ;;  %10923 = vmatprep.mubr.msk.bf16.mxu1 %vm6205_vm12, %v17598_v28  ;;  %v17601_v29 = vcombine.low %v17466_v6, %v17600_v32  ;;  %v17610_v6 = vld [vmem:[#allocation9_spill] sm:$0xff] }
 0x27f   : > { %17594 = vst [vmem:[#allocation21_spill] sm:$0xff] %v15062_v57  ;;  %v15067_v37 = vrot.slane %v8728_v50, %v11559_v8  ;;  %v8744_v55 = vcombine.low %v15038_v9, %v15059_v19  ;;  %v17599_v50 = vld [vmem:[#allocation119_spill] sm:$0xff]  ;;  %v17604_v57 = vld [vmem:[#allocation121_spill] sm:$0xff] }
 0x280   : > { %v7106_v0 = vcombine.low %v7098_v24, %v7105_v22  ;;  %v2359_v60 = vadd.f32 %v14936_v20, %v17599_v50  ;;  %v6663_v45 = vrot.slane %v17601_v29, %v11559_v8  ;;  %11060 = vmatmul.mubr.msk.bf16.gmra.mxu0 %vm6205_vm12, %v14885_v41  ;;  %v17605_v36 = vcombine.low %v17603_v62, %v17604_v57  ;;  %v17607_v9 = vld [vmem:[#allocation123_spill] sm:$0xff]  ;;  %v17616_v57 = vld [vmem:[#allocation92_spill] sm:$0xff] }
 0x281   : > { %v17608_v40 = vcombine.low %v17606_v3, %v17607_v9  ;;  %11063 = vmatprep.mubr.msk.bf16.mxu0 %vm6205_vm12, %v14943_v44  ;;  %v4135_v24 = vcombine.high %v4133_v18, %v4133_v18  ;;  %v17611_v50 = vcombine.low %v17610_v6, %v17459_v14  ;;  %v17613_v3 = vcombine.low %v17463_v27, %v17465_v52  ;;  %v17617_v62 = vld [vmem:[#allocation72_spill] sm:$0xff]  ;;  %v17618_v6 = vld [vmem:[#allocation57_spill] sm:$0xff] }
 0x282   : > { %v15089_v28 = vpack.c.bf16 %v7106_v0, %v7089_v47  ;;  %v2404_v20 = vmax.f32 %v2359_v60, 0.0  ;;  %v17612_v47 = vcombine.low %v17460_v31, %v17462_v63  ;;  %v10233_v63 = vld.sshfl [vmem:[%s16782_s1 + $0x1a8] sm:$0x3 pattern:$0x76325410] }
 0x283   : > { %v15097_v22 = vpack.c.bf16 %v17608_v40, %v17605_v36  ;;  %v6639_v32 = vrot.slane %v17611_v50, %v11559_v8  ;;  %v6656_v9 = vrot.slane %v17613_v3, %v11559_v8  ;;  %v17614_v36 = vcombine.low %v14687_v33, %v14705_v56 }
 0x284   : > { %17602 = vst [vmem:[#allocation23_spill] sm:$0xff] %v15089_v28  ;;  %v6646_v0 = vrot.slane %v17612_v47, %v11559_v8  ;;  %v3132_v18 = vrot.slane %v2404_v20, %v11559_v8  ;;  %v15129_v56 = vrot.slane %v8242_v2, %v11559_v8  ;;  %v7159_v20 = vcombine.low %v14525_v5, %v14551_v12  ;;  %v17619_v47 = vld [vmem:[#allocation14_spill] sm:$0xff] }
 0x285   : > { %17609 = vst [vmem:[#allocation24_spill] sm:$0xff] %v15097_v22  ;;  %v15116_v60 = vpack.c.bf16 %v8012_v15, %v17614_v36  ;;  %10924 = vmatmul.mubr.msk.bf16.gmra.mxu1 %vm6205_vm12, %v17616_v57  ;;  %v6664_v40 = vcombine.low %v6656_v9, %v6663_v45  ;;  %v15143_v45 = vrot.slane %v8744_v55, %v11559_v8  ;;  %v7730_v3 = vrot.slane %v14679_v13, 7  ;;  %v17620_v9 = vld [vmem:[#allocation107_spill] sm:$0xff] }
 0x286   : > { %v6647_v14 = vcombine.low %v6639_v32, %v6646_v0  ;;  %10927 = vmatprep.mubr.msk.bf16.mxu1 %vm6205_vm12, %v17617_v62  ;;  %v3133_v31 = vcombine.high %v3132_v18, %v3132_v18  ;;  %v15126_v27 = vmul.f32 %v4135_v24, %v3132_v18  ;;  %v7142_v32 = vcombine.low %v14442_v16, %v14444_v46 }
 0x287   : > { %17615 = vst [vmem:[#allocation25_spill] sm:$0xff] %v15116_v60  ;;  %v7158_v55 = vcombine.low %v14514_v26, %v14523_v23  ;;  %v7141_v12 = vcombine.low %v17448_v59, %v14431_v17  ;;  %v7173_v0 = vrot.slane %v7159_v20, %v11559_v8  ;;  %v17621_v36 = vrot.slane %v17620_v9, 7  ;;  %v17634_v9 = vld [vmem:[#allocation44_spill] sm:$0xff] }
 0x288   : > { %v7207_v33 = vpack.c.bf16 %v6664_v40, %v6647_v14  ;;  %v8243_v52 = vcombine.low %v15059_v19, %v15126_v27  ;;  %11064 = vmatmul.mubr.msk.bf16.gmra.mxu0 %vm6205_vm12, %v14907_v25  ;;  %v15135_v15 = vmul.f32 %v10233_v63, %v3133_v31  ;;  %v7156_v46 = vrot.slane %v7142_v32, %v11559_v8  ;;  %v17623_v14 = vld [vmem:[#allocation52_spill] sm:$0xff]  ;;  %v17624_v40 = vld [vmem:[#allocation87_spill] sm:$0xff] }
 0x289   : > { %11067 = vmatprep.mubr.msk.bf16.mxu0 %vm6205_vm12, %v14972_v11  ;;  %v7166_v16 = vrot.slane %v7158_v55, %v11559_v8  ;;  %v7149_v26 = vrot.slane %v7141_v12, %v11559_v8  ;;  %v7723_v17 = vrot.slane %v17621_v36, 2  ;;  %v17622_v59 = vrot.slane %v14671_v49, 7  ;;  %v17635_v36 = vld [vmem:[#allocation15_spill] sm:$0xff] }
 0x28a   : > { %v15140_v29 = vrot.slane %v8243_v52, %v11559_v8  ;;  %v8745_v2 = vcombine.low %v15126_v27, %v15135_v15  ;;  %v7732_v13 = vrot.slane %v7730_v3, 2  ;;  %v17626_v52 = vrot.slane %v14561_v4, 7 }
 0x28b   : > { %v7174_v23 = vcombine.low %v7166_v16, %v7173_v0  ;;  %v7729_v18 = vrot.slane %v17622_v59, 2  ;;  %v7157_v31 = vcombine.low %v7149_v26, %v7156_v46  ;;  %v17627_v20 = vrot.slane %v14681_v30, 7  ;;  %v17630_v26 = vld [vmem:[#allocation111_spill] sm:$0xff] }
 0x28c   : > { %v15154_v50 = vrot.slane %v8745_v2, %v11559_v8  ;;  %v7725_v2 = vsel %vm12112_vm11, %v7723_v17, %v17626_v52  ;;  %v17628_v4 = vcombine.low %v14599_v35, %v14619_v34  ;;  %v17631_v34 = vld [vmem:[#allocation6_spill] sm:$0xff]  ;;  %v7784_v17 = vsel %vm6254_vm4, %v17635_v36, 0  ;;  %v15232_v59 = vld [vmem:[%s16787_s6 + $0xc] sm:$0x3]  ;;  %v17640_v52 = vld [vmem:[#allocation124_spill] sm:$0xff] }
 0x28d   : > { %10928 = vmatmul.mubr.msk.bf16.gmra.mxu1 %vm6205_vm12, %v17618_v6  ;;  %v15183_v63 = vpack.c.bf16 %v7174_v23, %v7157_v31  ;;  %v7731_v49 = vsel %vm12112_vm11, %v7729_v18, %v7730_v3  ;;  %v7734_v32 = vsel %vm12112_vm11, %v7732_v13, %v17627_v20  ;;  %v7742_v55 = vcombine.low %v7725_v2, %v14699_v58  ;;  %v17636_v18 = vld [vmem:[#allocation74_spill] sm:$0xff]  ;;  %v17637_v13 = vld [vmem:[#allocation41_spill] sm:$0xff]  ;;  %v17639_v31 = vld [vmem:[#allocation91_spill] sm:$0xff] }
 0x28e   : > { %10931 = vmatprep.mubr.msk.bf16.mxu1 %vm6205_vm12, %v17619_v47  ;;  %v7749_v12 = vrot.slane %v17628_v4, %v11559_v8  ;;  %v7758_v0 = vcombine.low %v7731_v49, %v7734_v32  ;;  %v17629_v3 = vcombine.low %v14949_v38, %v15017_v42  ;;  %v17632_v38 = vld [vmem:[#allocation93_spill] sm:$0xff]  ;;  %v17633_v42 = vld [vmem:[#allocation42_spill] sm:$0xff]  ;;  %v17641_v2 = vld [vmem:[#allocation115_spill] sm:$0xff]  ;;  %v8466_v4 = vrot.slane %v15009_v1, 7 }
 0x28f   : > { %17625 = vst [vmem:[#allocation26_spill] sm:$0xff] %v15183_v63  ;;  %v7756_v30 = vrot.slane %v7742_v55, %v11559_v8  ;;  %v17642_v49 = vld [vmem:[#allocation34_spill] sm:$0xff]  ;;  %v17643_v20 = vld [vmem:[#allocation79_spill] sm:$0xff] }
 0x290   : > { %11068 = vmatmul.mubr.msk.bf16.gmra.mxu0 %vm6205_vm12, %v14967_v10  ;;  %v7773_v46 = vrot.slane %v17629_v3, %v11559_v8  ;;  %v7766_v16 = vrot.slane %v7758_v0, %v11559_v8  ;;  %v17644_v32 = vld [vmem:[#allocation58_spill] sm:$0xff]  ;;  %v17645_v55 = vld [vmem:[#allocation71_spill] sm:$0xff]  ;;  %v8472_v0 = vrot.slane %v15032_v39, 7  ;;  %v8475_v3 = vrot.slane %v15036_v43, 7 }
 0x291   : > { %11071 = vmatprep.mubr.msk.bf16.mxu0 %vm6205_vm12, %v15089_v28  ;;  %v7757_v58 = vcombine.low %v7749_v12, %v7756_v30  ;;  %v8469_v12 = vrot.slane %v15013_v7, 7  ;;  %v8468_v36 = vrot.slane %v8466_v4, 2 }
 0x292   : > { %v7774_v23 = vcombine.low %v7766_v16, %v7773_v46  ;;  %v17646_v46 = vld [vmem:[#allocation18_spill] sm:$0xff]  ;;  %v8481_v16 = vrot.slane %v15059_v19, 7  ;;  %v8477_v39 = vrot.slane %v8475_v3, 2 }
 0x293   : > { %v8478_v30 = vrot.slane %v17646_v46, 7  ;;  %v8471_v7 = vrot.slane %v8469_v12, 2  ;;  %v8487_v46 = vrot.slane %v15135_v15, 7  ;;  %v17649_v19 = vld [vmem:[#allocation66_spill] sm:$0xff] }
 0x294   : > { %v15214_v35 = vpack.c.bf16 %v7774_v23, %v7757_v58  ;;  %v8484_v58 = vrot.slane %v15126_v27, 7  ;;  %v17647_v23 = vld [vmem:[#allocation16_spill] sm:$0xff]  ;;  %v8483_v5 = vrot.slane %v8481_v16, 2 }
 0x295   : > { %10932 = vmatmul.mubr.msk.bf16.gmra.mxu1 %vm6205_vm12, %v17623_v14  ;;  %v10369_v1 = vrot.slane %v17647_v23, 9  ;;  %v8480_v43 = vrot.slane %v8478_v30, 2  ;;  %v8470_v23 = vsel %vm12112_vm11, %v8468_v36, %v8469_v12  ;;  %v8479_v15 = vsel %vm12112_vm11, %v8477_v39, %v8478_v30  ;;  %v17651_v30 = vld [vmem:[#allocation106_spill] sm:$0xff] }
 0x296   : > { %10935 = vmatprep.mubr.msk.bf16.mxu1 %vm6205_vm12, %v17624_v40  ;;  %v8486_v24 = vrot.slane %v8484_v58, 2 }
 0x297   : > { %v8467_v27 = vsel %vm12112_vm11, %v10369_v1, %v8466_v4  ;;  %v8485_v4 = vsel %vm12112_vm11, %v8483_v5, %v8484_v58  ;;  %v17652_v5 = vld [vmem:[#allocation62_spill] sm:$0xff] }
 0x298   : > { %11072 = vmatmul.mubr.msk.bf16.gmra.mxu0 %vm6205_vm12, %v15097_v22  ;;  %v8488_v12 = vsel %vm12112_vm11, %v8486_v24, %v8487_v46 }
 0x299   : > { %11075 = vmatprep.mubr.msk.bf16.mxu0 %vm6205_vm12, %v15183_v63  ;;  %v8507_v36 = vcombine.low %v8485_v4, %v8488_v12  ;;  %v17655_v4 = vld [vmem:[#allocation21_spill] sm:$0xff] }
 0x29d   : > { %10936 = vmatmul.mubr.msk.bf16.gmra.mxu1 %vm6205_vm12, %v17630_v26 }
 0x29e   : > { %10939 = vmatprep.mubr.msk.bf16.mxu1 %vm6205_vm12, %v14637_v53 }
 0x2a0   : > { %11076 = vmatmul.mubr.msk.bf16.gmra.mxu0 %vm6205_vm12, %v15116_v60  ;;  %v8473_v60 = vsel %vm12112_vm11, %v8471_v7, %v8472_v0  ;;  %v15297_v7 = vpop.f32.mrf.mxu1 }
 0x2a1   : > { %11115 = vmatprep.mubr.msk.bf16.mxu0 %vm6205_vm12, %v17631_v34 }
 0x2a5   : > { %10940 = vmatmul.mubr.msk.bf16.gmra.mxu1 %vm6205_vm12, %v17632_v38 }
 0x2a6   : > { %10945 = vmatprep.mubr.msk.bf16.mxu1 %vm6205_vm12, %v7207_v33  ;;  %v17638_v33 = vld [vmem:[#allocation53_spill] sm:$0xff] }
 0x2a8   : > { %11116 = vmatmul.mubr.msk.bf16.vlgmr.msra.gmra.mxu0 %vm6205_vm12, %v17633_v42 }
 0x2a9   : > { %11119 = vmatprep.mubr.msk.bf16.mxu0 %vm6205_vm12, %v17634_v9 }
 0x2ad   : > { %10946 = vmatmul.mubr.msk.bf16.vlgmr.msra.gmra.mxu1 %vm6205_vm12, %v17636_v18  ;;  %v17648_v18 = vld [vmem:[#allocation85_spill] sm:$0xff] }
 0x2ae   : > { %10949 = vmatprep.mubr.msk.bf16.mxu1 %vm6205_vm12, %v17637_v13  ;;  %11012 = vmatpush3.bf16.msra.mxu1 %v7784_v17  ;;  %v8474_v17 = vrot.slane %v8472_v0, 2  ;;  %v8489_v0 = vcombine.low %v8467_v27, %v8470_v23  ;;  %v17653_v23 = vld [vmem:[#allocation43_spill] sm:$0xff] }
 0x2af   : > { %11258 = vmatprep.subr.msk.bf16.mxu1 %vm6254_vm4, %v15232_v59 }
 0x2b0   : > { %11120 = vmatmul.mubr.msk.bf16.gmra.mxu0 %vm6205_vm12, %v17638_v33  ;;  %v8497_v21 = vrot.slane %v8489_v0, %v11559_v8  ;;  %v17657_v0 = vcombine.low %v15129_v56, %v15140_v29 }
 0x2b1   : > { %11123 = vmatprep.mubr.msk.bf16.mxu0 %vm6205_vm12, %v17639_v31 }
 0x2b5   : > { %10950 = vmatmul.mubr.msk.bf16.gmra.mxu1 %vm6205_vm12, %v17640_v52 }
 0x2b6   : > { %10953 = vmatprep.mubr.msk.bf16.mxu1 %vm6205_vm12, %v17641_v2 }
 0x2b8   : > { %11124 = vmatmul.mubr.msk.bf16.gmra.mxu0 %vm6205_vm12, %v17642_v49 }
 0x2b9   : > { %11127 = vmatprep.mubr.msk.bf16.mxu0 %vm6205_vm12, %v17643_v20 }
 0x2bd   : > { %10954 = vmatmul.mubr.msk.bf16.gmra.mxu1 %vm6205_vm12, %v14891_v61 }
 0x2be   : > { %10957 = vmatprep.mubr.msk.bf16.mxu1 %vm6205_vm12, %v14853_v48 }
 0x2c0   : > { %11128 = vmatmul.mubr.msk.bf16.gmra.mxu0 %vm6205_vm12, %v17644_v32 }
 0x2c1   : > { %11131 = vmatprep.mubr.msk.bf16.mxu0 %vm6205_vm12, %v17645_v55 }
 0x2c5   : > { %10958 = vmatmul.mubr.msk.bf16.gmra.mxu1 %vm6205_vm12, %v14940_v51  ;;  %v8482_v51 = vsel %vm12112_vm11, %v8480_v43, %v8481_v16  ;;  %v15303_v16 = vpop.f32.mrf.mxu1 }
 0x2c6   : > { %10961 = vmatprep.mubr.msk.bf16.mxu1 %vm6205_vm12, %v14885_v41  ;;  %v8476_v41 = vsel %vm12112_vm11, %v8474_v17, %v8475_v3  ;;  %v8506_v1 = vcombine.low %v8479_v15, %v8482_v51  ;;  %v17650_v17 = vld [vmem:[#allocation103_spill] sm:$0xff]  ;;  %v8521_v51 = vrot.slane %v8507_v36, %v11559_v8 }
 0x2c7   : > { %v8490_v3 = vcombine.low %v8473_v60, %v8476_v41  ;;  %v15313_v60 = vpop.f32.mrf.mxu1  ;;  %v17654_v15 = vld [vmem:[#allocation19_spill] sm:$0xff] }
 0x2c8   : > { %11132 = vmatmul.mubr.msk.bf16.gmra.mxu0 %vm6205_vm12, %v17648_v18  ;;  %v8514_v41 = vrot.slane %v8506_v1, %v11559_v8  ;;  %v17656_v12 = vcombine.low %v17654_v15, %v17655_v4 }
 0x2c9   : > { %11135 = vmatprep.mubr.msk.bf16.mxu0 %vm6205_vm12, %v17649_v19  ;;  %v8504_v24 = vrot.slane %v8490_v3, %v11559_v8  ;;  %v15319_v43 = vpop.f32.mrf.mxu1 }
 0x2ca   : > { %v8522_v39 = vcombine.low %v8514_v41, %v8521_v51  ;;  %v15340_v3 = vpack.c.bf16 %v17657_v0, %v17656_v12  ;;  %v15351_v41 = vpop.f32.mrf.mxu0 }
 0x2cb   : > { %v8505_v58 = vcombine.low %v8497_v21, %v8504_v24  ;;  %v15325_v8 = vpop.f32.mrf.mxu1  ;;  %v8268_v21 = vsel %vm6254_vm4, %v15232_v59, 0  ;;  %v10387_v24 = vld [vmem:[%s16787_s6 + $0x10] sm:$0x3] }
 0x2cc   : > { %v15360_v56 = vpop.f32.mrf.mxu0 }
 0x2cd   : > { %10962 = vmatmul.mubr.msk.bf16.gmra.mxu1 %vm6205_vm12, %v14943_v44  ;;  %v8525_v46 = vpack.c.bf16 %v8522_v39, %v8505_v58  ;;  %v15328_v27 = vpop.f32.mrf.mxu1 }
 0x2ce   : > { %10965 = vmatprep.mubr.msk.bf16.mxu1 %vm6205_vm12, %v14907_v25  ;;  %v15364_v59 = vpop.f32.mrf.mxu0 }
 0x2cf   : > { %v15342_v1 = vpop.f32.mrf.mxu1 }
 0x2d0   : > { %11136 = vmatmul.mubr.msk.bf16.gmra.mxu0 %vm6205_vm12, %v17650_v17 }
 0x2d1   : > { %11139 = vmatprep.mubr.msk.bf16.mxu0 %vm6205_vm12, %v17651_v30  ;;  %v15344_v36 = vpop.f32.mrf.mxu1 }
 0x2d3   : > { %v15353_v51 = vpop.f32.mrf.mxu1 }
 0x2d5   : > { %10966 = vmatmul.mubr.msk.bf16.gmra.mxu1 %vm6205_vm12, %v14972_v11  ;;  %v15362_v29 = vpop.f32.mrf.mxu1 }
 0x2d6   : > { %10969 = vmatprep.mubr.msk.bf16.mxu1 %vm6205_vm12, %v14967_v10 }
 0x2d7   : > { %v15366_v58 = vpop.f32.mrf.mxu1 }
 0x2d8   : > { %11140 = vmatmul.mubr.msk.bf16.gmra.mxu0 %vm6205_vm12, %v17652_v5 }
 0x2d9   : > { %11143 = vmatprep.mubr.msk.bf16.mxu0 %vm6205_vm12, %v15214_v35 }
 0x2dd   : > { %10970 = vmatmul.mubr.msk.bf16.gmra.mxu1 %vm6205_vm12, %v15089_v28 }
 0x2de   : > { %10973 = vmatprep.mubr.msk.bf16.mxu1 %vm6205_vm12, %v15097_v22 }
 0x2e0   : > { %11144 = vmatmul.mubr.msk.bf16.gmra.mxu0 %vm6205_vm12, %v8525_v46 }
 0x2e5   : > { %10974 = vmatmul.mubr.msk.bf16.gmra.mxu1 %vm6205_vm12, %v15183_v63 }
 0x2e6   : > { %11013 = vmatprep.mubr.msk.bf16.mxu1 %vm6205_vm12, %v17653_v23 }
 0x2ed   : > { %11014 = vmatmul.mubr.msk.bf16.vlgmr.msra.gmra.mxu1 %vm6205_vm12, %v17631_v34  ;;  %v15372_v34 = vpop.f32.mrf.mxu0 }
 0x2ee   : > { %11017 = vmatprep.mubr.msk.bf16.mxu1 %vm6205_vm12, %v17633_v42  ;;  %11080 = vmatpush3.bf16.msra.mxu1 %v8268_v21  ;;  %v15374_v42 = vpop.f32.mrf.mxu1 }
 0x2ef   : > { %11260 = vmatprep.subr.msk.bf16.mxu1 %vm6254_vm4, %v10387_v24  ;;  %v15378_v46 = vpop.f32.mrf.mxu0 }
 0x2f0   : > { %v15376_v39 = vpop.f32.mrf.mxu1  ;;  %17658 = vst [vmem:[#allocation27_spill] sm:$0xff] %v15378_v46 }
 0x2f2   : > { %v15384_v23 = vpop.f32.mrf.mxu1 }
 0x2f4   : > { %v15388_v15 = vpop.f32.mrf.mxu1 }
 0x2f5   : > { %11018 = vmatmul.mubr.msk.bf16.gmra.mxu1 %vm6205_vm12, %v17634_v9  ;;  %v15386_v9 = vpop.f32.mrf.mxu0 }
 0x2f6   : > { %11021 = vmatprep.mubr.msk.bf16.mxu1 %vm6205_vm12, %v17638_v33  ;;  %17659 = vst [vmem:[#allocation28_spill] sm:$0xff] %v15386_v9  ;;  %v15396_v4 = vpop.f32.mrf.mxu1 }
 0x2f7   : > { %v15390_v33 = vpop.f32.mrf.mxu0  ;;  %17661 = vst [vmem:[#allocation36_spill] sm:$0xff] %v15396_v4 }
 0x2f8   : > { %17660 = vst [vmem:[#allocation38_spill] sm:$0xff] %v15390_v33  ;;  %v15400_v12 = vpop.f32.mrf.mxu1 }
 0x2f9   : > { %17663 = vst [vmem:[#allocation40_spill] sm:$0xff] %v15400_v12 }
 0x2fa   : > { %v15404_v0 = vpop.f32.mrf.mxu1 }
 0x2fb   : > { %17665 = vst [vmem:[#allocation46_spill] sm:$0xff] %v15404_v0 }
 0x2fc   : > { %v15412_v21 = vpop.f32.mrf.mxu1 }
 0x2fd   : > { %11022 = vmatmul.mubr.msk.bf16.gmra.mxu1 %vm6205_vm12, %v17639_v31  ;;  %v15398_v31 = vpop.f32.mrf.mxu0  ;;  %17667 = vst [vmem:[#allocation47_spill] sm:$0xff] %v15412_v21 }
 0x2fe   : > { %11025 = vmatprep.mubr.msk.bf16.mxu1 %vm6205_vm12, %v17642_v49  ;;  %17662 = vst [vmem:[#allocation39_spill] sm:$0xff] %v15398_v31  ;;  %v15416_v33 = vpop.f32.mrf.mxu1 }
 0x2ff   : > { %v15402_v49 = vpop.f32.mrf.mxu0  ;;  %17669 = vst [vmem:[#allocation55_spill] sm:$0xff] %v15416_v33 }
 0x300   : > { %17664 = vst [vmem:[#allocation45_spill] sm:$0xff] %v15402_v49 }
 0x305   : > { %11026 = vmatmul.mubr.msk.bf16.gmra.mxu1 %vm6205_vm12, %v17643_v20  ;;  %v15410_v20 = vpop.f32.mrf.mxu0 }
 0x306   : > { %11029 = vmatprep.mubr.msk.bf16.mxu1 %vm6205_vm12, %v17644_v32  ;;  %17666 = vst [vmem:[#allocation31_spill] sm:$0xff] %v15410_v20 }
 0x307   : > { %v15414_v32 = vpop.f32.mrf.mxu0 }
 0x308   : > { %17668 = vst [vmem:[#allocation49_spill] sm:$0xff] %v15414_v32 }
 0x309   : > { %v15422_v49 = vpop.f32.mrf.mxu0 }
 0x30a   : > { %17670 = vst [vmem:[#allocation56_spill] sm:$0xff] %v15422_v49 }
 0x30b   : > { %v15426_v31 = vpop.f32.mrf.mxu0 }
 0x30c   : > { %17672 = vst [vmem:[#allocation61_spill] sm:$0xff] %v15426_v31 }
 0x30d   : > { %11030 = vmatmul.mubr.msk.bf16.gmra.mxu1 %vm6205_vm12, %v17645_v55  ;;  %v15424_v55 = vpop.f32.mrf.mxu1  ;;  %v15430_v20 = vpop.f32.mrf.mxu0 }
 0x30e   : > { %11033 = vmatprep.mubr.msk.bf16.mxu1 %vm6205_vm12, %v17648_v18  ;;  %17671 = vst [vmem:[#allocation60_spill] sm:$0xff] %v15424_v55  ;;  %17674 = vst [vmem:[#allocation4_spill] sm:$0xff] %v15430_v20  ;;  %v17678_v20 = vld [vmem:[#allocation51_spill] sm:$0xff] }
 0x30f   : > { %v15428_v18 = vpop.f32.mrf.mxu1  ;;  %v15438_v32 = vpop.f32.mrf.mxu0 }
 0x310   : > { %17673 = vst [vmem:[#allocation59_spill] sm:$0xff] %v15428_v18  ;;  %17676 = vst [vmem:[#allocation32_spill] sm:$0xff] %v15438_v32 }
 0x311   : > { %v15442_v49 = vpop.f32.mrf.mxu0 }
 0x312   : > { %17677 = vst [vmem:[#allocation35_spill] sm:$0xff] %v15442_v49 }
 0x313   : > { %v15458_v32 = vpop.f32.mrf.mxu0 }
 0x314   : > { %17682 = vst [vmem:[#allocation7_spill] sm:$0xff] %v15458_v32 }
 0x315   : > { %11034 = vmatmul.mubr.msk.bf16.gmra.mxu1 %vm6205_vm12, %v17649_v19  ;;  %v15436_v19 = vpop.f32.mrf.mxu1 }
 0x316   : > { %11037 = vmatprep.mubr.msk.bf16.mxu1 %vm6205_vm12, %v17650_v17  ;;  %17675 = vst [vmem:[#allocation29_spill] sm:$0xff] %v15436_v19  ;;  %v15464_v19 = vpop.f32.mrf.mxu0 }
 0x317   : > { %v15440_v17 = vpop.f32.mrf.mxu1  ;;  %17683 = vst [vmem:[#allocation11_spill] sm:$0xff] %v15464_v19 }
 0x31c   : > { %v15444_v9 = vpop.f32.mrf.mxu1 }
 0x31d   : > { %11038 = vmatmul.mubr.msk.bf16.gmra.mxu1 %vm6205_vm12, %v17651_v30  ;;  %v17679_v30 = vcombine.low %v15053_v54, %v15067_v37  ;;  %v17684_v54 = vld [vmem:[#allocation37_spill] sm:$0xff]  ;;  %v17685_v37 = vld [vmem:[#allocation63_spill] sm:$0xff] }
 0x31e   : > { %11041 = vmatprep.mubr.msk.bf16.mxu1 %vm6205_vm12, %v17652_v5  ;;  %v17680_v5 = vcombine.low %v15143_v45, %v15154_v50  ;;  %v15460_v46 = vpop.f32.mrf.mxu1  ;;  %v15475_v45 = vpop.f32.mrf.mxu0 }
 0x31f   : > { %17686 = vst [vmem:[#allocation20_spill] sm:$0xff] %v15475_v45 }
 0x320   : > { %v15456_v31 = vpack.c.bf16 %v17680_v5, %v17679_v30  ;;  %v15462_v49 = vpop.f32.mrf.mxu1  ;;  %v15481_v5 = vpop.f32.mrf.mxu0 }
 0x321   : > { %17687 = vst [vmem:[#allocation64_spill] sm:$0xff] %v15481_v5 }
 0x322   : > { %17681 = vst [vmem:[#allocation30_spill] sm:$0xff] %v15456_v31  ;;  %v17689_v31 = vld [vmem:[#allocation50_spill] sm:$0xff] }
 0x325   : > { %11042 = vmatmul.mubr.msk.bf16.gmra.mxu1 %vm6205_vm12, %v15214_v35  ;;  %v15466_v35 = vpop.f32.mrf.mxu1 }
 0x326   : > { %11081 = vmatprep.mubr.msk.bf16.mxu1 %vm6205_vm12, %v17678_v20  ;;  %v8770_v20 = vsel %vm6254_vm4, %v10387_v24, 0  ;;  %v15485_v24 = vpop.f32.mrf.mxu0 }
 0x327   : > { %17688 = vst [vmem:[#allocation54_spill] sm:$0xff] %v15485_v24 }
 0x32c   : > { %v15469_v18 = vpop.f32.mrf.mxu1 }
 0x32d   : > { %11082 = vmatmul.mubr.msk.bf16.vlgmr.msra.gmra.mxu1 %vm6205_vm12, %v17684_v54  ;;  %v17690_v54 = vld [vmem:[#allocation73_spill] sm:$0xff] }
 0x32e   : > { %11085 = vmatprep.mubr.msk.bf16.mxu1 %vm6205_vm12, %v17685_v37  ;;  %11148 = vmatpush3.bf16.msra.mxu1 %v8770_v20  ;;  %v15477_v50 = vpop.f32.mrf.mxu1  ;;  %v15495_v37 = vpop.f32.mrf.mxu0 }
 0x32f   : > { %17691 = vst [vmem:[#allocation12_spill] sm:$0xff] %v15495_v37 }
 0x330   : > { %v15479_v30 = vpop.f32.mrf.mxu1  ;;  %v15501_v5 = vpop.f32.mrf.mxu0 }
 0x331   : > { %17692 = vst [vmem:[#allocation65_spill] sm:$0xff] %v15501_v5 }
 0x332   : > { %v15483_v19 = vpop.f32.mrf.mxu1 }
 0x335   : > { %v15487_v32 = vpop.f32.mrf.mxu1  ;;  %11086 = vmatmul.mubr.msk.bf16.gmra.mxu1 %vm6205_vm12, %v17689_v31 }
 0x336   : > { %11089 = vmatprep.mubr.msk.bf16.mxu1 %vm6205_vm12, %v17690_v54  ;;  %v15511_v54 = vpop.f32.mrf.mxu0 }
 0x337   : > { %v15493_v20 = vpop.f32.mrf.mxu1  ;;  %17693 = vst [vmem:[#allocation17_spill] sm:$0xff] %v15511_v54 }
 0x338   : > { %v15515_v37 = vpop.f32.mrf.mxu0 }
 0x339   : > { %v15497_v45 = vpop.f32.mrf.mxu1  ;;  %17694 = vst [vmem:[#allocation67_spill] sm:$0xff] %v15515_v37 }
 0x33b   : > { %v15499_v63 = vpop.f32.mrf.mxu1 }
 0x33d   : > { %v15503_v55 = vpop.f32.mrf.mxu1  ;;  %11090 = vmatmul.mubr.msk.bf16.gmra.mxu1 %vm6205_vm12, %v17616_v57  ;;  %v15525_v57 = vpop.f32.mrf.mxu0 }
 0x33e   : > { %11093 = vmatprep.mubr.msk.bf16.mxu1 %vm6205_vm12, %v17617_v62  ;;  %17695 = vst [vmem:[#allocation68_spill] sm:$0xff] %v15525_v57 }
 0x33f   : > { %v15509_v31 = vpop.f32.mrf.mxu1  ;;  %v15531_v54 = vpop.f32.mrf.mxu0 }
 0x340   : > { %17696 = vst [vmem:[#allocation8_spill] sm:$0xff] %v15531_v54 }
 0x341   : > { %v15513_v24 = vpop.f32.mrf.mxu1 }
 0x343   : > { %v15517_v33 = vpop.f32.mrf.mxu1 }
 0x345   : > { %v15519_v21 = vpop.f32.mrf.mxu1  ;;  %11094 = vmatmul.mubr.msk.bf16.gmra.mxu1 %vm6205_vm12, %v17618_v6  ;;  %v15541_v6 = vpop.f32.mrf.mxu0 }
 0x346   : > { %11097 = vmatprep.mubr.msk.bf16.mxu1 %vm6205_vm12, %v17619_v47  ;;  %17697 = vst [vmem:[#allocation69_spill] sm:$0xff] %v15541_v6 }
 0x347   : > { %v15527_v62 = vpop.f32.mrf.mxu1  ;;  %v15545_v57 = vpop.f32.mrf.mxu0 }
 0x348   : > { %17698 = vst [vmem:[#allocation70_spill] sm:$0xff] %v15545_v57 }
 0x349   : > { %v15529_v5 = vpop.f32.mrf.mxu1  ;;  %v15551_v54 = vpop.f32.mrf.mxu0 }
 0x34a   : > { %17700 = vst [vmem:[#allocation77_spill] sm:$0xff] %v15551_v54  ;;  %v17706_v54 = vld [vmem:[#allocation94_spill] sm:$0xff] }
 0x34b   : > { %v15533_v22 = vpop.f32.mrf.mxu1 }
 0x34d   : > { %v15535_v37 = vpop.f32.mrf.mxu1  ;;  %11098 = vmatmul.mubr.msk.bf16.gmra.mxu1 %vm6205_vm12, %v17623_v14 }
 0x34e   : > { %11101 = vmatprep.mubr.msk.bf16.mxu1 %vm6205_vm12, %v17624_v40  ;;  %v15561_v40 = vpop.f32.mrf.mxu0 }
 0x34f   : > { %v15543_v47 = vpop.f32.mrf.mxu1  ;;  %17702 = vst [vmem:[#allocation84_spill] sm:$0xff] %v15561_v40 }
 0x350   : > { %v15567_v4 = vpop.f32.mrf.mxu0 }
 0x351   : > { %v15547_v0 = vpop.f32.mrf.mxu1  ;;  %17705 = vst [vmem:[#allocation88_spill] sm:$0xff] %v15567_v4 }
 0x353   : > { %v15549_v28 = vpop.f32.mrf.mxu1 }
 0x354   : > { %17699 = vst [vmem:[#allocation76_spill] sm:$0xff] %v15549_v28 }
 0x355   : > { %v15553_v12 = vpop.f32.mrf.mxu1  ;;  %11102 = vmatmul.mubr.msk.bf16.gmra.mxu1 %vm6205_vm12, %v17630_v26  ;;  %v15575_v26 = vpop.f32.mrf.mxu0 }
 0x356   : > { %11105 = vmatprep.mubr.msk.bf16.mxu1 %vm6205_vm12, %v14637_v53  ;;  %17707 = vst [vmem:[#allocation86_spill] sm:$0xff] %v15575_v26 }
 0x357   : > { %v15559_v14 = vpop.f32.mrf.mxu1  ;;  %v15581_v40 = vpop.f32.mrf.mxu0 }
 0x358   : > { %17701 = vst [vmem:[#allocation83_spill] sm:$0xff] %v15559_v14  ;;  %17709 = vst [vmem:[#allocation90_spill] sm:$0xff] %v15581_v40 }
 0x359   : > { %v15563_v6 = vpop.f32.mrf.mxu1 }
 0x35a   : > { %17703 = vst [vmem:[#allocation80_spill] sm:$0xff] %v15563_v6 }
 0x35b   : > { %v15565_v57 = vpop.f32.mrf.mxu1 }
 0x35c   : > { %17704 = vst [vmem:[#allocation81_spill] sm:$0xff] %v15565_v57 }
 0x35d   : > { %v15569_v28 = vpop.f32.mrf.mxu1  ;;  %11106 = vmatmul.mubr.msk.bf16.gmra.mxu1 %vm6205_vm12, %v17632_v38 }
 0x35e   : > { %11109 = vmatprep.mubr.msk.bf16.mxu1 %vm6205_vm12, %v17706_v54  ;;  %v15593_v54 = vpop.f32.mrf.mxu0 }
 0x35f   : > { %v15577_v53 = vpop.f32.mrf.mxu1 }
 0x361   : > { %v15579_v14 = vpop.f32.mrf.mxu1 }
 0x362   : > { %17708 = vst [vmem:[#allocation89_spill] sm:$0xff] %v15579_v14 }
 0x363   : > { %v6603_v6 = vpop.f32.mrf.mxu1 }
 0x364   : > { %v15584_v57 = vadd.f32 %v6603_v6, %v15440_v17  ;;  %v15601_v6 = vpop.f32.mrf.mxu0 }
 0x365   : > { %v10941_v4 = vpop.f32.mrf.mxu1  ;;  %11110 = vmatmul.mubr.msk.bf16.gmra.mxu1 %vm6205_vm12, %v15340_v3  ;;  %v6513_v3 = vadd.f32 %v15469_v18, %v15351_v41  ;;  %v6516_v41 = vadd.f32 %v15479_v30, %v15364_v59  ;;  %v6521_v59 = vadd.f32 %v15493_v20, %v15303_v16 }
 0x366   : > { %17710 = vst [vmem:[#allocation96_spill] sm:$0xff] %v15584_v57  ;;  %v15589_v38 = vadd.f32 %v10941_v4, %v15444_v9  ;;  %11149 = vmatprep.mubr.msk.bf16.mxu1 %vm6205_vm12, %v17637_v13 }
 0x367   : > { %v6616_v26 = vpop.f32.mrf.mxu1 }
 0x368   : > { %v15596_v14 = vadd.f32 %v6616_v26, %v15460_v46  ;;  %v6505_v46 = vadd.f32 %v15477_v50, %v15360_v56 }
 0x369   : > { %v10942_v40 = vpop.f32.mrf.mxu1 }
 0x36a   : > { %v15599_v17 = vadd.f32 %v10942_v40, %v15462_v49  ;;  %v15616_v49 = vpop.f32.mrf.mxu0 }
 0x36b   : > { %v6619_v57 = vpop.f32.mrf.mxu1 }
 0x36c   : > { %v15606_v9 = vadd.f32 %v6619_v57, %v15466_v35  ;;  %v15626_v56 = vpop.f32.mrf.mxu0 }
 0x36d   : > { %v10947_v13 = vpop.f32.mrf.mxu1  ;;  %11150 = vmatmul.mubr.msk.bf16.vlgmr.msra.gmra.mxu1 %vm6205_vm12, %v17640_v52  ;;  %v6508_v52 = vadd.f32 %v15483_v19, %v15372_v34 }
 0x36e   : > { %v15612_v4 = vadd.f32 %v10947_v13, %v6513_v3  ;;  %11153 = vmatprep.mubr.msk.bf16.mxu1 %vm6205_vm12, %v17641_v2  ;;  %v6529_v2 = vadd.f32 %v15487_v32, %v15297_v7  ;;  %v15640_v34 = vpop.f32.mrf.mxu0  ;;  %v6532_v7 = vadd.f32 %v15497_v45, %v15313_v60  ;;  %v6537_v60 = vadd.f32 %v15509_v31, %v15328_v27 }
 0x36f   : > { %v7310_v40 = vpop.f32.mrf.mxu1 }
 0x370   : > { %v15620_v18 = vadd.f32 %v7310_v40, %v6505_v46  ;;  %v15650_v16 = vpop.f32.mrf.mxu0 }
 0x371   : > { %v10948_v35 = vpop.f32.mrf.mxu1 }
 0x372   : > { %v15624_v57 = vadd.f32 %v10948_v35, %v6516_v41  ;;  %v17711_v35 = vld [vmem:[#allocation13_spill] sm:$0xff] }
 0x373   : > { %v7313_v50 = vpop.f32.mrf.mxu1 }
 0x374   : > { %v15630_v26 = vadd.f32 %v7313_v50, %v6508_v52  ;;  %v6548_v50 = vadd.f32 %v15513_v24, %v15342_v1  ;;  %v6553_v1 = vadd.f32 %v15527_v62, %v15362_v29 }
 0x375   : > { %v10951_v3 = vpop.f32.mrf.mxu1  ;;  %11154 = vmatmul.mubr.msk.bf16.gmra.mxu1 %vm6205_vm12, %v14891_v61  ;;  %v6524_v61 = vadd.f32 %v15499_v63, %v15319_v43  ;;  %v17712_v63 = vld [vmem:[#allocation10_spill] sm:$0xff] }
 0x376   : > { %v15636_v30 = vadd.f32 %v10951_v3, %v6529_v2  ;;  %11157 = vmatprep.mubr.msk.bf16.mxu1 %vm6205_vm12, %v14853_v48  ;;  %v6545_v48 = vadd.f32 %v15503_v55, %v15325_v8  ;;  %v9052_v43 = vld [vmem:[%s16789_s8] sm:$0x3]  ;;  %v15670_v55 = vpop.f32.mrf.mxu0 }
 0x377   : > { %v7326_v19 = vpop.f32.mrf.mxu1  ;;  %v9401_v8 = vld [vmem:[%s16791_s10] sm:$0xf]  ;;  %11261 = vmatprep.subr.msk.bf16.mxu0 %vm6254_vm4, %v9052_v43  ;;  %v9109_v27 = vsel %vm6254_vm4, %v9052_v43, 0 }
 0x378   : > { %v15644_v32 = vadd.f32 %v7326_v19, %v6521_v59  ;;  %11262 = vmatprep.subr.msk.bf16.mxu1 %vm2160_vm0, %v9401_v8  ;;  %v9458_v31 = vsel %vm2160_vm0, %v9401_v8, 0  ;;  %11182 = vmatpush3.bf16.msra.mxu0 %v9109_v27  ;;  %v6540_v59 = vadd.f32 %v15517_v33, %v15344_v36  ;;  %v17713_v8 = vld [vmem:[#allocation36_spill] sm:$0xff] }
 0x379   : > { %v10952_v13 = vpop.f32.mrf.mxu1  ;;  %11216 = vmatpush3.bf16.msra.mxu1 %v9458_v31  ;;  %v17715_v31 = vld [vmem:[#allocation40_spill] sm:$0xff] }
 0x37a   : > { %v15648_v46 = vadd.f32 %v10952_v13, %v6532_v7  ;;  %v15684_v7 = vpop.f32.mrf.mxu0 }
 0x37b   : > { %v7329_v20 = vpop.f32.mrf.mxu1 }
 0x37c   : > { %v15654_v40 = vadd.f32 %v7329_v20, %v6524_v61  ;;  %v6561_v61 = vadd.f32 %v15519_v21, %v15353_v51  ;;  %v15698_v36 = vpop.f32.mrf.mxu0  ;;  %v6564_v51 = vadd.f32 %v15529_v5, %v15366_v58  ;;  %v6569_v58 = vadd.f32 %v15543_v47, %v15384_v23 }
 0x37d   : > { %v10955_v41 = vpop.f32.mrf.mxu1  ;;  %11158 = vmatmul.mubr.msk.bf16.gmra.mxu1 %vm6205_vm12, %v17711_v35 }
 0x37e   : > { %v15660_v45 = vadd.f32 %v10955_v41, %v6545_v48  ;;  %11161 = vmatprep.mubr.msk.bf16.mxu1 %vm6205_vm12, %v17712_v63  ;;  %v15708_v29 = vpop.f32.mrf.mxu0 }
 0x37f   : > { %v7342_v52 = vpop.f32.mrf.mxu1 }
 0x380   : > { %v15678_v2 = vadd.f32 %v7342_v52, %v6537_v60  ;;  %v17714_v52 = vld [vmem:[#allocation76_spill] sm:$0xff] }
 0x381   : > { %v10956_v3 = vpop.f32.mrf.mxu1 }
 0x382   : > { %v15682_v19 = vadd.f32 %v10956_v3, %v6548_v50 }
 0x383   : > { %v7345_v13 = vpop.f32.mrf.mxu1 }
 0x384   : > { %v15688_v20 = vadd.f32 %v7345_v13, %v6540_v59  ;;  %v17716_v59 = vld [vmem:[#allocation23_spill] sm:$0xff] }
 0x385   : > { %v10959_v48 = vpop.f32.mrf.mxu1  ;;  %11162 = vmatmul.mubr.msk.bf16.gmra.mxu1 %vm6205_vm12, %v14943_v44  ;;  %v6556_v44 = vadd.f32 %v15533_v22, %v15374_v42  ;;  %v15722_v22 = vpop.f32.mrf.mxu0 }
 0x386   : > { %v15694_v24 = vadd.f32 %v10959_v48, %v6561_v61  ;;  %11165 = vmatprep.mubr.msk.bf16.mxu1 %vm6205_vm12, %v14907_v25  ;;  %v6577_v25 = vadd.f32 %v15535_v37, %v15376_v39  ;;  %v6580_v39 = vadd.f32 %v15547_v0, %v15388_v15  ;;  %v17717_v15 = vld [vmem:[#allocation46_spill] sm:$0xff]  ;;  %v17718_v0 = vld [vmem:[#allocation83_spill] sm:$0xff]  ;;  %v17719_v48 = vld [vmem:[#allocation24_spill] sm:$0xff] }
 0x387   : > { %v7358_v33 = vpop.f32.mrf.mxu1  ;;  %v15732_v23 = vpop.f32.mrf.mxu0  ;;  %v6585_v13 = vadd.f32 %v17718_v0, %v17717_v15  ;;  %v17729_v15 = vld [vmem:[#allocation25_spill] sm:$0xff] }
 0x388   : > { %v15702_v21 = vadd.f32 %v7358_v33, %v6553_v1 }
 0x389   : > { %v10960_v41 = vpop.f32.mrf.mxu1  ;;  %v15746_v1 = vpop.f32.mrf.mxu0 }
 0x38a   : > { %v15706_v35 = vadd.f32 %v10960_v41, %v6564_v51  ;;  %17720 = vst [vmem:[#allocation97_spill] sm:$0xff] %v15746_v1  ;;  %v17721_v51 = vld [vmem:[#allocation47_spill] sm:$0xff]  ;;  %v17722_v41 = vld [vmem:[#allocation80_spill] sm:$0xff] }
 0x38b   : > { %v7361_v62 = vpop.f32.mrf.mxu1 }
 0x38c   : > { %v15712_v60 = vadd.f32 %v7361_v62, %v6556_v44 }
 0x38d   : > { %v10963_v63 = vpop.f32.mrf.mxu1  ;;  %11166 = vmatmul.mubr.msk.bf16.gmra.mxu1 %vm6205_vm12, %v14972_v11  ;;  %v6572_v11 = vadd.f32 %v17714_v52, %v17713_v8  ;;  %v17726_v8 = vld [vmem:[#allocation60_spill] sm:$0xff] }
 0x38e   : > { %v15718_v5 = vadd.f32 %v10963_v63, %v6577_v25  ;;  %11169 = vmatprep.mubr.msk.bf16.mxu1 %vm6205_vm12, %v14967_v10  ;;  %v6593_v10 = vadd.f32 %v15553_v12, %v17715_v31  ;;  %v6596_v12 = vadd.f32 %v17722_v41, %v17721_v51  ;;  %v17723_v25 = vld [vmem:[#allocation55_spill] sm:$0xff]  ;;  %v17724_v63 = vld [vmem:[#allocation81_spill] sm:$0xff]  ;;  %v6609_v52 = vadd.f32 %v15569_v28, %v17726_v8  ;;  %v17727_v31 = vld [vmem:[#allocation26_spill] sm:$0xff] }
 0x38f   : > { %v7374_v42 = vpop.f32.mrf.mxu1 }
 0x390   : > { %v15726_v37 = vadd.f32 %v7374_v42, %v6569_v58  ;;  %v6588_v58 = vadd.f32 %v17724_v63, %v17723_v25 }
 0x391   : > { %v10964_v43 = vpop.f32.mrf.mxu1 }
 0x392   : > { %v15730_v27 = vadd.f32 %v10964_v43, %v6580_v39  ;;  %v15756_v39 = vpop.f32.mrf.mxu0 }
 0x393   : > { %v7377_v47 = vpop.f32.mrf.mxu1  ;;  %17725 = vst [vmem:[#allocation5_spill] sm:$0xff] %v15756_v39 }
 0x394   : > { %v15736_v50 = vadd.f32 %v7377_v47, %v6572_v11  ;;  %v15770_v0 = vpop.f32.mrf.mxu0 }
 0x395   : > { %v10967_v3 = vpop.f32.mrf.mxu1  ;;  %11170 = vmatmul.mubr.msk.bf16.gmra.mxu1 %vm6205_vm12, %v17716_v59 }
 0x396   : > { %v15742_v61 = vadd.f32 %v10967_v3, %v6593_v10  ;;  %11173 = vmatprep.mubr.msk.bf16.mxu1 %vm6205_vm12, %v17719_v48  ;;  %v17728_v10 = vld [vmem:[#allocation59_spill] sm:$0xff]  ;;  %v17730_v48 = vld [vmem:[#allocation29_spill] sm:$0xff] }
 0x397   : > { %v7390_v33 = vpop.f32.mrf.mxu1  ;;  %v6601_v3 = vadd.f32 %v15577_v53, %v17728_v10  ;;  %v17732_v53 = vld [vmem:[#allocation96_spill] sm:$0xff] }
 0x398   : > { %v15750_v44 = vadd.f32 %v7390_v33, %v6585_v13  ;;  %v17731_v33 = vld [vmem:[#allocation89_spill] sm:$0xff] }
 0x399   : > { %v10968_v62 = vpop.f32.mrf.mxu1  ;;  %v6612_v28 = vadd.f32 %v17731_v33, %v17730_v48  ;;  %v17736_v33 = vld [vmem:[#allocation27_spill] sm:$0xff] }
 0x39a   : > { %v15754_v42 = vadd.f32 %v10968_v62, %v6596_v12  ;;  %v15778_v62 = vpop.f32.mrf.mxu0 }
 0x39b   : > { %v7393_v43 = vpop.f32.mrf.mxu1 }
 0x39c   : > { %v15760_v11 = vadd.f32 %v7393_v43, %v6588_v58  ;;  %v17733_v43 = vld [vmem:[#allocation30_spill] sm:$0xff] }
 0x39d   : > { %v10971_v47 = vpop.f32.mrf.mxu1  ;;  %11174 = vmatmul.mubr.msk.bf16.gmra.mxu1 %vm6205_vm12, %v17727_v31 }
 0x39e   : > { %v15766_v59 = vadd.f32 %v10971_v47, %v6609_v52  ;;  %11177 = vmatprep.mubr.msk.bf16.mxu1 %vm6205_vm12, %v17729_v15  ;;  %v15788_v52 = vpop.f32.mrf.mxu0 }
 0x39f   : > { %v7406_v13 = vpop.f32.mrf.mxu1  ;;  %17734 = vst [vmem:[#allocation98_spill] sm:$0xff] %v15788_v52 }
 0x3a0   : > { %v15774_v51 = vadd.f32 %v7406_v13, %v6601_v3  ;;  %v15796_v15 = vpop.f32.mrf.mxu0 }
 0x3a1   : > { %v10972_v41 = vpop.f32.mrf.mxu1  ;;  %17735 = vst [vmem:[#allocation100_spill] sm:$0xff] %v15796_v15 }
 0x3a2   : > { %v15776_v12 = vadd.f32 %v10972_v41, %v6612_v28 }
 0x3a3   : > { %v7409_v25 = vpop.f32.mrf.mxu1 }
 0x3a4   : > { %v15781_v63 = vadd.f32 %v7409_v25, %v17732_v53  ;;  %v17737_v25 = vld [vmem:[#allocation28_spill] sm:$0xff]  ;;  %v15807_v53 = vpop.f32.mrf.mxu0 }
 0x3a5   : > { %v10975_v58 = vpop.f32.mrf.mxu1  ;;  %11178 = vmatmul.mubr.msk.bf16.gmra.mxu1 %vm6205_vm12, %v17733_v43  ;;  %v17738_v43 = vld [vmem:[#allocation38_spill] sm:$0xff] }
 0x3a6   : > { %v15786_v8 = vadd.f32 %v10975_v58, %v15589_v38  ;;  %v7685_v38 = vadd.f32 %v17736_v33, %v15612_v4  ;;  %v15818_v33 = vpop.f32.mrf.mxu0 }
 0x3a7   : > { %v7422_v47 = vpop.f32.mrf.mxu1 }
 0x3a8   : > { %v15791_v31 = vadd.f32 %v7422_v47, %v15596_v14  ;;  %v7683_v14 = vadd.f32 %v17737_v25, %v15620_v18  ;;  %v7686_v47 = vadd.f32 %v17738_v43, %v15624_v57  ;;  %v15828_v43 = vpop.f32.mrf.mxu0 }
 0x3a9   : > { %v10976_v10 = vpop.f32.mrf.mxu1  ;;  %17742 = vst [vmem:[#allocation99_spill] sm:$0xff] %v15828_v43 }
 0x3aa   : > { %v15794_v3 = vadd.f32 %v10976_v10, %v15599_v17 }
 0x3ab   : > { %v7425_v13 = vpop.f32.mrf.mxu1 }
 0x3ac   : > { %v15799_v48 = vadd.f32 %v7425_v13, %v15606_v9  ;;  %v17739_v9 = vld [vmem:[#allocation39_spill] sm:$0xff] }
 0x3ad   : > { %v11015_v28 = vpop.f32.mrf.mxu1  ;;  %v7684_v13 = vadd.f32 %v17739_v9, %v15630_v26 }
 0x3ae   : > { %v15803_v41 = vadd.f32 %v11015_v28, %v7685_v38  ;;  %v17740_v28 = vld [vmem:[#allocation45_spill] sm:$0xff] }
 0x3af   : > { %v7820_v58 = vpop.f32.mrf.mxu1  ;;  %v7689_v25 = vadd.f32 %v17740_v28, %v15636_v30  ;;  %v11368_v28 = vld [vmem:[%s11557_s17 + $0x18] sm:$0xff] }
 0x3b0   : > { %v7947_v17 = vadd.f32 %v7820_v58, %v7683_v14  ;;  %v17741_v58 = vld [vmem:[#allocation31_spill] sm:$0xff] }
 0x3b1   : > { %v11016_v10 = vpop.f32.mrf.mxu1  ;;  %v7687_v26 = vadd.f32 %v17741_v58, %v15644_v32  ;;  %v15841_v58 = vpop.f32.mrf.mxu0 }
 0x3b2   : > { %v15811_v15 = vadd.f32 %v11016_v10, %v7686_v47  ;;  %v15816_v4 = vadd.f32 %v15626_v56, %v7947_v17  ;;  %v17743_v47 = vld [vmem:[#allocation49_spill] sm:$0xff]  ;;  %17745 = vst [vmem:[#allocation101_spill] sm:$0xff] %v15841_v58 }
 0x3b3   : > { %v7823_v18 = vpop.f32.mrf.mxu1  ;;  %v7690_v10 = vadd.f32 %v17743_v47, %v15648_v46  ;;  %v17746_v46 = vld [vmem:[#allocation61_spill] sm:$0xff] }
 0x3b4   : > { %v15820_v38 = vadd.f32 %v7823_v18, %v7684_v13  ;;  %v17744_v13 = vld [vmem:[#allocation56_spill] sm:$0xff]  ;;  %v7693_v47 = vadd.f32 %v17746_v46, %v15660_v45  ;;  %v17750_v46 = vld [vmem:[#allocation3_spill] sm:$0xff] }
 0x3b5   : > { %v11019_v57 = vpop.f32.mrf.mxu1  ;;  %v7688_v18 = vadd.f32 %v17744_v13, %v15654_v40  ;;  %v17748_v45 = vld [vmem:[#allocation32_spill] sm:$0xff] }
 0x3b6   : > { %v15824_v14 = vadd.f32 %v11019_v57, %v7689_v25  ;;  %v9273_v25 = vrot.slane %v11368_v28, 1  ;;  %v11369_v57 = vld [vmem:[%s11557_s17 + $0x20] sm:$0xff] }
 0x3b7   : > { %v7836_v56 = vpop.f32.mrf.mxu1  ;;  %v9274_v32 = vrot.slane %v11369_v57, 1  ;;  %v15854_v57 = vpop.f32.mrf.mxu0 }
 0x3b8   : > { %v7951_v17 = vadd.f32 %v7836_v56, %v7687_v26  ;;  %v11370_v26 = vld [vmem:[%s11557_s17 + $0x28] sm:$0x3] }
 0x3b9   : > { %v11020_v9 = vpop.f32.mrf.mxu1  ;;  %v9276_v56 = vrot.slane %v11370_v26, 1  ;;  %v9275_v40 = vsel %vm9272_vm3, %v9273_v25, %v9274_v32  ;;  %v7694_v26 = vadd.f32 %v17748_v45, %v15682_v19 }
 0x3ba   : > { %v15834_v52 = vadd.f32 %v11020_v9, %v7690_v10  ;;  %v15837_v30 = vadd.f32 %v15684_v7, %v7951_v17  ;;  %v17747_v9 = vld [vmem:[#allocation4_spill] sm:$0xff] }
 0x3bb   : > { %v7839_v43 = vpop.f32.mrf.mxu1  ;;  %v9277_v7 = vsel %vm9272_vm3, %v9274_v32, %v9276_v56  ;;  %v7691_v13 = vadd.f32 %v17747_v9, %v15678_v2  ;;  %v17749_v32 = vld [vmem:[#allocation35_spill] sm:$0xff]  ;;  %v11372_v9 = vld [vmem:[%s11557_s17 + $0x50] sm:$0xff] }
 0x3bc   : > { %v15844_v39 = vadd.f32 %v7839_v43, %v7688_v18  ;;  %v9385_v28 = vpack.c.bf16 %v9277_v7, %v9275_v40  ;;  %v7692_v56 = vadd.f32 %v17749_v32, %v15688_v20  ;;  %v11371_v7 = vld [vmem:[%s11557_s17 + $0x48] sm:$0xff]  ;;  %v11373_v20 = vld [vmem:[%s11557_s17 + $0x58] sm:$0x3] }
 0x3bd   : > { %v11023_v10 = vpop.f32.mrf.mxu1  ;;  %v9283_v19 = vrot.slane %v11371_v7, 1  ;;  %v9286_v45 = vrot.slane %v11373_v20, 1  ;;  %v11375_v7 = vld [vmem:[%s11557_s17 + $0x68] sm:$0xff] }
 0x3be   : > { %v15850_v17 = vadd.f32 %v11023_v10, %v7693_v47  ;;  %11217 = vmatprep.mubr.msk.bf16.mxu1 %vm2096_vm2, %v9385_v28  ;;  %v17751_v47 = vld [vmem:[#allocation2_spill] sm:$0xff]  ;;  %v15872_v28 = vpop.f32.mrf.mxu0  ;;  %v9289_v58 = vrot.slane %v11375_v7, 1  ;;  %v17755_v20 = vld [vmem:[#allocation11_spill] sm:$0xff] }
 0x3bf   : > { %v7852_v43 = vpop.f32.mrf.mxu1  ;;  %v17752_v10 = vpack.c.bf16 %v17750_v46, %v17751_v47  ;;  %v17754_v46 = vld [vmem:[#allocation7_spill] sm:$0xff] }
 0x3c0   : > { %v7955_v18 = vadd.f32 %v7852_v43, %v7691_v13  ;;  %v9284_v13 = vrot.slane %v11372_v9, 1  ;;  %v11376_v9 = vld [vmem:[%s11557_s17 + $0x70] sm:$0x3] }
 0x3c1   : > { %v11024_v25 = vpop.f32.mrf.mxu1  ;;  %11218 = vmatmul.mubr.msk.bf16.vlgmr.msra.gmra.mxu1 %vm2096_vm2, %v17752_v10  ;;  %v9291_v1 = vrot.slane %v11376_v9, 1 }
 0x3c2   : > { %v15865_v2 = vadd.f32 %v11024_v25, %v7694_v26  ;;  %v15868_v40 = vadd.f32 %v15732_v23, %v7955_v18  ;;  %v7697_v26 = vadd.f32 %v17754_v46, %v15694_v24  ;;  %v9285_v25 = vsel %vm9272_vm3, %v9283_v19, %v9284_v13  ;;  %v11374_v23 = vld [vmem:[%s11557_s17 + $0x60] sm:$0xff]  ;;  %v15888_v24 = vpop.f32.mrf.mxu0 }
 0x3c3   : > { %v7855_v43 = vpop.f32.mrf.mxu1  ;;  %v9288_v18 = vrot.slane %v11374_v23, 1  ;;  %v9287_v10 = vsel %vm9272_vm3, %v9284_v13, %v9286_v45  ;;  %17756 = vst [vmem:[#allocation82_spill] sm:$0xff] %v15888_v24  ;;  %v9292_v23 = vsel %vm9272_vm3, %v9289_v58, %v9291_v1  ;;  %v17757_v45 = vld [vmem:[#allocation20_spill] sm:$0xff]  ;;  %v11377_v1 = vld [vmem:[%s11557_s17 + $0x78] sm:$0xff] }
 0x3c4   : > { %17753 = vst [vmem:[#allocation102_spill] sm:$0xff] %v15865_v2  ;;  %v15875_v32 = vadd.f32 %v7855_v43, %v7692_v56  ;;  %v7695_v56 = vadd.f32 %v17755_v20, %v15702_v21  ;;  %v9387_v43 = vpack.c.bf16 %v9287_v10, %v9285_v25  ;;  %v7698_v7 = vadd.f32 %v17757_v45, %v15706_v35  ;;  %v17758_v21 = vld [vmem:[#allocation64_spill] sm:$0xff]  ;;  %v11378_v35 = vld [vmem:[%s11557_s17 + $0x80] sm:$0xff]  ;;  %v15905_v20 = vpop.f32.mrf.mxu0 }
 0x3c5   : > { %v11027_v47 = vpop.f32.mrf.mxu1  ;;  %v9290_v46 = vsel %vm9272_vm3, %v9288_v18, %v9289_v58  ;;  %v7696_v25 = vadd.f32 %v17758_v21, %v15712_v60  ;;  %v9293_v58 = vrot.slane %v11377_v1, 1  ;;  %v9294_v18 = vrot.slane %v11378_v35, 1  ;;  %17759 = vst [vmem:[#allocation75_spill] sm:$0xff] %v15905_v20  ;;  %v17760_v60 = vld [vmem:[#allocation54_spill] sm:$0xff]  ;;  %v17761_v20 = vld [vmem:[#allocation12_spill] sm:$0xff] }
 0x3c6   : > { %v15884_v2 = vadd.f32 %v11027_v47, %v7697_v26  ;;  %11221 = vmatprep.mubr.msk.bf16.mxu1 %vm2096_vm2, %v9387_v43  ;;  %v9388_v26 = vpack.c.bf16 %v9292_v23, %v9290_v46  ;;  %v11379_v43 = vld [vmem:[%s11557_s17 + $0x88] sm:$0x3]  ;;  %v7701_v23 = vadd.f32 %v17760_v60, %v15718_v5  ;;  %v11382_v1 = vld [vmem:[%s11557_s17 + $0xa0] sm:$0x3]  ;;  %v7699_v24 = vadd.f32 %v17761_v20, %v15726_v37  ;;  %v15921_v5 = vpop.f32.mrf.mxu0 }
 0x3c7   : > { %v7868_v19 = vpop.f32.mrf.mxu1  ;;  %v9301_v35 = vrot.slane %v11382_v1, 1 }
 0x3c8   : > { %v7959_v13 = vadd.f32 %v7868_v19, %v7695_v56  ;;  %v9296_v19 = vrot.slane %v11379_v43, 1 }
 0x3c9   : > { %v11028_v47 = vpop.f32.mrf.mxu1  ;;  %11222 = vmatmul.mubr.msk.bf16.gmra.mxu1 %vm2096_vm2, %v9388_v26 }
 0x3ca   : > { %v15897_v10 = vadd.f32 %v11028_v47, %v7698_v7  ;;  %v15900_v9 = vadd.f32 %v15778_v62, %v7959_v13  ;;  %v9295_v62 = vsel %vm9272_vm3, %v9293_v58, %v9294_v18  ;;  %v11380_v13 = vld [vmem:[%s11557_s17 + $0x90] sm:$0xff]  ;;  %v9297_v26 = vsel %vm9272_vm3, %v9294_v18, %v9296_v19  ;;  %v11381_v47 = vld [vmem:[%s11557_s17 + $0x98] sm:$0xff] }
 0x3cb   : > { %v7871_v56 = vpop.f32.mrf.mxu1  ;;  %v9298_v45 = vrot.slane %v11380_v13, 1  ;;  %v9299_v21 = vrot.slane %v11381_v47, 1  ;;  %v17762_v19 = vld [vmem:[#allocation65_spill] sm:$0xff] }
 0x3cc   : > { %v15908_v46 = vadd.f32 %v7871_v56, %v7696_v25  ;;  %v9389_v56 = vpack.c.bf16 %v9297_v26, %v9295_v62  ;;  %v7702_v13 = vadd.f32 %v17762_v19, %v15730_v27  ;;  %v11384_v27 = vld [vmem:[%s11557_s17 + $0xb0] sm:$0xff] }
 0x3cd   : > { %v11031_v7 = vpop.f32.mrf.mxu1  ;;  %v9300_v43 = vsel %vm9272_vm3, %v9298_v45, %v9299_v21  ;;  %v9302_v60 = vsel %vm9272_vm3, %v9299_v21, %v9301_v35  ;;  %v9304_v47 = vrot.slane %v11384_v27, 1  ;;  %v15938_v21 = vpop.f32.mrf.mxu0  ;;  %v11385_v35 = vld [vmem:[%s11557_s17 + $0xb8] sm:$0x3] }
 0x3ce   : > { %v15919_v25 = vadd.f32 %v11031_v7, %v7701_v23  ;;  %11225 = vmatprep.mubr.msk.bf16.mxu1 %vm2096_vm2, %v9389_v56  ;;  %v9390_v37 = vpack.c.bf16 %v9302_v60, %v9300_v43  ;;  %v17763_v23 = vld [vmem:[#allocation17_spill] sm:$0xff]  ;;  %v9306_v56 = vrot.slane %v11385_v35, 1  ;;  %v11386_v60 = vld [vmem:[%s11557_s17 + $0xc0] sm:$0xff]  ;;  %v17765_v35 = vld [vmem:[#allocation68_spill] sm:$0xff] }
 0x3cf   : > { %v7884_v58 = vpop.f32.mrf.mxu1  ;;  %v7700_v62 = vadd.f32 %v17763_v23, %v15736_v50  ;;  %v17764_v50 = vld [vmem:[#allocation67_spill] sm:$0xff]  ;;  %v11388_v23 = vld [vmem:[%s11557_s17 + $0xd0] sm:$0x3] }
 0x3d0   : > { %v7963_v18 = vadd.f32 %v7884_v58, %v7699_v24  ;;  %v11383_v24 = vld [vmem:[%s11557_s17 + $0xa8] sm:$0xff]  ;;  %v7705_v43 = vadd.f32 %v17764_v50, %v15742_v61  ;;  %v15954_v61 = vpop.f32.mrf.mxu0 }
 0x3d1   : > { %v11032_v20 = vpop.f32.mrf.mxu1  ;;  %11226 = vmatmul.mubr.msk.bf16.gmra.mxu1 %vm2096_vm2, %v9390_v37  ;;  %v9303_v45 = vrot.slane %v11383_v24, 1  ;;  %v11387_v37 = vld [vmem:[%s11557_s17 + $0xc8] sm:$0xff]  ;;  %v9311_v24 = vrot.slane %v11388_v23, 1  ;;  %17766 = vst [vmem:[#allocation95_spill] sm:$0xff] %v15954_v61 }
 0x3d2   : > { %v15930_v7 = vadd.f32 %v11032_v20, %v7702_v13  ;;  %v15933_v26 = vadd.f32 %v15818_v33, %v7963_v18  ;;  %v9308_v18 = vrot.slane %v11386_v60, 1  ;;  %v9307_v13 = vsel %vm9272_vm3, %v9304_v47, %v9306_v56  ;;  %v17767_v56 = vld [vmem:[#allocation8_spill] sm:$0xff] }
 0x3d3   : > { %v7887_v1 = vpop.f32.mrf.mxu1  ;;  %v9305_v33 = vsel %vm9272_vm3, %v9303_v45, %v9304_v47  ;;  %v9309_v20 = vrot.slane %v11387_v37, 1  ;;  %v7706_v37 = vadd.f32 %v17767_v56, %v15754_v42  ;;  %v11390_v42 = vld [vmem:[%s11557_s17 + $0xe0] sm:$0xff] }
 0x3d4   : > { %v15941_v58 = vadd.f32 %v7887_v1, %v7700_v62  ;;  %v7703_v62 = vadd.f32 %v17765_v35, %v15750_v44  ;;  %v9391_v1 = vpack.c.bf16 %v9307_v13, %v9305_v33  ;;  %v17768_v44 = vld [vmem:[#allocation69_spill] sm:$0xff]  ;;  %v15971_v35 = vpop.f32.mrf.mxu0 }
 0x3d5   : > { %v11035_v19 = vpop.f32.mrf.mxu1  ;;  %v9310_v50 = vsel %vm9272_vm3, %v9308_v18, %v9309_v20  ;;  %v9312_v60 = vsel %vm9272_vm3, %v9309_v20, %v9311_v24  ;;  %v7704_v33 = vadd.f32 %v17768_v44, %v15760_v11  ;;  %v11389_v18 = vld [vmem:[%s11557_s17 + $0xd8] sm:$0xff]  ;;  %v9314_v24 = vrot.slane %v11390_v42, 1  ;;  %17769 = vst [vmem:[#allocation78_spill] sm:$0xff] %v15971_v35  ;;  %v17771_v11 = vld [vmem:[#allocation70_spill] sm:$0xff] }
 0x3d6   : > { %v15950_v27 = vadd.f32 %v11035_v19, %v7705_v43  ;;  %11229 = vmatprep.mubr.msk.bf16.mxu1 %vm2096_vm2, %v9391_v1  ;;  %v9392_v43 = vpack.c.bf16 %v9312_v60, %v9310_v50  ;;  %v9313_v20 = vrot.slane %v11389_v18, 1  ;;  %v11391_v1 = vld [vmem:[%s11557_s17 + $0xe8] sm:$0x3]  ;;  %v7709_v60 = vadd.f32 %v17771_v11, %v15766_v59  ;;  %v11394_v18 = vld [vmem:[%s11557_s17 + $0x100] sm:$0x3]  ;;  %v15987_v59 = vpop.f32.mrf.mxu0 }
 0x3d7   : > { %v7900_v45 = vpop.f32.mrf.mxu1  ;;  %v9321_v42 = vrot.slane %v11394_v18, 1 }
 0x3d8   : > { %v7967_v47 = vadd.f32 %v7900_v45, %v7703_v62  ;;  %v9316_v45 = vrot.slane %v11391_v1, 1  ;;  %v17772_v1 = vld [vmem:[#allocation77_spill] sm:$0xff] }
 0x3d9   : > { %v11036_v19 = vpop.f32.mrf.mxu1  ;;  %11230 = vmatmul.mubr.msk.bf16.gmra.mxu1 %vm2096_vm2, %v9392_v43 }
 0x3da   : > { %v15963_v13 = vadd.f32 %v11036_v19, %v7706_v37  ;;  %v15966_v23 = vadd.f32 %v15872_v28, %v7967_v47  ;;  %v9315_v28 = vsel %vm9272_vm3, %v9313_v20, %v9314_v24  ;;  %v11392_v47 = vld [vmem:[%s11557_s17 + $0xf0] sm:$0xff]  ;;  %v9317_v43 = vsel %vm9272_vm3, %v9314_v24, %v9316_v45  ;;  %v11393_v19 = vld [vmem:[%s11557_s17 + $0xf8] sm:$0xff] }
 0x3db   : > { %v7903_v62 = vpop.f32.mrf.mxu1  ;;  %v9318_v56 = vrot.slane %v11392_v47, 1  ;;  %v9319_v44 = vrot.slane %v11393_v19, 1  ;;  %v17773_v45 = vld [vmem:[#allocation84_spill] sm:$0xff] }
 0x3dc   : > { %v15974_v50 = vadd.f32 %v7903_v62, %v7704_v33  ;;  %v7707_v33 = vadd.f32 %v17772_v1, %v15774_v51  ;;  %v9393_v62 = vpack.c.bf16 %v9317_v43, %v9315_v28  ;;  %v7710_v19 = vadd.f32 %v17773_v45, %v15776_v12  ;;  %v17774_v51 = vld [vmem:[#allocation88_spill] sm:$0xff]  ;;  %v8170_v1 = vpop.f32.mrf.mxu0 }
 0x3dd   : > { %v11039_v37 = vpop.f32.mrf.mxu1  ;;  %v9320_v11 = vsel %vm9272_vm3, %v9318_v56, %v9319_v44  ;;  %v9322_v47 = vsel %vm9272_vm3, %v9319_v44, %v9321_v42  ;;  %v7708_v28 = vadd.f32 %v17774_v51, %v15781_v63  ;;  %v11395_v56 = vld [vmem:[%s11557_s17 + $0x108] sm:$0xff]  ;;  %v11396_v12 = vld [vmem:[%s11557_s17 + $0x110] sm:$0xff]  ;;  %v17777_v63 = vld [vmem:[#allocation86_spill] sm:$0xff] }
 0x3de   : > { %17770 = vst [vmem:[#allocation33_spill] sm:$0xff] %v15974_v50  ;;  %v15983_v35 = vadd.f32 %v11039_v37, %v7709_v60  ;;  %11233 = vmatprep.mubr.msk.bf16.mxu1 %vm2096_vm2, %v9393_v62  ;;  %v9394_v60 = vpack.c.bf16 %v9322_v47, %v9320_v11  ;;  %v9323_v44 = vrot.slane %v11395_v56, 1  ;;  %v9324_v42 = vrot.slane %v11396_v12, 1  ;;  %v11397_v62 = vld [vmem:[%s11557_s17 + $0x118] sm:$0x3] }
 0x3df   : > { %v7916_v20 = vpop.f32.mrf.mxu1  ;;  %v7713_v47 = vadd.f32 %v17777_v63, %v15786_v8  ;;  %v11400_v56 = vld [vmem:[%s11557_s17 + $0x130] sm:$0x3]  ;;  %v16018_v8 = vpop.f32.mrf.mxu0 }
 0x3e0   : > { %v7971_v24 = vadd.f32 %v7916_v20, %v7707_v33  ;;  %v9326_v20 = vrot.slane %v11397_v62, 1  ;;  %v9331_v12 = vrot.slane %v11400_v56, 1  ;;  %v17778_v62 = vld [vmem:[#allocation90_spill] sm:$0xff]  ;;  %17779 = vst [vmem:[#allocation104_spill] sm:$0xff] %v16018_v8  ;;  %v8207_v8 = vadd.f32 %v15854_v57, %v15950_v27 }
 0x3e1   : > { %v11040_v37 = vpop.f32.mrf.mxu1  ;;  %11234 = vmatmul.mubr.msk.bf16.gmra.mxu1 %vm2096_vm2, %v9394_v60 }
 0x3e2   : > { %v15996_v43 = vadd.f32 %v11040_v37, %v7710_v19  ;;  %v15999_v18 = vadd.f32 %v15938_v21, %v7971_v24  ;;  %v9325_v21 = vsel %vm9272_vm3, %v9323_v44, %v9324_v42  ;;  %v11398_v24 = vld [vmem:[%s11557_s17 + $0x120] sm:$0xff]  ;;  %v9327_v60 = vsel %vm9272_vm3, %v9324_v42, %v9326_v20  ;;  %v11399_v37 = vld [vmem:[%s11557_s17 + $0x128] sm:$0xff] }
 0x3e3   : > { %v7919_v33 = vpop.f32.mrf.mxu1  ;;  %v9328_v45 = vrot.slane %v11398_v24, 1  ;;  %v9329_v51 = vrot.slane %v11399_v37, 1  ;;  %v7714_v20 = vadd.f32 %v15593_v54, %v15794_v3  ;;  %v16034_v3 = vpop.f32.mrf.mxu0 }
 0x3e4   : > { %17775 = vst [vmem:[#allocation114_spill] sm:$0xff] %v15996_v43  ;;  %v16005_v11 = vadd.f32 %v7919_v33, %v7708_v28  ;;  %v7711_v28 = vadd.f32 %v17778_v62, %v15791_v31  ;;  %v9395_v33 = vpack.c.bf16 %v9327_v60, %v9325_v21  ;;  %v7712_v31 = vadd.f32 %v15601_v6, %v15799_v48 }
 0x3e5   : > { %v11043_v19 = vpop.f32.mrf.mxu1  ;;  %v9330_v63 = vsel %vm9272_vm3, %v9328_v45, %v9329_v51  ;;  %v9332_v24 = vsel %vm9272_vm3, %v9329_v51, %v9331_v12  ;;  %v11401_v45 = vld [vmem:[%s11557_s17 + $0x138] sm:$0xff]  ;;  %v11402_v51 = vld [vmem:[%s11557_s17 + $0x140] sm:$0xff]  ;;  %17781 = vst [vmem:[#allocation109_spill] sm:$0xff] %v16034_v3  ;;  %v11403_v12 = vld [vmem:[%s11557_s17 + $0x148] sm:$0x3]  ;;  %v8187_v6 = vadd.f32 %v15616_v49, %v15803_v41  ;;  %v8211_v43 = vadd.f32 %v15921_v5, %v15983_v35 }
 0x3e6   : > { %17776 = vst [vmem:[#allocation48_spill] sm:$0xff] %v16005_v11  ;;  %v16014_v61 = vadd.f32 %v11043_v19, %v7713_v47  ;;  %11237 = vmatprep.mubr.msk.bf16.mxu1 %vm2096_vm2, %v9395_v33  ;;  %v9396_v47 = vpack.c.bf16 %v9332_v24, %v9330_v63  ;;  %v9333_v37 = vrot.slane %v11401_v45, 1  ;;  %v9334_v54 = vrot.slane %v11402_v51, 1  ;;  %v11405_v24 = vld [vmem:[%s11557_s17 + $0x158] sm:$0xff]  ;;  %v16048_v45 = vpop.f32.mrf.mxu0 }
 0x3e7   : > { %v7932_v44 = vpop.f32.mrf.mxu1  ;;  %v9336_v62 = vrot.slane %v11403_v12, 1  ;;  %v11407_v12 = vld [vmem:[%s11557_s17 + $0x168] sm:$0xff] }
 0x3e8   : > { %v7975_v42 = vadd.f32 %v7932_v44, %v7711_v28  ;;  %v9335_v48 = vsel %vm9272_vm3, %v9333_v37, %v9334_v54 }
 0x3e9   : > { %v11044_v19 = vpop.f32.mrf.mxu1  ;;  %11238 = vmatmul.mubr.msk.bf16.gmra.mxu1 %vm2096_vm2, %v9396_v47  ;;  %v9337_v63 = vsel %vm9272_vm3, %v9334_v54, %v9336_v62  ;;  %v9343_v62 = vrot.slane %v11407_v12, 1 }
 0x3ea   : > { %v16027_v21 = vadd.f32 %v11044_v19, %v7714_v20  ;;  %v16029_v60 = vadd.f32 %v8170_v1, %v7975_v42  ;;  %v11404_v1 = vld [vmem:[%s11557_s17 + $0x150] sm:$0xff]  ;;  %v9339_v42 = vrot.slane %v11405_v24, 1  ;;  %v11406_v20 = vld [vmem:[%s11557_s17 + $0x160] sm:$0x3] }
 0x3eb   : > { %v7935_v56 = vpop.f32.mrf.mxu1  ;;  %v9338_v33 = vrot.slane %v11404_v1, 1  ;;  %v9341_v47 = vrot.slane %v11406_v20, 1  ;;  %v16061_v1 = vpop.f32.mrf.mxu0 }
 0x3ec   : > { %17780 = vst [vmem:[#allocation105_spill] sm:$0xff] %v16027_v21  ;;  %v16037_v28 = vadd.f32 %v7935_v56, %v7712_v31  ;;  %v9397_v31 = vpack.c.bf16 %v9337_v63, %v9335_v48 }
 0x3ed   : > { %v11083_v44 = vpop.f32.mrf.mxu1  ;;  %v9340_v41 = vsel %vm9272_vm3, %v9338_v33, %v9339_v42  ;;  %v9342_v37 = vsel %vm9272_vm3, %v9339_v42, %v9341_v47  ;;  %v11411_v42 = vld [vmem:[%s11557_s17 + $0x188] sm:$0xff]  ;;  %v11412_v47 = vld [vmem:[%s11557_s17 + $0x190] sm:$0x3] }
 0x3ee   : > { %17782 = vst [vmem:[#allocation110_spill] sm:$0xff] %v16037_v28  ;;  %v16046_v19 = vadd.f32 %v11083_v44, %v8187_v6  ;;  %11241 = vmatprep.mubr.msk.bf16.mxu1 %vm2096_vm2, %v9397_v31  ;;  %v9398_v54 = vpack.c.bf16 %v9342_v37, %v9340_v41  ;;  %v11408_v6 = vld [vmem:[%s11557_s17 + $0x170] sm:$0xff]  ;;  %v11409_v44 = vld [vmem:[%s11557_s17 + $0x178] sm:$0x3]  ;;  %v9349_v20 = vrot.slane %v11411_v42, 1  ;;  %v9351_v31 = vrot.slane %v11412_v47, 1  ;;  %v16077_v28 = vpop.f32.mrf.mxu0 }
 0x3ef   : > { %v8304_v49 = vpop.f32.mrf.mxu1  ;;  %v9344_v48 = vrot.slane %v11408_v6, 1  ;;  %v9346_v63 = vrot.slane %v11409_v44, 1 }
 0x3f0   : > { %v16053_v51 = vadd.f32 %v8304_v49, %v15816_v4  ;;  %v11410_v4 = vld [vmem:[%s11557_s17 + $0x180] sm:$0xff]  ;;  %v8191_v49 = vadd.f32 %v15670_v55, %v15824_v14  ;;  %v9352_v6 = vsel %vm9272_vm3, %v9349_v20, %v9351_v31  ;;  %v16086_v14 = vpop.f32.mrf.mxu0 }
 0x3f1   : > { %v16056_v56 = vpop.f32.mrf.mxu1  ;;  %11242 = vmatmul.mubr.msk.bf16.gmra.mxu1 %vm2096_vm2, %v9398_v54  ;;  %v9348_v24 = vrot.slane %v11410_v4, 1  ;;  %v9345_v41 = vsel %vm9272_vm3, %v9343_v62, %v9344_v48  ;;  %v9347_v54 = vsel %vm9272_vm3, %v9344_v48, %v9346_v63  ;;  %v8195_v48 = vadd.f32 %v15722_v22, %v15850_v17 }
 0x3f2   : > { %v9399_v44 = vpack.c.bf16 %v9347_v54, %v9345_v41  ;;  %v8199_v54 = vadd.f32 %v15770_v0, %v15884_v2 }
 0x3f3   : > { %v16063_v33 = vpop.f32.mrf.mxu1  ;;  %v9350_v12 = vsel %vm9272_vm3, %v9348_v24, %v9349_v20  ;;  %v16094_v20 = vpop.f32.mrf.mxu0 }
 0x3f4   : > { %v9400_v4 = vpack.c.bf16 %v9352_v6, %v9350_v12  ;;  %11245 = vmatprep.mubr.msk.bf16.mxu1 %vm2096_vm2, %v9399_v44 }
 0x3f5   : > { %v11087_v37 = vpop.f32.mrf.mxu1  ;;  %v16101_v41 = vpop.f32.mrf.mxu0 }
 0x3f6   : > { %v16075_v3 = vadd.f32 %v11087_v37, %v8191_v49 }
 0x3f7   : > { %v8320_v42 = vpop.f32.mrf.mxu1  ;;  %v16109_v17 = vpop.f32.mrf.mxu0 }
 0x3f8   : > { %v16080_v47 = vadd.f32 %v8320_v42, %v15837_v30 }
 0x3f9   : > { %v16083_v55 = vpop.f32.mrf.mxu1  ;;  %11246 = vmatmul.mubr.msk.bf16.gmra.mxu1 %vm2096_vm2, %v9400_v4  ;;  %v16116_v4 = vpop.f32.mrf.mxu0 }
 0x3fb   : > { %v16088_v62 = vpop.f32.mrf.mxu1  ;;  %v16124_v2 = vpop.f32.mrf.mxu0 }
 0x3fd   : > { %v11091_v63 = vpop.f32.mrf.mxu1 }
 0x3fe   : > { %v16092_v24 = vadd.f32 %v11091_v63, %v8195_v48  ;;  %v8203_v48 = vadd.f32 %v15807_v53, %v15919_v25 }
 0x3ff   : > { %v8336_v30 = vpop.f32.mrf.mxu1 }
 0x400   : > { %v16097_v31 = vadd.f32 %v8336_v30, %v15868_v40 }
 0x401   : > { %v16099_v49 = vpop.f32.mrf.mxu1 }
 0x403   : > { %v16103_v37 = vpop.f32.mrf.mxu1 }
 0x405   : > { %v11095_v12 = vpop.f32.mrf.mxu1 }
 0x406   : > { %v16107_v22 = vadd.f32 %v11095_v12, %v8199_v54  ;;  %v16131_v12 = vpop.f32.mrf.mxu0 }
 0x407   : > { %v8352_v6 = vpop.f32.mrf.mxu1 }
 0x408   : > { %v16112_v44 = vadd.f32 %v8352_v6, %v15900_v9  ;;  %v16139_v25 = vpop.f32.mrf.mxu0 }
 0x409   : > { %v16114_v40 = vpop.f32.mrf.mxu1 }
 0x40b   : > { %v16118_v42 = vpop.f32.mrf.mxu1 }
 0x40d   : > { %v11099_v63 = vpop.f32.mrf.mxu1 }
 0x40e   : > { %v16122_v0 = vadd.f32 %v11099_v63, %v8203_v48 }
 0x40f   : > { %v8368_v30 = vpop.f32.mrf.mxu1 }
 0x410   : > { %v16127_v54 = vadd.f32 %v8368_v30, %v15933_v26  ;;  %v16146_v30 = vpop.f32.mrf.mxu0 }
 0x411   : > { %v16129_v9 = vpop.f32.mrf.mxu1 }
 0x412   : > { %v16154_v27 = vpop.f32.mrf.mxu0 }
 0x413   : > { %v16133_v6 = vpop.f32.mrf.mxu1 }
 0x415   : > { %v11103_v21 = vpop.f32.mrf.mxu1 }
 0x416   : > { %v16137_v53 = vadd.f32 %v11103_v21, %v8207_v8 }
 0x417   : > { %v8384_v48 = vpop.f32.mrf.mxu1 }
 0x418   : > { %v16142_v63 = vadd.f32 %v8384_v48, %v15966_v23  ;;  %v16161_v48 = vpop.f32.mrf.mxu0 }
 0x419   : > { %v16144_v26 = vpop.f32.mrf.mxu1 }
 0x41a   : > { %17783 = vst [vmem:[#allocation118_spill] sm:$0xff] %v16142_v63  ;;  %17784 = vst [vmem:[#allocation117_spill] sm:$0xff] %v16144_v26  ;;  %v16169_v35 = vpop.f32.mrf.mxu0 }
 0x41b   : > { %v16148_v11 = vpop.f32.mrf.mxu1 }
 0x41c   : > { %17785 = vst [vmem:[#allocation108_spill] sm:$0xff] %v16148_v11  ;;  %v8215_v11 = vadd.f32 %v15987_v59, %v16014_v61  ;;  %v8186_v59 = vadd.f32 %v15650_v16, %v15820_v38  ;;  %v8192_v16 = vadd.f32 %v15698_v36, %v15834_v52  ;;  %v16198_v38 = vld [vmem:[%s16788_s7] ss:$0 sm:$0xff] }
 0x41d   : > { %v11107_v50 = vpop.f32.mrf.mxu1 }
 0x41e   : > { %v16152_v57 = vadd.f32 %v11107_v50, %v8211_v43 }
 0x41f   : > { %v8400_v8 = vpop.f32.mrf.mxu1 }
 0x420   : > { %v16157_v21 = vadd.f32 %v8400_v8, %v15999_v18  ;;  %v8188_v8 = vadd.f32 %v15640_v34, %v15811_v15  ;;  %v8697_v34 = vadd.f32 %v16048_v45, %v16046_v19  ;;  %v8190_v19 = vadd.f32 %v15708_v29, %v15844_v39 }
 0x421   : > { %v16159_v23 = vpop.f32.mrf.mxu1  ;;  %v8699_v29 = vadd.f32 %v16101_v41, %v16080_v47  ;;  %v17791_v47 = vld [vmem:[#allocation102_spill] sm:$0xff]  ;;  %v17792_v41 = vld [vmem:[#allocation97_spill] sm:$0xff] }
 0x422   : > { %17786 = vst [vmem:[#allocation112_spill] sm:$0xff] %v16157_v21  ;;  %v16178_v21 = vpop.f32.mrf.mxu0  ;;  %v8434_v61 = vadd.f32 %v16056_v56, %v8188_v8 }
 0x423   : > { %v16163_v63 = vpop.f32.mrf.mxu1 }
 0x424   : > { %17787 = vst [vmem:[#allocation116_spill] sm:$0xff] %v16163_v63 }
 0x425   : > { %v11111_v26 = vpop.f32.mrf.mxu1 }
 0x426   : > { %v16167_v5 = vadd.f32 %v11111_v26, %v8215_v11  ;;  %v8432_v26 = vadd.f32 %v16063_v33, %v8186_v59 }
 0x427   : > { %v8416_v50 = vpop.f32.mrf.mxu1 }
 0x428   : > { %17788 = vst [vmem:[#allocation113_spill] sm:$0xff] %v16167_v5  ;;  %v16172_v43 = vadd.f32 %v8416_v50, %v16029_v60  ;;  %v8695_v60 = vadd.f32 %v16061_v1, %v16053_v51  ;;  %v16188_v50 = vpop.f32.mrf.mxu0  ;;  %v8696_v1 = vadd.f32 %v16086_v14, %v8432_v26  ;;  %v8436_v14 = vadd.f32 %v16088_v62, %v8190_v19  ;;  %v17793_v19 = vld [vmem:[#allocation5_spill] sm:$0xff] }
 0x429   : > { %v16174_v18 = vpop.f32.mrf.mxu1 }
 0x42a   : > { %17789 = vst [vmem:[#allocation119_spill] sm:$0xff] %v16172_v43  ;;  %v16201_v33 = vpop.f32.mrf.mxu0 }
 0x42b   : > { %v16180_v63 = vpop.f32.mrf.mxu1 }
 0x42c   : > { %17790 = vst [vmem:[#allocation22_spill] sm:$0xff] %v16180_v63  ;;  %v8698_v63 = vadd.f32 %v16077_v28, %v8434_v61  ;;  %v8438_v28 = vadd.f32 %v16083_v55, %v8192_v16  ;;  %v16221_v39 = vpop.f32.mrf.mxu0  ;;  %v8196_v16 = vadd.f32 %v17792_v41, %v17791_v47 }
 0x42d   : > { %v11151_v11 = vpop.f32.mrf.mxu1 }
 0x42e   : > { %v8935_v5 = vadd.f32 %v11151_v11, %v8697_v34  ;;  %v8702_v62 = vadd.f32 %v16109_v17, %v8438_v28  ;;  %v8194_v17 = vadd.f32 %v17793_v19, %v15875_v32 }
 0x42f   : > { %v8806_v15 = vpop.f32.mrf.mxu1 }
 0x430   : > { %v8933_v43 = vadd.f32 %v8806_v15, %v8695_v60  ;;  %v16213_v61 = vadd.f32 %v16198_v38, %v8935_v5 }
 0x431   : > { %v11152_v56 = vpop.f32.mrf.mxu1 }
 0x432   : > { %v8936_v51 = vadd.f32 %v11152_v56, %v8698_v63  ;;  %v16207_v8 = vadd.f32 %v16198_v38, %v8933_v43  ;;  %v8701_v43 = vadd.f32 %v16094_v20, %v16075_v3  ;;  %v17021_v34 = vmax.f32 %v16213_v61, 0.0 }
 0x433   : > { %v8809_v45 = vpop.f32.mrf.mxu1 }
 0x434   : > { %v16210_v36 = vadd.f32 %v16198_v38, %v8936_v51  ;;  %v8934_v52 = vadd.f32 %v8809_v45, %v8696_v1  ;;  %v17017_v5 = vmax.f32 %v16207_v8, 0.0  ;;  %v8700_v51 = vadd.f32 %v16116_v4, %v8436_v14  ;;  %v16237_v1 = vpop.f32.mrf.mxu0 }
 0x435   : > { %v11155_v63 = vpop.f32.mrf.mxu1 }
 0x436   : > { %v16217_v59 = vadd.f32 %v16198_v38, %v8934_v52  ;;  %v17023_v55 = vmax.f32 %v16210_v36, 0.0  ;;  %v8939_v15 = vadd.f32 %v11155_v63, %v8701_v43  ;;  %v8705_v52 = vadd.f32 %v16124_v2, %v16092_v24 }
 0x437   : > { %v8822_v11 = vpop.f32.mrf.mxu1  ;;  %v8442_v63 = vadd.f32 %v16099_v49, %v8196_v16  ;;  %v8703_v2 = vadd.f32 %v16131_v12, %v16097_v31 }
 0x438   : > { %v17018_v26 = vmax.f32 %v16217_v59, 0.0  ;;  %v8937_v60 = vadd.f32 %v8822_v11, %v8699_v29  ;;  %v9037_v45 = vpack.c.bf16 %v17023_v55, %v17021_v34  ;;  %v16256_v32 = vadd.f32 %v16198_v38, %v8939_v15  ;;  %v17813_v55 = vld [vmem:[#allocation109_spill] sm:$0xff] }
 0x439   : > { %v11156_v56 = vpop.f32.mrf.mxu1  ;;  %v8440_v11 = vadd.f32 %v16103_v37, %v8194_v17  ;;  %v8706_v16 = vadd.f32 %v16139_v25, %v8442_v63  ;;  %v17794_v37 = vld [vmem:[#allocation98_spill] sm:$0xff] }
 0x43a   : > { %v9036_v3 = vpack.c.bf16 %v17018_v26, %v17017_v5  ;;  %v8940_v20 = vadd.f32 %v11156_v56, %v8702_v62  ;;  %v16249_v29 = vadd.f32 %v16198_v38, %v8937_v60  ;;  %v16265_v60 = vpop.f32.mrf.mxu0 }
 0x43b   : > { %v8825_v28 = vpop.f32.mrf.mxu1  ;;  %v8704_v17 = vadd.f32 %v16146_v30, %v8440_v11 }
 0x43c   : > { %v16252_v4 = vadd.f32 %v16198_v38, %v8940_v20  ;;  %v8938_v14 = vadd.f32 %v8825_v28, %v8700_v51  ;;  %11183 = vmatprep.mubr.msk.bf16.mxu0 %vm6205_vm12, %v9036_v3  ;;  %v17025_v15 = vmax.f32 %v16249_v29, 0.0  ;;  %v8200_v3 = vadd.f32 %v17794_v37, %v15897_v10  ;;  %v17795_v10 = vld [vmem:[#allocation100_spill] sm:$0xff] }
 0x43d   : > { %v11159_v43 = vpop.f32.mrf.mxu1  ;;  %11184 = vmatmul.mubr.msk.bf16.vlgmr.msra.gmra.mxu0 %vm6205_vm12, %v9037_v45  ;;  %v17029_v20 = vmax.f32 %v16256_v32, 0.0  ;;  %v16282_v45 = vpop.f32.mrf.mxu0  ;;  %v8198_v28 = vadd.f32 %v17795_v10, %v15908_v46 }
 0x43e   : > { %v16261_v24 = vadd.f32 %v16198_v38, %v8938_v14  ;;  %v8943_v49 = vadd.f32 %v11159_v43, %v8705_v52  ;;  %v9011_v62 = vmax.f32 %v16252_v4, 0.0  ;;  %v8446_v25 = vadd.f32 %v16114_v40, %v8200_v3 }
 0x43f   : > { %v8838_v56 = vpop.f32.mrf.mxu1  ;;  %v8709_v40 = vadd.f32 %v16154_v27, %v16107_v22  ;;  %v8444_v46 = vadd.f32 %v16118_v42, %v8198_v28  ;;  %v16309_v37 = vpop.f32.mrf.mxu0 }
 0x440   : > { %v17026_v47 = vmax.f32 %v16261_v24, 0.0  ;;  %v8941_v41 = vadd.f32 %v8838_v56, %v8703_v2  ;;  %v16279_v12 = vadd.f32 %v16198_v38, %v8943_v49  ;;  %v9039_v52 = vpack.c.bf16 %v9011_v62, %v17029_v20 }
 0x441   : > { %v11160_v51 = vpop.f32.mrf.mxu1  ;;  %v8707_v49 = vadd.f32 %v16161_v48, %v16112_v44  ;;  %v8710_v22 = vadd.f32 %v16169_v35, %v8446_v25  ;;  %v8708_v10 = vadd.f32 %v16178_v21, %v8444_v46  ;;  %v8651_v28 = vpop.f32.mrf.mxu0  ;;  %v8711_v21 = vadd.f32 %v16201_v33, %v16127_v54 }
 0x442   : > { %v9038_v31 = vpack.c.bf16 %v17026_v47, %v17025_v15  ;;  %v8944_v19 = vadd.f32 %v11160_v51, %v8706_v16  ;;  %v16292_v14 = vadd.f32 %v16198_v38, %v8941_v41  ;;  %v9014_v2 = vmax.f32 %v16279_v12, 0.0  ;;  %v17796_v51 = vld [vmem:[#allocation99_spill] sm:$0xff]  ;;  %v17814_v15 = vld [vmem:[#allocation113_spill] sm:$0xff] }
 0x443   : > { %v8841_v63 = vpop.f32.mrf.mxu1 }
 0x444   : > { %v16295_v43 = vadd.f32 %v16198_v38, %v8944_v19  ;;  %v8942_v30 = vadd.f32 %v8841_v63, %v8704_v17  ;;  %11187 = vmatprep.mubr.msk.bf16.mxu0 %vm6205_vm12, %v9038_v31  ;;  %v9012_v42 = vmax.f32 %v16292_v14, 0.0  ;;  %v8204_v31 = vadd.f32 %v17796_v51, %v15930_v7 }
 0x445   : > { %v11163_v11 = vpop.f32.mrf.mxu1  ;;  %11188 = vmatmul.mubr.msk.bf16.gmra.mxu0 %vm6205_vm12, %v9039_v52  ;;  %v17820_v14 = vmax.f32 %v16261_v24, 0.0 }
 0x446   : > { %v9015_v56 = vmax.f32 %v16295_v43, 0.0  ;;  %v16307_v41 = vadd.f32 %v16198_v38, %v8942_v30  ;;  %v8947_v16 = vadd.f32 %v11163_v11, %v8709_v40  ;;  %v8450_v52 = vadd.f32 %v16129_v9, %v8204_v31  ;;  %v17797_v30 = vld [vmem:[#allocation101_spill] sm:$0xff] }
 0x447   : > { %v8854_v3 = vpop.f32.mrf.mxu1  ;;  %v8202_v40 = vadd.f32 %v17797_v30, %v15941_v58  ;;  %v17800_v30 = vld [vmem:[#allocation75_spill] sm:$0xff]  ;;  %v17824_v43 = vmax.f32 %v16210_v36, 0.0 }
 0x448   : > { %v9041_v44 = vpack.c.bf16 %v9015_v56, %v9014_v2  ;;  %v9013_v27 = vmax.f32 %v16307_v41, 0.0  ;;  %v8945_v48 = vadd.f32 %v8854_v3, %v8707_v49  ;;  %v16325_v35 = vadd.f32 %v16198_v38, %v8947_v16 }
 0x449   : > { %v11164_v19 = vpop.f32.mrf.mxu1  ;;  %v8448_v9 = vadd.f32 %v16133_v6, %v8202_v40  ;;  %v8714_v31 = vadd.f32 %v16221_v39, %v8450_v52 }
 0x44a   : > { %v9040_v17 = vpack.c.bf16 %v9013_v27, %v9012_v42  ;;  %v8948_v25 = vadd.f32 %v11164_v19, %v8710_v22  ;;  %v16332_v7 = vadd.f32 %v16198_v38, %v8945_v48  ;;  %v9018_v46 = vmax.f32 %v16325_v35, 0.0  ;;  %v11141_v22 = vpop.f32.mrf.mxu0 }
 0x44b   : > { %v8857_v63 = vpop.f32.mrf.mxu1  ;;  %v8713_v48 = vadd.f32 %v16188_v50, %v16122_v0  ;;  %v8712_v39 = vadd.f32 %v16237_v1, %v8448_v9 }
 0x44c   : > { %v16335_v11 = vadd.f32 %v16198_v38, %v8948_v25  ;;  %v8946_v49 = vadd.f32 %v8857_v63, %v8708_v10  ;;  %11191 = vmatprep.mubr.msk.bf16.mxu0 %vm6205_vm12, %v9040_v17  ;;  %v17798_v25 = vld [vmem:[#allocation82_spill] sm:$0xff]  ;;  %v8664_v52 = vpop.f32.mrf.mxu0  ;;  %v17799_v63 = vld [vmem:[#allocation33_spill] sm:$0xff] }
 0x44d   : > { %v11167_v16 = vpop.f32.mrf.mxu1  ;;  %11192 = vmatmul.mubr.msk.bf16.gmra.mxu0 %vm6205_vm12, %v9041_v44  ;;  %v9016_v44 = vmax.f32 %v16332_v7, 0.0  ;;  %v8208_v10 = vadd.f32 %v17798_v25, %v15963_v13  ;;  %v8206_v40 = vadd.f32 %v17800_v30, %v17799_v63 }
 0x44e   : > { %v9019_v58 = vmax.f32 %v16335_v11, 0.0  ;;  %v16345_v3 = vadd.f32 %v16198_v38, %v8946_v49  ;;  %v8951_v19 = vadd.f32 %v11167_v16, %v8713_v48  ;;  %v8717_v16 = vadd.f32 %v16265_v60, %v16137_v53 }
 0x44f   : > { %v8870_v51 = vpop.f32.mrf.mxu1 }
 0x450   : > { %v9043_v54 = vpack.c.bf16 %v9019_v58, %v9018_v46  ;;  %v9017_v6 = vmax.f32 %v16345_v3, 0.0  ;;  %v8949_v33 = vadd.f32 %v8870_v51, %v8711_v21  ;;  %v17801_v21 = vld [vmem:[#allocation117_spill] sm:$0xff]  ;;  %v16376_v1 = vadd.f32 %v16198_v38, %v8951_v19 }
 0x451   : > { %v11168_v17 = vpop.f32.mrf.mxu1  ;;  %v8454_v48 = vadd.f32 %v17801_v21, %v8208_v10 }
 0x452   : > { %v9042_v0 = vpack.c.bf16 %v9017_v6, %v9016_v44  ;;  %v8952_v50 = vadd.f32 %v11168_v17, %v8714_v31  ;;  %v16369_v13 = vadd.f32 %v16198_v38, %v8949_v33  ;;  %v17802_v31 = vld [vmem:[#allocation108_spill] sm:$0xff]  ;;  %v17803_v33 = vld [vmem:[#allocation118_spill] sm:$0xff]  ;;  %v17825_v24 = vmax.f32 %v16376_v1, 0.0 }
 0x453   : > { %v8873_v49 = vpop.f32.mrf.mxu1  ;;  %v8452_v17 = vadd.f32 %v17802_v31, %v8206_v40  ;;  %v8715_v10 = vadd.f32 %v16282_v45, %v17803_v33  ;;  %v17805_v40 = vld [vmem:[#allocation95_spill] sm:$0xff] }
 0x454   : > { %v16372_v51 = vadd.f32 %v16198_v38, %v8952_v50  ;;  %v8950_v25 = vadd.f32 %v8873_v49, %v8712_v39  ;;  %11195 = vmatprep.mubr.msk.bf16.mxu0 %vm6205_vm12, %v9042_v0  ;;  %v11142_v50 = vpop.f32.mrf.mxu0  ;;  %v17019_v0 = vmax.f32 %v16369_v13, 0.0  ;;  %v17804_v49 = vld [vmem:[#allocation114_spill] sm:$0xff]  ;;  %v17829_v36 = vmax.f32 %v16369_v13, 0.0 }
 0x455   : > { %v11171_v9 = vpop.f32.mrf.mxu1  ;;  %11196 = vmatmul.mubr.msk.bf16.gmra.mxu0 %vm6205_vm12, %v9043_v54  ;;  %v8718_v54 = vadd.f32 %v16309_v37, %v8454_v48  ;;  %v8212_v21 = vadd.f32 %v17805_v40, %v17804_v49  ;;  %v8716_v33 = vadd.f32 %v8651_v28, %v8452_v17  ;;  %v17806_v37 = vld [vmem:[#allocation48_spill] sm:$0xff]  ;;  %v17807_v48 = vld [vmem:[#allocation78_spill] sm:$0xff] }
 0x456   : > { %v16381_v53 = vadd.f32 %v16198_v38, %v8950_v25  ;;  %v8955_v60 = vadd.f32 %v11171_v9, %v8717_v16  ;;  %v17024_v39 = vmax.f32 %v16372_v51, 0.0  ;;  %v17022_v25 = vmax.f32 %v16376_v1, 0.0  ;;  %v8667_v5 = vpop.f32.mrf.mxu0  ;;  %v17808_v17 = vld [vmem:[#allocation116_spill] sm:$0xff]  ;;  %v16552_v1 = vld [vmem:[%s16790_s9] ss:$0 sm:$0xff] }
 0x457   : > { %v8886_v63 = vpop.f32.mrf.mxu1 }
 0x458   : > { %v17020_v19 = vmax.f32 %v16381_v53, 0.0  ;;  %v8953_v30 = vadd.f32 %v8886_v63, %v8715_v10  ;;  %v16397_v9 = vadd.f32 %v16198_v38, %v8955_v60  ;;  %v8458_v10 = vadd.f32 %v16159_v23, %v8212_v21  ;;  %v11145_v28 = vpop.f32.mrf.mxu0 }
 0x459   : > { %v11172_v16 = vpop.f32.mrf.mxu1  ;;  %v8210_v63 = vadd.f32 %v17807_v48, %v17806_v37  ;;  %v9045_v49 = vpack.c.bf16 %v17024_v39, %v17022_v25  ;;  %v8721_v23 = vadd.f32 %v11141_v22, %v16152_v57  ;;  %v17809_v37 = vld [vmem:[#allocation112_spill] sm:$0xff]  ;;  %v17812_v25 = vld [vmem:[#allocation110_spill] sm:$0xff]  ;;  %v8725_v47 = vadd.f32 %v11145_v28, %v17814_v15 }
 0x45a   : > { %v9044_v45 = vpack.c.bf16 %v17020_v19, %v17019_v0  ;;  %v8956_v31 = vadd.f32 %v11172_v16, %v8718_v54  ;;  %v16407_v26 = vadd.f32 %v16198_v38, %v8953_v30  ;;  %v8719_v48 = vadd.f32 %v8664_v52, %v17809_v37  ;;  %v17811_v37 = vld [vmem:[#allocation104_spill] sm:$0xff] }
 0x45b   : > { %v8889_v40 = vpop.f32.mrf.mxu1  ;;  %v8456_v21 = vadd.f32 %v17808_v17, %v8210_v63  ;;  %v17030_v0 = vmax.f32 %v16397_v9, 0.0  ;;  %v17810_v17 = vld [vmem:[#allocation105_spill] sm:$0xff]  ;;  %v8214_v39 = vadd.f32 %v17813_v55, %v17812_v25 }
 0x45c   : > { %v16410_v60 = vadd.f32 %v16198_v38, %v8956_v31  ;;  %v8954_v54 = vadd.f32 %v8889_v40, %v8716_v33  ;;  %11199 = vmatprep.mubr.msk.bf16.mxu0 %vm6205_vm12, %v9044_v45  ;;  %v8722_v45 = vadd.f32 %v11142_v50, %v8458_v10  ;;  %v17027_v57 = vmax.f32 %v16407_v26, 0.0 }
 0x45d   : > { %v11175_v16 = vpop.f32.mrf.mxu1  ;;  %11200 = vmatmul.mubr.msk.bf16.gmra.mxu0 %vm6205_vm12, %v9045_v49  ;;  %v8680_v49 = vpop.f32.mrf.mxu0  ;;  %v8216_v19 = vadd.f32 %v17811_v37, %v17810_v17  ;;  %v17821_v4 = vmax.f32 %v16407_v26, 0.0  ;;  %v17826_v26 = vmax.f32 %v16213_v61, 0.0 }
 0x45e   : > { %v9027_v30 = vmax.f32 %v16410_v60, 0.0  ;;  %v16420_v31 = vadd.f32 %v16198_v38, %v8954_v54  ;;  %v8959_v33 = vadd.f32 %v11175_v16, %v8721_v23  ;;  %v8720_v23 = vadd.f32 %v8667_v5, %v8456_v21  ;;  %v16560_v60 = vld [vmem:[%s16783_s2] sm:$0xff] }
 0x45f   : > { %v8902_v40 = vpop.f32.mrf.mxu1  ;;  %v8462_v16 = vadd.f32 %v16174_v18, %v8216_v19  ;;  %v17816_v18 = vld [vmem:[#allocation119_spill] sm:$0xff]  ;;  %17831 = vst [vmem:[#allocation120_spill] sm:$0xff] %v16560_v60 }
 0x460   : > { %v9047_v22 = vpack.c.bf16 %v9027_v30, %v17030_v0  ;;  %v17028_v63 = vmax.f32 %v16420_v31, 0.0  ;;  %v8957_v52 = vadd.f32 %v8902_v40, %v8719_v48  ;;  %v8998_v10 = vadd.f32 %v16198_v38, %v8959_v33 }
 0x461   : > { %v11176_v34 = vpop.f32.mrf.mxu1  ;;  %v8723_v5 = vadd.f32 %v8680_v49, %v17816_v18  ;;  %v17819_v12 = vmax.f32 %v16420_v31, 0.0 }
 0x462   : > { %v9046_v50 = vpack.c.bf16 %v17028_v63, %v17027_v57  ;;  %v8960_v54 = vadd.f32 %v11176_v34, %v8722_v45  ;;  %v8996_v40 = vadd.f32 %v16198_v38, %v8957_v52  ;;  %v11146_v57 = vpop.f32.mrf.mxu0  ;;  %v17815_v63 = vld [vmem:[#allocation22_spill] sm:$0xff]  ;;  %v9030_v19 = vmax.f32 %v8998_v10, 0.0 }
 0x463   : > { %v8905_v48 = vpop.f32.mrf.mxu1  ;;  %v8460_v33 = vadd.f32 %v17815_v63, %v8214_v39  ;;  %v8726_v52 = vadd.f32 %v11146_v57, %v8462_v16 }
 0x464   : > { %v8999_v17 = vadd.f32 %v16198_v38, %v8960_v54  ;;  %v8958_v37 = vadd.f32 %v8905_v48, %v8720_v23  ;;  %11203 = vmatprep.mubr.msk.bf16.mxu0 %vm6205_vm12, %v9046_v50  ;;  %v9028_v54 = vmax.f32 %v8996_v40, 0.0  ;;  %v8683_v15 = vpop.f32.mrf.mxu0 }
 0x465   : > { %v11179_v34 = vpop.f32.mrf.mxu1  ;;  %11204 = vmatmul.mubr.msk.bf16.gmra.mxu0 %vm6205_vm12, %v9047_v22  ;;  %v8724_v22 = vadd.f32 %v8683_v15, %v8460_v33 }
 0x466   : > { %v9031_v55 = vmax.f32 %v8999_v17, 0.0  ;;  %v8997_v25 = vadd.f32 %v16198_v38, %v8958_v37  ;;  %v8963_v21 = vadd.f32 %v11179_v34, %v8725_v47 }
 0x467   : > { %v8918_v45 = vpop.f32.mrf.mxu1 }
 0x468   : > { %v9049_v23 = vpack.c.bf16 %v9031_v55, %v9030_v19  ;;  %v9029_v50 = vmax.f32 %v8997_v25, 0.0  ;;  %v8961_v48 = vadd.f32 %v8918_v45, %v8723_v5  ;;  %v9002_v39 = vadd.f32 %v16198_v38, %v8963_v21  ;;  %v9871_v25 = vld [vmem:[%s16784_s3] sm:$0xf] }
 0x469   : > { %v11180_v28 = vpop.f32.mrf.mxu1  ;;  %10787 = vmatprep.mubr.msk.f32.mxu1 %vm6205_vm12, %v9871_v25 }
 0x46a   : > { %v9048_v20 = vpack.c.bf16 %v9029_v50, %v9028_v54  ;;  %v8964_v63 = vadd.f32 %v11180_v28, %v8726_v52  ;;  %v9000_v49 = vadd.f32 %v16198_v38, %v8961_v48  ;;  %v9034_v47 = vmax.f32 %v9002_v39, 0.0 }
 0x46b   : > { %v8921_v0 = vpop.f32.mrf.mxu1 }
 0x46c   : > { %v9003_v10 = vadd.f32 %v16198_v38, %v8964_v63  ;;  %v8962_v17 = vadd.f32 %v8921_v0, %v8724_v22  ;;  %11207 = vmatprep.mubr.msk.bf16.mxu0 %vm6205_vm12, %v9048_v20  ;;  %v9032_v40 = vmax.f32 %v9000_v49, 0.0  ;;  %v17818_v20 = vmax.f32 %v16256_v32, 0.0 }
 0x46d   : > { %11208 = vmatmul.mubr.msk.bf16.gmra.mxu0 %vm6205_vm12, %v9049_v23  ;;  %v17823_v32 = vmax.f32 %v16372_v51, 0.0  ;;  %v16547_v51 = vld [vmem:[%s16792_s11] ss:$0 sm:$0xff] }
 0x46e   : > { %v9035_v57 = vmax.f32 %v9003_v10, 0.0  ;;  %v9001_v16 = vadd.f32 %v16198_v38, %v8962_v17  ;;  %v17817_v38 = vmax.f32 %v16397_v9, 0.0 }
 0x470   : > { %v9051_v37 = vpack.c.bf16 %v9035_v57, %v9034_v47  ;;  %v9033_v34 = vmax.f32 %v9001_v16, 0.0  ;;  %10755 = vmatprep.subr.msk.mxu1 %vm6205_vm12, %v9035_v57 }
 0x471   : > { %10756 = vmatpush3.xpose.msk.msra.mxu1 %vm6205_vm12, %v9019_v58 }
 0x472   : > { %v9050_v33 = vpack.c.bf16 %v9033_v34, %v9032_v40  ;;  %10757 = vmatprep.subr.msk.mxu1 %vm6205_vm12, %v9034_v47 }
 0x474   : > { %11211 = vmatprep.mubr.msk.bf16.mxu0 %vm6205_vm12, %v9050_v33 }
 0x475   : > { %11212 = vmatmul.mubr.msk.bf16.gmra.mxu0 %vm6205_vm12, %v9051_v37  ;;  %10758 = vmatpush3.xpose.msk.msra.mxu1 %vm6205_vm12, %v9018_v46 }
 0x476   : > { %10759 = vmatprep.subr.msk.mxu1 %vm6205_vm12, %v9033_v34  ;;  %10751 = vmatprep.mubr.msk.f32.mxu0 %vm9687_vm13, %v16560_v60 }
 0x479   : > { %10760 = vmatpush3.xpose.msk.msra.mxu1 %vm6205_vm12, %v9017_v6 }
 0x47a   : > { %10761 = vmatprep.subr.msk.mxu1 %vm6205_vm12, %v9032_v40 }
 0x47d   : > { %10762 = vmatpush3.xpose.msk.msra.mxu1 %vm6205_vm12, %v9016_v44 }
 0x47e   : > { %10763 = vmatprep.subr.msk.mxu1 %vm6205_vm12, %v9031_v55 }
 0x481   : > { %10764 = vmatpush3.xpose.msk.msra.mxu1 %vm6205_vm12, %v9015_v56  ;;  %v17830_v56 = vmax.f32 %v16207_v8, 0.0  ;;  %v11219_v41 = vpop.f32.mrf.mxu1 }
 0x482   : > { %10765 = vmatprep.subr.msk.mxu1 %vm6205_vm12, %v9030_v19  ;;  %v9503_v0 = vadd.f32 %v11219_v41, %v16547_v51 }
 0x483   : > { %v9494_v61 = vpop.f32.mrf.mxu1 }
 0x484   : > { %v9495_v5 = vadd.f32 %v16547_v51, %v9494_v61 }
 0x485   : > { %10766 = vmatpush3.xpose.msk.msra.mxu1 %vm6205_vm12, %v9014_v2  ;;  %v17828_v2 = vmax.f32 %v16217_v59, 0.0 }
 0x486   : > { %10767 = vmatprep.subr.msk.mxu1 %vm6205_vm12, %v9029_v50 }
 0x489   : > { %10768 = vmatpush3.xpose.msk.msra.mxu1 %vm6205_vm12, %v9013_v27 }
 0x48a   : > { %10769 = vmatprep.subr.msk.mxu1 %vm6205_vm12, %v9028_v54 }
 0x48d   : > { %10770 = vmatpush3.xpose.msk.msra.mxu1 %vm6205_vm12, %v9012_v42  ;;  %v11220_v42 = vpop.f32.mrf.mxu1 }
 0x48e   : > { %10771 = vmatprep.subr.msk.mxu1 %vm6205_vm12, %v9027_v30  ;;  %v9506_v45 = vadd.f32 %v11220_v42, %v16547_v51 }
 0x48f   : > { %v9497_v27 = vpop.f32.mrf.mxu1 }
 0x490   : > { %v9498_v48 = vadd.f32 %v16547_v51, %v9497_v27 }
 0x491   : > { %10772 = vmatpush3.xpose.msk.msra.mxu1 %vm6205_vm12, %v9011_v62  ;;  %v17822_v62 = vmax.f32 %v16249_v29, 0.0  ;;  %v17827_v29 = vmax.f32 %v16381_v53, 0.0  ;;  %v11223_v35 = vpop.f32.mrf.mxu1 }
 0x492   : > { %10773 = vmatprep.subr.msk.mxu1 %vm6205_vm12, %v17817_v38  ;;  %v9519_v15 = vadd.f32 %v11223_v35, %v16547_v51 }
 0x493   : > { %v9510_v7 = vpop.f32.mrf.mxu1 }
 0x494   : > { %v9511_v47 = vadd.f32 %v16547_v51, %v9510_v7 }
 0x495   : > { %10774 = vmatpush3.xpose.msk.msra.mxu1 %vm6205_vm12, %v17818_v20  ;;  %v11224_v11 = vpop.f32.mrf.mxu1 }
 0x496   : > { %10775 = vmatprep.subr.msk.mxu1 %vm6205_vm12, %v17819_v12  ;;  %v9522_v37 = vadd.f32 %v11224_v11, %v16547_v51 }
 0x497   : > { %v9513_v46 = vpop.f32.mrf.mxu1 }
 0x498   : > { %v9514_v12 = vadd.f32 %v16547_v51, %v9513_v46 }
 0x499   : > { %10776 = vmatpush3.xpose.msk.msra.mxu1 %vm6205_vm12, %v17820_v14  ;;  %v11227_v58 = vpop.f32.mrf.mxu1 }
 0x49a   : > { %10777 = vmatprep.subr.msk.mxu1 %vm6205_vm12, %v17821_v4  ;;  %v9535_v14 = vadd.f32 %v11227_v58, %v16547_v51 }
 0x49b   : > { %v9526_v59 = vpop.f32.mrf.mxu1 }
 0x49d   : > { %10778 = vmatpush3.xpose.msk.msra.mxu1 %vm6205_vm12, %v17822_v62  ;;  %v16534_v3 = vpop.f32.mrf.mxu1 }
 0x49e   : > { %10779 = vmatprep.subr.msk.mxu1 %vm6205_vm12, %v17823_v32 }
 0x49f   : > { %v16536_v44 = vpop.f32.mrf.mxu1 }
 0x4a1   : > { %10780 = vmatpush3.xpose.msk.msra.mxu1 %vm6205_vm12, %v17824_v43  ;;  %v16538_v6 = vpop.f32.mrf.mxu1 }
 0x4a2   : > { %10781 = vmatprep.subr.msk.mxu1 %vm6205_vm12, %v17825_v24 }
 0x4a3   : > { %v16540_v13 = vpop.f32.mrf.mxu1 }
 0x4a5   : > { %10782 = vmatpush3.xpose.msk.msra.mxu1 %vm6205_vm12, %v17826_v26  ;;  %v16542_v8 = vpop.f32.mrf.mxu1 }
 0x4a6   : > { %10783 = vmatprep.subr.msk.mxu1 %vm6205_vm12, %v17827_v29 }
 0x4a7   : > { %v16554_v53 = vpop.f32.mrf.mxu1 }
 0x4a9   : > { %10784 = vmatpush3.xpose.msk.msra.mxu1 %vm6205_vm12, %v17828_v2  ;;  %v11235_v18 = vpop.f32.mrf.mxu1  ;;  %v9527_v2 = vadd.f32 %v16547_v51, %v9526_v59 }
 0x4aa   : > { %10785 = vmatprep.subr.msk.mxu1 %vm6205_vm12, %v17829_v36 }
 0x4ab   : > { %v9558_v50 = vpop.f32.mrf.mxu1 }
 0x4ad   : > { %10786 = vmatpush3.xpose.msk.msra.mxu1 %vm6205_vm12, %v17830_v56  ;;  %v11236_v17 = vpop.f32.mrf.mxu1 }
 0x4af   : > { %v9561_v20 = vpop.f32.mrf.mxu1 }
 0x4b0   : > { %10788 = vmatmul.mubr.msk.f32.vlgmr.msra.gmra.mxu1 %vm6205_vm12, %v9871_v25 }
 0x4b1   : > { %v16602_v29 = vpop.f32.mrf.mxu1 }
 0x4b3   : > { %v16614_v27 = vpop.f32.mrf.mxu1 }
 0x4b5   : > { %v16618_v11 = vpop.f32.mrf.mxu1 }
 0x4b7   : > { %v16620_v59 = vpop.f32.mrf.mxu1 }
 0x4fd   : > { %v11185_v9 = vpop.f32.mrf.mxu0 }
 0x4fe   : > { %v9154_v30 = vadd.f32 %v11185_v9, %v16552_v1 }
 0x4ff   : > { %v9145_v31 = vpop.f32.mrf.mxu0 }
 0x500   : > { %v16566_v19 = vadd.f32 %v9503_v0, %v9154_v30  ;;  %v9146_v55 = vadd.f32 %v16552_v1, %v9145_v31  ;;  %v9567_v0 = vadd.f32 %v11235_v18, %v16547_v51 }
 0x501   : > { %v11186_v21 = vpop.f32.mrf.mxu0 }
 0x502   : > { %v16574_v52 = vadd.f32 %v9495_v5, %v9146_v55  ;;  %v9157_v54 = vadd.f32 %v11186_v21, %v16552_v1  ;;  %v16624_v5 = vpop.f32.mrf.mxu1  ;;  %v9559_v55 = vadd.f32 %v16547_v51, %v9558_v50 }
 0x503   : > { %v9148_v23 = vpop.f32.mrf.mxu0 }
 0x504   : > { %17832 = vst [vmem:[#allocation121_spill] sm:$0xff] %v16574_v52  ;;  %v16580_v28 = vadd.f32 %v9506_v45, %v9157_v54  ;;  %v9149_v39 = vadd.f32 %v16552_v1, %v9148_v23  ;;  %v9570_v54 = vadd.f32 %v11236_v17, %v16547_v51 }
 0x505   : > { %v11189_v63 = vpop.f32.mrf.mxu0 }
 0x506   : > { %v16583_v22 = vadd.f32 %v9498_v48, %v9149_v39  ;;  %v9170_v49 = vadd.f32 %v11189_v63, %v16552_v1  ;;  %v9562_v39 = vadd.f32 %v16547_v51, %v9561_v20 }
 0x507   : > { %v9161_v10 = vpop.f32.mrf.mxu0 }
 0x508   : > { %v16587_v57 = vadd.f32 %v9519_v15, %v9170_v49  ;;  %v9162_v16 = vadd.f32 %v16552_v1, %v9161_v10  ;;  %v16634_v15 = vpop.f32.mrf.mxu1 }
 0x509   : > { %v11190_v40 = vpop.f32.mrf.mxu0 }
 0x50a   : > { %v16591_v34 = vadd.f32 %v9511_v47, %v9162_v16  ;;  %v9173_v33 = vadd.f32 %v11190_v40, %v16552_v1  ;;  %v11244_v17 = vpop.f32.mrf.mxu1 }
 0x50b   : > { %v9164_v38 = vpop.f32.mrf.mxu0 }
 0x50c   : > { %v16596_v4 = vadd.f32 %v9522_v37, %v9173_v33  ;;  %v9165_v62 = vadd.f32 %v16552_v1, %v9164_v38  ;;  %v16650_v37 = vpop.f32.mrf.mxu1 }
 0x50d   : > { %v11193_v32 = vpop.f32.mrf.mxu0 }
 0x50e   : > { %v16599_v43 = vadd.f32 %v9514_v12, %v9165_v62  ;;  %v9186_v24 = vadd.f32 %v11193_v32, %v16552_v1  ;;  %v11247_v20 = vpop.f32.mrf.mxu1 }
 0x50f   : > { %v9177_v26 = vpop.f32.mrf.mxu0 }
 0x510   : > { %v16605_v36 = vadd.f32 %v9535_v14, %v9186_v24  ;;  %v9178_v56 = vadd.f32 %v16552_v1, %v9177_v26  ;;  %v9606_v14 = vpop.f32.mrf.mxu1 }
 0x511   : > { %v16608_v41 = vpop.f32.mrf.mxu0 }
 0x512   : > { %v16610_v61 = vadd.f32 %v9527_v2, %v9178_v56  ;;  %v11248_v26 = vpop.f32.mrf.mxu1  ;;  %v9615_v56 = vadd.f32 %v11247_v20, %v16547_v51 }
 0x513   : > { %v16612_v42 = vpop.f32.mrf.mxu0 }
 0x515   : > { %v11197_v35 = vpop.f32.mrf.mxu0 }
 0x517   : > { %v16616_v7 = vpop.f32.mrf.mxu0 }
 0x519   : > { %v11198_v46 = vpop.f32.mrf.mxu0 }
 0x51a   : > { %v9205_v24 = vadd.f32 %v11198_v46, %v16552_v1 }
 0x51b   : > { %v9196_v58 = vpop.f32.mrf.mxu0 }
 0x51d   : > { %v11201_v9 = vpop.f32.mrf.mxu0 }
 0x51e   : > { %v9218_v30 = vadd.f32 %v11201_v9, %v16552_v1  ;;  %v9554_v9 = vadd.f32 %v16542_v8, %v16547_v51 }
 0x51f   : > { %v9209_v31 = vpop.f32.mrf.mxu0 }
 0x520   : > { %v16627_v25 = vadd.f32 %v9567_v0, %v9218_v30  ;;  %v9210_v21 = vadd.f32 %v16552_v1, %v9209_v31  ;;  %v9618_v31 = vadd.f32 %v11248_v26, %v16547_v51  ;;  %v9636_v46 = vadd.f32 %v9554_v9, %v9205_v24 }
 0x521   : > { %v11202_v45 = vpop.f32.mrf.mxu0  ;;  %v9197_v26 = vadd.f32 %v16552_v1, %v9196_v58  ;;  %v9607_v24 = vadd.f32 %v16547_v51, %v9606_v14 }
 0x522   : > { %v16631_v23 = vadd.f32 %v9559_v55, %v9210_v21  ;;  %v9221_v48 = vadd.f32 %v11202_v45, %v16552_v1  ;;  %v9551_v21 = vadd.f32 %v16538_v6, %v16547_v51  ;;  %v9202_v45 = vadd.f32 %v11197_v35, %v16552_v1 }
 0x523   : > { %v9212_v18 = vpop.f32.mrf.mxu0  ;;  %v9668_v60 = vmax.f32 %v9636_v46, 0.0  ;;  %v9546_v35 = vadd.f32 %v16547_v51, %v16554_v53  ;;  %v9602_v53 = vadd.f32 %v11244_v17, %v16547_v51 }
 0x524   : > { %v16637_v63 = vadd.f32 %v9570_v54, %v9221_v48  ;;  %v9213_v50 = vadd.f32 %v16552_v1, %v9212_v18  ;;  %v9609_v54 = vpop.f32.mrf.mxu1 }
 0x525   : > { %v16640_v49 = vpop.f32.mrf.mxu0  ;;  %v9610_v20 = vadd.f32 %v16547_v51, %v9609_v54  ;;  %v9634_v58 = vadd.f32 %v9546_v35, %v9197_v26 }
 0x526   : > { %v16642_v10 = vadd.f32 %v9562_v39, %v9213_v50 }
 0x527   : > { %v16644_v47 = vpop.f32.mrf.mxu0 }
 0x529   : > { %v16646_v16 = vpop.f32.mrf.mxu0 }
 0x52b   : > { %v16648_v40 = vpop.f32.mrf.mxu0 }
 0x52d   : > { %v11209_v33 = vpop.f32.mrf.mxu0 }
 0x52f   : > { %v16652_v38 = vpop.f32.mrf.mxu0 }
 0x531   : > { %v11210_v12 = vpop.f32.mrf.mxu0 }
 0x532   : > { %v9253_v9 = vadd.f32 %v11210_v12, %v16552_v1 }
 0x533   : > { %v9244_v62 = vpop.f32.mrf.mxu0 }
 0x534   : > { %v9648_v12 = vadd.f32 %v9602_v53, %v9253_v9 }
 0x535   : > { %v11213_v32 = vpop.f32.mrf.mxu0 }
 0x536   : > { %v9266_v0 = vadd.f32 %v11213_v32, %v16552_v1  ;;  %v9635_v32 = vadd.f32 %v9551_v21, %v9202_v45  ;;  %v9666_v21 = vmax.f32 %v9634_v58, 0.0 }
 0x537   : > { %v9257_v2 = vpop.f32.mrf.mxu0 }
 0x538   : > { %v9651_v18 = vadd.f32 %v9615_v56, %v9266_v0  ;;  %v9258_v52 = vadd.f32 %v16552_v1, %v9257_v2  ;;  %v9667_v56 = vmax.f32 %v9635_v32, 0.0  ;;  %v9194_v0 = vadd.f32 %v16552_v1, %v16616_v7 }
 0x539   : > { %v11214_v30 = vpop.f32.mrf.mxu0  ;;  %v9599_v7 = vadd.f32 %v16624_v5, %v16547_v51  ;;  %v9594_v5 = vadd.f32 %v16547_v51, %v16650_v37  ;;  %v9663_v37 = vmax.f32 %v16605_v36, 0.0  ;;  %v9234_v36 = vadd.f32 %v16640_v49, %v16552_v1 }
 0x53a   : > { %v9269_v55 = vadd.f32 %v11214_v30, %v16552_v1  ;;  %v9683_v30 = vmax.f32 %v9651_v18, 0.0  ;;  %v9649_v2 = vadd.f32 %v9607_v24, %v9258_v52  ;;  %v9250_v52 = vadd.f32 %v11209_v33, %v16552_v1 }
 0x53b   : > { %v9260_v48 = vpop.f32.mrf.mxu0  ;;  %v9660_v49 = vmax.f32 %v16596_v4, 0.0  ;;  %v9658_v4 = vmax.f32 %v16599_v43, 0.0  ;;  %v9655_v43 = vmax.f32 %v16566_v19, 0.0  ;;  %v9686_v19 = vld [vmem:[%s16783_s2 + $0x8] sm:$0xff] }
 0x53c   : > { %v9652_v39 = vadd.f32 %v9618_v31, %v9269_v55  ;;  %v9261_v50 = vadd.f32 %v16552_v1, %v9260_v48  ;;  %v9543_v55 = vadd.f32 %v16547_v51, %v16540_v13  ;;  %v9681_v45 = vmax.f32 %v9649_v2, 0.0 }
 0x53d   : > { %v9538_v13 = vadd.f32 %v16534_v3, %v16547_v51  ;;  %v9647_v54 = vadd.f32 %v9599_v7, %v9250_v52  ;;  %v9245_v48 = vadd.f32 %v16552_v1, %v9244_v62  ;;  %v9181_v3 = vadd.f32 %v16552_v1, %v16612_v42 }
 0x53e   : > { %v9684_v8 = vmax.f32 %v9652_v39, 0.0  ;;  %v9650_v6 = vadd.f32 %v9610_v20, %v9261_v50  ;;  %v9633_v14 = vadd.f32 %v9543_v55, %v9194_v0  ;;  %v9242_v39 = vadd.f32 %v16552_v1, %v16652_v38 }
 0x53f   : > { %v9679_v18 = vmax.f32 %v9647_v54, 0.0  ;;  %v9646_v50 = vadd.f32 %v9594_v5, %v9245_v48  ;;  %v9530_v20 = vadd.f32 %v16547_v51, %v16536_v44  ;;  %v9591_v62 = vadd.f32 %v16547_v51, %v16634_v15 }
 0x540   : > { %10719 = vmatprep.subr.msk.mxu0 %vm9687_vm13, %v9684_v8  ;;  %v9682_v31 = vmax.f32 %v9650_v6, 0.0  ;;  %v9665_v46 = vmax.f32 %v9633_v14, 0.0  ;;  %v9237_v42 = vadd.f32 %v16646_v16, %v16552_v1  ;;  %v9586_v44 = vadd.f32 %v16618_v11, %v16547_v51 }
 0x541   : > { %10720 = vmatpush3.xpose.msk.msra.mxu0 %vm9687_vm13, %v9668_v60  ;;  %v9189_v60 = vadd.f32 %v16608_v41, %v16552_v1  ;;  %v9680_v41 = vmax.f32 %v9648_v12, 0.0  ;;  %v9630_v8 = vadd.f32 %v9530_v20, %v9181_v3  ;;  %v9645_v32 = vadd.f32 %v9591_v62, %v9242_v39 }
 0x542   : > { %10721 = vmatprep.subr.msk.mxu0 %vm9687_vm13, %v9683_v30  ;;  %v9678_v26 = vmax.f32 %v9646_v50, 0.0  ;;  %v9583_v15 = vadd.f32 %v16602_v29, %v16547_v51  ;;  %v9644_v30 = vadd.f32 %v9586_v44, %v9237_v42  ;;  %v9661_v16 = vmax.f32 %v16610_v61, 0.0 }
 0x543   : > { %v9632_v17 = vadd.f32 %v9538_v13, %v9189_v60  ;;  %v9662_v38 = vmax.f32 %v9630_v8, 0.0  ;;  %v9677_v6 = vmax.f32 %v9645_v32, 0.0  ;;  %v9229_v11 = vadd.f32 %v16552_v1, %v16648_v40 }
 0x544   : > { %v9643_v35 = vadd.f32 %v9583_v15, %v9234_v36  ;;  %v9676_v24 = vmax.f32 %v9644_v30, 0.0  ;;  %v9578_v29 = vadd.f32 %v16547_v51, %v16620_v59  ;;  %v9226_v0 = vadd.f32 %v16552_v1, %v16644_v47 }
 0x545   : > { %10722 = vmatpush3.xpose.msk.msra.mxu0 %vm9687_vm13, %v9667_v56  ;;  %v9664_v33 = vmax.f32 %v9632_v17, 0.0  ;;  %v9575_v61 = vadd.f32 %v16547_v51, %v16614_v27  ;;  %v9659_v40 = vmax.f32 %v16587_v57, 0.0  ;;  %v9657_v1 = vmax.f32 %v16591_v34, 0.0 }
 0x546   : > { %10723 = vmatprep.subr.msk.mxu0 %vm9687_vm13, %v9682_v31  ;;  %v9675_v56 = vmax.f32 %v9643_v35, 0.0  ;;  %v9642_v58 = vadd.f32 %v9578_v29, %v9229_v11  ;;  %v9672_v51 = vmax.f32 %v16637_v63, 0.0  ;;  %v9656_v57 = vmax.f32 %v16580_v28, 0.0 }
 0x547   : > { %v9641_v9 = vadd.f32 %v9575_v61, %v9226_v0  ;;  %v9671_v27 = vmax.f32 %v16627_v25, 0.0  ;;  %v9670_v47 = vmax.f32 %v16642_v10, 0.0  ;;  %v9654_v34 = vmax.f32 %v16583_v22, 0.0  ;;  %v17833_v25 = vld [vmem:[#allocation121_spill] sm:$0xff]  ;;  %v17834_v10 = vld [vmem:[#allocation120_spill] sm:$0xff] }
 0x548   : > { %v9674_v59 = vmax.f32 %v9642_v58, 0.0  ;;  %v9669_v28 = vmax.f32 %v16631_v23, 0.0  ;;  %v9653_v63 = vmax.f32 %v17833_v25, 0.0 }
 0x549   : > { %10724 = vmatpush3.xpose.msk.msra.mxu0 %vm9687_vm13, %v9666_v21  ;;  %v9673_v2 = vmax.f32 %v9641_v9, 0.0 }
 0x54a   : > { %10725 = vmatprep.subr.msk.mxu0 %vm9687_vm13, %v9681_v45 }
 0x54d   : > { %10726 = vmatpush3.xpose.msk.msra.mxu0 %vm9687_vm13, %v9665_v46 }
 0x54e   : > { %10727 = vmatprep.subr.msk.mxu0 %vm9687_vm13, %v9680_v41 }
 0x551   : > { %10728 = vmatpush3.xpose.msk.msra.mxu0 %vm9687_vm13, %v9664_v33 }
 0x552   : > { %10729 = vmatprep.subr.msk.mxu0 %vm9687_vm13, %v9679_v18 }
 0x555   : > { %10730 = vmatpush3.xpose.msk.msra.mxu0 %vm9687_vm13, %v9663_v37 }
 0x556   : > { %10731 = vmatprep.subr.msk.mxu0 %vm9687_vm13, %v9678_v26 }
 0x559   : > { %10732 = vmatpush3.xpose.msk.msra.mxu0 %vm9687_vm13, %v9662_v38 }
 0x55a   : > { %10733 = vmatprep.subr.msk.mxu0 %vm9687_vm13, %v9677_v6 }
 0x55d   : > { %10734 = vmatpush3.xpose.msk.msra.mxu0 %vm9687_vm13, %v9661_v16 }
 0x55e   : > { %10735 = vmatprep.subr.msk.mxu0 %vm9687_vm13, %v9676_v24 }
 0x561   : > { %10736 = vmatpush3.xpose.msk.msra.mxu0 %vm9687_vm13, %v9660_v49 }
 0x562   : > { %10737 = vmatprep.subr.msk.mxu0 %vm9687_vm13, %v9675_v56 }
 0x565   : > { %10738 = vmatpush3.xpose.msk.msra.mxu0 %vm9687_vm13, %v9659_v40 }
 0x566   : > { %10739 = vmatprep.subr.msk.mxu0 %vm9687_vm13, %v9674_v59 }
 0x569   : > { %10740 = vmatpush3.xpose.msk.msra.mxu0 %vm9687_vm13, %v9658_v4 }
 0x56a   : > { %10741 = vmatprep.subr.msk.mxu0 %vm9687_vm13, %v9673_v2 }
 0x56d   : > { %10742 = vmatpush3.xpose.msk.msra.mxu0 %vm9687_vm13, %v9657_v1 }
 0x56e   : > { %10743 = vmatprep.subr.msk.mxu0 %vm9687_vm13, %v9672_v51 }
 0x570   : > { %v10037_v22 = vpop.f32.mrf.mxu1 }
 0x571   : > { %10744 = vmatpush3.xpose.msk.msra.mxu0 %vm9687_vm13, %v9656_v57 }
 0x572   : > { %10745 = vmatprep.subr.msk.mxu0 %vm9687_vm13, %v9671_v27  ;;  %v10039_v23 = vpop.f32.mrf.mxu1 }
 0x573   : > { %v10044_v31 = vcombine.low %v10037_v22, %v10039_v23 }
 0x575   : > { %10746 = vmatpush3.xpose.msk.msra.mxu0 %vm9687_vm13, %v9655_v43  ;;  %10046 = vst [vmem:[%s486_s16] sm:$0xff] %v10044_v31 }
 0x576   : > { %10747 = vmatprep.subr.msk.mxu0 %vm9687_vm13, %v9670_v47 }
 0x579   : > { %10748 = vmatpush3.xpose.msk.msra.mxu0 %vm9687_vm13, %v9654_v34 }
 0x57a   : > { %10749 = vmatprep.subr.msk.mxu0 %vm9687_vm13, %v9669_v28 }
 0x57d   : > { %10750 = vmatpush3.xpose.msk.msra.mxu0 %vm9687_vm13, %v9653_v63 }
 0x580   : > { %10752 = vmatmul.mubr.msk.f32.vlgmr.msra.gmra.mxu0 %vm9687_vm13, %v17834_v10 }
 0x581   : > { %10753 = vmatprep.mubr.msk.f32.mxu0 %vm9687_vm13, %v9686_v19 }
 0x584   : > { %10754 = vmatmul.mubr.msk.f32.gmra.mxu0 %vm9687_vm13, %v9686_v19 }
 0x640   : > { %v9856_v55 = vpop.f32.mrf.mxu0 }
 0x641   : > { %9867 = vst [vmem:[%s476_s21] sm:$0xff] %v9856_v55 }
 0x642   : > { %v9858_v53 = vpop.f32.mrf.mxu0 }
 0x643   : > { %9868 = vst [vmem:[%s476_s21 + $0x8] sm:$0xff] %v9858_v53 }
 0x644   : > { %v9862_v60 = vpop.f32.mrf.mxu0 }
 0x645   : > { %9869 = vst [vmem:[%s476_s21 + $0x10] sm:$0xff] %v9862_v60 }
 0x646   : > { %v9864_v14 = vpop.f32.mrf.mxu0 }
 0x647   : > { %9870 = vst [vmem:[%s476_s21 + $0x18] sm:$0xff] %v9864_v14 }
 0x648 PF: > { %s24_s27 = sadd.s32 1, %s11451_s27   ;;  %s17835_s25 = smov %s11447_s26 }
 0x649   : > { %p21_p5 = scmp.ge.s32.totalorder %s24_s27, 4   ;;  %s17836_s26 = smov %s17838_s28 }
 0x64b   :  { %23 = sbr.rel (!%p21_p5) target bundleno = 2 (0x2), region = 120 }

</bundles_post_ra>
